<compile_context>
chip_gen: v7x
topology: tpu7x:2x2x1
jax: 0.10.0
libtpu: 0.0.40
codegen_flags: <defaults>
</compile_context>

<pallas_src>
import functools

import jax
import jax.numpy as jnp
from jax.experimental import pallas as pl
from jax.experimental.pallas import tpu as pltpu

# ---- model dims (consistent with the PyTorch module defaults) ----
VOCAB_SIZE   = 32          # len(vocab)
MAX_LEN      = 20
PAD_IDX      = 0
D_MODEL      = 128         # TextTransformer d
N_HEADS      = 8
D_HEAD       = D_MODEL // N_HEADS
FF_DIM       = 256         # EncoderLayer ff
DEPTH        = 2
VIS_DIM      = 512         # resnet18 feature dim
CLF_HIDDEN   = 256
N_CLASSES    = 10          # len(idx2label)
N_CLASSES_PAD = 128        # lane-dense padded logits width

B, L     = 2, 8            # batch, question length (<= MAX_LEN)
C, H, W  = 3, 16, 16       # small image
IMG_FLAT = C * H * W


def _layernorm(x, g, b, eps=1e-5):
    mu = jnp.mean(x, axis=-1, keepdims=True)
    var = jnp.mean(jnp.square(x - mu), axis=-1, keepdims=True)
    return (x - mu) * jax.lax.rsqrt(var + eps) * g + b


def _gelu(x):
    # TODO(synk): PyTorch nn.GELU default is the exact erf form; tanh
    # approximation is used here (erf lowering in Mosaic not guaranteed).
    return jax.nn.gelu(x, approximate=True)


# -----------------------------------------------------------------------------
# One fused kernel: processes one batch element per grid step.
# -----------------------------------------------------------------------------
def vqa_fused_kernel(seq_len,
                     tok_ref,                        # scalar-prefetch (B, L) i32 in SMEM
                     img_ref, emb_ref, pos_ref,
                     ln1g_ref, ln1b_ref, wq_ref, wk_ref, wv_ref, wo_ref, projb_ref,
                     ln2g_ref, ln2b_ref, w1_ref, b1_ref, w2_ref, b2_ref,
                     visw_ref, visb_ref, cw1_ref, cb1_ref, cw2_ref, cb2_ref,
                     out_ref):
    b = pl.program_id(0)
    scale = 1.0 / (D_HEAD ** 0.5)
    # contract lhs[2] with rhs[1], batch lhs[0] with rhs[0]
    bdot = (((2,), (1,)), ((0,), (0,)))
    # scores: contract head dim d_k, batch over heads
    sdot = (((2,), (2,)), ((0,), (0,)))

    # ---- token embedding gather (PAD row of emb is zero) + positional add ----
    rows = [emb_ref[tok_ref[b, l]] for l in range(seq_len)]        # each (1, D)
    x = jnp.concatenate(rows, axis=0) + pos_ref[pl.ds(0, seq_len), :]   # (L, D) f32

    for d in range(DEPTH):                    # static unroll over encoder layers
        # --- pre-LN multi-head self-attention + residual (dropout = identity) ---
        hn = _layernorm(x, ln1g_ref[d], ln1b_ref[d])                        # (L, D)
        hb = jnp.broadcast_to(hn.astype(jnp.bfloat16)[None],
                              (N_HEADS, seq_len, D_MODEL))                  # (H, L, D)
        q = jax.lax.dot_general(hb, wq_ref[d], bdot,
                                preferred_element_type=jnp.float32)        # (H, L, dk)
        k = jax.lax.dot_general(hb, wk_ref[d], bdot,
                                preferred_element_type=jnp.float32)
        v = jax.lax.dot_general(hb, wv_ref[d], bdot,
                                preferred_element_type=jnp.float32)

        s = jax.lax.dot_general(q.astype(jnp.bfloat16), k.astype(jnp.bfloat16),
                                sdot, preferred_element_type=jnp.float32) * scale  # (H, L, L)
        s = s - jnp.max(s, axis=-1, keepdims=True)
        e = jnp.exp(s)
        a = e * pl.reciprocal(jnp.sum(e, axis=-1, keepdims=True), approx=True)

        o = jax.lax.dot_general(a.astype(jnp.bfloat16), v.astype(jnp.bfloat16),
                                bdot, preferred_element_type=jnp.float32)   # (H, L, dk)
        # proj(concat_h o_h) == sum_h o_h @ W_proj[h*dk:(h+1)*dk, :]
        po = jax.lax.dot_general(o.astype(jnp.bfloat16), wo_ref[d],
                                 bdot, preferred_element_type=jnp.float32)  # (H, L, D)
        x = x + jnp.sum(po, axis=0) + projb_ref[d]

        # --- pre-LN feed-forward + residual ---
        h2 = _layernorm(x, ln2g_ref[d], ln2b_ref[d])
        f = jnp.dot(h2.astype(jnp.bfloat16), w1_ref[d],
                    preferred_element_type=jnp.float32) + b1_ref[d]
        f = _gelu(f)
        f = jnp.dot(f.astype(jnp.bfloat16), w2_ref[d],
                    preferred_element_type=jnp.float32) + b2_ref[d]
        x = x + f

    # ---- text mean-pool over sequence (matches reference: unmasked mean) ----
    t = jnp.mean(x, axis=0, keepdims=True)                                  # (1, D)

    # ---- vision projection (ResNet18 stand-in) ----
    vfeat = jnp.dot(img_ref[0].astype(jnp.bfloat16), visw_ref[...],
                    preferred_element_type=jnp.float32) + visb_ref[...]     # (1, 512)

    # ---- classifier head: Linear -> GELU -> (Dropout=id) -> Linear (lane-padded) ----
    feat = jnp.concatenate([vfeat, t], axis=-1)                             # (1, 640)
    c = jnp.dot(feat.astype(jnp.bfloat16), cw1_ref[...],
                preferred_element_type=jnp.float32) + cb1_ref[...]
    c = _gelu(c)
    out_ref[0] = jnp.dot(c.astype(jnp.bfloat16), cw2_ref[...],
                         preferred_element_type=jnp.float32) + cb2_ref[...]  # (1, 128)


# -----------------------------------------------------------------------------
# Parameter init (PyTorch-layout, f32) and packing into kernel layout.
# -----------------------------------------------------------------------------
def init_params(key):
    keys = iter(jax.random.split(key, 64))

    def nrm(shape, scale=0.02):
        return scale * jax.random.normal(next(keys), shape, jnp.float32)

    p = {}
    emb = jax.random.normal(next(keys), (VOCAB_SIZE, D_MODEL), jnp.float32)
    p['tok_emb'] = emb.at[PAD_IDX].set(0.0)           # nn.Embedding padding_idx row
    p['pos'] = jax.random.normal(next(keys), (1, MAX_LEN, D_MODEL), jnp.float32)

    layers = []
    for _ in range(DEPTH):
        layers.append(dict(
            ln1_g=jnp.ones((1, D_MODEL), jnp.float32),
            ln1_b=jnp.zeros((1, D_MODEL), jnp.float32),
            qkv_w=nrm((D_MODEL, 3 * D_MODEL)),
            proj_w=nrm((D_MODEL, D_MODEL)),
            proj_b=jnp.zeros((1, D_MODEL), jnp.float32),
            ln2_g=jnp.ones((1, D_MODEL), jnp.float32),
            ln2_b=jnp.zeros((1, D_MODEL), jnp.float32),
            ffn_w1=nrm((D_MODEL, FF_DIM)),
            ffn_b1=jnp.zeros((1, FF_DIM), jnp.float32),
            ffn_w2=nrm((FF_DIM, D_MODEL)),
            ffn_b2=jnp.zeros((1, D_MODEL), jnp.float32),
        ))
    p['layers'] = layers

    # TODO(synk): frozen pretrained timm ResNet18 backbone cannot be loaded
    # here; stood in for by a single linear projection of flattened pixels.
    p['vis_w'] = nrm((IMG_FLAT, VIS_DIM))
    p['vis_b'] = jnp.zeros((1, VIS_DIM), jnp.float32)

    p['clf_w1'] = nrm((VIS_DIM + D_MODEL, CLF_HIDDEN))
    p['clf_b1'] = jnp.zeros((1, CLF_HIDDEN), jnp.float32)
    p['clf_w2'] = nrm((CLF_HIDDEN, N_CLASSES))
    p['clf_b2'] = jnp.zeros((1, N_CLASSES), jnp.float32)
    return p


def pack_params(p):
    """Repack PyTorch-layout params into the fused-kernel layout:
    head-major attention weights, bf16 matmul operands, stacked layers,
    lane-padded classifier output."""
    def stack(name):
        return jnp.stack([lp[name] for lp in p['layers']], axis=0)

    qkv = stack('qkv_w')                                        # (DEPTH, D, 3D)

    def head_major(w):                                          # (DEPTH, D, D) -> (DEPTH, H, D, dk)
        return w.reshape(DEPTH, D_MODEL, N_HEADS, D_HEAD).transpose(0, 2, 1, 3)

    wq = head_major(qkv[:, :, :D_MODEL]).astype(jnp.bfloat16)
    wk = head_major(qkv[:, :, D_MODEL:2 * D_MODEL]).astype(jnp.bfloat16)
    wv = head_major(qkv[:, :, 2 * D_MODEL:]).astype(jnp.bfloat16)
    wo = stack('proj_w').reshape(DEPTH, N_HEADS, D_HEAD, D_MODEL).astype(jnp.bfloat16)

    clf_w2p = jnp.zeros((CLF_HIDDEN, N_CLASSES_PAD), jnp.float32)
    clf_w2p = clf_w2p.at[:, :N_CLASSES].set(p['clf_w2'])
    clf_b2p = jnp.zeros((1, N_CLASSES_PAD), jnp.float32)
    clf_b2p = clf_b2p.at[:, :N_CLASSES].set(p['clf_b2'])

    return dict(
        emb=p['tok_emb'].reshape(VOCAB_SIZE, 1, D_MODEL),       # leading-axis gather
        pos=p['pos'][0],                                        # (MAX_LEN, D)
        ln1_g=stack('ln1_g'), ln1_b=stack('ln1_b'),
        wq=wq, wk=wk, wv=wv, wo=wo, proj_b=stack('proj_b'),
        ln2_g=stack('ln2_g'), ln2_b=stack('ln2_b'),
        ffn_w1=stack('ffn_w1').astype(jnp.bfloat16), ffn_b1=stack('ffn_b1'),
        ffn_w2=stack('ffn_w2').astype(jnp.bfloat16), ffn_b2=stack('ffn_b2'),
        vis_w=p['vis_w'].astype(jnp.bfloat16), vis_b=p['vis_b'],
        clf_w1=p['clf_w1'].astype(jnp.bfloat16), clf_b1=p['clf_b1'],
        clf_w2=clf_w2p.astype(jnp.bfloat16), clf_b2=clf_b2p,
    )


# -----------------------------------------------------------------------------
# Full forward: one pallas_call.
# -----------------------------------------------------------------------------
@jax.jit
def vqa_forward(kp, img, q_tokens):
    B_, L_ = q_tokens.shape
    img3 = img.reshape(B_, 1, -1)                               # (B, 1, C*H*W)

    weights = [kp['emb'], kp['pos'],
               kp['ln1_g'], kp['ln1_b'], kp['wq'], kp['wk'], kp['wv'], kp['wo'],
               kp['proj_b'], kp['ln2_g'], kp['ln2_b'],
               kp['ffn_w1'], kp['ffn_b1'], kp['ffn_w2'], kp['ffn_b2'],
               kp['vis_w'], kp['vis_b'],
               kp['clf_w1'], kp['clf_b1'], kp['clf_w2'], kp['clf_b2']]

    def full_spec(a):
        return pl.BlockSpec(a.shape, lambda b, tok, _nd=a.ndim: (0,) * _nd)

    grid_spec = pltpu.PrefetchScalarGridSpec(
        num_scalar_prefetch=1,                                  # q_tokens -> SMEM
        grid=(B_,),
        in_specs=[pl.BlockSpec((1, 1, img3.shape[-1]), lambda b, tok: (b, 0, 0))]
                 + [full_spec(a) for a in weights],
        out_specs=pl.BlockSpec((1, 1, N_CLASSES_PAD), lambda b, tok: (b, 0, 0)),
    )

    out = pl.pallas_call(
        functools.partial(vqa_fused_kernel, L_),
        out_shape=jax.ShapeDtypeStruct((B_, 1, N_CLASSES_PAD), jnp.float32),
        grid_spec=grid_spec,
        compiler_params=pltpu.CompilerParams(
            dimension_semantics=("parallel",)),                 # v7x: one TC per batch elem
    )(q_tokens.astype(jnp.int32), img3, *weights)

    return out[:, 0, :N_CLASSES]                                # drop lane padding


if __name__ == "__main__":
    key = jax.random.PRNGKey(0)
    pk, ik, qk = jax.random.split(key, 3)
    params = init_params(pk)
    kparams = pack_params(params)

    img = jax.random.normal(ik, (B, C, H, W), jnp.float32)      # NCHW
    q = jax.random.randint(qk, (B, L), 0, VOCAB_SIZE, dtype=jnp.int32)

    logits = vqa_forward(kparams, img, q)
    logits = jax.block_until_ready(logits)

    assert logits.shape == (B, N_CLASSES), logits.shape
    assert bool(jnp.all(jnp.isfinite(logits)))
    print("KERNEL_OK")
</pallas_src>

<mosaic_0001>
module attributes {stable_mosaic.version = 11 : i64} {
  func.func @vqa_fused_kernel(%arg0: i32, %arg1: memref<2x8xi32, #tpu.memory_space<smem>>, %arg2: memref<1x1x768xf32, #tpu.memory_space<vmem>>, %arg3: memref<32x1x128xf32, #tpu.memory_space<vmem>>, %arg4: memref<20x128xf32, #tpu.memory_space<vmem>>, %arg5: memref<2x1x128xf32, #tpu.memory_space<vmem>>, %arg6: memref<2x1x128xf32, #tpu.memory_space<vmem>>, %arg7: memref<2x8x128x16xbf16, #tpu.memory_space<vmem>>, %arg8: memref<2x8x128x16xbf16, #tpu.memory_space<vmem>>, %arg9: memref<2x8x128x16xbf16, #tpu.memory_space<vmem>>, %arg10: memref<2x8x16x128xbf16, #tpu.memory_space<vmem>>, %arg11: memref<2x1x128xf32, #tpu.memory_space<vmem>>, %arg12: memref<2x1x128xf32, #tpu.memory_space<vmem>>, %arg13: memref<2x1x128xf32, #tpu.memory_space<vmem>>, %arg14: memref<2x128x256xbf16, #tpu.memory_space<vmem>>, %arg15: memref<2x1x256xf32, #tpu.memory_space<vmem>>, %arg16: memref<2x256x128xbf16, #tpu.memory_space<vmem>>, %arg17: memref<2x1x128xf32, #tpu.memory_space<vmem>>, %arg18: memref<768x512xbf16, #tpu.memory_space<vmem>>, %arg19: memref<1x512xf32, #tpu.memory_space<vmem>>, %arg20: memref<640x256xbf16, #tpu.memory_space<vmem>>, %arg21: memref<1x256xf32, #tpu.memory_space<vmem>>, %arg22: memref<256x128xbf16, #tpu.memory_space<vmem>>, %arg23: memref<1x128xf32, #tpu.memory_space<vmem>>, %arg24: memref<1x1x128xf32, #tpu.memory_space<vmem>>) attributes {dimension_semantics = [#tpu.dimension_semantics<parallel>], iteration_bounds = array<i64: 2>, scalar_prefetch = 1 : i64, scratch_operands = 0 : i64, tpu.core_type = #tpu.core_type<tc>, window_params = [{transform_indices = @transform_0, window_bounds = array<i64: 1, 1, 768>}, {pipeline_mode = #tpu.pipeline_mode<synchronous>, transform_indices = @transform_1, window_bounds = array<i64: 32, 1, 128>}, {pipeline_mode = #tpu.pipeline_mode<synchronous>, transform_indices = @transform_2, window_bounds = array<i64: 20, 128>}, {pipeline_mode = #tpu.pipeline_mode<synchronous>, transform_indices = @transform_3, window_bounds = array<i64: 2, 1, 128>}, {pipeline_mode = #tpu.pipeline_mode<synchronous>, transform_indices = @transform_4, window_bounds = array<i64: 2, 1, 128>}, {pipeline_mode = #tpu.pipeline_mode<synchronous>, transform_indices = @transform_5, window_bounds = array<i64: 2, 8, 128, 16>}, {pipeline_mode = #tpu.pipeline_mode<synchronous>, transform_indices = @transform_6, window_bounds = array<i64: 2, 8, 128, 16>}, {pipeline_mode = #tpu.pipeline_mode<synchronous>, transform_indices = @transform_7, window_bounds = array<i64: 2, 8, 128, 16>}, {pipeline_mode = #tpu.pipeline_mode<synchronous>, transform_indices = @transform_8, window_bounds = array<i64: 2, 8, 16, 128>}, {pipeline_mode = #tpu.pipeline_mode<synchronous>, transform_indices = @transform_9, window_bounds = array<i64: 2, 1, 128>}, {pipeline_mode = #tpu.pipeline_mode<synchronous>, transform_indices = @transform_10, window_bounds = array<i64: 2, 1, 128>}, {pipeline_mode = #tpu.pipeline_mode<synchronous>, transform_indices = @transform_11, window_bounds = array<i64: 2, 1, 128>}, {pipeline_mode = #tpu.pipeline_mode<synchronous>, transform_indices = @transform_12, window_bounds = array<i64: 2, 128, 256>}, {pipeline_mode = #tpu.pipeline_mode<synchronous>, transform_indices = @transform_13, window_bounds = array<i64: 2, 1, 256>}, {pipeline_mode = #tpu.pipeline_mode<synchronous>, transform_indices = @transform_14, window_bounds = array<i64: 2, 256, 128>}, {pipeline_mode = #tpu.pipeline_mode<synchronous>, transform_indices = @transform_15, window_bounds = array<i64: 2, 1, 128>}, {pipeline_mode = #tpu.pipeline_mode<synchronous>, transform_indices = @transform_16, window_bounds = array<i64: 768, 512>}, {pipeline_mode = #tpu.pipeline_mode<synchronous>, transform_indices = @transform_17, window_bounds = array<i64: 1, 512>}, {pipeline_mode = #tpu.pipeline_mode<synchronous>, transform_indices = @transform_18, window_bounds = array<i64: 640, 256>}, {pipeline_mode = #tpu.pipeline_mode<synchronous>, transform_indices = @transform_19, window_bounds = array<i64: 1, 256>}, {pipeline_mode = #tpu.pipeline_mode<synchronous>, transform_indices = @transform_20, window_bounds = array<i64: 256, 128>}, {pipeline_mode = #tpu.pipeline_mode<synchronous>, transform_indices = @transform_21, window_bounds = array<i64: 1, 128>}, {transform_indices = @transform_22, window_bounds = array<i64: 1, 1, 128>}]} {
    %0 = arith.index_cast %arg0 : i32 to index
    %c0 = arith.constant 0 : index
    %1 = memref.load %arg1[%0, %c0] : memref<2x8xi32, #tpu.memory_space<smem>>
    %2 = arith.index_cast %1 : i32 to index
    %c0_0 = arith.constant 0 : index
    %c0_1 = arith.constant 0 : index
    %3 = vector.load %arg3[%2, %c0_0, %c0_1] : memref<32x1x128xf32, #tpu.memory_space<vmem>>, vector<1x1x128xf32>
    %4 = vector.shape_cast %3 : vector<1x1x128xf32> to vector<1x128xf32>
    %5 = arith.index_cast %arg0 : i32 to index
    %c1 = arith.constant 1 : index
    %6 = memref.load %arg1[%5, %c1] : memref<2x8xi32, #tpu.memory_space<smem>>
    %7 = arith.index_cast %6 : i32 to index
    %c0_2 = arith.constant 0 : index
    %c0_3 = arith.constant 0 : index
    %8 = vector.load %arg3[%7, %c0_2, %c0_3] : memref<32x1x128xf32, #tpu.memory_space<vmem>>, vector<1x1x128xf32>
    %9 = vector.shape_cast %8 : vector<1x1x128xf32> to vector<1x128xf32>
    %10 = arith.index_cast %arg0 : i32 to index
    %c2 = arith.constant 2 : index
    %11 = memref.load %arg1[%10, %c2] : memref<2x8xi32, #tpu.memory_space<smem>>
    %12 = arith.index_cast %11 : i32 to index
    %c0_4 = arith.constant 0 : index
    %c0_5 = arith.constant 0 : index
    %13 = vector.load %arg3[%12, %c0_4, %c0_5] : memref<32x1x128xf32, #tpu.memory_space<vmem>>, vector<1x1x128xf32>
    %14 = vector.shape_cast %13 : vector<1x1x128xf32> to vector<1x128xf32>
    %15 = arith.index_cast %arg0 : i32 to index
    %c3 = arith.constant 3 : index
    %16 = memref.load %arg1[%15, %c3] : memref<2x8xi32, #tpu.memory_space<smem>>
    %17 = arith.index_cast %16 : i32 to index
    %c0_6 = arith.constant 0 : index
    %c0_7 = arith.constant 0 : index
    %18 = vector.load %arg3[%17, %c0_6, %c0_7] : memref<32x1x128xf32, #tpu.memory_space<vmem>>, vector<1x1x128xf32>
    %19 = vector.shape_cast %18 : vector<1x1x128xf32> to vector<1x128xf32>
    %20 = arith.index_cast %arg0 : i32 to index
    %c4 = arith.constant 4 : index
    %21 = memref.load %arg1[%20, %c4] : memref<2x8xi32, #tpu.memory_space<smem>>
    %22 = arith.index_cast %21 : i32 to index
    %c0_8 = arith.constant 0 : index
    %c0_9 = arith.constant 0 : index
    %23 = vector.load %arg3[%22, %c0_8, %c0_9] : memref<32x1x128xf32, #tpu.memory_space<vmem>>, vector<1x1x128xf32>
    %24 = vector.shape_cast %23 : vector<1x1x128xf32> to vector<1x128xf32>
    %25 = arith.index_cast %arg0 : i32 to index
    %c5 = arith.constant 5 : index
    %26 = memref.load %arg1[%25, %c5] : memref<2x8xi32, #tpu.memory_space<smem>>
    %27 = arith.index_cast %26 : i32 to index
    %c0_10 = arith.constant 0 : index
    %c0_11 = arith.constant 0 : index
    %28 = vector.load %arg3[%27, %c0_10, %c0_11] : memref<32x1x128xf32, #tpu.memory_space<vmem>>, vector<1x1x128xf32>
    %29 = vector.shape_cast %28 : vector<1x1x128xf32> to vector<1x128xf32>
    %30 = arith.index_cast %arg0 : i32 to index
    %c6 = arith.constant 6 : index
    %31 = memref.load %arg1[%30, %c6] : memref<2x8xi32, #tpu.memory_space<smem>>
    %32 = arith.index_cast %31 : i32 to index
    %c0_12 = arith.constant 0 : index
    %c0_13 = arith.constant 0 : index
    %33 = vector.load %arg3[%32, %c0_12, %c0_13] : memref<32x1x128xf32, #tpu.memory_space<vmem>>, vector<1x1x128xf32>
    %34 = vector.shape_cast %33 : vector<1x1x128xf32> to vector<1x128xf32>
    %35 = arith.index_cast %arg0 : i32 to index
    %c7 = arith.constant 7 : index
    %36 = memref.load %arg1[%35, %c7] : memref<2x8xi32, #tpu.memory_space<smem>>
    %37 = arith.index_cast %36 : i32 to index
    %c0_14 = arith.constant 0 : index
    %c0_15 = arith.constant 0 : index
    %38 = vector.load %arg3[%37, %c0_14, %c0_15] : memref<32x1x128xf32, #tpu.memory_space<vmem>>, vector<1x1x128xf32>
    %39 = vector.shape_cast %38 : vector<1x1x128xf32> to vector<1x128xf32>
    %40 = tpu.concatenate %4, %9, %14, %19, %24, %29, %34, %39 in 0 : vector<1x128xf32>, vector<1x128xf32>, vector<1x128xf32>, vector<1x128xf32>, vector<1x128xf32>, vector<1x128xf32>, vector<1x128xf32>, vector<1x128xf32> -> vector<8x128xf32>
    %c0_16 = arith.constant 0 : index
    %c0_17 = arith.constant 0 : index
    %41 = vector.load %arg4[%c0_16, %c0_17] : memref<20x128xf32, #tpu.memory_space<vmem>>, vector<8x128xf32>
    %42 = arith.addf %40, %41 : vector<8x128xf32>
    %c0_18 = arith.constant 0 : index
    %c0_19 = arith.constant 0 : index
    %c0_20 = arith.constant 0 : index
    %43 = vector.load %arg5[%c0_18, %c0_19, %c0_20] : memref<2x1x128xf32, #tpu.memory_space<vmem>>, vector<1x1x128xf32>
    %44 = vector.shape_cast %43 : vector<1x1x128xf32> to vector<1x128xf32>
    %c0_21 = arith.constant 0 : index
    %c0_22 = arith.constant 0 : index
    %c0_23 = arith.constant 0 : index
    %45 = vector.load %arg6[%c0_21, %c0_22, %c0_23] : memref<2x1x128xf32, #tpu.memory_space<vmem>>, vector<1x1x128xf32>
    %46 = vector.shape_cast %45 : vector<1x1x128xf32> to vector<1x128xf32>
    %cst = arith.constant dense<0.000000e+00> : vector<8xf32>
    %47 = vector.multi_reduction <add>, %42, %cst [1] : vector<8x128xf32> to vector<8xf32>
    %48 = vector.shape_cast %47 : vector<8xf32> to vector<8x1xf32>
    %cst_24 = arith.constant 1.280000e+02 : f32
    %49 = vector.broadcast %cst_24 : f32 to vector<8x1xf32>
    %50 = arith.divf %48, %49 : vector<8x1xf32>
    %51 = vector.broadcast %50 : vector<8x1xf32> to vector<8x128xf32>
    %52 = arith.subf %42, %51 : vector<8x128xf32>
    %53 = arith.mulf %52, %52 : vector<8x128xf32>
    %cst_25 = arith.constant dense<0.000000e+00> : vector<8xf32>
    %54 = vector.multi_reduction <add>, %53, %cst_25 [1] : vector<8x128xf32> to vector<8xf32>
    %55 = vector.shape_cast %54 : vector<8xf32> to vector<8x1xf32>
    %cst_26 = arith.constant 1.280000e+02 : f32
    %56 = vector.broadcast %cst_26 : f32 to vector<8x1xf32>
    %57 = arith.divf %55, %56 : vector<8x1xf32>
    %58 = vector.broadcast %50 : vector<8x1xf32> to vector<8x128xf32>
    %59 = arith.subf %42, %58 : vector<8x128xf32>
    %cst_27 = arith.constant 9.99999974E-6 : f32
    %60 = vector.broadcast %cst_27 : f32 to vector<8x1xf32>
    %61 = arith.addf %57, %60 : vector<8x1xf32>
    %62 = math.rsqrt %61 : vector<8x1xf32>
    %63 = vector.broadcast %62 : vector<8x1xf32> to vector<8x128xf32>
    %64 = arith.mulf %59, %63 : vector<8x128xf32>
    %65 = vector.broadcast %44 : vector<1x128xf32> to vector<8x128xf32>
    %66 = arith.mulf %64, %65 : vector<8x128xf32>
    %67 = vector.broadcast %46 : vector<1x128xf32> to vector<8x128xf32>
    %68 = arith.addf %66, %67 : vector<8x128xf32>
    %69 = arith.truncf %68 : vector<8x128xf32> to vector<8x128xbf16>
    %70 = vector.shape_cast %69 : vector<8x128xbf16> to vector<1x8x128xbf16>
    %71 = vector.shape_cast %70 : vector<1x8x128xbf16> to vector<1x8x128xbf16>
    %72 = vector.broadcast %71 : vector<1x8x128xbf16> to vector<8x8x128xbf16>
    %c0_28 = arith.constant 0 : index
    %c0_29 = arith.constant 0 : index
    %c0_30 = arith.constant 0 : index
    %c0_31 = arith.constant 0 : index
    %73 = vector.load %arg7[%c0_28, %c0_29, %c0_30, %c0_31] : memref<2x8x128x16xbf16, #tpu.memory_space<vmem>>, vector<1x8x128x16xbf16>
    %74 = vector.shape_cast %73 : vector<1x8x128x16xbf16> to vector<8x128x16xbf16>
    %cst_32 = arith.constant dense<0.000000e+00> : vector<8x8x16xf32>
    %75 = tpu.matmul %72, %74, %cst_32 {dimension_numbers = #tpu.dot_dimension_numbers<[2], [1], [1], [2], [0, 0, 0, 1, 1, 2], [0], [0]>} : vector<8x8x128xbf16>, vector<8x128x16xbf16>, vector<8x8x16xf32> -> vector<8x8x16xf32>
    %c0_33 = arith.constant 0 : index
    %c0_34 = arith.constant 0 : index
    %c0_35 = arith.constant 0 : index
    %c0_36 = arith.constant 0 : index
    %76 = vector.load %arg8[%c0_33, %c0_34, %c0_35, %c0_36] : memref<2x8x128x16xbf16, #tpu.memory_space<vmem>>, vector<1x8x128x16xbf16>
    %77 = vector.shape_cast %76 : vector<1x8x128x16xbf16> to vector<8x128x16xbf16>
    %cst_37 = arith.constant dense<0.000000e+00> : vector<8x8x16xf32>
    %78 = tpu.matmul %72, %77, %cst_37 {dimension_numbers = #tpu.dot_dimension_numbers<[2], [1], [1], [2], [0, 0, 0, 1, 1, 2], [0], [0]>} : vector<8x8x128xbf16>, vector<8x128x16xbf16>, vector<8x8x16xf32> -> vector<8x8x16xf32>
    %c0_38 = arith.constant 0 : index
    %c0_39 = arith.constant 0 : index
    %c0_40 = arith.constant 0 : index
    %c0_41 = arith.constant 0 : index
    %79 = vector.load %arg9[%c0_38, %c0_39, %c0_40, %c0_41] : memref<2x8x128x16xbf16, #tpu.memory_space<vmem>>, vector<1x8x128x16xbf16>
    %80 = vector.shape_cast %79 : vector<1x8x128x16xbf16> to vector<8x128x16xbf16>
    %cst_42 = arith.constant dense<0.000000e+00> : vector<8x8x16xf32>
    %81 = tpu.matmul %72, %80, %cst_42 {dimension_numbers = #tpu.dot_dimension_numbers<[2], [1], [1], [2], [0, 0, 0, 1, 1, 2], [0], [0]>} : vector<8x8x128xbf16>, vector<8x128x16xbf16>, vector<8x8x16xf32> -> vector<8x8x16xf32>
    %82 = arith.truncf %75 : vector<8x8x16xf32> to vector<8x8x16xbf16>
    %83 = arith.truncf %78 : vector<8x8x16xf32> to vector<8x8x16xbf16>
    %cst_43 = arith.constant dense<0.000000e+00> : vector<8x8x8xf32>
    %84 = tpu.matmul %82, %83, %cst_43 {dimension_numbers = #tpu.dot_dimension_numbers<[2], [2], [1], [1], [0, 0, 0, 1, 1, 1], [0], [0]>} : vector<8x8x16xbf16>, vector<8x8x16xbf16>, vector<8x8x8xf32> -> vector<8x8x8xf32>
    %cst_44 = arith.constant 2.500000e-01 : f32
    %85 = vector.broadcast %cst_44 : f32 to vector<8x8x8xf32>
    %86 = arith.mulf %84, %85 : vector<8x8x8xf32>
    %cst_45 = arith.constant dense<0xFF800000> : vector<8x8xf32>
    %87 = vector.multi_reduction <maximumf>, %86, %cst_45 [2] : vector<8x8x8xf32> to vector<8x8xf32>
    %88 = vector.shape_cast %87 : vector<8x8xf32> to vector<8x8x1xf32>
    %89 = vector.broadcast %88 : vector<8x8x1xf32> to vector<8x8x8xf32>
    %90 = arith.subf %86, %89 : vector<8x8x8xf32>
    %91 = math.exp %90 : vector<8x8x8xf32>
    %cst_46 = arith.constant dense<0.000000e+00> : vector<8x8xf32>
    %92 = vector.multi_reduction <add>, %91, %cst_46 [2] : vector<8x8x8xf32> to vector<8x8xf32>
    %93 = vector.shape_cast %92 : vector<8x8xf32> to vector<8x8x1xf32>
    %94 = tpu.reciprocal %93 {approx = true} : vector<8x8x1xf32> -> vector<8x8x1xf32>
    %95 = vector.broadcast %94 : vector<8x8x1xf32> to vector<8x8x8xf32>
    %96 = arith.mulf %91, %95 : vector<8x8x8xf32>
    %97 = arith.truncf %96 : vector<8x8x8xf32> to vector<8x8x8xbf16>
    %98 = arith.truncf %81 : vector<8x8x16xf32> to vector<8x8x16xbf16>
    %cst_47 = arith.constant dense<0.000000e+00> : vector<8x8x16xf32>
    %99 = tpu.matmul %97, %98, %cst_47 {dimension_numbers = #tpu.dot_dimension_numbers<[2], [1], [1], [2], [0, 0, 0, 1, 1, 2], [0], [0]>} : vector<8x8x8xbf16>, vector<8x8x16xbf16>, vector<8x8x16xf32> -> vector<8x8x16xf32>
    %100 = arith.truncf %99 : vector<8x8x16xf32> to vector<8x8x16xbf16>
    %c0_48 = arith.constant 0 : index
    %c0_49 = arith.constant 0 : index
    %c0_50 = arith.constant 0 : index
    %c0_51 = arith.constant 0 : index
    %101 = vector.load %arg10[%c0_48, %c0_49, %c0_50, %c0_51] : memref<2x8x16x128xbf16, #tpu.memory_space<vmem>>, vector<1x8x16x128xbf16>
    %102 = vector.shape_cast %101 : vector<1x8x16x128xbf16> to vector<8x16x128xbf16>
    %cst_52 = arith.constant dense<0.000000e+00> : vector<8x8x128xf32>
    %103 = tpu.matmul %100, %102, %cst_52 {dimension_numbers = #tpu.dot_dimension_numbers<[2], [1], [1], [2], [0, 0, 0, 1, 1, 2], [0], [0]>} : vector<8x8x16xbf16>, vector<8x16x128xbf16>, vector<8x8x128xf32> -> vector<8x8x128xf32>
    %cst_53 = arith.constant dense<0.000000e+00> : vector<8x128xf32>
    %104 = vector.multi_reduction <add>, %103, %cst_53 [0] : vector<8x8x128xf32> to vector<8x128xf32>
    %105 = arith.addf %42, %104 : vector<8x128xf32>
    %c0_54 = arith.constant 0 : index
    %c0_55 = arith.constant 0 : index
    %c0_56 = arith.constant 0 : index
    %106 = vector.load %arg11[%c0_54, %c0_55, %c0_56] : memref<2x1x128xf32, #tpu.memory_space<vmem>>, vector<1x1x128xf32>
    %107 = vector.shape_cast %106 : vector<1x1x128xf32> to vector<1x128xf32>
    %108 = vector.broadcast %107 : vector<1x128xf32> to vector<8x128xf32>
    %109 = arith.addf %105, %108 : vector<8x128xf32>
    %c0_57 = arith.constant 0 : index
    %c0_58 = arith.constant 0 : index
    %c0_59 = arith.constant 0 : index
    %110 = vector.load %arg12[%c0_57, %c0_58, %c0_59] : memref<2x1x128xf32, #tpu.memory_space<vmem>>, vector<1x1x128xf32>
    %111 = vector.shape_cast %110 : vector<1x1x128xf32> to vector<1x128xf32>
    %c0_60 = arith.constant 0 : index
    %c0_61 = arith.constant 0 : index
    %c0_62 = arith.constant 0 : index
    %112 = vector.load %arg13[%c0_60, %c0_61, %c0_62] : memref<2x1x128xf32, #tpu.memory_space<vmem>>, vector<1x1x128xf32>
    %113 = vector.shape_cast %112 : vector<1x1x128xf32> to vector<1x128xf32>
    %cst_63 = arith.constant dense<0.000000e+00> : vector<8xf32>
    %114 = vector.multi_reduction <add>, %109, %cst_63 [1] : vector<8x128xf32> to vector<8xf32>
    %115 = vector.shape_cast %114 : vector<8xf32> to vector<8x1xf32>
    %cst_64 = arith.constant 1.280000e+02 : f32
    %116 = vector.broadcast %cst_64 : f32 to vector<8x1xf32>
    %117 = arith.divf %115, %116 : vector<8x1xf32>
    %118 = vector.broadcast %117 : vector<8x1xf32> to vector<8x128xf32>
    %119 = arith.subf %109, %118 : vector<8x128xf32>
    %120 = arith.mulf %119, %119 : vector<8x128xf32>
    %cst_65 = arith.constant dense<0.000000e+00> : vector<8xf32>
    %121 = vector.multi_reduction <add>, %120, %cst_65 [1] : vector<8x128xf32> to vector<8xf32>
    %122 = vector.shape_cast %121 : vector<8xf32> to vector<8x1xf32>
    %cst_66 = arith.constant 1.280000e+02 : f32
    %123 = vector.broadcast %cst_66 : f32 to vector<8x1xf32>
    %124 = arith.divf %122, %123 : vector<8x1xf32>
    %125 = vector.broadcast %117 : vector<8x1xf32> to vector<8x128xf32>
    %126 = arith.subf %109, %125 : vector<8x128xf32>
    %cst_67 = arith.constant 9.99999974E-6 : f32
    %127 = vector.broadcast %cst_67 : f32 to vector<8x1xf32>
    %128 = arith.addf %124, %127 : vector<8x1xf32>
    %129 = math.rsqrt %128 : vector<8x1xf32>
    %130 = vector.broadcast %129 : vector<8x1xf32> to vector<8x128xf32>
    %131 = arith.mulf %126, %130 : vector<8x128xf32>
    %132 = vector.broadcast %111 : vector<1x128xf32> to vector<8x128xf32>
    %133 = arith.mulf %131, %132 : vector<8x128xf32>
    %134 = vector.broadcast %113 : vector<1x128xf32> to vector<8x128xf32>
    %135 = arith.addf %133, %134 : vector<8x128xf32>
    %136 = arith.truncf %135 : vector<8x128xf32> to vector<8x128xbf16>
    %c0_68 = arith.constant 0 : index
    %c0_69 = arith.constant 0 : index
    %c0_70 = arith.constant 0 : index
    %137 = vector.load %arg14[%c0_68, %c0_69, %c0_70] : memref<2x128x256xbf16, #tpu.memory_space<vmem>>, vector<1x128x256xbf16>
    %138 = vector.shape_cast %137 : vector<1x128x256xbf16> to vector<128x256xbf16>
    %cst_71 = arith.constant dense<0.000000e+00> : vector<8x256xf32>
    %139 = tpu.matmul %136, %138, %cst_71 {dimension_numbers = #tpu.dot_dimension_numbers<[1], [0], [0], [1], [0, 0, 1, 1], [], []>} : vector<8x128xbf16>, vector<128x256xbf16>, vector<8x256xf32> -> vector<8x256xf32>
    %c0_72 = arith.constant 0 : index
    %c0_73 = arith.constant 0 : index
    %c0_74 = arith.constant 0 : index
    %140 = vector.load %arg15[%c0_72, %c0_73, %c0_74] : memref<2x1x256xf32, #tpu.memory_space<vmem>>, vector<1x1x256xf32>
    %141 = vector.shape_cast %140 : vector<1x1x256xf32> to vector<1x256xf32>
    %142 = vector.broadcast %141 : vector<1x256xf32> to vector<8x256xf32>
    %143 = arith.addf %139, %142 : vector<8x256xf32>
    %144 = arith.mulf %143, %143 : vector<8x256xf32>
    %145 = arith.mulf %143, %144 : vector<8x256xf32>
    %cst_75 = arith.constant 4.471500e-02 : f32
    %146 = vector.broadcast %cst_75 : f32 to vector<8x256xf32>
    %147 = arith.mulf %146, %145 : vector<8x256xf32>
    %148 = arith.addf %143, %147 : vector<8x256xf32>
    %cst_76 = arith.constant 0.797884583 : f32
    %149 = vector.broadcast %cst_76 : f32 to vector<8x256xf32>
    %150 = arith.mulf %149, %148 : vector<8x256xf32>
    %151 = math.tanh %150 : vector<8x256xf32>
    %cst_77 = arith.constant 1.000000e+00 : f32
    %152 = vector.broadcast %cst_77 : f32 to vector<8x256xf32>
    %153 = arith.addf %152, %151 : vector<8x256xf32>
    %cst_78 = arith.constant 5.000000e-01 : f32
    %154 = vector.broadcast %cst_78 : f32 to vector<8x256xf32>
    %155 = arith.mulf %154, %153 : vector<8x256xf32>
    %156 = arith.mulf %143, %155 : vector<8x256xf32>
    %157 = arith.truncf %156 : vector<8x256xf32> to vector<8x256xbf16>
    %c0_79 = arith.constant 0 : index
    %c0_80 = arith.constant 0 : index
    %c0_81 = arith.constant 0 : index
    %158 = vector.load %arg16[%c0_79, %c0_80, %c0_81] : memref<2x256x128xbf16, #tpu.memory_space<vmem>>, vector<1x256x128xbf16>
    %159 = vector.shape_cast %158 : vector<1x256x128xbf16> to vector<256x128xbf16>
    %cst_82 = arith.constant dense<0.000000e+00> : vector<8x128xf32>
    %160 = tpu.matmul %157, %159, %cst_82 {dimension_numbers = #tpu.dot_dimension_numbers<[1], [0], [0], [1], [0, 0, 1, 1], [], []>} : vector<8x256xbf16>, vector<256x128xbf16>, vector<8x128xf32> -> vector<8x128xf32>
    %c0_83 = arith.constant 0 : index
    %c0_84 = arith.constant 0 : index
    %c0_85 = arith.constant 0 : index
    %161 = vector.load %arg17[%c0_83, %c0_84, %c0_85] : memref<2x1x128xf32, #tpu.memory_space<vmem>>, vector<1x1x128xf32>
    %162 = vector.shape_cast %161 : vector<1x1x128xf32> to vector<1x128xf32>
    %163 = vector.broadcast %162 : vector<1x128xf32> to vector<8x128xf32>
    %164 = arith.addf %160, %163 : vector<8x128xf32>
    %165 = arith.addf %109, %164 : vector<8x128xf32>
    %c1_86 = arith.constant 1 : index
    %c0_87 = arith.constant 0 : index
    %c0_88 = arith.constant 0 : index
    %166 = vector.load %arg5[%c1_86, %c0_87, %c0_88] : memref<2x1x128xf32, #tpu.memory_space<vmem>>, vector<1x1x128xf32>
    %167 = vector.shape_cast %166 : vector<1x1x128xf32> to vector<1x128xf32>
    %c1_89 = arith.constant 1 : index
    %c0_90 = arith.constant 0 : index
    %c0_91 = arith.constant 0 : index
    %168 = vector.load %arg6[%c1_89, %c0_90, %c0_91] : memref<2x1x128xf32, #tpu.memory_space<vmem>>, vector<1x1x128xf32>
    %169 = vector.shape_cast %168 : vector<1x1x128xf32> to vector<1x128xf32>
    %cst_92 = arith.constant dense<0.000000e+00> : vector<8xf32>
    %170 = vector.multi_reduction <add>, %165, %cst_92 [1] : vector<8x128xf32> to vector<8xf32>
    %171 = vector.shape_cast %170 : vector<8xf32> to vector<8x1xf32>
    %cst_93 = arith.constant 1.280000e+02 : f32
    %172 = vector.broadcast %cst_93 : f32 to vector<8x1xf32>
    %173 = arith.divf %171, %172 : vector<8x1xf32>
    %174 = vector.broadcast %173 : vector<8x1xf32> to vector<8x128xf32>
    %175 = arith.subf %165, %174 : vector<8x128xf32>
    %176 = arith.mulf %175, %175 : vector<8x128xf32>
    %cst_94 = arith.constant dense<0.000000e+00> : vector<8xf32>
    %177 = vector.multi_reduction <add>, %176, %cst_94 [1] : vector<8x128xf32> to vector<8xf32>
    %178 = vector.shape_cast %177 : vector<8xf32> to vector<8x1xf32>
    %cst_95 = arith.constant 1.280000e+02 : f32
    %179 = vector.broadcast %cst_95 : f32 to vector<8x1xf32>
    %180 = arith.divf %178, %179 : vector<8x1xf32>
    %181 = vector.broadcast %173 : vector<8x1xf32> to vector<8x128xf32>
    %182 = arith.subf %165, %181 : vector<8x128xf32>
    %cst_96 = arith.constant 9.99999974E-6 : f32
    %183 = vector.broadcast %cst_96 : f32 to vector<8x1xf32>
    %184 = arith.addf %180, %183 : vector<8x1xf32>
    %185 = math.rsqrt %184 : vector<8x1xf32>
    %186 = vector.broadcast %185 : vector<8x1xf32> to vector<8x128xf32>
    %187 = arith.mulf %182, %186 : vector<8x128xf32>
    %188 = vector.broadcast %167 : vector<1x128xf32> to vector<8x128xf32>
    %189 = arith.mulf %187, %188 : vector<8x128xf32>
    %190 = vector.broadcast %169 : vector<1x128xf32> to vector<8x128xf32>
    %191 = arith.addf %189, %190 : vector<8x128xf32>
    %192 = arith.truncf %191 : vector<8x128xf32> to vector<8x128xbf16>
    %193 = vector.shape_cast %192 : vector<8x128xbf16> to vector<1x8x128xbf16>
    %194 = vector.shape_cast %193 : vector<1x8x128xbf16> to vector<1x8x128xbf16>
    %195 = vector.broadcast %194 : vector<1x8x128xbf16> to vector<8x8x128xbf16>
    %c1_97 = arith.constant 1 : index
    %c0_98 = arith.constant 0 : index
    %c0_99 = arith.constant 0 : index
    %c0_100 = arith.constant 0 : index
    %196 = vector.load %arg7[%c1_97, %c0_98, %c0_99, %c0_100] : memref<2x8x128x16xbf16, #tpu.memory_space<vmem>>, vector<1x8x128x16xbf16>
    %197 = vector.shape_cast %196 : vector<1x8x128x16xbf16> to vector<8x128x16xbf16>
    %cst_101 = arith.constant dense<0.000000e+00> : vector<8x8x16xf32>
    %198 = tpu.matmul %195, %197, %cst_101 {dimension_numbers = #tpu.dot_dimension_numbers<[2], [1], [1], [2], [0, 0, 0, 1, 1, 2], [0], [0]>} : vector<8x8x128xbf16>, vector<8x128x16xbf16>, vector<8x8x16xf32> -> vector<8x8x16xf32>
    %c1_102 = arith.constant 1 : index
    %c0_103 = arith.constant 0 : index
    %c0_104 = arith.constant 0 : index
    %c0_105 = arith.constant 0 : index
    %199 = vector.load %arg8[%c1_102, %c0_103, %c0_104, %c0_105] : memref<2x8x128x16xbf16, #tpu.memory_space<vmem>>, vector<1x8x128x16xbf16>
    %200 = vector.shape_cast %199 : vector<1x8x128x16xbf16> to vector<8x128x16xbf16>
    %cst_106 = arith.constant dense<0.000000e+00> : vector<8x8x16xf32>
    %201 = tpu.matmul %195, %200, %cst_106 {dimension_numbers = #tpu.dot_dimension_numbers<[2], [1], [1], [2], [0, 0, 0, 1, 1, 2], [0], [0]>} : vector<8x8x128xbf16>, vector<8x128x16xbf16>, vector<8x8x16xf32> -> vector<8x8x16xf32>
    %c1_107 = arith.constant 1 : index
    %c0_108 = arith.constant 0 : index
    %c0_109 = arith.constant 0 : index
    %c0_110 = arith.constant 0 : index
    %202 = vector.load %arg9[%c1_107, %c0_108, %c0_109, %c0_110] : memref<2x8x128x16xbf16, #tpu.memory_space<vmem>>, vector<1x8x128x16xbf16>
    %203 = vector.shape_cast %202 : vector<1x8x128x16xbf16> to vector<8x128x16xbf16>
    %cst_111 = arith.constant dense<0.000000e+00> : vector<8x8x16xf32>
    %204 = tpu.matmul %195, %203, %cst_111 {dimension_numbers = #tpu.dot_dimension_numbers<[2], [1], [1], [2], [0, 0, 0, 1, 1, 2], [0], [0]>} : vector<8x8x128xbf16>, vector<8x128x16xbf16>, vector<8x8x16xf32> -> vector<8x8x16xf32>
    %205 = arith.truncf %198 : vector<8x8x16xf32> to vector<8x8x16xbf16>
    %206 = arith.truncf %201 : vector<8x8x16xf32> to vector<8x8x16xbf16>
    %cst_112 = arith.constant dense<0.000000e+00> : vector<8x8x8xf32>
    %207 = tpu.matmul %205, %206, %cst_112 {dimension_numbers = #tpu.dot_dimension_numbers<[2], [2], [1], [1], [0, 0, 0, 1, 1, 1], [0], [0]>} : vector<8x8x16xbf16>, vector<8x8x16xbf16>, vector<8x8x8xf32> -> vector<8x8x8xf32>
    %cst_113 = arith.constant 2.500000e-01 : f32
    %208 = vector.broadcast %cst_113 : f32 to vector<8x8x8xf32>
    %209 = arith.mulf %207, %208 : vector<8x8x8xf32>
    %cst_114 = arith.constant dense<0xFF800000> : vector<8x8xf32>
    %210 = vector.multi_reduction <maximumf>, %209, %cst_114 [2] : vector<8x8x8xf32> to vector<8x8xf32>
    %211 = vector.shape_cast %210 : vector<8x8xf32> to vector<8x8x1xf32>
    %212 = vector.broadcast %211 : vector<8x8x1xf32> to vector<8x8x8xf32>
    %213 = arith.subf %209, %212 : vector<8x8x8xf32>
    %214 = math.exp %213 : vector<8x8x8xf32>
    %cst_115 = arith.constant dense<0.000000e+00> : vector<8x8xf32>
    %215 = vector.multi_reduction <add>, %214, %cst_115 [2] : vector<8x8x8xf32> to vector<8x8xf32>
    %216 = vector.shape_cast %215 : vector<8x8xf32> to vector<8x8x1xf32>
    %217 = tpu.reciprocal %216 {approx = true} : vector<8x8x1xf32> -> vector<8x8x1xf32>
    %218 = vector.broadcast %217 : vector<8x8x1xf32> to vector<8x8x8xf32>
    %219 = arith.mulf %214, %218 : vector<8x8x8xf32>
    %220 = arith.truncf %219 : vector<8x8x8xf32> to vector<8x8x8xbf16>
    %221 = arith.truncf %204 : vector<8x8x16xf32> to vector<8x8x16xbf16>
    %cst_116 = arith.constant dense<0.000000e+00> : vector<8x8x16xf32>
    %222 = tpu.matmul %220, %221, %cst_116 {dimension_numbers = #tpu.dot_dimension_numbers<[2], [1], [1], [2], [0, 0, 0, 1, 1, 2], [0], [0]>} : vector<8x8x8xbf16>, vector<8x8x16xbf16>, vector<8x8x16xf32> -> vector<8x8x16xf32>
    %223 = arith.truncf %222 : vector<8x8x16xf32> to vector<8x8x16xbf16>
    %c1_117 = arith.constant 1 : index
    %c0_118 = arith.constant 0 : index
    %c0_119 = arith.constant 0 : index
    %c0_120 = arith.constant 0 : index
    %224 = vector.load %arg10[%c1_117, %c0_118, %c0_119, %c0_120] : memref<2x8x16x128xbf16, #tpu.memory_space<vmem>>, vector<1x8x16x128xbf16>
    %225 = vector.shape_cast %224 : vector<1x8x16x128xbf16> to vector<8x16x128xbf16>
    %cst_121 = arith.constant dense<0.000000e+00> : vector<8x8x128xf32>
    %226 = tpu.matmul %223, %225, %cst_121 {dimension_numbers = #tpu.dot_dimension_numbers<[2], [1], [1], [2], [0, 0, 0, 1, 1, 2], [0], [0]>} : vector<8x8x16xbf16>, vector<8x16x128xbf16>, vector<8x8x128xf32> -> vector<8x8x128xf32>
    %cst_122 = arith.constant dense<0.000000e+00> : vector<8x128xf32>
    %227 = vector.multi_reduction <add>, %226, %cst_122 [0] : vector<8x8x128xf32> to vector<8x128xf32>
    %228 = arith.addf %165, %227 : vector<8x128xf32>
    %c1_123 = arith.constant 1 : index
    %c0_124 = arith.constant 0 : index
    %c0_125 = arith.constant 0 : index
    %229 = vector.load %arg11[%c1_123, %c0_124, %c0_125] : memref<2x1x128xf32, #tpu.memory_space<vmem>>, vector<1x1x128xf32>
    %230 = vector.shape_cast %229 : vector<1x1x128xf32> to vector<1x128xf32>
    %231 = vector.broadcast %230 : vector<1x128xf32> to vector<8x128xf32>
    %232 = arith.addf %228, %231 : vector<8x128xf32>
    %c1_126 = arith.constant 1 : index
    %c0_127 = arith.constant 0 : index
    %c0_128 = arith.constant 0 : index
    %233 = vector.load %arg12[%c1_126, %c0_127, %c0_128] : memref<2x1x128xf32, #tpu.memory_space<vmem>>, vector<1x1x128xf32>
    %234 = vector.shape_cast %233 : vector<1x1x128xf32> to vector<1x128xf32>
    %c1_129 = arith.constant 1 : index
    %c0_130 = arith.constant 0 : index
    %c0_131 = arith.constant 0 : index
    %235 = vector.load %arg13[%c1_129, %c0_130, %c0_131] : memref<2x1x128xf32, #tpu.memory_space<vmem>>, vector<1x1x128xf32>
    %236 = vector.shape_cast %235 : vector<1x1x128xf32> to vector<1x128xf32>
    %cst_132 = arith.constant dense<0.000000e+00> : vector<8xf32>
    %237 = vector.multi_reduction <add>, %232, %cst_132 [1] : vector<8x128xf32> to vector<8xf32>
    %238 = vector.shape_cast %237 : vector<8xf32> to vector<8x1xf32>
    %cst_133 = arith.constant 1.280000e+02 : f32
    %239 = vector.broadcast %cst_133 : f32 to vector<8x1xf32>
    %240 = arith.divf %238, %239 : vector<8x1xf32>
    %241 = vector.broadcast %240 : vector<8x1xf32> to vector<8x128xf32>
    %242 = arith.subf %232, %241 : vector<8x128xf32>
    %243 = arith.mulf %242, %242 : vector<8x128xf32>
    %cst_134 = arith.constant dense<0.000000e+00> : vector<8xf32>
    %244 = vector.multi_reduction <add>, %243, %cst_134 [1] : vector<8x128xf32> to vector<8xf32>
    %245 = vector.shape_cast %244 : vector<8xf32> to vector<8x1xf32>
    %cst_135 = arith.constant 1.280000e+02 : f32
    %246 = vector.broadcast %cst_135 : f32 to vector<8x1xf32>
    %247 = arith.divf %245, %246 : vector<8x1xf32>
    %248 = vector.broadcast %240 : vector<8x1xf32> to vector<8x128xf32>
    %249 = arith.subf %232, %248 : vector<8x128xf32>
    %cst_136 = arith.constant 9.99999974E-6 : f32
    %250 = vector.broadcast %cst_136 : f32 to vector<8x1xf32>
    %251 = arith.addf %247, %250 : vector<8x1xf32>
    %252 = math.rsqrt %251 : vector<8x1xf32>
    %253 = vector.broadcast %252 : vector<8x1xf32> to vector<8x128xf32>
    %254 = arith.mulf %249, %253 : vector<8x128xf32>
    %255 = vector.broadcast %234 : vector<1x128xf32> to vector<8x128xf32>
    %256 = arith.mulf %254, %255 : vector<8x128xf32>
    %257 = vector.broadcast %236 : vector<1x128xf32> to vector<8x128xf32>
    %258 = arith.addf %256, %257 : vector<8x128xf32>
    %259 = arith.truncf %258 : vector<8x128xf32> to vector<8x128xbf16>
    %c1_137 = arith.constant 1 : index
    %c0_138 = arith.constant 0 : index
    %c0_139 = arith.constant 0 : index
    %260 = vector.load %arg14[%c1_137, %c0_138, %c0_139] : memref<2x128x256xbf16, #tpu.memory_space<vmem>>, vector<1x128x256xbf16>
    %261 = vector.shape_cast %260 : vector<1x128x256xbf16> to vector<128x256xbf16>
    %cst_140 = arith.constant dense<0.000000e+00> : vector<8x256xf32>
    %262 = tpu.matmul %259, %261, %cst_140 {dimension_numbers = #tpu.dot_dimension_numbers<[1], [0], [0], [1], [0, 0, 1, 1], [], []>} : vector<8x128xbf16>, vector<128x256xbf16>, vector<8x256xf32> -> vector<8x256xf32>
    %c1_141 = arith.constant 1 : index
    %c0_142 = arith.constant 0 : index
    %c0_143 = arith.constant 0 : index
    %263 = vector.load %arg15[%c1_141, %c0_142, %c0_143] : memref<2x1x256xf32, #tpu.memory_space<vmem>>, vector<1x1x256xf32>
    %264 = vector.shape_cast %263 : vector<1x1x256xf32> to vector<1x256xf32>
    %265 = vector.broadcast %264 : vector<1x256xf32> to vector<8x256xf32>
    %266 = arith.addf %262, %265 : vector<8x256xf32>
    %267 = arith.mulf %266, %266 : vector<8x256xf32>
    %268 = arith.mulf %266, %267 : vector<8x256xf32>
    %cst_144 = arith.constant 4.471500e-02 : f32
    %269 = vector.broadcast %cst_144 : f32 to vector<8x256xf32>
    %270 = arith.mulf %269, %268 : vector<8x256xf32>
    %271 = arith.addf %266, %270 : vector<8x256xf32>
    %cst_145 = arith.constant 0.797884583 : f32
    %272 = vector.broadcast %cst_145 : f32 to vector<8x256xf32>
    %273 = arith.mulf %272, %271 : vector<8x256xf32>
    %274 = math.tanh %273 : vector<8x256xf32>
    %cst_146 = arith.constant 1.000000e+00 : f32
    %275 = vector.broadcast %cst_146 : f32 to vector<8x256xf32>
    %276 = arith.addf %275, %274 : vector<8x256xf32>
    %cst_147 = arith.constant 5.000000e-01 : f32
    %277 = vector.broadcast %cst_147 : f32 to vector<8x256xf32>
    %278 = arith.mulf %277, %276 : vector<8x256xf32>
    %279 = arith.mulf %266, %278 : vector<8x256xf32>
    %280 = arith.truncf %279 : vector<8x256xf32> to vector<8x256xbf16>
    %c1_148 = arith.constant 1 : index
    %c0_149 = arith.constant 0 : index
    %c0_150 = arith.constant 0 : index
    %281 = vector.load %arg16[%c1_148, %c0_149, %c0_150] : memref<2x256x128xbf16, #tpu.memory_space<vmem>>, vector<1x256x128xbf16>
    %282 = vector.shape_cast %281 : vector<1x256x128xbf16> to vector<256x128xbf16>
    %cst_151 = arith.constant dense<0.000000e+00> : vector<8x128xf32>
    %283 = tpu.matmul %280, %282, %cst_151 {dimension_numbers = #tpu.dot_dimension_numbers<[1], [0], [0], [1], [0, 0, 1, 1], [], []>} : vector<8x256xbf16>, vector<256x128xbf16>, vector<8x128xf32> -> vector<8x128xf32>
    %c1_152 = arith.constant 1 : index
    %c0_153 = arith.constant 0 : index
    %c0_154 = arith.constant 0 : index
    %284 = vector.load %arg17[%c1_152, %c0_153, %c0_154] : memref<2x1x128xf32, #tpu.memory_space<vmem>>, vector<1x1x128xf32>
    %285 = vector.shape_cast %284 : vector<1x1x128xf32> to vector<1x128xf32>
    %286 = vector.broadcast %285 : vector<1x128xf32> to vector<8x128xf32>
    %287 = arith.addf %283, %286 : vector<8x128xf32>
    %288 = arith.addf %232, %287 : vector<8x128xf32>
    %cst_155 = arith.constant dense<0.000000e+00> : vector<128xf32>
    %289 = vector.multi_reduction <add>, %288, %cst_155 [0] : vector<8x128xf32> to vector<128xf32>
    %290 = vector.shape_cast %289 : vector<128xf32> to vector<1x128xf32>
    %cst_156 = arith.constant 8.000000e+00 : f32
    %291 = vector.broadcast %cst_156 : f32 to vector<1x128xf32>
    %292 = arith.divf %290, %291 : vector<1x128xf32>
    %c0_157 = arith.constant 0 : index
    %c0_158 = arith.constant 0 : index
    %c0_159 = arith.constant 0 : index
    %293 = vector.load %arg2[%c0_157, %c0_158, %c0_159] : memref<1x1x768xf32, #tpu.memory_space<vmem>>, vector<1x1x768xf32>
    %294 = vector.shape_cast %293 : vector<1x1x768xf32> to vector<1x768xf32>
    %295 = arith.truncf %294 : vector<1x768xf32> to vector<1x768xbf16>
    %c0_160 = arith.constant 0 : index
    %c0_161 = arith.constant 0 : index
    %296 = vector.load %arg18[%c0_160, %c0_161] : memref<768x512xbf16, #tpu.memory_space<vmem>>, vector<768x512xbf16>
    %cst_162 = arith.constant dense<0.000000e+00> : vector<1x512xf32>
    %297 = tpu.matmul %295, %296, %cst_162 {dimension_numbers = #tpu.dot_dimension_numbers<[1], [0], [0], [1], [0, 0, 1, 1], [], []>} : vector<1x768xbf16>, vector<768x512xbf16>, vector<1x512xf32> -> vector<1x512xf32>
    %c0_163 = arith.constant 0 : index
    %c0_164 = arith.constant 0 : index
    %298 = vector.load %arg19[%c0_163, %c0_164] : memref<1x512xf32, #tpu.memory_space<vmem>>, vector<1x512xf32>
    %299 = arith.addf %297, %298 : vector<1x512xf32>
    %300 = tpu.concatenate %299, %292 in 1 : vector<1x512xf32>, vector<1x128xf32> -> vector<1x640xf32>
    %301 = arith.truncf %300 : vector<1x640xf32> to vector<1x640xbf16>
    %c0_165 = arith.constant 0 : index
    %c0_166 = arith.constant 0 : index
    %302 = vector.load %arg20[%c0_165, %c0_166] : memref<640x256xbf16, #tpu.memory_space<vmem>>, vector<640x256xbf16>
    %cst_167 = arith.constant dense<0.000000e+00> : vector<1x256xf32>
    %303 = tpu.matmul %301, %302, %cst_167 {dimension_numbers = #tpu.dot_dimension_numbers<[1], [0], [0], [1], [0, 0, 1, 1], [], []>} : vector<1x640xbf16>, vector<640x256xbf16>, vector<1x256xf32> -> vector<1x256xf32>
    %c0_168 = arith.constant 0 : index
    %c0_169 = arith.constant 0 : index
    %304 = vector.load %arg21[%c0_168, %c0_169] : memref<1x256xf32, #tpu.memory_space<vmem>>, vector<1x256xf32>
    %305 = arith.addf %303, %304 : vector<1x256xf32>
    %306 = arith.mulf %305, %305 : vector<1x256xf32>
    %307 = arith.mulf %305, %306 : vector<1x256xf32>
    %cst_170 = arith.constant 4.471500e-02 : f32
    %308 = vector.broadcast %cst_170 : f32 to vector<1x256xf32>
    %309 = arith.mulf %308, %307 : vector<1x256xf32>
    %310 = arith.addf %305, %309 : vector<1x256xf32>
    %cst_171 = arith.constant 0.797884583 : f32
    %311 = vector.broadcast %cst_171 : f32 to vector<1x256xf32>
    %312 = arith.mulf %311, %310 : vector<1x256xf32>
    %313 = math.tanh %312 : vector<1x256xf32>
    %cst_172 = arith.constant 1.000000e+00 : f32
    %314 = vector.broadcast %cst_172 : f32 to vector<1x256xf32>
    %315 = arith.addf %314, %313 : vector<1x256xf32>
    %cst_173 = arith.constant 5.000000e-01 : f32
    %316 = vector.broadcast %cst_173 : f32 to vector<1x256xf32>
    %317 = arith.mulf %316, %315 : vector<1x256xf32>
    %318 = arith.mulf %305, %317 : vector<1x256xf32>
    %319 = arith.truncf %318 : vector<1x256xf32> to vector<1x256xbf16>
    %c0_174 = arith.constant 0 : index
    %c0_175 = arith.constant 0 : index
    %320 = vector.load %arg22[%c0_174, %c0_175] : memref<256x128xbf16, #tpu.memory_space<vmem>>, vector<256x128xbf16>
    %cst_176 = arith.constant dense<0.000000e+00> : vector<1x128xf32>
    %321 = tpu.matmul %319, %320, %cst_176 {dimension_numbers = #tpu.dot_dimension_numbers<[1], [0], [0], [1], [0, 0, 1, 1], [], []>} : vector<1x256xbf16>, vector<256x128xbf16>, vector<1x128xf32> -> vector<1x128xf32>
    %c0_177 = arith.constant 0 : index
    %c0_178 = arith.constant 0 : index
    %322 = vector.load %arg23[%c0_177, %c0_178] : memref<1x128xf32, #tpu.memory_space<vmem>>, vector<1x128xf32>
    %323 = arith.addf %321, %322 : vector<1x128xf32>
    %c0_179 = arith.constant 0 : index
    %c0_180 = arith.constant 0 : index
    %c0_181 = arith.constant 0 : index
    %324 = vector.load %arg24[%c0_179, %c0_180, %c0_181] : memref<1x1x128xf32, #tpu.memory_space<vmem>>, vector<1x1x128xf32>
    %325 = vector.shape_cast %324 : vector<1x1x128xf32> to vector<1x128xf32>
    %326 = vector.shape_cast %323 : vector<1x128xf32> to vector<1x1x128xf32>
    tpu.vector_store %arg24[%c0_179, %c0_180, %c0_181], %326 {strides = array<i32>} : memref<1x1x128xf32, #tpu.memory_space<vmem>>, vector<1x1x128xf32>,
    return
  }
  func.func @transform_0(%arg0: i32, %arg1: memref<2x8xi32, #tpu.memory_space<smem>>) -> (i32, i32, i32) {
    %c0_i32 = arith.constant 0 : i32
    %c0_i32_0 = arith.constant 0 : i32
    %c0_i32_1 = arith.constant 0 : i32
    return %arg0, %c0_i32, %c0_i32_0 : i32, i32, i32
  }
  func.func @transform_1(%arg0: i32, %arg1: memref<2x8xi32, #tpu.memory_space<smem>>) -> (i32, i32, i32) {
    %c0_i32 = arith.constant 0 : i32
    %c0_i32_0 = arith.constant 0 : i32
    %c0_i32_1 = arith.constant 0 : i32
    %c0_i32_2 = arith.constant 0 : i32
    return %c0_i32, %c0_i32_0, %c0_i32_1 : i32, i32, i32
  }
  func.func @transform_2(%arg0: i32, %arg1: memref<2x8xi32, #tpu.memory_space<smem>>) -> (i32, i32) {
    %c0_i32 = arith.constant 0 : i32
    %c0_i32_0 = arith.constant 0 : i32
    %c0_i32_1 = arith.constant 0 : i32
    return %c0_i32, %c0_i32_0 : i32, i32
  }
  func.func @transform_3(%arg0: i32, %arg1: memref<2x8xi32, #tpu.memory_space<smem>>) -> (i32, i32, i32) {
    %c0_i32 = arith.constant 0 : i32
    %c0_i32_0 = arith.constant 0 : i32
    %c0_i32_1 = arith.constant 0 : i32
    %c0_i32_2 = arith.constant 0 : i32
    return %c0_i32, %c0_i32_0, %c0_i32_1 : i32, i32, i32
  }
  func.func @transform_4(%arg0: i32, %arg1: memref<2x8xi32, #tpu.memory_space<smem>>) -> (i32, i32, i32) {
    %c0_i32 = arith.constant 0 : i32
    %c0_i32_0 = arith.constant 0 : i32
    %c0_i32_1 = arith.constant 0 : i32
    %c0_i32_2 = arith.constant 0 : i32
    return %c0_i32, %c0_i32_0, %c0_i32_1 : i32, i32, i32
  }
  func.func @transform_5(%arg0: i32, %arg1: memref<2x8xi32, #tpu.memory_space<smem>>) -> (i32, i32, i32, i32) {
    %c0_i32 = arith.constant 0 : i32
    %c0_i32_0 = arith.constant 0 : i32
    %c0_i32_1 = arith.constant 0 : i32
    %c0_i32_2 = arith.constant 0 : i32
    %c0_i32_3 = arith.constant 0 : i32
    return %c0_i32, %c0_i32_0, %c0_i32_1, %c0_i32_2 : i32, i32, i32, i32
  }
  func.func @transform_6(%arg0: i32, %arg1: memref<2x8xi32, #tpu.memory_space<smem>>) -> (i32, i32, i32, i32) {
    %c0_i32 = arith.constant 0 : i32
    %c0_i32_0 = arith.constant 0 : i32
    %c0_i32_1 = arith.constant 0 : i32
    %c0_i32_2 = arith.constant 0 : i32
    %c0_i32_3 = arith.constant 0 : i32
    return %c0_i32, %c0_i32_0, %c0_i32_1, %c0_i32_2 : i32, i32, i32, i32
  }
  func.func @transform_7(%arg0: i32, %arg1: memref<2x8xi32, #tpu.memory_space<smem>>) -> (i32, i32, i32, i32) {
    %c0_i32 = arith.constant 0 : i32
    %c0_i32_0 = arith.constant 0 : i32
    %c0_i32_1 = arith.constant 0 : i32
    %c0_i32_2 = arith.constant 0 : i32
    %c0_i32_3 = arith.constant 0 : i32
    return %c0_i32, %c0_i32_0, %c0_i32_1, %c0_i32_2 : i32, i32, i32, i32
  }
  func.func @transform_8(%arg0: i32, %arg1: memref<2x8xi32, #tpu.memory_space<smem>>) -> (i32, i32, i32, i32) {
    %c0_i32 = arith.constant 0 : i32
    %c0_i32_0 = arith.constant 0 : i32
    %c0_i32_1 = arith.constant 0 : i32
    %c0_i32_2 = arith.constant 0 : i32
    %c0_i32_3 = arith.constant 0 : i32
    return %c0_i32, %c0_i32_0, %c0_i32_1, %c0_i32_2 : i32, i32, i32, i32
  }
  func.func @transform_9(%arg0: i32, %arg1: memref<2x8xi32, #tpu.memory_space<smem>>) -> (i32, i32, i32) {
    %c0_i32 = arith.constant 0 : i32
    %c0_i32_0 = arith.constant 0 : i32
    %c0_i32_1 = arith.constant 0 : i32
    %c0_i32_2 = arith.constant 0 : i32
    return %c0_i32, %c0_i32_0, %c0_i32_1 : i32, i32, i32
  }
  func.func @transform_10(%arg0: i32, %arg1: memref<2x8xi32, #tpu.memory_space<smem>>) -> (i32, i32, i32) {
    %c0_i32 = arith.constant 0 : i32
    %c0_i32_0 = arith.constant 0 : i32
    %c0_i32_1 = arith.constant 0 : i32
    %c0_i32_2 = arith.constant 0 : i32
    return %c0_i32, %c0_i32_0, %c0_i32_1 : i32, i32, i32
  }
  func.func @transform_11(%arg0: i32, %arg1: memref<2x8xi32, #tpu.memory_space<smem>>) -> (i32, i32, i32) {
    %c0_i32 = arith.constant 0 : i32
    %c0_i32_0 = arith.constant 0 : i32
    %c0_i32_1 = arith.constant 0 : i32
    %c0_i32_2 = arith.constant 0 : i32
    return %c0_i32, %c0_i32_0, %c0_i32_1 : i32, i32, i32
  }
  func.func @transform_12(%arg0: i32, %arg1: memref<2x8xi32, #tpu.memory_space<smem>>) -> (i32, i32, i32) {
    %c0_i32 = arith.constant 0 : i32
    %c0_i32_0 = arith.constant 0 : i32
    %c0_i32_1 = arith.constant 0 : i32
    %c0_i32_2 = arith.constant 0 : i32
    return %c0_i32, %c0_i32_0, %c0_i32_1 : i32, i32, i32
  }
  func.func @transform_13(%arg0: i32, %arg1: memref<2x8xi32, #tpu.memory_space<smem>>) -> (i32, i32, i32) {
    %c0_i32 = arith.constant 0 : i32
    %c0_i32_0 = arith.constant 0 : i32
    %c0_i32_1 = arith.constant 0 : i32
    %c0_i32_2 = arith.constant 0 : i32
    return %c0_i32, %c0_i32_0, %c0_i32_1 : i32, i32, i32
  }
  func.func @transform_14(%arg0: i32, %arg1: memref<2x8xi32, #tpu.memory_space<smem>>) -> (i32, i32, i32) {
    %c0_i32 = arith.constant 0 : i32
    %c0_i32_0 = arith.constant 0 : i32
    %c0_i32_1 = arith.constant 0 : i32
    %c0_i32_2 = arith.constant 0 : i32
    return %c0_i32, %c0_i32_0, %c0_i32_1 : i32, i32, i32
  }
  func.func @transform_15(%arg0: i32, %arg1: memref<2x8xi32, #tpu.memory_space<smem>>) -> (i32, i32, i32) {
    %c0_i32 = arith.constant 0 : i32
    %c0_i32_0 = arith.constant 0 : i32
    %c0_i32_1 = arith.constant 0 : i32
    %c0_i32_2 = arith.constant 0 : i32
    return %c0_i32, %c0_i32_0, %c0_i32_1 : i32, i32, i32
  }
  func.func @transform_16(%arg0: i32, %arg1: memref<2x8xi32, #tpu.memory_space<smem>>) -> (i32, i32) {
    %c0_i32 = arith.constant 0 : i32
    %c0_i32_0 = arith.constant 0 : i32
    %c0_i32_1 = arith.constant 0 : i32
    return %c0_i32, %c0_i32_0 : i32, i32
  }
  func.func @transform_17(%arg0: i32, %arg1: memref<2x8xi32, #tpu.memory_space<smem>>) -> (i32, i32) {
    %c0_i32 = arith.constant 0 : i32
    %c0_i32_0 = arith.constant 0 : i32
    %c0_i32_1 = arith.constant 0 : i32
    return %c0_i32, %c0_i32_0 : i32, i32
  }
  func.func @transform_18(%arg0: i32, %arg1: memref<2x8xi32, #tpu.memory_space<smem>>) -> (i32, i32) {
    %c0_i32 = arith.constant 0 : i32
    %c0_i32_0 = arith.constant 0 : i32
    %c0_i32_1 = arith.constant 0 : i32
    return %c0_i32, %c0_i32_0 : i32, i32
  }
  func.func @transform_19(%arg0: i32, %arg1: memref<2x8xi32, #tpu.memory_space<smem>>) -> (i32, i32) {
    %c0_i32 = arith.constant 0 : i32
    %c0_i32_0 = arith.constant 0 : i32
    %c0_i32_1 = arith.constant 0 : i32
    return %c0_i32, %c0_i32_0 : i32, i32
  }
  func.func @transform_20(%arg0: i32, %arg1: memref<2x8xi32, #tpu.memory_space<smem>>) -> (i32, i32) {
    %c0_i32 = arith.constant 0 : i32
    %c0_i32_0 = arith.constant 0 : i32
    %c0_i32_1 = arith.constant 0 : i32
    return %c0_i32, %c0_i32_0 : i32, i32
  }
  func.func @transform_21(%arg0: i32, %arg1: memref<2x8xi32, #tpu.memory_space<smem>>) -> (i32, i32) {
    %c0_i32 = arith.constant 0 : i32
    %c0_i32_0 = arith.constant 0 : i32
    %c0_i32_1 = arith.constant 0 : i32
    return %c0_i32, %c0_i32_0 : i32, i32
  }
  func.func @transform_22(%arg0: i32, %arg1: memref<2x8xi32, #tpu.memory_space<smem>>) -> (i32, i32, i32) {
    %c0_i32 = arith.constant 0 : i32
    %c0_i32_0 = arith.constant 0 : i32
    %c0_i32_1 = arith.constant 0 : i32
    return %arg0, %c0_i32, %c0_i32_0 : i32, i32, i32
  }
}

</mosaic_0001>

<bundles_post_ra>
// kernel: vqa_forward.1
= control target key start
LH: loop header
LB: loop body
LE: loop exit
PB: predicated region body
PF: predicated region fallthrough
CT: control target
= control target key end

     0   :  { %s19410_s0 = inlined_call_operand.vmem [shape: s32[2,8], index: 0, kind: input, shape index: {}]   ;;  %s19411_s1 = inlined_call_operand.vmem [shape: f32[2,1,768], index: 1, kind: input, shape index: {}]   ;;  %s19412_s2 = inlined_call_operand.vmem [shape: f32[32,1,128], index: 2, kind: input, shape index: {}]   ;;  %s19413_s3 = inlined_call_operand.vmem [shape: f32[20,128], index: 3, kind: input, shape index: {}]   ;;  %s19414_s4 = inlined_call_operand.vmem [shape: f32[2,1,128], index: 4, kind: input, shape index: {}]   ;;  %s19415_s5 = inlined_call_operand.vmem [shape: f32[2,1,128], index: 5, kind: input, shape index: {}]   ;;  %s19416_s6 = inlined_call_operand.vmem [shape: bf16[2,8,128,16], index: 6, kind: input, shape index: {}]   ;;  %s19417_s7 = inlined_call_operand.vmem [shape: bf16[2,8,128,16], index: 7, kind: input, shape index: {}]   ;;  %s19418_s8 = inlined_call_operand.vmem [shape: bf16[2,8,128,16], index: 8, kind: input, shape index: {}]   ;;  %s19419_s9 = inlined_call_operand.vmem [shape: bf16[2,8,16,128], index: 9, kind: input, shape index: {}]   ;;  %s19420_s10 = inlined_call_operand.vmem [shape: f32[2,1,128], index: 10, kind: input, shape index: {}]   ;;  %s19421_s11 = inlined_call_operand.vmem [shape: f32[2,1,128], index: 11, kind: input, shape index: {}]   ;;  %s19422_s12 = inlined_call_operand.vmem [shape: f32[2,1,128], index: 12, kind: input, shape index: {}]   ;;  %s19423_s13 = inlined_call_operand.vmem [shape: bf16[2,128,256], index: 13, kind: input, shape index: {}]   ;;  %s19424_s14 = inlined_call_operand.vmem [shape: f32[2,1,256], index: 14, kind: input, shape index: {}]   ;;  %s19425_s15 = inlined_call_operand.vmem [shape: bf16[2,256,128], index: 15, kind: input, shape index: {}]   ;;  %s19426_s16 = inlined_call_operand.vmem [shape: f32[2,1,128], index: 16, kind: input, shape index: {}]   ;;  %s19427_s17 = inlined_call_operand.vmem [shape: bf16[768,512], index: 17, kind: input, shape index: {}]   ;;  %s19428_s18 = inlined_call_operand.vmem [shape: f32[1,512], index: 18, kind: input, shape index: {}]   ;;  %s19429_s19 = inlined_call_operand.vmem [shape: bf16[640,256], index: 19, kind: input, shape index: {}]   ;;  %s19430_s20 = inlined_call_operand.vmem [shape: f32[1,256], index: 20, kind: input, shape index: {}]   ;;  %s19431_s21 = inlined_call_operand.vmem [shape: bf16[256,128], index: 21, kind: input, shape index: {}]   ;;  %s19432_s22 = inlined_call_operand.vmem [shape: f32[1,128], index: 22, kind: input, shape index: {}]   ;;  %s19433_s23 = inlined_call_operand.hbm [shape: f32[2,1,128], index: 23, kind: output, shape index: {}]  }
   0x1   :  { %19456 = sst [smem:[#allocation17_spill]] %s19410_s0 }
   0x2   :  { %19457 = sst [smem:[#allocation18_spill]] %s19411_s1  ;;  %s19473_s24 = sld [smem:[#allocation17_spill]] }
   0x3   :  { %19458 = sst [smem:[#allocation19_spill]] %s19412_s2 }
   0x4   :  { %19459 = sst [smem:[#allocation20_spill]] %s19413_s3 }
   0x5   :  { %19460 = sst [smem:[#allocation21_spill]] %s19414_s4 }
   0x6   :  { %19461 = sst [smem:[#allocation22_spill]] %s19415_s5 }
   0x7   :  { %19462 = sst [smem:[#allocation23_spill]] %s19416_s6 }
   0x8   :  { %19463 = sst [smem:[#allocation24_spill]] %s19417_s7 }
   0x9   :  { %19464 = sst [smem:[#allocation25_spill]] %s19424_s14 }
   0xa   :  { %19465 = sst [smem:[#allocation26_spill]] %s19426_s16 }
   0xb   :  { %19466 = sst [smem:[#allocation27_spill]] %s19427_s17  ;;  %s28_s17 = sshll.u32 %s19473_s24, 4  ;;  %s29_s17 = int_to_ptr.vmem [resolvable:$true] %s28_s17 }
   0xc   :  { %19467 = sst [smem:[#allocation28_spill]] %s19428_s18  ;;  %s15714_s25 = scalar_lea.vmem %s29_s17, 32 }
   0xd   :  { %19468 = sst [smem:[#allocation29_spill]] %s19429_s19  ;;  %p15715_p0 = scmp.ne.s32.totalorder %s29_s17, %s15714_s25 }
   0xe   :  { %19469 = sst [smem:[#allocation30_spill]] %s19430_s20  ;;  %p15719_p1 = scmp.lt.s32.totalorder %s29_s17, %s29_s17 }
   0xf   :  { %19470 = sst [smem:[#allocation31_spill]] %s19431_s21  ;;  %p15720_p2 = scmp.lt.s32.totalorder %s15714_s25, %s15714_s25 }
  0x10   :  { %19471 = sst [smem:[#allocation32_spill]] %s19432_s22 }
  0x11   :  { %19472 = sst [smem:[#allocation33_spill]] %s19433_s23  ;;  %p15721_p3 = por %p15720_p2, %p15719_p1 }
  0x13   :  { %p15722_p4 = pnand %p15721_p3, %p15715_p0 }
  0x15   :  { %15725 = shalt.err (!%p15722_p4)  }
  0x16   :  { %s15792_s5 = smov [#allocation3]  }
  0x17   :  { %31 = dma.vmem_to_smem %s29_s17, 32, %s15792_s5, [#allocation2] }
  0x18   :  { %15770 = dma.done.wait [#allocation2], 32 }
  0x19   :  { %15771 = vsyncadd [#allocation2], 4294967264 }
  0x1a   :  { %33 = sfence }
  0x1b   :  { %34 = vsyncpa [#allocation5], 0 }
  0x1c   :  { %36 = vsyncpa [#allocation5 + $0x1], 0  ;;  %s15920_s1 = smov 0   ;;  %s15922_s26 = smov 0  }
  0x1d   :  { %s15924_s2 = smov 0   ;;  %s15926_s6 = smov 0  }
  0x1e LB: > { %19474 = sst [smem:[#allocation8_spill]] %s15778_s1  ;;  %s15941_s17 = sadd.s32 4294967295, %s15790_s6   ;;  %s15790_s6 = sphi %s15926_s6, %s19508_s6   ;;  %s15786_s2 = sphi %s15924_s2, %s19511_s2   ;;  %s15782_s26 = sphi %s15922_s26, %s19510_s26   ;;  %s15778_s1 = sphi %s15920_s1, %s19509_s1  }
  0x1f   : > { %19475 = sst [smem:[#allocation9_spill]] %s15782_s26  ;;  %s11530_s27 = sadd.s32 4294967294, %s15790_s6  }
  0x20   : > { %19476 = sst [smem:[#allocation10_spill]] %s15786_s2  ;;  %s15945_s7 = sadd.s32 1, %s15790_s6  }
  0x21   : > { %19477 = sst [smem:[#allocation11_spill]] %s15790_s6  ;;  %s516_s28 = sadd.s32 1, %s15786_s2 }
  0x22   : > { %19478 = sst [smem:[#allocation12_spill]] %s15941_s17  ;;  %s513_s29 = ssub.s32 %s15790_s6, %s15945_s7 }
  0x23   : > { %19479 = sst [smem:[#allocation13_spill]] %s15945_s7  ;;  %p526_p5 = scmp.ne.s32.totalorder %s15786_s2, %s15782_s26 }
  0x24   : > { %p514_p6 = scmp.eq.s32.totalorder %s513_s29, 0  ;;  %p527_p7 = scmp.eq.s32.totalorder %s15941_s17, 1 }
  0x25   : > { %p532_p8 = scmp.ne.s32.totalorder %s15782_s26, %s15778_s1  ;;  %p533_p9 = scmp.eq.s32.totalorder %s11530_s27, 1 }
  0x26   : > { %s15956_s3 = scalar_select %p514_p6, %s15786_s2, %s516_s28  }
  0x27   : > { %p15958_p10 = por %p527_p7, %p526_p5  ;;  %p15962_p11 = por %p533_p9, %p532_p8 }
  0x28   : > { %19480 = sst [smem:[#allocation14_spill]] %s15956_s3  ;;  %p11533_p12 = scmp.ge.s32.totalorder %s15790_s6, 1 }
  0x29   : > { %s19481_s0 = scalar_select %p15958_p10, 1, 0 }
  0x2a   : > { %s19483_s4 = scalar_select %p15962_p11, 1, 0 }
  0x2b   : > { %19482 = sst [smem:[#allocation15_spill]] %s19481_s0  ;;  %p621_p13 = scmp.lt.s32.totalorder %s15790_s6, 3 }
  0x2c   : > { %19484 = sst [smem:[#allocation16_spill]] %s19483_s4 }
  0x2d   : > { %p622_p0 = pnand %p11533_p12, %p621_p13 }
  0x2e   : > { %s11534_s30 = sshll.u32 (!%p622_p0), %s15941_s17, 7  ;;  %vm760_vm0 = vcmask (!%p622_p0), 1040384   ;;  %vm762_vm1 = vcmask (!%p622_p0), 1041408   ;;  %vm764_vm2 = vcmask (!%p622_p0), 1042432   ;;  %vm766_vm3 = vcmask (!%p622_p0), 1043456   ;;  %s19485_s22 = sld [smem:[#allocation19_spill]] (!%p622_p0) }
  0x2f   : > { %625 = sbr.rel (%p622_p0) target bundleno = 5832 (0x16c8), region = 108  ;;  %s687_s24 = sld [smem:[#allocation3 + %s11534_s30]] (!%p622_p0)  ;;  %vm768_vm4 = vcmask (!%p622_p0), 1044480   ;;  %vm770_vm5 = vcmask (!%p622_p0), 1045504   ;;  %vm772_vm6 = vcmask (!%p622_p0), 1046528   ;;  %v15793_v19 = vmov (!%p622_p0), 0.0  }
  0x30   : > { %s690_s25 = sadd.s32 (!%p622_p0), 1, %s11534_s30  ;;  %s694_s27 = sadd.s32 (!%p622_p0), 2, %s11534_s30  ;;  %13406 = vmatprep.subr.bf16.mxu0 (!%p622_p0), %v15793_v19  ;;  %13426 = vmatprep.subr.bf16.mxu1 (!%p622_p0), %v15793_v19  ;;  %vm15794_vm7 = vmmov (!%p622_p0), 0   ;;  %vm3317_vm8 = vcmask (!%p622_p0), 130048   ;;  %vm3694_vm9 = vcmask (!%p622_p0), 64512  }
  0x31   : > { %s691_s5 = sld [smem:[#allocation3 + %s690_s25]] (!%p622_p0)  ;;  %s698_s29 = sadd.s32 (!%p622_p0), 3, %s11534_s30  ;;  %13422 = vmatprep.mubr.msk.bf16.mxu0 (!%p622_p0), %vm15794_vm7, %v15793_v19  ;;  %13442 = vmatprep.mubr.msk.bf16.mxu1 (!%p622_p0), %vm15794_vm7, %v15793_v19 }
  0x32   : > { %s695_s28 = sld [smem:[#allocation3 + %s694_s27]] (!%p622_p0)  ;;  %s702_s2 = sadd.s32 (!%p622_p0), 4, %s11534_s30 }
  0x33   : > { %s699_s3 = sld [smem:[#allocation3 + %s698_s29]] (!%p622_p0)  ;;  %s706_s4 = sadd.s32 (!%p622_p0), 5, %s11534_s30 }
  0x34   : > { %s703_s7 = sld [smem:[#allocation3 + %s702_s2]] (!%p622_p0)  ;;  %s710_s6 = sadd.s32 (!%p622_p0), 6, %s11534_s30 }
  0x35   : > { %s707_s1 = sld [smem:[#allocation3 + %s706_s4]] (!%p622_p0)  ;;  %s688_s26 = scalar_lea.vmem (!%p622_p0), %s19485_s22, %s687_s24 }
  0x36   : > { %s711_s20 = sld [smem:[#allocation3 + %s710_s6]]  ;;  %v689_v0 = vld [vmem:[%s688_s26] sm:$0x1]  ;;  %s714_s18 = sadd.s32 7, %s11534_s30 }
  0x37   : > { %s692_s27 = scalar_lea.vmem %s19485_s22, %s691_s5  ;;  %s715_s17 = sld [smem:[#allocation3 + %s714_s18]] }
  0x38   : > { %v11535_v1 = vld [vmem:[%s692_s27] ss:$0 sm:$0xff]  ;;  %s696_s2 = scalar_lea.vmem %s19485_s22, %s695_s28  ;;  %s19486_s24 = sld [smem:[#allocation20_spill]] }
  0x39   : > { %v11536_v2 = vld [vmem:[%s696_s2] ss:$0 sm:$0xff]  ;;  %s700_s14 = scalar_lea.vmem %s19485_s22, %s699_s3  ;;  %v761_v3 = vsel %vm760_vm0, %v689_v0, %v11535_v1  ;;  %s19487_s25 = sld [smem:[#allocation23_spill]] }
  0x3a   : > { %v11537_v4 = vld [vmem:[%s700_s14] ss:$0 sm:$0xff]  ;;  %s704_s21 = scalar_lea.vmem %s19485_s22, %s703_s7  ;;  %v763_v5 = vsel %vm762_vm1, %v761_v3, %v11536_v2  ;;  %s19490_s18 = sld [smem:[#allocation24_spill]] }
  0x3b   : > { %v11538_v6 = vld [vmem:[%s704_s21] ss:$0 sm:$0xff]  ;;  %s708_s19 = scalar_lea.vmem %s19485_s22, %s707_s1  ;;  %v765_v7 = vsel %vm764_vm2, %v763_v5, %v11537_v4  ;;  %s19491_s16 = sld [smem:[#allocation25_spill]] }
  0x3c   : > { %v11539_v8 = vld [vmem:[%s708_s19] ss:$0 sm:$0xff]  ;;  %s712_s3 = scalar_lea.vmem %s19485_s22, %s711_s20  ;;  %v767_v9 = vsel %vm766_vm3, %v765_v7, %v11538_v6  ;;  %s19488_s19 = sld [smem:[#allocation21_spill]] }
  0x3d   : > { %v11540_v11 = vld [vmem:[%s712_s3] ss:$0 sm:$0xff]  ;;  %v769_v12 = vsel %vm768_vm4, %v767_v9, %v11539_v8  ;;  %s716_s1 = scalar_lea.vmem %s19485_s22, %s715_s17  ;;  %s19489_s3 = sld [smem:[#allocation22_spill]] }
  0x3e   : > { %v774_v10 = vld [vmem:[%s19486_s24] sm:$0xff]  ;;  %v771_v13 = vsel %vm770_vm5, %v769_v12, %v11540_v11  ;;  %s19492_s24 = sld [smem:[#allocation26_spill]]  ;;  %s19493_s14 = sld [smem:[#allocation27_spill]] }
  0x3f   : > { %v11541_v14 = vld [vmem:[%s716_s1] ss:$0 sm:$0xff]  ;;  %v14728_v20 = vld [vmem:[%s19487_s25 + $0x8] sm:$0xff]   ;;  %v14730_v22 = vld [vmem:[%s19487_s25 + $0x10] sm:$0xff]   ;;  %s19494_s26 = sld [smem:[#allocation12_spill]]  ;;  %s19495_s17 = sld [smem:[#allocation18_spill]] }
  0x40   : > { %v773_v15 = vsel %vm772_vm6, %v771_v13, %v11541_v14  ;;  %v14726_v17 = vld [vmem:[%s19487_s25] sm:$0xff]   ;;  %v14729_v21 = vld [vmem:[%s19487_s25 + $0x48] sm:$0xff]   ;;  %v14731_v23 = vld [vmem:[%s19487_s25 + $0x50] sm:$0xff]   ;;  %s19496_s23 = sld [smem:[#allocation29_spill]]  ;;  %s19497_s21 = sld [smem:[#allocation28_spill]] }
  0x41   : > { %v16003_v16 = vadd.f32 %v774_v10, %v773_v15  ;;  %v14727_v18 = vld [vmem:[%s19487_s25 + $0x40] sm:$0xff]   ;;  %13407 = vmatpush3.bf16.msra.mxu0 %v14726_v17  ;;  %v14732_v28 = vld [vmem:[%s19487_s25 + $0x18] sm:$0xff]   ;;  %v14736_v32 = vld [vmem:[%s19487_s25 + $0x28] sm:$0xff]   ;;  %s19498_s6 = sld [smem:[#allocation31_spill]]  ;;  %s19500_s27 = sld [smem:[#allocation30_spill]] }
  0x42   : > { %13427 = vmatpush3.bf16.msra.mxu1 %v14727_v18  ;;  %13408 = vmatprep.subr.bf16.mxu0 %v15793_v19  ;;  %v14733_v29 = vld [vmem:[%s19487_s25 + $0x58] sm:$0xff]   ;;  %v14734_v30 = vld [vmem:[%s19487_s25 + $0x20] sm:$0xff]   ;;  %v14737_v33 = vld [vmem:[%s19487_s25 + $0x68] sm:$0xff]   ;;  %s19501_s29 = sld [smem:[#allocation9_spill]]  ;;  %s19504_s28 = sld [smem:[#allocation33_spill]] }
  0x43   : > { %778 = vadd.xlane.f32.xlu0 %v16003_v16  ;;  %13428 = vmatprep.subr.bf16.mxu1 %v15793_v19  ;;  %v14735_v31 = vld [vmem:[%s19487_s25 + $0x60] sm:$0xff]   ;;  %v14738_v34 = vld [vmem:[%s19487_s25 + $0x30] sm:$0xff]   ;;  %v14740_v36 = vld [vmem:[%s19487_s25 + $0x38] sm:$0xff]  }
  0x44   : > { %v14739_v35 = vld [vmem:[%s19487_s25 + $0x70] sm:$0xff]   ;;  %v14741_v37 = vld [vmem:[%s19487_s25 + $0x78] sm:$0xff]   ;;  %v11542_v41 = vld [vmem:[%s19488_s19] ss:$0 sm:$0xff] }
  0x45   : > { %13409 = vmatpush3.bf16.msra.mxu0 %v14728_v20  ;;  %v11543_v43 = vld [vmem:[%s19489_s3] ss:$0 sm:$0xff]  ;;  %v14744_v50 = vld [vmem:[%s19487_s25 + $0x88] sm:$0xff]   ;;  %v14746_v52 = vld [vmem:[%s19487_s25 + $0x90] sm:$0xff]   ;;  %p681_p1 = scmp.lt.s32.totalorder %s19494_s26, 1 }
  0x46   : > { %13429 = vmatpush3.bf16.msra.mxu1 %v14729_v21  ;;  %13410 = vmatprep.subr.bf16.mxu0 %v15793_v19  ;;  %v14742_v46 = vld [vmem:[%s19487_s25 + $0x80] sm:$0xff]   ;;  %v14745_v51 = vld [vmem:[%s19487_s25 + $0xc8] sm:$0xff]   ;;  %v14747_v53 = vld [vmem:[%s19487_s25 + $0xd0] sm:$0xff]  }
  0x47   : > { %13430 = vmatprep.subr.bf16.mxu1 %v15793_v19  ;;  %v14743_v47 = vld [vmem:[%s19487_s25 + $0xc0] sm:$0xff]   ;;  %v14748_v54 = vld [vmem:[%s19487_s25 + $0x98] sm:$0xff]   ;;  %v14752_v58 = vld [vmem:[%s19487_s25 + $0xa8] sm:$0xff]   ;;  %s682_s30 = scalar_select %p681_p1, %s19494_s26, 1 }
  0x48   : > { %v14749_v55 = vld [vmem:[%s19487_s25 + $0xd8] sm:$0xff]   ;;  %v14750_v56 = vld [vmem:[%s19487_s25 + $0xa0] sm:$0xff]   ;;  %v14753_v59 = vld [vmem:[%s19487_s25 + $0xe8] sm:$0xff]   ;;  %s19499_s0 = smov %s19498_s6 }
  0x49   : > { %13411 = vmatpush3.bf16.msra.mxu0 %v14730_v22  ;;  %v14751_v57 = vld [vmem:[%s19487_s25 + $0xe0] sm:$0xff]   ;;  %v14754_v60 = vld [vmem:[%s19487_s25 + $0xb0] sm:$0xff]   ;;  %v14756_v62 = vld [vmem:[%s19487_s25 + $0xb8] sm:$0xff]   ;;  %s14682_s1 = smul.u32 6, %s682_s30  ;;  %s12809_s30 = sshll.u32 %s19494_s26, 4 }
  0x4a   : > { %13431 = vmatpush3.bf16.msra.mxu1 %v14731_v23  ;;  %13412 = vmatprep.subr.bf16.mxu0 %v15793_v19  ;;  %v14755_v61 = vld [vmem:[%s19487_s25 + $0xf0] sm:$0xff]   ;;  %v14757_v63 = vld [vmem:[%s19487_s25 + $0xf8] sm:$0xff]   ;;  %v14758_v0 = vld [vmem:[%s19487_s25 + $0x100] sm:$0xff]   ;;  %s15796_s26 = smov [#allocation4]  }
  0x4b   : > { %13432 = vmatprep.subr.bf16.mxu1 %v15793_v19  ;;  %v14759_v1 = vld [vmem:[%s19487_s25 + $0x140] sm:$0xff]   ;;  %v14760_v2 = vld [vmem:[%s19487_s25 + $0x108] sm:$0xff]   ;;  %v14762_v4 = vld [vmem:[%s19487_s25 + $0x110] sm:$0xff]   ;;  %s684_s2 = scalar_lea.vmem %s19495_s17, %s14682_s1  ;;  %s679_s17 = sand.u32 1, %s19501_s29  }
  0x4c   : > { %v14761_v3 = vld [vmem:[%s19487_s25 + $0x148] sm:$0xff]   ;;  %v14763_v5 = vld [vmem:[%s19487_s25 + $0x150] sm:$0xff]   ;;  %v14764_v6 = vld [vmem:[%s19487_s25 + $0x118] sm:$0xff]   ;;  %s680_s7 = scalar_lea.vmem [#allocation4], %s679_s17  ;;  %s11455_s29 = scalar_lea.sflag [#allocation5], %s679_s17 }
  0x4d   : > { %13413 = vmatpush3.bf16.msra.mxu0 %v14732_v28  ;;  %v14765_v7 = vld [vmem:[%s19487_s25 + $0x158] sm:$0xff]   ;;  %v14766_v8 = vld [vmem:[%s19487_s25 + $0x120] sm:$0xff]   ;;  %v14768_v10 = vld [vmem:[%s19487_s25 + $0x128] sm:$0xff]   ;;  %s11467_s5 = sshll.u32 %s680_s7, 4  ;;  %s15730_s4 = sshll.u32 %s15796_s26, 4  ;;  %s19370_s5 = int_to_ptr.vmem [resolvable:$true] %s11467_s5  ;;  %s15731_s4 = int_to_ptr.vmem [resolvable:$false] %s15730_s4 }
  0x4e   : > { %13433 = vmatpush3.bf16.msra.mxu1 %v14733_v29  ;;  %13414 = vmatprep.subr.bf16.mxu0 %v15793_v19  ;;  %v14767_v9 = vld [vmem:[%s19487_s25 + $0x160] sm:$0xff]   ;;  %v14769_v11 = vld [vmem:[%s19487_s25 + $0x168] sm:$0xff]   ;;  %v14770_v12 = vld [vmem:[%s19487_s25 + $0x130] sm:$0xff]   ;;  %p15733_p5 = scmp.lt.s32.totalorder %s19370_s5, %s15731_s4 }
  0x4f   : > { %13434 = vmatprep.subr.bf16.mxu1 %v15793_v19  ;;  %v14771_v13 = vld [vmem:[%s19487_s25 + $0x170] sm:$0xff]   ;;  %v14772_v14 = vld [vmem:[%s19487_s25 + $0x138] sm:$0xff]   ;;  %v14774_v17 = vld [vmem:[%s19487_s25 + $0x180] sm:$0xff]  }
  0x50   : > { %v14773_v15 = vld [vmem:[%s19487_s25 + $0x178] sm:$0xff]   ;;  %v14775_v18 = vld [vmem:[%s19487_s25 + $0x1c0] sm:$0xff]   ;;  %v14776_v20 = vld [vmem:[%s19487_s25 + $0x188] sm:$0xff]  }
  0x51   : > { %13415 = vmatpush3.bf16.msra.mxu0 %v14734_v30  ;;  %v14777_v21 = vld [vmem:[%s19487_s25 + $0x1c8] sm:$0xff]   ;;  %v14778_v22 = vld [vmem:[%s19487_s25 + $0x190] sm:$0xff]  }
  0x52   : > { %13435 = vmatpush3.bf16.msra.mxu1 %v14735_v31  ;;  %13416 = vmatprep.subr.bf16.mxu0 %v15793_v19  ;;  %v14779_v23 = vld [vmem:[%s19487_s25 + $0x1d0] sm:$0xff]   ;;  %v14784_v28 = vld [vmem:[%s19487_s25 + $0x1a8] sm:$0xff]  }
  0x53   : > { %13436 = vmatprep.subr.bf16.mxu1 %v15793_v19  ;;  %v14785_v29 = vld [vmem:[%s19487_s25 + $0x1e8] sm:$0xff]   ;;  %v14786_v30 = vld [vmem:[%s19487_s25 + $0x1b0] sm:$0xff]  }
  0x54   : > { %v14787_v31 = vld [vmem:[%s19487_s25 + $0x1f0] sm:$0xff]  }
  0x55   : > { %13417 = vmatpush3.bf16.msra.mxu0 %v14736_v32  ;;  %v14788_v32 = vld [vmem:[%s19487_s25 + $0x1b8] sm:$0xff]  }
  0x56   : > { %13437 = vmatpush3.bf16.msra.mxu1 %v14737_v33  ;;  %13418 = vmatprep.subr.bf16.mxu0 %v15793_v19  ;;  %v14789_v33 = vld [vmem:[%s19487_s25 + $0x1f8] sm:$0xff]  }
  0x57   : > { %13438 = vmatprep.subr.bf16.mxu1 %v15793_v19 }
  0x59   : > { %13419 = vmatpush3.bf16.msra.mxu0 %v14738_v34  ;;  %v14790_v34 = vld [vmem:[%s19490_s18] sm:$0xff]  }
  0x5a   : > { %13439 = vmatpush3.bf16.msra.mxu1 %v14739_v35  ;;  %13420 = vmatprep.subr.bf16.mxu0 %v15793_v19  ;;  %v14791_v35 = vld [vmem:[%s19490_s18 + $0x40] sm:$0xff]  }
  0x5b   : > { %13440 = vmatprep.subr.bf16.mxu1 %v15793_v19 }
  0x5d   : > { %13421 = vmatpush3.bf16.msra.mxu0 %v14740_v36  ;;  %v14792_v36 = vld [vmem:[%s19490_s18 + $0x8] sm:$0xff]  }
  0x5e   : > { %13441 = vmatpush3.bf16.msra.mxu1 %v14741_v37  ;;  %13446 = vmatprep.subr.bf16.mxu0 %v15793_v19  ;;  %v14793_v37 = vld [vmem:[%s19490_s18 + $0x48] sm:$0xff]  }
  0x5f   : > { %13466 = vmatprep.subr.bf16.mxu1 %v15793_v19 }
  0xd0   : > { %v779_v24 = vpop.xlane.xlu0 %778 }
  0xd1   : > { %v781_v25 = vmul.f32 0.0078125, %v779_v24  ;;  %v14780_v24 = vld [vmem:[%s19487_s25 + $0x198] sm:$0xff]  }
  0xd3   : > { %v782_v26 = vsub.f32 %v16003_v16, %v781_v25  ;;  %v14781_v25 = vld [vmem:[%s19487_s25 + $0x1d8] sm:$0xff]  }
  0xd5   : > { %v783_v27 = vmul.f32 %v782_v26, %v782_v26 }
  0xd7   : > { %784 = vadd.xlane.f32.xlu0 %v783_v27  ;;  %v14783_v27 = vld [vmem:[%s19487_s25 + $0x1e0] sm:$0xff]  }
 0x164   : > { %v785_v38 = vpop.xlane.xlu0 %784 }
 0x165   : > { %v786_v39 = vmul.f32 0.0078125, %v785_v38  ;;  %v14794_v38 = vld [vmem:[%s19490_s18 + $0x10] sm:$0xff]  }
 0x167   : > { %v787_v40 = vadd.f32 1e-05, %v786_v39  ;;  %v14795_v39 = vld [vmem:[%s19490_s18 + $0x50] sm:$0xff]  }
 0x169   : > { %15630 = vrsqrt.f32 %v787_v40  ;;  %v14796_v40 = vld [vmem:[%s19490_s18 + $0x18] sm:$0xff]  }
 0x173   : > { %v15631_v42 = vpop.eup %15630 }
 0x174   : > { %v789_v44 = vmul.f32 %v15631_v42, %v782_v26  ;;  %v14782_v26 = vld [vmem:[%s19487_s25 + $0x1a0] sm:$0xff]  }
 0x175   : > { %v14798_v42 = vld [vmem:[%s19490_s18 + $0x20] sm:$0xff]  }
 0x176   : > { %v796_v45 = vmul.f32 %v11542_v41, %v789_v44  ;;  %v14797_v41 = vld [vmem:[%s19490_s18 + $0x58] sm:$0xff]   ;;  %v14800_v44 = vld [vmem:[%s19490_s18 + $0x28] sm:$0xff]  }
 0x178   : > { %v803_v48 = vadd.f32 %v11543_v43, %v796_v45  ;;  %v14799_v43 = vld [vmem:[%s19490_s18 + $0x60] sm:$0xff]   ;;  %v14801_v45 = vld [vmem:[%s19490_s18 + $0x68] sm:$0xff]  }
 0x17a   : > { %v16089_v49 = vpack.c.bf16 %v803_v48, %v803_v48  ;;  %v14804_v48 = vld [vmem:[%s19490_s18 + $0x38] sm:$0xff]  }
 0x17c   : > { %13423 = vmatmul.mubr.bf16.vlgmr.msra.gmra.mrb[0].mxu0 %v16089_v49  ;;  %13443 = vmatmul.mubr.bf16.vlgmr.msra.gmra.mrb[0].mxu1 %v16089_v49 }
 0x17d   : > { %13447 = vmatpush3.bf16.msra.mxu0 %v14742_v46  ;;  %13467 = vmatpush3.bf16.msra.mxu1 %v14743_v47  ;;  %v14802_v46 = vld [vmem:[%s19490_s18 + $0x30] sm:$0xff]  }
 0x17e   : > { %13448 = vmatprep.subr.bf16.mxu0 %v15793_v19  ;;  %13468 = vmatprep.subr.bf16.mxu1 %v15793_v19  ;;  %v14803_v47 = vld [vmem:[%s19490_s18 + $0x70] sm:$0xff]  }
 0x17f   : > { %13462 = vmatprep.mubr.msk.bf16.mxu0 %vm15794_vm7, %v15793_v19  ;;  %13482 = vmatprep.mubr.msk.bf16.mxu1 %vm15794_vm7, %v15793_v19 }
 0x181   : > { %13449 = vmatpush3.bf16.msra.mxu0 %v14744_v50  ;;  %13469 = vmatpush3.bf16.msra.mxu1 %v14745_v51  ;;  %v14805_v50 = vld [vmem:[%s19490_s18 + $0x78] sm:$0xff]   ;;  %v14806_v51 = vld [vmem:[%s19490_s18 + $0x80] sm:$0xff]  }
 0x182   : > { %13450 = vmatprep.subr.bf16.mxu0 %v15793_v19  ;;  %13470 = vmatprep.subr.bf16.mxu1 %v15793_v19 }
 0x185   : > { %13451 = vmatpush3.bf16.msra.mxu0 %v14746_v52  ;;  %13471 = vmatpush3.bf16.msra.mxu1 %v14747_v53  ;;  %v14807_v52 = vld [vmem:[%s19490_s18 + $0xc0] sm:$0xff]   ;;  %v14808_v53 = vld [vmem:[%s19490_s18 + $0x88] sm:$0xff]  }
 0x186   : > { %13452 = vmatprep.subr.bf16.mxu0 %v15793_v19  ;;  %13472 = vmatprep.subr.bf16.mxu1 %v15793_v19 }
 0x189   : > { %13453 = vmatpush3.bf16.msra.mxu0 %v14748_v54  ;;  %13473 = vmatpush3.bf16.msra.mxu1 %v14749_v55  ;;  %v14809_v54 = vld [vmem:[%s19490_s18 + $0xc8] sm:$0xff]   ;;  %v14810_v55 = vld [vmem:[%s19490_s18 + $0x90] sm:$0xff]  }
 0x18a   : > { %13454 = vmatprep.subr.bf16.mxu0 %v15793_v19  ;;  %13474 = vmatprep.subr.bf16.mxu1 %v15793_v19 }
 0x18d   : > { %13455 = vmatpush3.bf16.msra.mxu0 %v14750_v56  ;;  %13475 = vmatpush3.bf16.msra.mxu1 %v14751_v57  ;;  %v14811_v56 = vld [vmem:[%s19490_s18 + $0xd0] sm:$0xff]   ;;  %v14812_v57 = vld [vmem:[%s19490_s18 + $0x98] sm:$0xff]  }
 0x18e   : > { %13456 = vmatprep.subr.bf16.mxu0 %v15793_v19  ;;  %13476 = vmatprep.subr.bf16.mxu1 %v15793_v19 }
 0x191   : > { %13457 = vmatpush3.bf16.msra.mxu0 %v14752_v58  ;;  %13477 = vmatpush3.bf16.msra.mxu1 %v14753_v59  ;;  %v14813_v58 = vld [vmem:[%s19490_s18 + $0xd8] sm:$0xff]   ;;  %v14814_v59 = vld [vmem:[%s19490_s18 + $0xa0] sm:$0xff]  }
 0x192   : > { %13458 = vmatprep.subr.bf16.mxu0 %v15793_v19  ;;  %13478 = vmatprep.subr.bf16.mxu1 %v15793_v19 }
 0x195   : > { %13459 = vmatpush3.bf16.msra.mxu0 %v14754_v60  ;;  %13479 = vmatpush3.bf16.msra.mxu1 %v14755_v61  ;;  %v14815_v60 = vld [vmem:[%s19490_s18 + $0xe0] sm:$0xff]   ;;  %v14816_v61 = vld [vmem:[%s19490_s18 + $0xa8] sm:$0xff]  }
 0x196   : > { %13460 = vmatprep.subr.bf16.mxu0 %v15793_v19  ;;  %13480 = vmatprep.subr.bf16.mxu1 %v15793_v19 }
 0x199   : > { %13461 = vmatpush3.bf16.msra.mxu0 %v14756_v62  ;;  %13481 = vmatpush3.bf16.msra.mxu1 %v14757_v63  ;;  %v14817_v62 = vld [vmem:[%s19490_s18 + $0xe8] sm:$0xff]   ;;  %v14818_v63 = vld [vmem:[%s19490_s18 + $0xb0] sm:$0xff]  }
 0x19a   : > { %13486 = vmatprep.subr.bf16.mxu0 %v15793_v19  ;;  %13506 = vmatprep.subr.bf16.mxu1 %v15793_v19 }
 0x19c   : > { %13463 = vmatmul.mubr.bf16.vlgmr.msra.gmra.mrb[4].mxu0 %v16089_v49  ;;  %13483 = vmatmul.mubr.bf16.vlgmr.msra.gmra.mrb[4].mxu1 %v16089_v49 }
 0x19d   : > { %13487 = vmatpush3.bf16.msra.mxu0 %v14758_v0  ;;  %13507 = vmatpush3.bf16.msra.mxu1 %v14759_v1  ;;  %v14819_v0 = vld [vmem:[%s19490_s18 + $0xf0] sm:$0xff]   ;;  %v14820_v1 = vld [vmem:[%s19490_s18 + $0xb8] sm:$0xff]  }
 0x19e   : > { %13488 = vmatprep.subr.bf16.mxu0 %v15793_v19  ;;  %13508 = vmatprep.subr.bf16.mxu1 %v15793_v19 }
 0x19f   : > { %13502 = vmatprep.mubr.msk.bf16.mxu0 %vm15794_vm7, %v15793_v19  ;;  %13522 = vmatprep.mubr.msk.bf16.mxu1 %vm15794_vm7, %v15793_v19 }
 0x1a1   : > { %13489 = vmatpush3.bf16.msra.mxu0 %v14760_v2  ;;  %13509 = vmatpush3.bf16.msra.mxu1 %v14761_v3  ;;  %v14821_v2 = vld [vmem:[%s19490_s18 + $0xf8] sm:$0xff]   ;;  %v14822_v3 = vld [vmem:[%s19490_s18 + $0x100] sm:$0xff]  }
 0x1a2   : > { %13490 = vmatprep.subr.bf16.mxu0 %v15793_v19  ;;  %13510 = vmatprep.subr.bf16.mxu1 %v15793_v19 }
 0x1a5   : > { %13491 = vmatpush3.bf16.msra.mxu0 %v14762_v4  ;;  %13511 = vmatpush3.bf16.msra.mxu1 %v14763_v5  ;;  %v14823_v4 = vld [vmem:[%s19490_s18 + $0x140] sm:$0xff]   ;;  %v14824_v5 = vld [vmem:[%s19490_s18 + $0x108] sm:$0xff]  }
 0x1a6   : > { %13492 = vmatprep.subr.bf16.mxu0 %v15793_v19  ;;  %13512 = vmatprep.subr.bf16.mxu1 %v15793_v19 }
 0x1a9   : > { %13493 = vmatpush3.bf16.msra.mxu0 %v14764_v6  ;;  %13513 = vmatpush3.bf16.msra.mxu1 %v14765_v7  ;;  %v14825_v6 = vld [vmem:[%s19490_s18 + $0x148] sm:$0xff]   ;;  %v14826_v7 = vld [vmem:[%s19490_s18 + $0x110] sm:$0xff]  }
 0x1aa   : > { %13494 = vmatprep.subr.bf16.mxu0 %v15793_v19  ;;  %13514 = vmatprep.subr.bf16.mxu1 %v15793_v19 }
 0x1ad   : > { %13495 = vmatpush3.bf16.msra.mxu0 %v14766_v8  ;;  %13515 = vmatpush3.bf16.msra.mxu1 %v14767_v9  ;;  %v14827_v8 = vld [vmem:[%s19490_s18 + $0x150] sm:$0xff]   ;;  %v14828_v9 = vld [vmem:[%s19490_s18 + $0x118] sm:$0xff]  }
 0x1ae   : > { %13496 = vmatprep.subr.bf16.mxu0 %v15793_v19  ;;  %13516 = vmatprep.subr.bf16.mxu1 %v15793_v19 }
 0x1b1   : > { %13497 = vmatpush3.bf16.msra.mxu0 %v14768_v10  ;;  %13517 = vmatpush3.bf16.msra.mxu1 %v14769_v11  ;;  %v14829_v10 = vld [vmem:[%s19490_s18 + $0x158] sm:$0xff]   ;;  %v14830_v11 = vld [vmem:[%s19490_s18 + $0x120] sm:$0xff]  }
 0x1b2   : > { %13498 = vmatprep.subr.bf16.mxu0 %v15793_v19  ;;  %13518 = vmatprep.subr.bf16.mxu1 %v15793_v19 }
 0x1b5   : > { %13499 = vmatpush3.bf16.msra.mxu0 %v14770_v12  ;;  %13519 = vmatpush3.bf16.msra.mxu1 %v14771_v13  ;;  %v14831_v12 = vld [vmem:[%s19490_s18 + $0x160] sm:$0xff]   ;;  %v14832_v13 = vld [vmem:[%s19490_s18 + $0x128] sm:$0xff]  }
 0x1b6   : > { %13500 = vmatprep.subr.bf16.mxu0 %v15793_v19  ;;  %13520 = vmatprep.subr.bf16.mxu1 %v15793_v19 }
 0x1b9   : > { %13501 = vmatpush3.bf16.msra.mxu0 %v14772_v14  ;;  %13521 = vmatpush3.bf16.msra.mxu1 %v14773_v15  ;;  %v14833_v14 = vld [vmem:[%s19490_s18 + $0x168] sm:$0xff]   ;;  %v14834_v15 = vld [vmem:[%s19490_s18 + $0x130] sm:$0xff]  }
 0x1ba   : > { %13526 = vmatprep.subr.bf16.mxu0 %v15793_v19  ;;  %13546 = vmatprep.subr.bf16.mxu1 %v15793_v19 }
 0x1bc   : > { %13503 = vmatmul.mubr.bf16.vlgmr.msra.gmra.mrb[8].mxu0 %v16089_v49  ;;  %13523 = vmatmul.mubr.bf16.vlgmr.msra.gmra.mrb[8].mxu1 %v16089_v49 }
 0x1bd   : > { %13527 = vmatpush3.bf16.msra.mxu0 %v14774_v17  ;;  %13547 = vmatpush3.bf16.msra.mxu1 %v14775_v18  ;;  %v14835_v17 = vld [vmem:[%s19490_s18 + $0x170] sm:$0xff]   ;;  %v14836_v18 = vld [vmem:[%s19490_s18 + $0x138] sm:$0xff]  }
 0x1be   : > { %13528 = vmatprep.subr.bf16.mxu0 %v15793_v19  ;;  %13548 = vmatprep.subr.bf16.mxu1 %v15793_v19 }
 0x1bf   : > { %13542 = vmatprep.mubr.msk.bf16.mxu0 %vm15794_vm7, %v15793_v19  ;;  %13562 = vmatprep.mubr.msk.bf16.mxu1 %vm15794_vm7, %v15793_v19 }
 0x1c1   : > { %13529 = vmatpush3.bf16.msra.mxu0 %v14776_v20  ;;  %13549 = vmatpush3.bf16.msra.mxu1 %v14777_v21  ;;  %v14837_v20 = vld [vmem:[%s19490_s18 + $0x178] sm:$0xff]   ;;  %v14838_v21 = vld [vmem:[%s19490_s18 + $0x180] sm:$0xff]  }
 0x1c2   : > { %13530 = vmatprep.subr.bf16.mxu0 %v15793_v19  ;;  %13550 = vmatprep.subr.bf16.mxu1 %v15793_v19 }
 0x1c5   : > { %13531 = vmatpush3.bf16.msra.mxu0 %v14778_v22  ;;  %13551 = vmatpush3.bf16.msra.mxu1 %v14779_v23  ;;  %v14839_v22 = vld [vmem:[%s19490_s18 + $0x1c0] sm:$0xff]   ;;  %v14840_v23 = vld [vmem:[%s19490_s18 + $0x188] sm:$0xff]  }
 0x1c6   : > { %13532 = vmatprep.subr.bf16.mxu0 %v15793_v19  ;;  %13552 = vmatprep.subr.bf16.mxu1 %v15793_v19 }
 0x1c9   : > { %13533 = vmatpush3.bf16.msra.mxu0 %v14780_v24  ;;  %13553 = vmatpush3.bf16.msra.mxu1 %v14781_v25  ;;  %v14841_v24 = vld [vmem:[%s19490_s18 + $0x1c8] sm:$0xff]   ;;  %v14842_v25 = vld [vmem:[%s19490_s18 + $0x190] sm:$0xff]  }
 0x1ca   : > { %13534 = vmatprep.subr.bf16.mxu0 %v15793_v19  ;;  %13554 = vmatprep.subr.bf16.mxu1 %v15793_v19 }
 0x1cd   : > { %13535 = vmatpush3.bf16.msra.mxu0 %v14782_v26  ;;  %13555 = vmatpush3.bf16.msra.mxu1 %v14783_v27  ;;  %v14843_v26 = vld [vmem:[%s19490_s18 + $0x1d0] sm:$0xff]   ;;  %v14844_v27 = vld [vmem:[%s19490_s18 + $0x198] sm:$0xff]  }
 0x1ce   : > { %13536 = vmatprep.subr.bf16.mxu0 %v15793_v19  ;;  %13556 = vmatprep.subr.bf16.mxu1 %v15793_v19 }
 0x1d1   : > { %13537 = vmatpush3.bf16.msra.mxu0 %v14784_v28  ;;  %13557 = vmatpush3.bf16.msra.mxu1 %v14785_v29  ;;  %v14845_v28 = vld [vmem:[%s19490_s18 + $0x1d8] sm:$0xff]   ;;  %v14846_v29 = vld [vmem:[%s19490_s18 + $0x1a0] sm:$0xff]  }
 0x1d2   : > { %13538 = vmatprep.subr.bf16.mxu0 %v15793_v19  ;;  %13558 = vmatprep.subr.bf16.mxu1 %v15793_v19 }
 0x1d5   : > { %13539 = vmatpush3.bf16.msra.mxu0 %v14786_v30  ;;  %13559 = vmatpush3.bf16.msra.mxu1 %v14787_v31  ;;  %v14847_v30 = vld [vmem:[%s19490_s18 + $0x1e0] sm:$0xff]   ;;  %v14848_v31 = vld [vmem:[%s19490_s18 + $0x1a8] sm:$0xff]  }
 0x1d6   : > { %13540 = vmatprep.subr.bf16.mxu0 %v15793_v19  ;;  %13560 = vmatprep.subr.bf16.mxu1 %v15793_v19 }
 0x1d9   : > { %13541 = vmatpush3.bf16.msra.mxu0 %v14788_v32  ;;  %13561 = vmatpush3.bf16.msra.mxu1 %v14789_v33  ;;  %v14849_v32 = vld [vmem:[%s19490_s18 + $0x1e8] sm:$0xff]  }
 0x1da   : > { %13566 = vmatprep.subr.bf16.mxu0 %v15793_v19  ;;  %13586 = vmatprep.subr.bf16.mxu1 %v15793_v19 }
 0x1dc   : > { %13543 = vmatmul.mubr.bf16.vlgmr.msra.gmra.mrb[12].mxu0 %v16089_v49  ;;  %13563 = vmatmul.mubr.bf16.vlgmr.msra.gmra.mrb[12].mxu1 %v16089_v49 }
 0x1dd   : > { %13567 = vmatpush3.bf16.msra.mxu0 %v14790_v34  ;;  %13587 = vmatpush3.bf16.msra.mxu1 %v14791_v35 }
 0x1de   : > { %13568 = vmatprep.subr.bf16.mxu0 %v15793_v19  ;;  %13588 = vmatprep.subr.bf16.mxu1 %v15793_v19 }
 0x1df   : > { %13582 = vmatprep.mubr.msk.bf16.mxu0 %vm15794_vm7, %v15793_v19  ;;  %13602 = vmatprep.mubr.msk.bf16.mxu1 %vm15794_vm7, %v15793_v19 }
 0x1e1   : > { %13569 = vmatpush3.bf16.msra.mxu0 %v14792_v36  ;;  %13589 = vmatpush3.bf16.msra.mxu1 %v14793_v37 }
 0x1e2   : > { %13570 = vmatprep.subr.bf16.mxu0 %v15793_v19  ;;  %13590 = vmatprep.subr.bf16.mxu1 %v15793_v19 }
 0x1e5   : > { %13571 = vmatpush3.bf16.msra.mxu0 %v14794_v38  ;;  %13591 = vmatpush3.bf16.msra.mxu1 %v14795_v39  ;;  %v14850_v39 = vld [vmem:[%s19490_s18 + $0x1b0] sm:$0xff]  }
 0x1e6   : > { %13572 = vmatprep.subr.bf16.mxu0 %v15793_v19  ;;  %13592 = vmatprep.subr.bf16.mxu1 %v15793_v19 }
 0x1e9   : > { %13573 = vmatpush3.bf16.msra.mxu0 %v14796_v40  ;;  %13593 = vmatpush3.bf16.msra.mxu1 %v14797_v41  ;;  %v14851_v40 = vld [vmem:[%s19490_s18 + $0x1f0] sm:$0xff]  }
 0x1ea   : > { %13574 = vmatprep.subr.bf16.mxu0 %v15793_v19  ;;  %13594 = vmatprep.subr.bf16.mxu1 %v15793_v19 }
 0x1ed   : > { %13575 = vmatpush3.bf16.msra.mxu0 %v14798_v42  ;;  %13595 = vmatpush3.bf16.msra.mxu1 %v14799_v43  ;;  %v14852_v43 = vld [vmem:[%s19490_s18 + $0x1b8] sm:$0xff]  }
 0x1ee   : > { %13576 = vmatprep.subr.bf16.mxu0 %v15793_v19  ;;  %13596 = vmatprep.subr.bf16.mxu1 %v15793_v19 }
 0x1f1   : > { %13577 = vmatpush3.bf16.msra.mxu0 %v14800_v44  ;;  %13597 = vmatpush3.bf16.msra.mxu1 %v14801_v45  ;;  %v14853_v44 = vld [vmem:[%s19490_s18 + $0x1f8] sm:$0xff]   ;;  %v14854_v45 = vld [vmem:[%s19418_s8] sm:$0xff]  }
 0x1f2   : > { %13578 = vmatprep.subr.bf16.mxu0 %v15793_v19  ;;  %13598 = vmatprep.subr.bf16.mxu1 %v15793_v19 }
 0x1f5   : > { %13579 = vmatpush3.bf16.msra.mxu0 %v14802_v46  ;;  %13599 = vmatpush3.bf16.msra.mxu1 %v14803_v47  ;;  %v14855_v46 = vld [vmem:[%s19418_s8 + $0x40] sm:$0xff]   ;;  %v14856_v47 = vld [vmem:[%s19418_s8 + $0x8] sm:$0xff]  }
 0x1f6   : > { %13580 = vmatprep.subr.bf16.mxu0 %v15793_v19  ;;  %13600 = vmatprep.subr.bf16.mxu1 %v15793_v19 }
 0x1f9   : > { %13581 = vmatpush3.bf16.msra.mxu0 %v14804_v48  ;;  %13601 = vmatpush3.bf16.msra.mxu1 %v14805_v50  ;;  %v14857_v48 = vld [vmem:[%s19418_s8 + $0x48] sm:$0xff]   ;;  %v14858_v50 = vld [vmem:[%s19418_s8 + $0x10] sm:$0xff]  }
 0x1fa   : > { %13606 = vmatprep.subr.bf16.mxu0 %v15793_v19  ;;  %13626 = vmatprep.subr.bf16.mxu1 %v15793_v19 }
 0x1fc   : > { %13583 = vmatmul.mubr.bf16.vlgmr.msra.gmra.mrb[16].mxu0 %v16089_v49  ;;  %13603 = vmatmul.mubr.bf16.vlgmr.msra.gmra.mrb[16].mxu1 %v16089_v49 }
 0x1fd   : > { %13607 = vmatpush3.bf16.msra.mxu0 %v14806_v51  ;;  %13627 = vmatpush3.bf16.msra.mxu1 %v14807_v52  ;;  %v14859_v51 = vld [vmem:[%s19418_s8 + $0x50] sm:$0xff]   ;;  %v14860_v52 = vld [vmem:[%s19418_s8 + $0x18] sm:$0xff]  }
 0x1fe   : > { %13608 = vmatprep.subr.bf16.mxu0 %v15793_v19  ;;  %13628 = vmatprep.subr.bf16.mxu1 %v15793_v19 }
 0x1ff   : > { %13622 = vmatprep.mubr.msk.bf16.mxu0 %vm15794_vm7, %v15793_v19  ;;  %13642 = vmatprep.mubr.msk.bf16.mxu1 %vm15794_vm7, %v15793_v19 }
 0x201   : > { %13609 = vmatpush3.bf16.msra.mxu0 %v14808_v53  ;;  %13629 = vmatpush3.bf16.msra.mxu1 %v14809_v54  ;;  %v14861_v53 = vld [vmem:[%s19418_s8 + $0x58] sm:$0xff]   ;;  %v14862_v54 = vld [vmem:[%s19418_s8 + $0x20] sm:$0xff]  }
 0x202   : > { %13610 = vmatprep.subr.bf16.mxu0 %v15793_v19  ;;  %13630 = vmatprep.subr.bf16.mxu1 %v15793_v19 }
 0x205   : > { %13611 = vmatpush3.bf16.msra.mxu0 %v14810_v55  ;;  %13631 = vmatpush3.bf16.msra.mxu1 %v14811_v56  ;;  %v14863_v55 = vld [vmem:[%s19418_s8 + $0x60] sm:$0xff]   ;;  %v14864_v56 = vld [vmem:[%s19418_s8 + $0x28] sm:$0xff]  }
 0x206   : > { %13612 = vmatprep.subr.bf16.mxu0 %v15793_v19  ;;  %13632 = vmatprep.subr.bf16.mxu1 %v15793_v19 }
 0x209   : > { %13613 = vmatpush3.bf16.msra.mxu0 %v14812_v57  ;;  %13633 = vmatpush3.bf16.msra.mxu1 %v14813_v58  ;;  %v14865_v57 = vld [vmem:[%s19418_s8 + $0x68] sm:$0xff]  }
 0x20a   : > { %13614 = vmatprep.subr.bf16.mxu0 %v15793_v19  ;;  %13634 = vmatprep.subr.bf16.mxu1 %v15793_v19 }
 0x20d   : > { %13615 = vmatpush3.bf16.msra.mxu0 %v14814_v59  ;;  %13635 = vmatpush3.bf16.msra.mxu1 %v14815_v60 }
 0x20e   : > { %13616 = vmatprep.subr.bf16.mxu0 %v15793_v19  ;;  %13636 = vmatprep.subr.bf16.mxu1 %v15793_v19 }
 0x211   : > { %13617 = vmatpush3.bf16.msra.mxu0 %v14816_v61  ;;  %13637 = vmatpush3.bf16.msra.mxu1 %v14817_v62 }
 0x212   : > { %13618 = vmatprep.subr.bf16.mxu0 %v15793_v19  ;;  %13638 = vmatprep.subr.bf16.mxu1 %v15793_v19 }
 0x215   : > { %13619 = vmatpush3.bf16.msra.mxu0 %v14818_v63  ;;  %13639 = vmatpush3.bf16.msra.mxu1 %v14819_v0  ;;  %v14866_v0 = vld [vmem:[%s19418_s8 + $0x30] sm:$0xff]  }
 0x216   : > { %13620 = vmatprep.subr.bf16.mxu0 %v15793_v19  ;;  %13640 = vmatprep.subr.bf16.mxu1 %v15793_v19 }
 0x219   : > { %13621 = vmatpush3.bf16.msra.mxu0 %v14820_v1  ;;  %13641 = vmatpush3.bf16.msra.mxu1 %v14821_v2  ;;  %v14867_v1 = vld [vmem:[%s19418_s8 + $0x70] sm:$0xff]  }
 0x21a   : > { %13646 = vmatprep.subr.bf16.mxu0 %v15793_v19  ;;  %13666 = vmatprep.subr.bf16.mxu1 %v15793_v19 }
 0x21c   : > { %13623 = vmatmul.mubr.bf16.vlgmr.msra.gmra.mrb[20].mxu0 %v16089_v49  ;;  %13643 = vmatmul.mubr.bf16.vlgmr.msra.gmra.mrb[20].mxu1 %v16089_v49 }
 0x21d   : > { %13647 = vmatpush3.bf16.msra.mxu0 %v14822_v3  ;;  %13667 = vmatpush3.bf16.msra.mxu1 %v14823_v4  ;;  %v14868_v4 = vld [vmem:[%s19418_s8 + $0x38] sm:$0xff]  }
 0x21e   : > { %13648 = vmatprep.subr.bf16.mxu0 %v15793_v19  ;;  %13668 = vmatprep.subr.bf16.mxu1 %v15793_v19 }
 0x21f   : > { %13662 = vmatprep.mubr.msk.bf16.mxu0 %vm15794_vm7, %v15793_v19  ;;  %13682 = vmatprep.mubr.msk.bf16.mxu1 %vm15794_vm7, %v15793_v19 }
 0x221   : > { %13649 = vmatpush3.bf16.msra.mxu0 %v14824_v5  ;;  %13669 = vmatpush3.bf16.msra.mxu1 %v14825_v6  ;;  %v14869_v5 = vld [vmem:[%s19418_s8 + $0x78] sm:$0xff]   ;;  %v14870_v6 = vld [vmem:[%s19418_s8 + $0x80] sm:$0xff]  }
 0x222   : > { %13650 = vmatprep.subr.bf16.mxu0 %v15793_v19  ;;  %13670 = vmatprep.subr.bf16.mxu1 %v15793_v19 }
 0x225   : > { %13651 = vmatpush3.bf16.msra.mxu0 %v14826_v7  ;;  %13671 = vmatpush3.bf16.msra.mxu1 %v14827_v8  ;;  %v14871_v7 = vld [vmem:[%s19418_s8 + $0xc0] sm:$0xff]   ;;  %v14872_v8 = vld [vmem:[%s19418_s8 + $0x88] sm:$0xff]  }
 0x226   : > { %13652 = vmatprep.subr.bf16.mxu0 %v15793_v19  ;;  %13672 = vmatprep.subr.bf16.mxu1 %v15793_v19 }
 0x229   : > { %13653 = vmatpush3.bf16.msra.mxu0 %v14828_v9  ;;  %13673 = vmatpush3.bf16.msra.mxu1 %v14829_v10  ;;  %v14873_v9 = vld [vmem:[%s19418_s8 + $0xc8] sm:$0xff]   ;;  %v14874_v10 = vld [vmem:[%s19418_s8 + $0x90] sm:$0xff]  }
 0x22a   : > { %13654 = vmatprep.subr.bf16.mxu0 %v15793_v19  ;;  %13674 = vmatprep.subr.bf16.mxu1 %v15793_v19 }
 0x22d   : > { %13655 = vmatpush3.bf16.msra.mxu0 %v14830_v11  ;;  %13675 = vmatpush3.bf16.msra.mxu1 %v14831_v12  ;;  %v14875_v11 = vld [vmem:[%s19418_s8 + $0xd0] sm:$0xff]   ;;  %v14876_v12 = vld [vmem:[%s19418_s8 + $0x98] sm:$0xff]  }
 0x22e   : > { %13656 = vmatprep.subr.bf16.mxu0 %v15793_v19  ;;  %13676 = vmatprep.subr.bf16.mxu1 %v15793_v19 }
 0x231   : > { %13657 = vmatpush3.bf16.msra.mxu0 %v14832_v13  ;;  %13677 = vmatpush3.bf16.msra.mxu1 %v14833_v14  ;;  %v14877_v13 = vld [vmem:[%s19418_s8 + $0xd8] sm:$0xff]   ;;  %v14878_v14 = vld [vmem:[%s19418_s8 + $0xa0] sm:$0xff]  }
 0x232   : > { %13658 = vmatprep.subr.bf16.mxu0 %v15793_v19  ;;  %13678 = vmatprep.subr.bf16.mxu1 %v15793_v19 }
 0x235   : > { %13659 = vmatpush3.bf16.msra.mxu0 %v14834_v15  ;;  %13679 = vmatpush3.bf16.msra.mxu1 %v14835_v17  ;;  %v14879_v15 = vld [vmem:[%s19418_s8 + $0xe0] sm:$0xff]   ;;  %v14880_v17 = vld [vmem:[%s19418_s8 + $0xa8] sm:$0xff]  }
 0x236   : > { %13660 = vmatprep.subr.bf16.mxu0 %v15793_v19  ;;  %13680 = vmatprep.subr.bf16.mxu1 %v15793_v19 }
 0x239   : > { %13661 = vmatpush3.bf16.msra.mxu0 %v14836_v18  ;;  %13681 = vmatpush3.bf16.msra.mxu1 %v14837_v20  ;;  %v14881_v18 = vld [vmem:[%s19418_s8 + $0xe8] sm:$0xff]  }
 0x23a   : > { %13686 = vmatprep.subr.bf16.mxu0 %v15793_v19  ;;  %13706 = vmatprep.subr.bf16.mxu1 %v15793_v19 }
 0x23c   : > { %13663 = vmatmul.mubr.bf16.vlgmr.msra.gmra.mrb[24].mxu0 %v16089_v49  ;;  %13683 = vmatmul.mubr.bf16.vlgmr.msra.gmra.mrb[24].mxu1 %v16089_v49 }
 0x23d   : > { %13687 = vmatpush3.bf16.msra.mxu0 %v14838_v21  ;;  %13707 = vmatpush3.bf16.msra.mxu1 %v14839_v22 }
 0x23e   : > { %13688 = vmatprep.subr.bf16.mxu0 %v15793_v19  ;;  %13708 = vmatprep.subr.bf16.mxu1 %v15793_v19 }
 0x23f   : > { %13702 = vmatprep.mubr.msk.bf16.mxu0 %vm15794_vm7, %v15793_v19  ;;  %13722 = vmatprep.mubr.msk.bf16.mxu1 %vm15794_vm7, %v15793_v19 }
 0x241   : > { %13689 = vmatpush3.bf16.msra.mxu0 %v14840_v23  ;;  %13709 = vmatpush3.bf16.msra.mxu1 %v14841_v24 }
 0x242   : > { %13690 = vmatprep.subr.bf16.mxu0 %v15793_v19  ;;  %13710 = vmatprep.subr.bf16.mxu1 %v15793_v19 }
 0x245   : > { %13691 = vmatpush3.bf16.msra.mxu0 %v14842_v25  ;;  %13711 = vmatpush3.bf16.msra.mxu1 %v14843_v26  ;;  %v14882_v26 = vld [vmem:[%s19418_s8 + $0xb0] sm:$0xff]  }
 0x246   : > { %13692 = vmatprep.subr.bf16.mxu0 %v15793_v19  ;;  %13712 = vmatprep.subr.bf16.mxu1 %v15793_v19 }
 0x249   : > { %13693 = vmatpush3.bf16.msra.mxu0 %v14844_v27  ;;  %13713 = vmatpush3.bf16.msra.mxu1 %v14845_v28  ;;  %v14883_v27 = vld [vmem:[%s19418_s8 + $0xf0] sm:$0xff]  }
 0x24a   : > { %13694 = vmatprep.subr.bf16.mxu0 %v15793_v19  ;;  %13714 = vmatprep.subr.bf16.mxu1 %v15793_v19 }
 0x24d   : > { %13695 = vmatpush3.bf16.msra.mxu0 %v14846_v29  ;;  %13715 = vmatpush3.bf16.msra.mxu1 %v14847_v30  ;;  %v14884_v30 = vld [vmem:[%s19418_s8 + $0xb8] sm:$0xff]  }
 0x24e   : > { %13696 = vmatprep.subr.bf16.mxu0 %v15793_v19  ;;  %13716 = vmatprep.subr.bf16.mxu1 %v15793_v19 }
 0x24f   : > { %v16557_v33 = vpop.f32.mrb[0].mxu0  ;;  %v16559_v34 = vpop.f32.mrb[0].mxu1 }
 0x250   : > { %v13424_v35 = vpop.f32.mrb[1].mxu0  ;;  %v13444_v36 = vpop.f32.mrb[1].mxu1 }
 0x251   : > { %13697 = vmatpush3.bf16.msra.mxu0 %v14848_v31  ;;  %13717 = vmatpush3.bf16.msra.mxu1 %v14849_v32  ;;  %v1018_v37 = vpop.f32.mrb[2].mxu0  ;;  %v1106_v38 = vpop.f32.mrb[2].mxu1  ;;  %v14885_v31 = vld [vmem:[%s19418_s8 + $0xf8] sm:$0xff]   ;;  %v14886_v32 = vld [vmem:[%s19418_s8 + $0x100] sm:$0xff]   ;;  %v14888_v36 = vld [vmem:[%s19418_s8 + $0x108] sm:$0xff]  }
 0x252   : > { %v13425_v41 = vpop.f32.mrb[3].mxu0  ;;  %v13445_v42 = vpop.f32.mrb[3].mxu1  ;;  %13698 = vmatprep.subr.bf16.mxu0 %v15793_v19  ;;  %13718 = vmatprep.subr.bf16.mxu1 %v15793_v19  ;;  %v14887_v35 = vld [vmem:[%s19418_s8 + $0x140] sm:$0xff]   ;;  %v14889_v37 = vld [vmem:[%s19418_s8 + $0x148] sm:$0xff]   ;;  %v14890_v38 = vld [vmem:[%s19418_s8 + $0x110] sm:$0xff]  }
 0x253   : > { %v14893_v41 = vld [vmem:[%s19418_s8 + $0x158] sm:$0xff]   ;;  %v14894_v42 = vld [vmem:[%s19418_s8 + $0x120] sm:$0xff]  }
 0x255   : > { %13699 = vmatpush3.bf16.msra.mxu0 %v14850_v39  ;;  %13719 = vmatpush3.bf16.msra.mxu1 %v14851_v40  ;;  %v14891_v39 = vld [vmem:[%s19418_s8 + $0x150] sm:$0xff]   ;;  %v14892_v40 = vld [vmem:[%s19418_s8 + $0x118] sm:$0xff]  }
 0x256   : > { %13700 = vmatprep.subr.bf16.mxu0 %v15793_v19  ;;  %13720 = vmatprep.subr.bf16.mxu1 %v15793_v19 }
 0x259   : > { %13701 = vmatpush3.bf16.msra.mxu0 %v14852_v43  ;;  %13721 = vmatpush3.bf16.msra.mxu1 %v14853_v44  ;;  %v14895_v43 = vld [vmem:[%s19418_s8 + $0x160] sm:$0xff]   ;;  %v14896_v44 = vld [vmem:[%s19418_s8 + $0x128] sm:$0xff]  }
 0x25a   : > { %13726 = vmatprep.subr.bf16.mxu0 %v15793_v19  ;;  %13746 = vmatprep.subr.bf16.mxu1 %v15793_v19 }
 0x25c   : > { %13703 = vmatmul.mubr.bf16.vlgmr.msra.gmra.mrb[28].mxu0 %v16089_v49  ;;  %13723 = vmatmul.mubr.bf16.vlgmr.msra.gmra.mrb[28].mxu1 %v16089_v49 }
 0x25d   : > { %13727 = vmatpush3.bf16.msra.mxu0 %v14854_v45  ;;  %13747 = vmatpush3.bf16.msra.mxu1 %v14855_v46  ;;  %v14897_v45 = vld [vmem:[%s19418_s8 + $0x168] sm:$0xff]  }
 0x25e   : > { %13728 = vmatprep.subr.bf16.mxu0 %v15793_v19  ;;  %13748 = vmatprep.subr.bf16.mxu1 %v15793_v19 }
 0x25f   : > { %13742 = vmatprep.mubr.msk.bf16.mxu0 %vm15794_vm7, %v15793_v19  ;;  %13762 = vmatprep.mubr.msk.bf16.mxu1 %vm15794_vm7, %v15793_v19 }
 0x261   : > { %13729 = vmatpush3.bf16.msra.mxu0 %v14856_v47  ;;  %13749 = vmatpush3.bf16.msra.mxu1 %v14857_v48 }
 0x262   : > { %13730 = vmatprep.subr.bf16.mxu0 %v15793_v19  ;;  %13750 = vmatprep.subr.bf16.mxu1 %v15793_v19 }
 0x265   : > { %13731 = vmatpush3.bf16.msra.mxu0 %v14858_v50  ;;  %13751 = vmatpush3.bf16.msra.mxu1 %v14859_v51 }
 0x266   : > { %13732 = vmatprep.subr.bf16.mxu0 %v15793_v19  ;;  %13752 = vmatprep.subr.bf16.mxu1 %v15793_v19 }
 0x269   : > { %13733 = vmatpush3.bf16.msra.mxu0 %v14860_v52  ;;  %13753 = vmatpush3.bf16.msra.mxu1 %v14861_v53  ;;  %v14898_v53 = vld [vmem:[%s19418_s8 + $0x130] sm:$0xff]  }
 0x26a   : > { %13734 = vmatprep.subr.bf16.mxu0 %v15793_v19  ;;  %13754 = vmatprep.subr.bf16.mxu1 %v15793_v19 }
 0x26d   : > { %13735 = vmatpush3.bf16.msra.mxu0 %v14862_v54  ;;  %13755 = vmatpush3.bf16.msra.mxu1 %v14863_v55  ;;  %v14899_v54 = vld [vmem:[%s19418_s8 + $0x170] sm:$0xff]  }
 0x26e   : > { %13736 = vmatprep.subr.bf16.mxu0 %v15793_v19  ;;  %13756 = vmatprep.subr.bf16.mxu1 %v15793_v19 }
 0x26f   : > { %v16631_v58 = vpop.f32.mrb[4].mxu0  ;;  %v16633_v59 = vpop.f32.mrb[4].mxu1 }
 0x270   : > { %v13464_v60 = vpop.f32.mrb[5].mxu0  ;;  %v13484_v61 = vpop.f32.mrb[5].mxu1 }
 0x271   : > { %v1194_v62 = vpop.f32.mrb[6].mxu0  ;;  %v1282_v63 = vpop.f32.mrb[6].mxu1  ;;  %13737 = vmatpush3.bf16.msra.mxu0 %v14864_v56  ;;  %13757 = vmatpush3.bf16.msra.mxu1 %v14865_v57  ;;  %v14900_v57 = vld [vmem:[%s19418_s8 + $0x138] sm:$0xff]   ;;  %v14902_v61 = vld [vmem:[%s19418_s8 + $0x180] sm:$0xff]  }
 0x272   : > { %v13465_v2 = vpop.f32.mrb[7].mxu0  ;;  %v13485_v3 = vpop.f32.mrb[7].mxu1  ;;  %13738 = vmatprep.subr.bf16.mxu0 %v15793_v19  ;;  %13758 = vmatprep.subr.bf16.mxu1 %v15793_v19  ;;  %v14901_v60 = vld [vmem:[%s19418_s8 + $0x178] sm:$0xff]   ;;  %v14903_v62 = vld [vmem:[%s19418_s8 + $0x1c0] sm:$0xff]   ;;  %v14904_v63 = vld [vmem:[%s19418_s8 + $0x188] sm:$0xff]  }
 0x273   : > { %v14907_v2 = vld [vmem:[%s19418_s8 + $0x1d0] sm:$0xff]   ;;  %v14908_v3 = vld [vmem:[%s19418_s8 + $0x198] sm:$0xff]  }
 0x275   : > { %13739 = vmatpush3.bf16.msra.mxu0 %v14866_v0  ;;  %13759 = vmatpush3.bf16.msra.mxu1 %v14867_v1  ;;  %v14905_v0 = vld [vmem:[%s19418_s8 + $0x1c8] sm:$0xff]   ;;  %v14906_v1 = vld [vmem:[%s19418_s8 + $0x190] sm:$0xff]  }
 0x276   : > { %13740 = vmatprep.subr.bf16.mxu0 %v15793_v19  ;;  %13760 = vmatprep.subr.bf16.mxu1 %v15793_v19 }
 0x279   : > { %13741 = vmatpush3.bf16.msra.mxu0 %v14868_v4  ;;  %13761 = vmatpush3.bf16.msra.mxu1 %v14869_v5  ;;  %v14909_v4 = vld [vmem:[%s19418_s8 + $0x1d8] sm:$0xff]   ;;  %v14910_v5 = vld [vmem:[%s19418_s8 + $0x1a0] sm:$0xff]  }
 0x27a   : > { %13766 = vmatprep.subr.bf16.mxu0 %v15793_v19  ;;  %13786 = vmatprep.subr.bf16.mxu1 %v15793_v19 }
 0x27c   : > { %13743 = vmatmul.mubr.bf16.vlgmr.msra.gmra.mrb[32].mxu0 %v16089_v49  ;;  %13763 = vmatmul.mubr.bf16.vlgmr.msra.gmra.mrb[32].mxu1 %v16089_v49 }
 0x27d   : > { %13767 = vmatpush3.bf16.msra.mxu0 %v14870_v6  ;;  %13787 = vmatpush3.bf16.msra.mxu1 %v14871_v7  ;;  %v14911_v6 = vld [vmem:[%s19418_s8 + $0x1e0] sm:$0xff]   ;;  %v14912_v7 = vld [vmem:[%s19418_s8 + $0x1a8] sm:$0xff]  }
 0x27e   : > { %13768 = vmatprep.subr.bf16.mxu0 %v15793_v19  ;;  %13788 = vmatprep.subr.bf16.mxu1 %v15793_v19 }
 0x27f   : > { %13782 = vmatprep.mubr.msk.bf16.mxu0 %vm15794_vm7, %v15793_v19  ;;  %13802 = vmatprep.mubr.msk.bf16.mxu1 %vm15794_vm7, %v15793_v19 }
 0x281   : > { %13769 = vmatpush3.bf16.msra.mxu0 %v14872_v8  ;;  %13789 = vmatpush3.bf16.msra.mxu1 %v14873_v9  ;;  %v14913_v8 = vld [vmem:[%s19418_s8 + $0x1e8] sm:$0xff]  }
 0x282   : > { %13770 = vmatprep.subr.bf16.mxu0 %v15793_v19  ;;  %13790 = vmatprep.subr.bf16.mxu1 %v15793_v19 }
 0x285   : > { %13771 = vmatpush3.bf16.msra.mxu0 %v14874_v10  ;;  %13791 = vmatpush3.bf16.msra.mxu1 %v14875_v11 }
 0x286   : > { %13772 = vmatprep.subr.bf16.mxu0 %v15793_v19  ;;  %13792 = vmatprep.subr.bf16.mxu1 %v15793_v19 }
 0x289   : > { %13773 = vmatpush3.bf16.msra.mxu0 %v14876_v12  ;;  %13793 = vmatpush3.bf16.msra.mxu1 %v14877_v13 }
 0x28a   : > { %13774 = vmatprep.subr.bf16.mxu0 %v15793_v19  ;;  %13794 = vmatprep.subr.bf16.mxu1 %v15793_v19 }
 0x28d   : > { %13775 = vmatpush3.bf16.msra.mxu0 %v14878_v14  ;;  %13795 = vmatpush3.bf16.msra.mxu1 %v14879_v15  ;;  %v14914_v15 = vld [vmem:[%s19418_s8 + $0x1b0] sm:$0xff]  }
 0x28e   : > { %13776 = vmatprep.subr.bf16.mxu0 %v15793_v19  ;;  %13796 = vmatprep.subr.bf16.mxu1 %v15793_v19 }
 0x28f   : > { %v16705_v20 = vpop.f32.mrb[8].mxu0  ;;  %v16707_v21 = vpop.f32.mrb[8].mxu1 }
 0x290   : > { %v13504_v22 = vpop.f32.mrb[9].mxu0  ;;  %v13524_v23 = vpop.f32.mrb[9].mxu1 }
 0x291   : > { %v1370_v24 = vpop.f32.mrb[10].mxu0  ;;  %v1458_v25 = vpop.f32.mrb[10].mxu1  ;;  %13777 = vmatpush3.bf16.msra.mxu0 %v14880_v17  ;;  %13797 = vmatpush3.bf16.msra.mxu1 %v14881_v18  ;;  %v14915_v17 = vld [vmem:[%s19418_s8 + $0x1f0] sm:$0xff]   ;;  %v14916_v23 = vld [vmem:[%s19418_s8 + $0x1b8] sm:$0xff]  }
 0x292   : > { %v13505_v28 = vpop.f32.mrb[11].mxu0  ;;  %v13525_v29 = vpop.f32.mrb[11].mxu1  ;;  %13778 = vmatprep.subr.bf16.mxu0 %v15793_v19  ;;  %13798 = vmatprep.subr.bf16.mxu1 %v15793_v19  ;;  %v14917_v24 = vld [vmem:[%s19418_s8 + $0x1f8] sm:$0xff]  }
 0x293   : > { %v3302_v29 = vpack.c.bf16 %v16559_v34, %v16559_v34 }
 0x295   : > { %13779 = vmatpush3.bf16.msra.mxu0 %v14882_v26  ;;  %13799 = vmatpush3.bf16.msra.mxu1 %v14883_v27 }
 0x296   : > { %13780 = vmatprep.subr.bf16.mxu0 %v15793_v19  ;;  %13800 = vmatprep.subr.bf16.mxu1 %v15793_v19 }
 0x299   : > { %13781 = vmatpush3.bf16.msra.mxu0 %v14884_v30  ;;  %13801 = vmatpush3.bf16.msra.mxu1 %v14885_v31 }
 0x29a   : > { %13806 = vmatprep.subr.bf16.mxu0 %v15793_v19  ;;  %13826 = vmatprep.subr.bf16.mxu1 %v15793_v19 }
 0x29c   : > { %13783 = vmatmul.mubr.bf16.vlgmr.msra.gmra.mrb[36].mxu0 %v16089_v49  ;;  %13803 = vmatmul.mubr.bf16.vlgmr.msra.gmra.mrb[36].mxu1 %v16089_v49 }
 0x29d   : > { %13807 = vmatpush3.bf16.msra.mxu0 %v14886_v32  ;;  %13827 = vmatpush3.bf16.msra.mxu1 %v14887_v35 }
 0x29e   : > { %13808 = vmatprep.subr.bf16.mxu0 %v15793_v19  ;;  %13828 = vmatprep.subr.bf16.mxu1 %v15793_v19 }
 0x29f   : > { %13822 = vmatprep.mubr.msk.bf16.mxu0 %vm15794_vm7, %v15793_v19  ;;  %13842 = vmatprep.mubr.msk.bf16.mxu1 %vm15794_vm7, %v15793_v19 }
 0x2a1   : > { %13809 = vmatpush3.bf16.msra.mxu0 %v14888_v36  ;;  %13829 = vmatpush3.bf16.msra.mxu1 %v14889_v37 }
 0x2a2   : > { %13810 = vmatprep.subr.bf16.mxu0 %v15793_v19  ;;  %13830 = vmatprep.subr.bf16.mxu1 %v15793_v19 }
 0x2a5   : > { %13811 = vmatpush3.bf16.msra.mxu0 %v14890_v38  ;;  %13831 = vmatpush3.bf16.msra.mxu1 %v14891_v39 }
 0x2a6   : > { %13812 = vmatprep.subr.bf16.mxu0 %v15793_v19  ;;  %13832 = vmatprep.subr.bf16.mxu1 %v15793_v19 }
 0x2a9   : > { %13813 = vmatpush3.bf16.msra.mxu0 %v14892_v40  ;;  %13833 = vmatpush3.bf16.msra.mxu1 %v14893_v41 }
 0x2aa   : > { %13814 = vmatprep.subr.bf16.mxu0 %v15793_v19  ;;  %13834 = vmatprep.subr.bf16.mxu1 %v15793_v19 }
 0x2ad   : > { %13815 = vmatpush3.bf16.msra.mxu0 %v14894_v42  ;;  %13835 = vmatpush3.bf16.msra.mxu1 %v14895_v43  ;;  %v3303_v42 = vpack.c.bf16 %v16631_v58, %v16631_v58  ;;  %v3304_v43 = vpack.c.bf16 %v16633_v59, %v16633_v59 }
 0x2ae   : > { %13816 = vmatprep.subr.bf16.mxu0 %v15793_v19  ;;  %13836 = vmatprep.subr.bf16.mxu1 %v15793_v19 }
 0x2af   : > { %v16779_v46 = vpop.f32.mrb[12].mxu0  ;;  %v16781_v47 = vpop.f32.mrb[12].mxu1 }
 0x2b0   : > { %v13544_v48 = vpop.f32.mrb[13].mxu0  ;;  %v13564_v50 = vpop.f32.mrb[13].mxu1 }
 0x2b1   : > { %v1546_v51 = vpop.f32.mrb[14].mxu0  ;;  %v1634_v52 = vpop.f32.mrb[14].mxu1  ;;  %13817 = vmatpush3.bf16.msra.mxu0 %v14896_v44  ;;  %13837 = vmatpush3.bf16.msra.mxu1 %v14897_v45 }
 0x2b2   : > { %v13545_v55 = vpop.f32.mrb[15].mxu0  ;;  %v13565_v56 = vpop.f32.mrb[15].mxu1  ;;  %13818 = vmatprep.subr.bf16.mxu0 %v15793_v19  ;;  %13838 = vmatprep.subr.bf16.mxu1 %v15793_v19 }
 0x2b5   : > { %13819 = vmatpush3.bf16.msra.mxu0 %v14898_v53  ;;  %13839 = vmatpush3.bf16.msra.mxu1 %v14899_v54 }
 0x2b6   : > { %13820 = vmatprep.subr.bf16.mxu0 %v15793_v19  ;;  %13840 = vmatprep.subr.bf16.mxu1 %v15793_v19 }
 0x2b9   : > { %13821 = vmatpush3.bf16.msra.mxu0 %v14900_v57  ;;  %13841 = vmatpush3.bf16.msra.mxu1 %v14901_v60  ;;  %v3305_v57 = vpack.c.bf16 %v16705_v20, %v16705_v20  ;;  %v3306_v60 = vpack.c.bf16 %v16707_v21, %v16707_v21 }
 0x2ba   : > { %13846 = vmatprep.subr.bf16.mxu0 %v15793_v19  ;;  %13866 = vmatprep.subr.bf16.mxu1 %v15793_v19 }
 0x2bc   : > { %13823 = vmatmul.mubr.bf16.vlgmr.msra.gmra.mrb[40].mxu0 %v16089_v49  ;;  %13843 = vmatmul.mubr.bf16.vlgmr.msra.gmra.mrb[40].mxu1 %v16089_v49 }
 0x2bd   : > { %13847 = vmatpush3.bf16.msra.mxu0 %v14902_v61  ;;  %13867 = vmatpush3.bf16.msra.mxu1 %v14903_v62 }
 0x2be   : > { %13848 = vmatprep.subr.bf16.mxu0 %v15793_v19  ;;  %13868 = vmatprep.subr.bf16.mxu1 %v15793_v19 }
 0x2bf   : > { %13862 = vmatprep.mubr.msk.bf16.mxu0 %vm15794_vm7, %v15793_v19  ;;  %13882 = vmatprep.mubr.msk.bf16.mxu1 %vm15794_vm7, %v15793_v19 }
 0x2c1   : > { %13849 = vmatpush3.bf16.msra.mxu0 %v14904_v63  ;;  %13869 = vmatpush3.bf16.msra.mxu1 %v14905_v0 }
 0x2c2   : > { %13850 = vmatprep.subr.bf16.mxu0 %v15793_v19  ;;  %13870 = vmatprep.subr.bf16.mxu1 %v15793_v19 }
 0x2c5   : > { %13851 = vmatpush3.bf16.msra.mxu0 %v14906_v1  ;;  %13871 = vmatpush3.bf16.msra.mxu1 %v14907_v2 }
 0x2c6   : > { %13852 = vmatprep.subr.bf16.mxu0 %v15793_v19  ;;  %13872 = vmatprep.subr.bf16.mxu1 %v15793_v19 }
 0x2c9   : > { %13853 = vmatpush3.bf16.msra.mxu0 %v14908_v3  ;;  %13873 = vmatpush3.bf16.msra.mxu1 %v14909_v4 }
 0x2ca   : > { %13854 = vmatprep.subr.bf16.mxu0 %v15793_v19  ;;  %13874 = vmatprep.subr.bf16.mxu1 %v15793_v19 }
 0x2cd   : > { %13855 = vmatpush3.bf16.msra.mxu0 %v14910_v5  ;;  %13875 = vmatpush3.bf16.msra.mxu1 %v14911_v6 }
 0x2ce   : > { %13856 = vmatprep.subr.bf16.mxu0 %v15793_v19  ;;  %13876 = vmatprep.subr.bf16.mxu1 %v15793_v19 }
 0x2cf   : > { %v1847_v9 = vpop.f32.mrb[16].mxu0  ;;  %v1935_v10 = vpop.f32.mrb[16].mxu1 }
 0x2d0   : > { %v13584_v11 = vpop.f32.mrb[17].mxu0  ;;  %v13604_v12 = vpop.f32.mrb[17].mxu1  ;;  %v3309_v25 = vpack.c.bf16 %v1847_v9, %v1847_v9  ;;  %v3310_v26 = vpack.c.bf16 %v1935_v10, %v1935_v10 }
 0x2d1   : > { %v1850_v13 = vpop.f32.mrb[18].mxu0  ;;  %v1938_v14 = vpop.f32.mrb[18].mxu1  ;;  %13857 = vmatpush3.bf16.msra.mxu0 %v14912_v7  ;;  %13877 = vmatpush3.bf16.msra.mxu1 %v14913_v8  ;;  %v3307_v7 = vpack.c.bf16 %v16779_v46, %v16779_v46  ;;  %v3308_v8 = vpack.c.bf16 %v16781_v47, %v16781_v47 }
 0x2d2   : > { %v13585_v18 = vpop.f32.mrb[19].mxu0  ;;  %v13605_v22 = vpop.f32.mrb[19].mxu1  ;;  %13858 = vmatprep.subr.bf16.mxu0 %v15793_v19  ;;  %13878 = vmatprep.subr.bf16.mxu1 %v15793_v19  ;;  %v3322_v27 = vsel %vm3317_vm8, %v3309_v25, 0  ;;  %v3368_v28 = vsel %vm3317_vm8, %v3310_v26, 0 }
 0x2d5   : > { %13859 = vmatpush3.bf16.msra.mxu0 %v14914_v15  ;;  %13879 = vmatpush3.bf16.msra.mxu1 %v14915_v17 }
 0x2d6   : > { %13860 = vmatprep.subr.bf16.mxu0 %v15793_v19  ;;  %13880 = vmatprep.subr.bf16.mxu1 %v15793_v19 }
 0x2d9   : > { %13861 = vmatpush3.bf16.msra.mxu0 %v14916_v23  ;;  %13881 = vmatpush3.bf16.msra.mxu1 %v14917_v24 }
 0x2da   : > { %13886 = vmatprep.subr.bf16.mxu0 %v15793_v19  ;;  %13892 = vmatprep.subr.bf16.mxu1 %v15793_v19 }
 0x2dc   : > { %13863 = vmatmul.mubr.bf16.vlgmr.msra.gmra.mrb[44].mxu0 %v16089_v49  ;;  %13883 = vmatmul.mubr.bf16.vlgmr.msra.gmra.mrb[44].mxu1 %v16089_v49  ;;  %v3301_v49 = vpack.c.bf16 %v16557_v33, %v16557_v33 }
 0x2dd   : > { %13888 = vmatprep.mubr.msk.bf16.mxu0 %vm15794_vm7, %v15793_v19  ;;  %13894 = vmatprep.mubr.msk.bf16.mxu1 %vm15794_vm7, %v15793_v19 }
 0x2e2   : > { %13887 = vmatpush3.bf16.xpose.msra.mxu0 %v3322_v27  ;;  %13893 = vmatpush3.bf16.xpose.msra.mxu1 %v3368_v28 }
 0x2e3   : > { %13898 = vmatprep.subr.bf16.mxu0 %v15793_v19  ;;  %13904 = vmatprep.subr.bf16.mxu1 %v15793_v19 }
 0x2e9   : > { %13889 = vmatmul.mubr.msk.bf16.vlgmr.msra.gmra.mrb[48].mxu0 %vm3317_vm8, %v3301_v49  ;;  %13895 = vmatmul.mubr.msk.bf16.vlgmr.msra.gmra.mrb[48].mxu1 %vm3317_vm8, %v3302_v29 }
 0x2ea   : > { %13900 = vmatprep.mubr.msk.bf16.mxu0 %vm15794_vm7, %v15793_v19  ;;  %13906 = vmatprep.mubr.msk.bf16.mxu1 %vm15794_vm7, %v15793_v19 }
 0x2ef   : > { %v2023_v30 = vpop.f32.mrb[20].mxu0  ;;  %v2111_v31 = vpop.f32.mrb[20].mxu1 }
 0x2f0   : > { %v3311_v32 = vpack.c.bf16 %v2023_v30, %v2023_v30  ;;  %v3312_v35 = vpack.c.bf16 %v2111_v31, %v2111_v31  ;;  %v13624_v36 = vpop.f32.mrb[21].mxu0  ;;  %v13644_v37 = vpop.f32.mrb[21].mxu1 }
 0x2f1   : > { %v2026_v33 = vpop.f32.mrb[22].mxu0  ;;  %v2114_v38 = vpop.f32.mrb[22].mxu1 }
 0x2f2   : > { %v3414_v34 = vsel %vm3317_vm8, %v3311_v32, 0  ;;  %v3460_v39 = vsel %vm3317_vm8, %v3312_v35, 0  ;;  %v13625_v40 = vpop.f32.mrb[23].mxu0  ;;  %v13645_v41 = vpop.f32.mrb[23].mxu1 }
 0x2f3   : > { %13899 = vmatpush3.bf16.xpose.msra.mxu0 %v3414_v34  ;;  %13905 = vmatpush3.bf16.xpose.msra.mxu1 %v3460_v39 }
 0x2f4   : > { %13910 = vmatprep.subr.bf16.mxu0 %v15793_v19  ;;  %13916 = vmatprep.subr.bf16.mxu1 %v15793_v19 }
 0x2fa   : > { %13901 = vmatmul.mubr.msk.bf16.vlgmr.msra.gmra.mrb[52].mxu0 %vm3317_vm8, %v3303_v42  ;;  %13907 = vmatmul.mubr.msk.bf16.vlgmr.msra.gmra.mrb[52].mxu1 %vm3317_vm8, %v3304_v43 }
 0x2fb   : > { %13912 = vmatprep.mubr.msk.bf16.mxu0 %vm15794_vm7, %v15793_v19  ;;  %13918 = vmatprep.mubr.msk.bf16.mxu1 %vm15794_vm7, %v15793_v19 }
 0x30f   : > { %v2199_v44 = vpop.f32.mrb[24].mxu0  ;;  %v2287_v45 = vpop.f32.mrb[24].mxu1 }
 0x310   : > { %v3313_v48 = vpack.c.bf16 %v2199_v44, %v2199_v44  ;;  %v3314_v50 = vpack.c.bf16 %v2287_v45, %v2287_v45  ;;  %v13664_v51 = vpop.f32.mrb[25].mxu0  ;;  %v13684_v52 = vpop.f32.mrb[25].mxu1 }
 0x311   : > { %v2202_v58 = vpop.f32.mrb[26].mxu0  ;;  %v2290_v53 = vpop.f32.mrb[26].mxu1 }
 0x312   : > { %v3506_v59 = vsel %vm3317_vm8, %v3313_v48, 0  ;;  %v3552_v54 = vsel %vm3317_vm8, %v3314_v50, 0  ;;  %v13665_v55 = vpop.f32.mrb[27].mxu0  ;;  %v13685_v56 = vpop.f32.mrb[27].mxu1 }
 0x313   : > { %13911 = vmatpush3.bf16.xpose.msra.mxu0 %v3506_v59  ;;  %13917 = vmatpush3.bf16.xpose.msra.mxu1 %v3552_v54 }
 0x314   : > { %13922 = vmatprep.subr.bf16.mxu0 %v15793_v19  ;;  %13928 = vmatprep.subr.bf16.mxu1 %v15793_v19 }
 0x31a   : > { %13913 = vmatmul.mubr.msk.bf16.vlgmr.msra.gmra.mrb[56].mxu0 %vm3317_vm8, %v3305_v57  ;;  %13919 = vmatmul.mubr.msk.bf16.vlgmr.msra.gmra.mrb[56].mxu1 %vm3317_vm8, %v3306_v60 }
 0x31b   : > { %13924 = vmatprep.mubr.msk.bf16.mxu0 %vm15794_vm7, %v15793_v19  ;;  %13930 = vmatprep.mubr.msk.bf16.mxu1 %vm15794_vm7, %v15793_v19 }
 0x32f   : > { %v2375_v61 = vpop.f32.mrb[28].mxu0  ;;  %v2463_v62 = vpop.f32.mrb[28].mxu1 }
 0x330   : > { %v3315_v63 = vpack.c.bf16 %v2375_v61, %v2375_v61  ;;  %v3316_v0 = vpack.c.bf16 %v2463_v62, %v2463_v62  ;;  %v13704_v1 = vpop.f32.mrb[29].mxu0  ;;  %v13724_v2 = vpop.f32.mrb[29].mxu1 }
 0x331   : > { %v2378_v20 = vpop.f32.mrb[30].mxu0  ;;  %v2466_v3 = vpop.f32.mrb[30].mxu1 }
 0x332   : > { %v3598_v21 = vsel %vm3317_vm8, %v3315_v63, 0  ;;  %v3644_v4 = vsel %vm3317_vm8, %v3316_v0, 0  ;;  %v13705_v5 = vpop.f32.mrb[31].mxu0  ;;  %v13725_v6 = vpop.f32.mrb[31].mxu1 }
 0x333   : > { %13923 = vmatpush3.bf16.xpose.msra.mxu0 %v3598_v21  ;;  %13929 = vmatpush3.bf16.xpose.msra.mxu1 %v3644_v4 }
 0x334   : > { %13934 = vmatprep.subr.bf16.mxu0 %v15793_v19  ;;  %13940 = vmatprep.subr.bf16.mxu1 %v15793_v19 }
 0x33a   : > { %13925 = vmatmul.mubr.msk.bf16.vlgmr.msra.gmra.mrb[60].mxu0 %vm3317_vm8, %v3307_v7  ;;  %13931 = vmatmul.mubr.msk.bf16.vlgmr.msra.gmra.mrb[60].mxu1 %vm3317_vm8, %v3308_v8 }
 0x33b   : > { %13936 = vmatprep.mubr.msk.bf16.mxu0 %vm15794_vm7, %v15793_v19  ;;  %13942 = vmatprep.mubr.msk.bf16.mxu1 %vm15794_vm7, %v15793_v19 }
 0x34f   : > { %v2679_v9 = vpop.f32.mrb[32].mxu0  ;;  %v2767_v10 = vpop.f32.mrb[32].mxu1 }
 0x350   : > { %v3791_v11 = vpack.c.bf16 %v2679_v9, %v2679_v9  ;;  %v3792_v12 = vpack.c.bf16 %v2767_v10, %v2767_v10  ;;  %v13744_v13 = vpop.f32.mrb[33].mxu0  ;;  %v13764_v14 = vpop.f32.mrb[33].mxu1 }
 0x351   : > { %v2682_v46 = vpop.f32.mrb[34].mxu0  ;;  %v2770_v15 = vpop.f32.mrb[34].mxu1 }
 0x352   : > { %v3803_v47 = vsel %vm766_vm3, %v3791_v11, 0  ;;  %v3849_v17 = vsel %vm766_vm3, %v3792_v12, 0  ;;  %v13745_v18 = vpop.f32.mrb[35].mxu0  ;;  %v13765_v22 = vpop.f32.mrb[35].mxu1 }
 0x353   : > { %13935 = vmatpush3.bf16.msra.mxu0 %v3803_v47  ;;  %13941 = vmatpush3.bf16.msra.mxu1 %v3849_v17 }
 0x354   : > { %13946 = vmatprep.subr.bf16.mxu0 %v15793_v19  ;;  %13952 = vmatprep.subr.bf16.mxu1 %v15793_v19 }
 0x36f   : > { %v16937_v23 = vpop.f32.mrb[36].mxu0  ;;  %v16939_v24 = vpop.f32.mrb[36].mxu1 }
 0x370   : > { %v13784_v25 = vpop.f32.mrb[37].mxu0  ;;  %v13804_v26 = vpop.f32.mrb[37].mxu1 }
 0x371   : > { %v2858_v27 = vpop.f32.mrb[38].mxu0  ;;  %v2946_v28 = vpop.f32.mrb[38].mxu1 }
 0x372   : > { %v13785_v49 = vpop.f32.mrb[39].mxu0  ;;  %v13805_v29 = vpop.f32.mrb[39].mxu1 }
 0x38f   : > { %v16941_v30 = vpop.f32.mrb[40].mxu0  ;;  %v16943_v31 = vpop.f32.mrb[40].mxu1 }
 0x390   : > { %v13824_v32 = vpop.f32.mrb[41].mxu0  ;;  %v13844_v35 = vpop.f32.mrb[41].mxu1 }
 0x391   : > { %v3034_v36 = vpop.f32.mrb[42].mxu0  ;;  %v3122_v37 = vpop.f32.mrb[42].mxu1 }
 0x392   : > { %v13825_v33 = vpop.f32.mrb[43].mxu0  ;;  %v13845_v38 = vpop.f32.mrb[43].mxu1 }
 0x3af   : > { %v16945_v34 = vpop.f32.mrb[44].mxu0  ;;  %v16947_v39 = vpop.f32.mrb[44].mxu1 }
 0x3b0   : > { %v13864_v40 = vpop.f32.mrb[45].mxu0  ;;  %v13884_v41 = vpop.f32.mrb[45].mxu1 }
 0x3b1   : > { %v3210_v42 = vpop.f32.mrb[46].mxu0  ;;  %v3298_v43 = vpop.f32.mrb[46].mxu1 }
 0x3b2   : > { %v13865_v44 = vpop.f32.mrb[47].mxu0  ;;  %v13885_v45 = vpop.f32.mrb[47].mxu1 }
 0x3bc   : > { %v3358_v48 = vpop.f32.mrb[48].mxu0  ;;  %v3404_v50 = vpop.f32.mrb[48].mxu1 }
 0x3bd   : > { %v3686_v51 = vmul.f32 0.25, %v3358_v48  ;;  %v13890_v52 = vpop.f32.mrb[49].mxu0  ;;  %v13896_v58 = vpop.f32.mrb[49].mxu1  ;;  %v3687_v54 = vmul.f32 0.25, %v3404_v50 }
 0x3be   : > { %v3361_v53 = vpop.f32.mrb[50].mxu0  ;;  %v3407_v59 = vpop.f32.mrb[50].mxu1 }
 0x3bf   : > { %v13891_v55 = vpop.f32.mrb[51].mxu0  ;;  %v13897_v56 = vpop.f32.mrb[51].mxu1  ;;  %v3695_v57 = vsel %vm3694_vm9, %v3686_v51, -inf  ;;  %v3698_v60 = vsel %vm3694_vm9, %v3687_v54, -inf }
 0x3c0   : > { %3696 = vmax.xlane.f32.xlu1 %v3695_v57 }
 0x3c4   : > { %3699 = vmax.xlane.f32.xlu1 %v3698_v60 }
 0x3cd   : > { %v3450_v61 = vpop.f32.mrb[52].mxu0  ;;  %v3496_v62 = vpop.f32.mrb[52].mxu1 }
 0x3ce   : > { %v3688_v63 = vmul.f32 0.25, %v3450_v61  ;;  %v3689_v0 = vmul.f32 0.25, %v3496_v62  ;;  %v13902_v1 = vpop.f32.mrb[53].mxu0  ;;  %v13908_v2 = vpop.f32.mrb[53].mxu1 }
 0x3cf   : > { %v3453_v20 = vpop.f32.mrb[54].mxu0  ;;  %v3499_v3 = vpop.f32.mrb[54].mxu1 }
 0x3d0   : > { %v13903_v21 = vpop.f32.mrb[55].mxu0  ;;  %v13909_v4 = vpop.f32.mrb[55].mxu1  ;;  %v3704_v5 = vsel %vm3694_vm9, %v3689_v0, -inf  ;;  %v3701_v6 = vsel %vm3694_vm9, %v3688_v63, -inf }
 0x3d1   : > { %3705 = vmax.xlane.f32.xlu1 %v3704_v5  ;;  %3702 = vmax.xlane.f32.xlu0 %v3701_v6 }
 0x3ed   : > { %v3542_v7 = vpop.f32.mrb[56].mxu0  ;;  %v3588_v8 = vpop.f32.mrb[56].mxu1 }
 0x3ee   : > { %v3690_v9 = vmul.f32 0.25, %v3542_v7  ;;  %v3691_v10 = vmul.f32 0.25, %v3588_v8  ;;  %v13914_v11 = vpop.f32.mrb[57].mxu0  ;;  %v13920_v12 = vpop.f32.mrb[57].mxu1 }
 0x3ef   : > { %v3545_v13 = vpop.f32.mrb[58].mxu0  ;;  %v3591_v14 = vpop.f32.mrb[58].mxu1 }
 0x3f0   : > { %v13915_v46 = vpop.f32.mrb[59].mxu0  ;;  %v13921_v15 = vpop.f32.mrb[59].mxu1  ;;  %v3710_v47 = vsel %vm3694_vm9, %v3691_v10, -inf  ;;  %v3707_v17 = vsel %vm3694_vm9, %v3690_v9, -inf }
 0x3f1   : > { %3711 = vmax.xlane.f32.xlu1 %v3710_v47  ;;  %3708 = vmax.xlane.f32.xlu0 %v3707_v17  ;;  %v3793_v17 = vpack.c.bf16 %v16937_v23, %v16937_v23 }
 0x40d   : > { %v3634_v18 = vpop.f32.mrb[60].mxu0  ;;  %v3680_v22 = vpop.f32.mrb[60].mxu1 }
 0x40e   : > { %v3692_v25 = vmul.f32 0.25, %v3634_v18  ;;  %v3693_v26 = vmul.f32 0.25, %v3680_v22  ;;  %v13926_v27 = vpop.f32.mrb[61].mxu0  ;;  %v13932_v28 = vpop.f32.mrb[61].mxu1 }
 0x40f   : > { %v3637_v49 = vpop.f32.mrb[62].mxu0  ;;  %v3683_v29 = vpop.f32.mrb[62].mxu1  ;;  %v3794_v27 = vpack.c.bf16 %v16939_v24, %v16939_v24 }
 0x410   : > { %v13927_v32 = vpop.f32.mrb[63].mxu0  ;;  %v13933_v35 = vpop.f32.mrb[63].mxu1  ;;  %v3716_v36 = vsel %vm3694_vm9, %v3693_v26, -inf  ;;  %v3713_v37 = vsel %vm3694_vm9, %v3692_v25, -inf }
 0x411   : > { %3717 = vmax.xlane.f32.xlu1 %v3716_v36  ;;  %3714 = vmax.xlane.f32.xlu0 %v3713_v37  ;;  %v3941_v23 = vsel %vm766_vm3, %v3794_v27, 0  ;;  %v3796_v36 = vpack.c.bf16 %v16943_v31, %v16943_v31 }
 0x44d   : > { %v3697_v33 = vpop.xlane.xlu1 %3696 }
 0x44e   : > { %v3719_v38 = vsub.f32 %v3686_v51, %v3697_v33  ;;  %v3795_v33 = vpack.c.bf16 %v16941_v30, %v16941_v30 }
 0x450   : > { %v3727_v40 = vmul.f32 1.442695, %v3719_v38 }
 0x451   : > { %v3700_v41 = vpop.xlane.xlu1 %3699 }
 0x452   : > { %15632 = vpow2.f32 %v3727_v40  ;;  %v3720_v42 = vsub.f32 %v3687_v54, %v3700_v41 }
 0x454   : > { %v3729_v43 = vmul.f32 1.442695, %v3720_v42  ;;  %v4033_v42 = vsel %vm766_vm3, %v3796_v36, 0 }
 0x456   : > { %15634 = vpow2.f32 %v3729_v43  ;;  %v3987_v43 = vsel %vm766_vm3, %v3795_v33, 0 }
 0x45c   : > { %v15633_v44 = vpop.eup %15632 }
 0x45d   : > { %v3743_v45 = vsel %vm3694_vm9, %v15633_v44, 0.0 }
 0x45e   : > { %v3706_v48 = vpop.xlane.xlu1 %3705  ;;  %v3703_v50 = vpop.xlane.xlu0 %3702  ;;  %3744 = vadd.xlane.f32.xlu0 %v3743_v45 }
 0x45f   : > { %v3722_v52 = vsub.f32 %v3689_v0, %v3706_v48  ;;  %v3721_v58 = vsub.f32 %v3688_v63, %v3703_v50  ;;  %v3798_v48 = vpack.c.bf16 %v16947_v39, %v16947_v39 }
 0x460   : > { %v15635_v53 = vpop.eup %15634 }
 0x461   : > { %v3733_v59 = vmul.f32 1.442695, %v3722_v52  ;;  %v3731_v55 = vmul.f32 1.442695, %v3721_v58  ;;  %v3746_v56 = vsel %vm3694_vm9, %v15635_v53, 0.0  ;;  %v3797_v52 = vpack.c.bf16 %v16945_v34, %v16945_v34 }
 0x462   : > { %3747 = vadd.xlane.f32.xlu1 %v3746_v56 }
 0x463   : > { %15636 = vpow2.f32 %v3733_v59  ;;  %v4079_v56 = vsel %vm766_vm3, %v3797_v52, 0 }
 0x464   : > { %15638 = vpow2.f32 %v3731_v55  ;;  %v4125_v55 = vsel %vm766_vm3, %v3798_v48, 0 }
 0x46d   : > { %v16959_v51 = vpop.eup %15636 }
 0x46e   : > { %v16961_v54 = vpop.eup %15638  ;;  %v3752_v57 = vsel %vm3694_vm9, %v16959_v51, 0.0 }
 0x46f   : > { %3753 = vadd.xlane.f32.xlu1 %v3752_v57  ;;  %v3749_v60 = vsel %vm3694_vm9, %v16961_v54, 0.0 }
 0x470   : > { %3750 = vadd.xlane.f32.xlu0 %v3749_v60 }
 0x47e   : > { %v3712_v61 = vpop.xlane.xlu1 %3711  ;;  %v3709_v62 = vpop.xlane.xlu0 %3708 }
 0x47f   : > { %v3724_v63 = vsub.f32 %v3691_v10, %v3712_v61  ;;  %v3723_v0 = vsub.f32 %v3690_v9, %v3709_v62 }
 0x481   : > { %v3737_v1 = vmul.f32 1.442695, %v3724_v63  ;;  %v3735_v2 = vmul.f32 1.442695, %v3723_v0  ;;  %v14918_v63 = vld [vmem:[%s19419_s9] sm:$0xff]   ;;  %v14919_v0 = vld [vmem:[%s19419_s9 + $0x8] sm:$0xff]  }
 0x483   : > { %15640 = vpow2.f32 %v3737_v1 }
 0x484   : > { %15642 = vpow2.f32 %v3735_v2  ;;  %v14920_v2 = vld [vmem:[%s19419_s9 + $0x10] sm:$0xff]  }
 0x48d   : > { %v16967_v20 = vpop.eup %15640 }
 0x48e   : > { %v16969_v3 = vpop.eup %15642  ;;  %v3758_v21 = vsel %vm3694_vm9, %v16967_v20, 0.0 }
 0x48f   : > { %3759 = vadd.xlane.f32.xlu1 %v3758_v21  ;;  %v3755_v4 = vsel %vm3694_vm9, %v16969_v3, 0.0 }
 0x490   : > { %3756 = vadd.xlane.f32.xlu0 %v3755_v4 }
 0x49e   : > { %v3718_v5 = vpop.xlane.xlu1 %3717  ;;  %v3715_v6 = vpop.xlane.xlu0 %3714 }
 0x49f   : > { %v3726_v7 = vsub.f32 %v3693_v26, %v3718_v5  ;;  %v3725_v8 = vsub.f32 %v3692_v25, %v3715_v6  ;;  %v3895_v26 = vsel %vm766_vm3, %v3793_v17, 0  ;;  %v14921_v6 = vld [vmem:[%s19419_s9 + $0x18] sm:$0xff]  }
 0x4a1   : > { %v3741_v9 = vmul.f32 1.442695, %v3726_v7  ;;  %v3739_v10 = vmul.f32 1.442695, %v3725_v8 }
 0x4a3   : > { %15644 = vpow2.f32 %v3741_v9 }
 0x4a4   : > { %15646 = vpow2.f32 %v3739_v10 }
 0x4ad   : > { %v16975_v11 = vpop.eup %15644 }
 0x4ae   : > { %v16977_v12 = vpop.eup %15646  ;;  %v3764_v13 = vsel %vm3694_vm9, %v16975_v11, 0.0 }
 0x4af   : > { %3765 = vadd.xlane.f32.xlu1 %v3764_v13  ;;  %v3761_v14 = vsel %vm3694_vm9, %v16977_v12, 0.0 }
 0x4b0   : > { %3762 = vadd.xlane.f32.xlu0 %v3761_v14 }
 0x4eb   : > { %v3745_v46 = vpop.xlane.xlu0 %3744 }
 0x4ec   : > { %15648 = vrcp.f32 %v3745_v46 }
 0x4ef   : > { %v3748_v15 = vpop.xlane.xlu1 %3747 }
 0x4f0   : > { %15650 = vrcp.f32 %v3748_v15  ;;  %v14922_v15 = vld [vmem:[%s19419_s9 + $0x20] sm:$0xff]  }
 0x4f6   : > { %v15649_v47 = vpop.eup %15648 }
 0x4f7   : > { %v3775_v18 = vmul.f32 %v15649_v47, %v15633_v44 }
 0x4f9   : > { %v3783_v22 = vpack.c.bf16 %v3775_v18, %v3775_v18 }
 0x4fa   : > { %v15651_v25 = vpop.eup %15650 }
 0x4fb   : > { %v3776_v28 = vmul.f32 %v15651_v25, %v15635_v53  ;;  %13937 = vmatmul.mubr.msk.bf16.vlgmr.msra.gmra.mrb[64].mxu0 %vm3694_vm9, %v3783_v22 }
 0x4fc   : > { %13947 = vmatpush3.bf16.msra.mxu0 %v3895_v26  ;;  %v3754_v49 = vpop.xlane.xlu1 %3753  ;;  %13948 = vmatprep.mubr.msk.bf16.mxu0 %vm15794_vm7, %v15793_v19 }
 0x4fd   : > { %15652 = vrcp.f32 %v3754_v49  ;;  %v3751_v29 = vpop.xlane.xlu0 %3750  ;;  %v3784_v32 = vpack.c.bf16 %v3776_v28, %v3776_v28  ;;  %13958 = vmatprep.subr.bf16.mxu0 %v15793_v19  ;;  %v14925_v28 = vld [vmem:[%s19419_s9 + $0x38] sm:$0xff]  }
 0x4fe   : > { %15654 = vrcp.f32 %v3751_v29 }
 0x4ff   : > { %13943 = vmatmul.mubr.msk.bf16.vlgmr.msra.gmra.mrb[64].mxu1 %vm3694_vm9, %v3784_v32 }
 0x500   : > { %13953 = vmatpush3.bf16.msra.mxu1 %v3941_v23  ;;  %13954 = vmatprep.mubr.msk.bf16.mxu1 %vm15794_vm7, %v15793_v19  ;;  %v14924_v23 = vld [vmem:[%s19419_s9 + $0x30] sm:$0xff]  }
 0x501   : > { %13964 = vmatprep.subr.bf16.mxu1 %v15793_v19 }
 0x507   : > { %v15653_v24 = vpop.eup %15652 }
 0x508   : > { %v15655_v35 = vpop.eup %15654  ;;  %v3778_v37 = vmul.f32 %v15653_v24, %v16959_v51 }
 0x509   : > { %v3777_v38 = vmul.f32 %v15655_v35, %v16961_v54 }
 0x50a   : > { %v3786_v40 = vpack.c.bf16 %v3778_v37, %v3778_v37 }
 0x50b   : > { %v3785_v41 = vpack.c.bf16 %v3777_v38, %v3777_v38 }
 0x50c   : > { %13955 = vmatmul.mubr.msk.bf16.vlgmr.msra.gmra.mrb[68].mxu1 %vm3694_vm9, %v3786_v40 }
 0x50d   : > { %13949 = vmatmul.mubr.msk.bf16.vlgmr.msra.gmra.mrb[68].mxu0 %vm3694_vm9, %v3785_v41  ;;  %13965 = vmatpush3.bf16.msra.mxu1 %v4033_v42 }
 0x50e   : > { %13959 = vmatpush3.bf16.msra.mxu0 %v3987_v43  ;;  %13960 = vmatprep.mubr.msk.bf16.mxu0 %vm15794_vm7, %v15793_v19 }
 0x50f   : > { %13966 = vmatprep.mubr.msk.bf16.mxu1 %vm15794_vm7, %v15793_v19  ;;  %13970 = vmatprep.subr.bf16.mxu0 %v15793_v19 }
 0x510   : > { %13976 = vmatprep.subr.bf16.mxu1 %v15793_v19 }
 0x51c   : > { %v3760_v30 = vpop.xlane.xlu1 %3759 }
 0x51d   : > { %15656 = vrcp.f32 %v3760_v30  ;;  %v3757_v31 = vpop.xlane.xlu0 %3756 }
 0x51e   : > { %15658 = vrcp.f32 %v3757_v31 }
 0x527   : > { %v15657_v44 = vpop.eup %15656 }
 0x528   : > { %v15659_v45 = vpop.eup %15658  ;;  %v3780_v50 = vmul.f32 %v15657_v44, %v16967_v20 }
 0x529   : > { %v3779_v58 = vmul.f32 %v15659_v45, %v16969_v3 }
 0x52a   : > { %v3788_v53 = vpack.c.bf16 %v3780_v50, %v3780_v50 }
 0x52b   : > { %v3787_v59 = vpack.c.bf16 %v3779_v58, %v3779_v58 }
 0x52c   : > { %13967 = vmatmul.mubr.msk.bf16.vlgmr.msra.gmra.mrb[72].mxu1 %vm3694_vm9, %v3788_v53 }
 0x52d   : > { %13961 = vmatmul.mubr.msk.bf16.vlgmr.msra.gmra.mrb[72].mxu0 %vm3694_vm9, %v3787_v59  ;;  %13977 = vmatpush3.bf16.msra.mxu1 %v4125_v55 }
 0x52e   : > { %13971 = vmatpush3.bf16.msra.mxu0 %v4079_v56  ;;  %13972 = vmatprep.mubr.msk.bf16.mxu0 %vm15794_vm7, %v15793_v19 }
 0x52f   : > { %13978 = vmatprep.mubr.msk.bf16.mxu1 %vm15794_vm7, %v15793_v19  ;;  %13982 = vmatprep.subr.bf16.mxu0 %v15793_v19 }
 0x530   : > { %13988 = vmatprep.subr.bf16.mxu1 %v15793_v19 }
 0x53c   : > { %v3766_v34 = vpop.xlane.xlu1 %3765 }
 0x53d   : > { %15660 = vrcp.f32 %v3766_v34  ;;  %v3763_v39 = vpop.xlane.xlu0 %3762 }
 0x53e   : > { %15662 = vrcp.f32 %v3763_v39 }
 0x547   : > { %v15661_v51 = vpop.eup %15660 }
 0x548   : > { %v15663_v54 = vpop.eup %15662  ;;  %v3782_v57 = vmul.f32 %v15661_v51, %v16975_v11 }
 0x549   : > { %v3781_v60 = vmul.f32 %v15663_v54, %v16977_v12  ;;  %v14923_v12 = vld [vmem:[%s19419_s9 + $0x28] sm:$0xff]  }
 0x54a   : > { %v3790_v61 = vpack.c.bf16 %v3782_v57, %v3782_v57 }
 0x54b   : > { %v3789_v62 = vpack.c.bf16 %v3781_v60, %v3781_v60 }
 0x54c   : > { %13979 = vmatmul.mubr.msk.bf16.vlgmr.msra.gmra.mrb[76].mxu1 %vm3694_vm9, %v3790_v61 }
 0x54d   : > { %13973 = vmatmul.mubr.msk.bf16.vlgmr.msra.gmra.mrb[76].mxu0 %vm3694_vm9, %v3789_v62  ;;  %13990 = vmatprep.mubr.msk.bf16.mxu1 %vm15794_vm7, %v15793_v19 }
 0x54e   : > { %13984 = vmatprep.mubr.msk.bf16.mxu0 %vm15794_vm7, %v15793_v19  ;;  %13983 = vmatpush3.bf16.msra.mxu0 %v14918_v63 }
 0x54f   : > { %13994 = vmatprep.subr.bf16.mxu0 %v15793_v19  ;;  %13989 = vmatpush3.bf16.msra.mxu1 %v14919_v0 }
 0x550   : > { %14000 = vmatprep.subr.bf16.mxu1 %v15793_v19 }
 0x5ce   : > { %v3839_v1 = vpop.f32.mrb[64].mxu0 }
 0x5cf   : > { %v4167_v20 = vpack.c.bf16 %v3839_v1, %v3839_v1  ;;  %v13938_v3 = vpop.f32.mrb[65].mxu0 }
 0x5d0   : > { %v3842_v21 = vpop.f32.mrb[66].mxu0 }
 0x5d1   : > { %v13939_v4 = vpop.f32.mrb[67].mxu0  ;;  %13985 = vmatmul.mubr.msk.bf16.vlgmr.msra.gmra.mrb[80].mxu0 %vm3317_vm8, %v4167_v20 }
 0x5d2   : > { %v3885_v5 = vpop.f32.mrb[64].mxu1  ;;  %13995 = vmatpush3.bf16.msra.mxu0 %v14920_v2  ;;  %13996 = vmatprep.mubr.msk.bf16.mxu0 %vm15794_vm7, %v15793_v19 }
 0x5d3   : > { %v4168_v7 = vpack.c.bf16 %v3885_v5, %v3885_v5  ;;  %v13944_v8 = vpop.f32.mrb[65].mxu1  ;;  %14006 = vmatprep.subr.bf16.mxu0 %v15793_v19 }
 0x5d4   : > { %v3888_v9 = vpop.f32.mrb[66].mxu1 }
 0x5d5   : > { %v13945_v10 = vpop.f32.mrb[67].mxu1  ;;  %13991 = vmatmul.mubr.msk.bf16.vlgmr.msra.gmra.mrb[80].mxu1 %vm3317_vm8, %v4168_v7 }
 0x5d6   : > { %14001 = vmatpush3.bf16.msra.mxu1 %v14921_v6  ;;  %14002 = vmatprep.mubr.msk.bf16.mxu1 %vm15794_vm7, %v15793_v19 }
 0x5d7   : > { %14012 = vmatprep.subr.bf16.mxu1 %v15793_v19 }
 0x5df   : > { %v3977_v11 = vpop.f32.mrb[68].mxu1 }
 0x5e0   : > { %v3931_v13 = vpop.f32.mrb[68].mxu0  ;;  %v4170_v14 = vpack.c.bf16 %v3977_v11, %v3977_v11  ;;  %v13956_v46 = vpop.f32.mrb[69].mxu1 }
 0x5e1   : > { %v4169_v47 = vpack.c.bf16 %v3931_v13, %v3931_v13  ;;  %v13950_v17 = vpop.f32.mrb[69].mxu0  ;;  %v3980_v18 = vpop.f32.mrb[70].mxu1 }
 0x5e2   : > { %v3934_v22 = vpop.f32.mrb[70].mxu0  ;;  %v13957_v25 = vpop.f32.mrb[71].mxu1  ;;  %14003 = vmatmul.mubr.msk.bf16.vlgmr.msra.gmra.mrb[84].mxu1 %vm3317_vm8, %v4170_v14 }
 0x5e3   : > { %v13951_v26 = vpop.f32.mrb[71].mxu0  ;;  %13997 = vmatmul.mubr.msk.bf16.vlgmr.msra.gmra.mrb[84].mxu0 %vm3317_vm8, %v4169_v47  ;;  %14013 = vmatpush3.bf16.msra.mxu1 %v14923_v12 }
 0x5e4   : > { %14007 = vmatpush3.bf16.msra.mxu0 %v14922_v15  ;;  %14008 = vmatprep.mubr.msk.bf16.mxu0 %vm15794_vm7, %v15793_v19  ;;  %v11768_v26 = vld [vmem:[%s19420_s10] ss:$0 sm:$0xff] }
 0x5e5   : > { %14014 = vmatprep.mubr.msk.bf16.mxu1 %vm15794_vm7, %v15793_v19  ;;  %14018 = vmatprep.subr.bf16.mxu0 %v15793_v19 }
 0x5e6   : > { %14024 = vmatprep.subr.bf16.mxu1 %v15793_v19 }
 0x5ff   : > { %v4069_v27 = vpop.f32.mrb[72].mxu1 }
 0x600   : > { %v4023_v49 = vpop.f32.mrb[72].mxu0  ;;  %v4172_v29 = vpack.c.bf16 %v4069_v27, %v4069_v27  ;;  %v13968_v32 = vpop.f32.mrb[73].mxu1 }
 0x601   : > { %v4171_v24 = vpack.c.bf16 %v4023_v49, %v4023_v49  ;;  %v13962_v35 = vpop.f32.mrb[73].mxu0  ;;  %v4072_v36 = vpop.f32.mrb[74].mxu1  ;;  %v14926_v49 = vld [vmem:[%s19423_s13] ss:$8 sps:$4 sm:$0xff]   ;;  %v14931_v32 = vld [vmem:[%s19423_s13 + $0x14] ss:$8 sps:$4 sm:$0xff]  }
 0x602   : > { %v4026_v37 = vpop.f32.mrb[74].mxu0  ;;  %v13969_v33 = vpop.f32.mrb[75].mxu1  ;;  %14015 = vmatmul.mubr.msk.bf16.vlgmr.msra.gmra.mrb[88].mxu1 %vm3317_vm8, %v4172_v29  ;;  %v14928_v29 = vld [vmem:[%s19423_s13 + $0x4] ss:$8 sps:$4 sm:$0xff]  }
 0x603   : > { %v13963_v38 = vpop.f32.mrb[75].mxu0  ;;  %14009 = vmatmul.mubr.msk.bf16.vlgmr.msra.gmra.mrb[88].mxu0 %vm3317_vm8, %v4171_v24  ;;  %14025 = vmatpush3.bf16.msra.mxu1 %v14925_v28  ;;  %v14932_v24 = vld [vmem:[%s19423_s13 + $0x20] ss:$8 sps:$4 sm:$0xff]  }
 0x604   : > { %14019 = vmatpush3.bf16.msra.mxu0 %v14924_v23  ;;  %14020 = vmatprep.mubr.msk.bf16.mxu0 %vm15794_vm7, %v15793_v19  ;;  %v14934_v23 = vld [vmem:[%s19423_s13 + $0x24] ss:$8 sps:$4 sm:$0xff]   ;;  %v14937_v38 = vld [vmem:[%s19423_s13 + $0x34] ss:$8 sps:$4 sm:$0xff]  }
 0x605   : > { %14026 = vmatprep.mubr.msk.bf16.mxu1 %vm15794_vm7, %v15793_v19  ;;  %4735 = vmatprep.subr.bf16.mxu0 %v14928_v29 }
 0x61f   : > { %v4161_v40 = vpop.f32.mrb[76].mxu1 }
 0x620   : > { %v4115_v41 = vpop.f32.mrb[76].mxu0  ;;  %v4174_v42 = vpack.c.bf16 %v4161_v40, %v4161_v40  ;;  %v13980_v43 = vpop.f32.mrb[77].mxu1  ;;  %v14935_v40 = vld [vmem:[%s19423_s13 + $0x30] ss:$8 sps:$4 sm:$0xff]  }
 0x621   : > { %v4173_v30 = vpack.c.bf16 %v4115_v41, %v4115_v41  ;;  %v13974_v31 = vpop.f32.mrb[77].mxu0  ;;  %v4164_v44 = vpop.f32.mrb[78].mxu1  ;;  %v14940_v41 = vld [vmem:[%s19423_s13 + $0x44] ss:$8 sps:$4 sm:$0xff]   ;;  %v14943_v43 = vld [vmem:[%s19423_s13 + $0x54] ss:$8 sps:$4 sm:$0xff]  }
 0x622   : > { %v4118_v45 = vpop.f32.mrb[78].mxu0  ;;  %v13981_v48 = vpop.f32.mrb[79].mxu1  ;;  %14027 = vmatmul.mubr.msk.bf16.vlgmr.msra.gmra.mrb[92].mxu1 %vm3317_vm8, %v4174_v42  ;;  %v14938_v42 = vld [vmem:[%s19423_s13 + $0x40] ss:$8 sps:$4 sm:$0xff]   ;;  %v14941_v31 = vld [vmem:[%s19423_s13 + $0x50] ss:$8 sps:$4 sm:$0xff]  }
 0x623   : > { %v13975_v50 = vpop.f32.mrb[79].mxu0  ;;  %14021 = vmatmul.mubr.msk.bf16.vlgmr.msra.gmra.mrb[92].mxu0 %vm3317_vm8, %v4173_v30  ;;  %v15795_v30 = vmov 0   ;;  %v14946_v44 = vld [vmem:[%s19423_s13 + $0x64] ss:$8 sps:$4 sm:$0xff]   ;;  %v14944_v45 = vld [vmem:[%s19423_s13 + $0x60] ss:$8 sps:$4 sm:$0xff]  }
 0x624   : > { %4736 = vmatpush1.bf16.msra.mxu0 %v14926_v49  ;;  %4767 = vmatprep.mubr.bf16.mxu0 %v15795_v30  ;;  %v14949_v48 = vld [vmem:[%s19423_s13 + $0x74] ss:$8 sps:$4 sm:$0xff]   ;;  %v14947_v50 = vld [vmem:[%s19423_s13 + $0x70] ss:$8 sps:$4 sm:$0xff]  }
 0x625   : > { %4737 = vmatprep.subr.bf16.mxu0 %v14931_v32 }
 0x6a4   : > { %v4234_v52 = vpop.f32.mrb[80].mxu0 }
 0x6a5   : > { %v13986_v58 = vpop.f32.mrb[81].mxu0 }
 0x6a6   : > { %v4237_v53 = vpop.f32.mrb[82].mxu0 }
 0x6a7   : > { %v13987_v59 = vpop.f32.mrb[83].mxu0 }
 0x6a8   : > { %v4283_v55 = vpop.f32.mrb[80].mxu1 }
 0x6a9   : > { %v4583_v56 = vadd.f32 %v4283_v55, %v4234_v52  ;;  %v13992_v34 = vpop.f32.mrb[81].mxu1  ;;  %v11769_v55 = vld [vmem:[%s19421_s11] ss:$0 sm:$0xff] }
 0x6aa   : > { %v4286_v39 = vpop.f32.mrb[82].mxu1  ;;  %v11770_v34 = vld [vmem:[%s19422_s12] ss:$0 sm:$0xff] }
 0x6ab   : > { %v13993_v51 = vpop.f32.mrb[83].mxu1 }
 0x6b5   : > { %v4381_v54 = vpop.f32.mrb[84].mxu1 }
 0x6b6   : > { %v4332_v57 = vpop.f32.mrb[84].mxu0  ;;  %v14004_v60 = vpop.f32.mrb[85].mxu1 }
 0x6b7   : > { %v4584_v61 = vadd.f32 %v4583_v56, %v4332_v57  ;;  %v13998_v62 = vpop.f32.mrb[85].mxu0  ;;  %v4384_v63 = vpop.f32.mrb[86].mxu1  ;;  %v14950_v57 = vld [vmem:[%s19425_s15 + $0x40] sm:$0xff]  }
 0x6b8   : > { %v4335_v0 = vpop.f32.mrb[86].mxu0  ;;  %v14005_v1 = vpop.f32.mrb[87].mxu1  ;;  %v14951_v60 = vld [vmem:[%s19425_s15] sm:$0xff]   ;;  %13076 = vmatprep.subr.bf16.mxu1 %v14950_v57  ;;  %v14953_v62 = vld [vmem:[%s19425_s15 + $0x8] sm:$0xff]   ;;  %v14954_v63 = vld [vmem:[%s19425_s15 + $0x50] sm:$0xff]  }
 0x6b9   : > { %v4585_v2 = vadd.f32 %v4584_v61, %v4381_v54  ;;  %v13999_v20 = vpop.f32.mrb[87].mxu0  ;;  %13077 = vmatpush3.bf16.msra.mxu1 %v14951_v60  ;;  %v14952_v61 = vld [vmem:[%s19425_s15 + $0x48] sm:$0xff]   ;;  %v14955_v0 = vld [vmem:[%s19425_s15 + $0x10] sm:$0xff]   ;;  %v14956_v1 = vld [vmem:[%s19425_s15 + $0x58] sm:$0xff]  }
 0x6ba   : > { %13078 = vmatprep.subr.bf16.mxu1 %v14952_v61  ;;  %v14958_v20 = vld [vmem:[%s19425_s15 + $0x60] sm:$0xff]   ;;  %v14971_v57 = vld [vmem:[%s19487_s25 + $0x250] sm:$0xff]  }
 0x6bd   : > { %13079 = vmatpush3.bf16.msra.mxu1 %v14953_v62 }
 0x6be   : > { %13080 = vmatprep.subr.bf16.mxu1 %v14954_v63 }
 0x6c1   : > { %13081 = vmatpush3.bf16.msra.mxu1 %v14955_v0  ;;  %v14972_v0 = vld [vmem:[%s19487_s25 + $0x218] sm:$0xff]  }
 0x6c2   : > { %13082 = vmatprep.subr.bf16.mxu1 %v14956_v1  ;;  %v14973_v1 = vld [vmem:[%s19487_s25 + $0x258] sm:$0xff]  }
 0x6d5   : > { %v4479_v3 = vpop.f32.mrb[88].mxu1 }
 0x6d6   : > { %v4430_v21 = vpop.f32.mrb[88].mxu0  ;;  %v14016_v4 = vpop.f32.mrb[89].mxu1 }
 0x6d7   : > { %v4586_v5 = vadd.f32 %v4585_v2, %v4430_v21  ;;  %v14010_v6 = vpop.f32.mrb[89].mxu0  ;;  %v4482_v7 = vpop.f32.mrb[90].mxu1  ;;  %v14957_v2 = vld [vmem:[%s19425_s15 + $0x18] sm:$0xff]   ;;  %v14960_v21 = vld [vmem:[%s19425_s15 + $0x68] sm:$0xff]  }
 0x6d8   : > { %v4433_v8 = vpop.f32.mrb[90].mxu0  ;;  %v14017_v9 = vpop.f32.mrb[91].mxu1  ;;  %13083 = vmatpush3.bf16.msra.mxu1 %v14957_v2  ;;  %v14961_v4 = vld [vmem:[%s19425_s15 + $0x28] sm:$0xff]   ;;  %v14963_v6 = vld [vmem:[%s19425_s15 + $0x30] sm:$0xff]   ;;  %v14964_v7 = vld [vmem:[%s19425_s15 + $0x78] sm:$0xff]  }
 0x6d9   : > { %v4587_v10 = vadd.f32 %v4586_v5, %v4479_v3  ;;  %v14011_v11 = vpop.f32.mrb[91].mxu0  ;;  %v14959_v3 = vld [vmem:[%s19425_s15 + $0x20] sm:$0xff]   ;;  %13084 = vmatprep.subr.bf16.mxu1 %v14958_v20  ;;  %v14962_v5 = vld [vmem:[%s19425_s15 + $0x70] sm:$0xff]   ;;  %v14965_v8 = vld [vmem:[%s19425_s15 + $0x38] sm:$0xff]   ;;  %v4645_v9 = vlaneseq }
 0x6da   : > { %v14974_v2 = vld [vmem:[%s19487_s25 + $0x220] sm:$0xff]  }
 0x6db   : > { %v14975_v20 = vld [vmem:[%s19487_s25 + $0x260] sm:$0xff]  }
 0x6dc   : > { %13085 = vmatpush3.bf16.msra.mxu1 %v14959_v3  ;;  %v14976_v3 = vld [vmem:[%s19487_s25 + $0x228] sm:$0xff]  }
 0x6dd   : > { %13086 = vmatprep.subr.bf16.mxu1 %v14960_v21  ;;  %v14977_v21 = vld [vmem:[%s19487_s25 + $0x268] sm:$0xff]  }
 0x6e0   : > { %13087 = vmatpush3.bf16.msra.mxu1 %v14961_v4  ;;  %v14978_v4 = vld [vmem:[%s19487_s25 + $0x230] sm:$0xff]  }
 0x6e1   : > { %13088 = vmatprep.subr.bf16.mxu1 %v14962_v5  ;;  %v14979_v5 = vld [vmem:[%s19487_s25 + $0x270] sm:$0xff]  }
 0x6e4   : > { %13089 = vmatpush3.bf16.msra.mxu1 %v14963_v6  ;;  %v14980_v6 = vld [vmem:[%s19487_s25 + $0x238] sm:$0xff]  }
 0x6e5   : > { %13090 = vmatprep.subr.bf16.mxu1 %v14964_v7  ;;  %v14981_v7 = vld [vmem:[%s19487_s25 + $0x278] sm:$0xff]  }
 0x6e8   : > { %13091 = vmatpush3.bf16.msra.mxu1 %v14965_v8 }
 0x6e9   : > { %14050 = vmatprep.subr.bf16.mxu1 %v15793_v19 }
 0x6f5   : > { %v4577_v12 = vpop.f32.mrb[92].mxu1 }
 0x6f6   : > { %v4528_v13 = vpop.f32.mrb[92].mxu0  ;;  %v14028_v14 = vpop.f32.mrb[93].mxu1 }
 0x6f7   : > { %v4588_v46 = vadd.f32 %v4587_v10, %v4528_v13  ;;  %v14022_v15 = vpop.f32.mrb[93].mxu0  ;;  %v4580_v47 = vpop.f32.mrb[94].mxu1  ;;  %v17202_v10 = vshrl.u32 %v4645_v9, 7 }
 0x6f8   : > { %v4531_v17 = vpop.f32.mrb[94].mxu0  ;;  %v14029_v18 = vpop.f32.mrb[95].mxu1 }
 0x6f9   : > { %v4589_v22 = vadd.f32 %v4588_v46, %v4577_v12  ;;  %v14023_v25 = vpop.f32.mrb[95].mxu0  ;;  %v17205_v11 = vsub.s32 0, %v17202_v10  ;;  %v4643_v12 = vld [vmem:[%s19491_s16] sm:$0x3]  ;;  %v17211_v13 = vsub.s32 1, %v17202_v10 }
 0x6fb   : > { %v4590_v27 = vadd.f32 %v4589_v22, %v16003_v16  ;;  %v14929_v16 = vld [vmem:[%s19423_s13 + $0x10] ss:$8 sps:$4 sm:$0xff]   ;;  %v4648_v14 = vrot.slane %v4643_v12, %v17205_v11  ;;  %v4652_v46 = vrot.slane %v4643_v12, %v17211_v13 }
 0x6fc   : > { %4738 = vmatpush1.bf16.msra.mxu0 %v14929_v16 }
 0x6fd   : > { %v17091_v28 = vadd.f32 %v11768_v26, %v4590_v27  ;;  %4739 = vmatprep.subr.bf16.mxu0 %v14934_v23 }
 0x6ff   : > { %4601 = vadd.xlane.f32.xlu0 %v17091_v28 }
 0x700   : > { %4740 = vmatpush1.bf16.msra.mxu0 %v14932_v24 }
 0x701   : > { %4741 = vmatprep.subr.bf16.mxu0 %v14937_v38 }
 0x704   : > { %4742 = vmatpush1.bf16.msra.mxu0 %v14935_v40 }
 0x705   : > { %4743 = vmatprep.subr.bf16.mxu0 %v14940_v41 }
 0x708   : > { %4744 = vmatpush1.bf16.msra.mxu0 %v14938_v42 }
 0x709   : > { %4745 = vmatprep.subr.bf16.mxu0 %v14943_v43 }
 0x70c   : > { %4746 = vmatpush1.bf16.msra.mxu0 %v14941_v31 }
 0x70d   : > { %4747 = vmatprep.subr.bf16.mxu0 %v14946_v44 }
 0x710   : > { %4748 = vmatpush1.bf16.msra.mxu0 %v14944_v45 }
 0x711   : > { %4749 = vmatprep.subr.bf16.mxu0 %v14949_v48 }
 0x714   : > { %4750 = vmatpush1.bf16.msra.mxu0 %v14947_v50  ;;  %v11787_v50 = vld [vmem:[%s19492_s24] ss:$0 sm:$0xff] }
 0x715   : > { %14030 = vmatprep.subr.bf16.mxu0 %v15793_v19 }
 0x78c   : > { %v4602_v35 = vpop.xlane.xlu0 %4601 }
 0x78d   : > { %v4603_v36 = vmul.f32 0.0078125, %v4602_v35 }
 0x78f   : > { %v4604_v37 = vsub.f32 %v17091_v28, %v4603_v36 }
 0x791   : > { %v4605_v33 = vmul.f32 %v4604_v37, %v4604_v37 }
 0x793   : > { %4606 = vadd.xlane.f32.xlu1 %v4605_v33 }
 0x820   : > { %v4607_v52 = vpop.xlane.xlu1 %4606 }
 0x821   : > { %v4608_v58 = vmul.f32 0.0078125, %v4607_v52 }
 0x823   : > { %v4609_v53 = vadd.f32 1e-05, %v4608_v58 }
 0x825   : > { %15664 = vrsqrt.f32 %v4609_v53 }
 0x82f   : > { %v15665_v59 = vpop.eup %15664 }
 0x830   : > { %v4611_v56 = vmul.f32 %v15665_v59, %v4604_v37 }
 0x832   : > { %v4618_v39 = vmul.f32 %v11769_v55, %v4611_v56 }
 0x834   : > { %v4625_v51 = vadd.f32 %v11770_v34, %v4618_v39  ;;  %v14966_v34 = vld [vmem:[%s19487_s25 + $0x200] sm:$0xff]  }
 0x835   : > { %v14967_v39 = vld [vmem:[%s19487_s25 + $0x240] sm:$0xff]  }
 0x836   : > { %v4626_v54 = vpack.c.bf16 %v4625_v51, %v4625_v51  ;;  %v14968_v51 = vld [vmem:[%s19487_s25 + $0x208] sm:$0xff]  }
 0x838   : > { %4768 = vmatmul.mubr.bf16.vlgmr.msra.gmra.mrb[96].mxu0 %v4626_v54  ;;  %v14970_v54 = vld [vmem:[%s19487_s25 + $0x210] sm:$0xff]  }
 0x839   : > { %14046 = vmatprep.mubr.msk.bf16.mxu0 %vm15794_vm7, %v15793_v19  ;;  %14031 = vmatpush3.bf16.msra.mxu0 %v14966_v34  ;;  %v15010_v34 = vld [vmem:[%s19487_s25 + $0x330] sm:$0xff]  }
 0x83a   : > { %14032 = vmatprep.subr.bf16.mxu0 %v15793_v19 }
 0x83d   : > { %14033 = vmatpush3.bf16.msra.mxu0 %v14968_v51  ;;  %v15012_v51 = vld [vmem:[%s19487_s25 + $0x338] sm:$0xff]  }
 0x83e   : > { %14034 = vmatprep.subr.bf16.mxu0 %v15793_v19 }
 0x841   : > { %14035 = vmatpush3.bf16.msra.mxu0 %v14970_v54  ;;  %v15014_v54 = vld [vmem:[%s19487_s25 + $0x380] sm:$0xff]  }
 0x842   : > { %14036 = vmatprep.subr.bf16.mxu0 %v15793_v19 }
 0x845   : > { %14037 = vmatpush3.bf16.msra.mxu0 %v14972_v0  ;;  %v15020_v0 = vld [vmem:[%s19487_s25 + $0x398] sm:$0xff]  }
 0x846   : > { %14038 = vmatprep.subr.bf16.mxu0 %v15793_v19 }
 0x849   : > { %14039 = vmatpush3.bf16.msra.mxu0 %v14974_v2  ;;  %v15022_v2 = vld [vmem:[%s19487_s25 + $0x3a0] sm:$0xff]  }
 0x84a   : > { %14040 = vmatprep.subr.bf16.mxu0 %v15793_v19 }
 0x84d   : > { %14041 = vmatpush3.bf16.msra.mxu0 %v14976_v3  ;;  %v15024_v3 = vld [vmem:[%s19487_s25 + $0x3a8] sm:$0xff]  }
 0x84e   : > { %14042 = vmatprep.subr.bf16.mxu0 %v15793_v19 }
 0x851   : > { %14043 = vmatpush3.bf16.msra.mxu0 %v14978_v4  ;;  %v15026_v4 = vld [vmem:[%s19487_s25 + $0x3b0] sm:$0xff]  }
 0x852   : > { %14044 = vmatprep.subr.bf16.mxu0 %v15793_v19 }
 0x855   : > { %14045 = vmatpush3.bf16.msra.mxu0 %v14980_v6  ;;  %v15028_v6 = vld [vmem:[%s19487_s25 + $0x3b8] sm:$0xff]  }
 0x856   : > { %14070 = vmatprep.subr.bf16.mxu0 %v15793_v19 }
 0x90b   : > { %v4769_v15 = vpop.f32.mrb[96].mxu0 }
 0x90c   : > { %v4770_v47 = vadd.f32 %v4769_v15, %v4648_v14  ;;  %v4771_v17 = vpop.f32.mrb[97].mxu0 }
 0x90d   : > { %v4772_v18 = vadd.f32 %v4771_v17, %v4652_v46  ;;  %v4773_v22 = vpop.f32.mrb[98].mxu0  ;;  %v11806_v46 = vld [vmem:[%s19488_s19 + $0x1] ss:$0 sm:$0xff] }
 0x90e   : > { %v4776_v25 = vmul.f32 %v4770_v47, %v4770_v47  ;;  %v4774_v26 = vpop.f32.mrb[99].mxu0  ;;  %v14982_v22 = vld [vmem:[%s19487_s25 + $0x280] sm:$0xff]  }
 0x90f   : > { %v4777_v27 = vmul.f32 %v4772_v18, %v4772_v18 }
 0x910   : > { %v4778_v49 = vmul.f32 %v4776_v25, %v4770_v47  ;;  %v14983_v25 = vld [vmem:[%s19487_s25 + $0x2c0] sm:$0xff]  }
 0x911   : > { %v4779_v29 = vmul.f32 %v4777_v27, %v4772_v18  ;;  %v14984_v27 = vld [vmem:[%s19487_s25 + $0x288] sm:$0xff]  }
 0x912   : > { %v4780_v32 = vmul.f32 0.044715, %v4778_v49  ;;  %v14985_v49 = vld [vmem:[%s19487_s25 + $0x2c8] sm:$0xff]  }
 0x913   : > { %v4781_v16 = vmul.f32 0.044715, %v4779_v29  ;;  %v14986_v29 = vld [vmem:[%s19487_s25 + $0x290] sm:$0xff]  }
 0x914   : > { %v4782_v23 = vadd.f32 %v4780_v32, %v4770_v47  ;;  %v14987_v32 = vld [vmem:[%s19487_s25 + $0x2d0] sm:$0xff]  }
 0x915   : > { %v4783_v24 = vadd.f32 %v4781_v16, %v4772_v18  ;;  %v14988_v16 = vld [vmem:[%s19487_s25 + $0x298] sm:$0xff]  }
 0x916   : > { %v4784_v35 = vmul.f32 0.7978846, %v4782_v23  ;;  %v14989_v23 = vld [vmem:[%s19487_s25 + $0x2d8] sm:$0xff]  }
 0x917   : > { %v4785_v36 = vmul.f32 0.7978846, %v4783_v24  ;;  %v14990_v24 = vld [vmem:[%s19487_s25 + $0x2a0] sm:$0xff]  }
 0x918   : > { %15666 = vtanh.f32 %v4784_v35  ;;  %v14991_v35 = vld [vmem:[%s19487_s25 + $0x2e0] sm:$0xff]  }
 0x919   : > { %15668 = vtanh.f32 %v4785_v36  ;;  %v14992_v36 = vld [vmem:[%s19487_s25 + $0x2a8] sm:$0xff]  }
 0x922   : > { %v15667_v37 = vpop.eup %15666 }
 0x923   : > { %v15669_v33 = vpop.eup %15668  ;;  %v4788_v38 = vadd.f32 1.0, %v15667_v37  ;;  %v14993_v37 = vld [vmem:[%s19487_s25 + $0x2e8] sm:$0xff]  }
 0x924   : > { %v4789_v40 = vadd.f32 1.0, %v15669_v33  ;;  %v14994_v33 = vld [vmem:[%s19487_s25 + $0x2b0] sm:$0xff]  }
 0x925   : > { %v4790_v41 = vmul.f32 0.5, %v4788_v38  ;;  %v14995_v38 = vld [vmem:[%s19487_s25 + $0x2f0] sm:$0xff]  }
 0x926   : > { %v4791_v42 = vmul.f32 0.5, %v4789_v40  ;;  %v14996_v40 = vld [vmem:[%s19487_s25 + $0x2b8] sm:$0xff]  }
 0x927   : > { %v4792_v43 = vmul.f32 %v4790_v41, %v4770_v47  ;;  %v11807_v47 = vld [vmem:[%s19489_s3 + $0x1] ss:$0 sm:$0xff]  ;;  %v14997_v41 = vld [vmem:[%s19487_s25 + $0x2f8] sm:$0xff]  }
 0x928   : > { %v4793_v31 = vmul.f32 %v4791_v42, %v4772_v18  ;;  %v14998_v42 = vld [vmem:[%s19487_s25 + $0x300] sm:$0xff]  }
 0x929   : > { %v4794_v45 = vpack.c.bf16 %v4792_v43, %v4792_v43  ;;  %v14999_v43 = vld [vmem:[%s19487_s25 + $0x340] sm:$0xff]  }
 0x92a   : > { %v4795_v44 = vpack.c.bf16 %v4793_v31, %v4793_v31  ;;  %v15000_v31 = vld [vmem:[%s19487_s25 + $0x308] sm:$0xff]  }
 0x92c   : > { %4963 = vmatprep.mubr.bf16.mxu1 %v4795_v44  ;;  %v15001_v44 = vld [vmem:[%s19487_s25 + $0x348] sm:$0xff]  }
 0x92d   : > { %4964 = vmatmul.mubr.bf16.vlgmr.msra.gmra.mrb[96].mxu1 %v4794_v45  ;;  %v15002_v45 = vld [vmem:[%s19487_s25 + $0x310] sm:$0xff]  }
 0x92e   : > { %14066 = vmatprep.mubr.msk.bf16.mxu1 %vm15794_vm7, %v15793_v19  ;;  %14051 = vmatpush3.bf16.msra.mxu1 %v14967_v39  ;;  %v15011_v39 = vld [vmem:[%s19487_s25 + $0x370] sm:$0xff]  }
 0x92f   : > { %14052 = vmatprep.subr.bf16.mxu1 %v15793_v19 }
 0xa00   : > { %v13092_v48 = vpop.f32.mrb[96].mxu1 }
 0xa01   : > { %v13093_v52 = vpop.f32.mrb[97].mxu1 }
 0xa02   : > { %v13094_v58 = vadd.f32 %v13093_v52, %v13092_v48  ;;  %v13095_v53 = vpop.f32.mrb[98].mxu1  ;;  %v15003_v48 = vld [vmem:[%s19487_s25 + $0x350] sm:$0xff]   ;;  %v15005_v52 = vld [vmem:[%s19487_s25 + $0x358] sm:$0xff]  }
 0xa03   : > { %v13096_v59 = vpop.f32.mrb[99].mxu1  ;;  %v15007_v53 = vld [vmem:[%s19487_s25 + $0x360] sm:$0xff]  }
 0xa04   : > { %v4966_v55 = vadd.f32 %v13094_v58, %v11787_v50  ;;  %v15004_v50 = vld [vmem:[%s19487_s25 + $0x318] sm:$0xff]   ;;  %v15006_v58 = vld [vmem:[%s19487_s25 + $0x320] sm:$0xff]   ;;  %v15008_v59 = vld [vmem:[%s19487_s25 + $0x328] sm:$0xff]  }
 0xa06   : > { %v17221_v56 = vadd.f32 %v4966_v55, %v17091_v28  ;;  %v14969_v28 = vld [vmem:[%s19487_s25 + $0x248] sm:$0xff]  }
 0xa07   : > { %14053 = vmatpush3.bf16.msra.mxu1 %v14969_v28  ;;  %v15009_v55 = vld [vmem:[%s19487_s25 + $0x368] sm:$0xff]   ;;  %v15013_v28 = vld [vmem:[%s19487_s25 + $0x378] sm:$0xff]  }
 0xa08   : > { %4976 = vadd.xlane.f32.xlu0 %v17221_v56  ;;  %14054 = vmatprep.subr.bf16.mxu1 %v15793_v19 }
 0xa0b   : > { %14055 = vmatpush3.bf16.msra.mxu1 %v14971_v57  ;;  %v15015_v57 = vld [vmem:[%s19487_s25 + $0x3c0] sm:$0xff]  }
 0xa0c   : > { %14056 = vmatprep.subr.bf16.mxu1 %v15793_v19 }
 0xa0f   : > { %14057 = vmatpush3.bf16.msra.mxu1 %v14973_v1  ;;  %v15021_v1 = vld [vmem:[%s19487_s25 + $0x3d8] sm:$0xff]  }
 0xa10   : > { %14058 = vmatprep.subr.bf16.mxu1 %v15793_v19 }
 0xa13   : > { %14059 = vmatpush3.bf16.msra.mxu1 %v14975_v20  ;;  %v15023_v20 = vld [vmem:[%s19487_s25 + $0x3e0] sm:$0xff]  }
 0xa14   : > { %14060 = vmatprep.subr.bf16.mxu1 %v15793_v19 }
 0xa17   : > { %14061 = vmatpush3.bf16.msra.mxu1 %v14977_v21  ;;  %v15025_v21 = vld [vmem:[%s19487_s25 + $0x3e8] sm:$0xff]  }
 0xa18   : > { %14062 = vmatprep.subr.bf16.mxu1 %v15793_v19 }
 0xa1b   : > { %14063 = vmatpush3.bf16.msra.mxu1 %v14979_v5  ;;  %v15027_v5 = vld [vmem:[%s19487_s25 + $0x3f0] sm:$0xff]  }
 0xa1c   : > { %14064 = vmatprep.subr.bf16.mxu1 %v15793_v19 }
 0xa1f   : > { %14065 = vmatpush3.bf16.msra.mxu1 %v14981_v7  ;;  %v15029_v7 = vld [vmem:[%s19487_s25 + $0x3f8] sm:$0xff]  }
 0xa20   : > { %14090 = vmatprep.subr.bf16.mxu1 %v15793_v19 }
 0xa95   : > { %v4977_v60 = vpop.xlane.xlu0 %4976 }
 0xa96   : > { %v4978_v61 = vmul.f32 0.0078125, %v4977_v60  ;;  %v15016_v60 = vld [vmem:[%s19487_s25 + $0x388] sm:$0xff]  }
 0xa98   : > { %v4979_v62 = vsub.f32 %v17221_v56, %v4978_v61  ;;  %v15017_v61 = vld [vmem:[%s19487_s25 + $0x3c8] sm:$0xff]  }
 0xa9a   : > { %v4980_v63 = vmul.f32 %v4979_v62, %v4979_v62 }
 0xa9c   : > { %4981 = vadd.xlane.f32.xlu1 %v4980_v63  ;;  %v15019_v63 = vld [vmem:[%s19487_s25 + $0x3d0] sm:$0xff]  }
 0xb29   : > { %v4982_v8 = vpop.xlane.xlu1 %4981 }
 0xb2a   : > { %v4983_v9 = vmul.f32 0.0078125, %v4982_v8  ;;  %v15030_v8 = vld [vmem:[%s19490_s18 + $0x200] sm:$0xff]  }
 0xb2c   : > { %v4984_v12 = vadd.f32 1e-05, %v4983_v9  ;;  %v15031_v9 = vld [vmem:[%s19490_s18 + $0x240] sm:$0xff]  }
 0xb2e   : > { %15670 = vrsqrt.f32 %v4984_v12  ;;  %v15032_v12 = vld [vmem:[%s19490_s18 + $0x208] sm:$0xff]  }
 0xb38   : > { %v15671_v14 = vpop.eup %15670 }
 0xb39   : > { %v4986_v15 = vmul.f32 %v15671_v14, %v4979_v62  ;;  %v15018_v62 = vld [vmem:[%s19487_s25 + $0x390] sm:$0xff]   ;;  %v15033_v14 = vld [vmem:[%s19490_s18 + $0x248] sm:$0xff]  }
 0xb3b   : > { %v4993_v17 = vmul.f32 %v11806_v46, %v4986_v15  ;;  %v15034_v46 = vld [vmem:[%s19490_s18 + $0x210] sm:$0xff]  }
 0xb3c   : > { %v15035_v15 = vld [vmem:[%s19490_s18 + $0x250] sm:$0xff]  }
 0xb3d   : > { %v5000_v18 = vadd.f32 %v11807_v47, %v4993_v17  ;;  %v15036_v47 = vld [vmem:[%s19490_s18 + $0x218] sm:$0xff]  }
 0xb3e   : > { %v15037_v17 = vld [vmem:[%s19490_s18 + $0x258] sm:$0xff]  }
 0xb3f   : > { %v17301_v26 = vpack.c.bf16 %v5000_v18, %v5000_v18  ;;  %v15038_v18 = vld [vmem:[%s19490_s18 + $0x220] sm:$0xff]  }
 0xb41   : > { %14047 = vmatmul.mubr.bf16.vlgmr.msra.gmra.mrb[100].mxu0 %v17301_v26  ;;  %14067 = vmatmul.mubr.bf16.vlgmr.msra.gmra.mrb[100].mxu1 %v17301_v26 }
 0xb42   : > { %14071 = vmatpush3.bf16.msra.mxu0 %v14982_v22  ;;  %14091 = vmatpush3.bf16.msra.mxu1 %v14983_v25  ;;  %v15039_v22 = vld [vmem:[%s19490_s18 + $0x260] sm:$0xff]   ;;  %v15040_v25 = vld [vmem:[%s19490_s18 + $0x228] sm:$0xff]  }
 0xb43   : > { %14072 = vmatprep.subr.bf16.mxu0 %v15793_v19  ;;  %14092 = vmatprep.subr.bf16.mxu1 %v15793_v19 }
 0xb44   : > { %14086 = vmatprep.mubr.msk.bf16.mxu0 %vm15794_vm7, %v15793_v19  ;;  %14106 = vmatprep.mubr.msk.bf16.mxu1 %vm15794_vm7, %v15793_v19 }
 0xb46   : > { %14073 = vmatpush3.bf16.msra.mxu0 %v14984_v27  ;;  %14093 = vmatpush3.bf16.msra.mxu1 %v14985_v49  ;;  %v15041_v27 = vld [vmem:[%s19490_s18 + $0x268] sm:$0xff]   ;;  %v15042_v49 = vld [vmem:[%s19490_s18 + $0x230] sm:$0xff]  }
 0xb47   : > { %14074 = vmatprep.subr.bf16.mxu0 %v15793_v19  ;;  %14094 = vmatprep.subr.bf16.mxu1 %v15793_v19 }
 0xb4a   : > { %14075 = vmatpush3.bf16.msra.mxu0 %v14986_v29  ;;  %14095 = vmatpush3.bf16.msra.mxu1 %v14987_v32  ;;  %v15043_v29 = vld [vmem:[%s19490_s18 + $0x270] sm:$0xff]   ;;  %v15044_v32 = vld [vmem:[%s19490_s18 + $0x238] sm:$0xff]  }
 0xb4b   : > { %14076 = vmatprep.subr.bf16.mxu0 %v15793_v19  ;;  %14096 = vmatprep.subr.bf16.mxu1 %v15793_v19 }
 0xb4e   : > { %14077 = vmatpush3.bf16.msra.mxu0 %v14988_v16  ;;  %14097 = vmatpush3.bf16.msra.mxu1 %v14989_v23  ;;  %v15045_v16 = vld [vmem:[%s19490_s18 + $0x278] sm:$0xff]   ;;  %v15046_v23 = vld [vmem:[%s19490_s18 + $0x280] sm:$0xff]  }
 0xb4f   : > { %14078 = vmatprep.subr.bf16.mxu0 %v15793_v19  ;;  %14098 = vmatprep.subr.bf16.mxu1 %v15793_v19 }
 0xb52   : > { %14079 = vmatpush3.bf16.msra.mxu0 %v14990_v24  ;;  %14099 = vmatpush3.bf16.msra.mxu1 %v14991_v35  ;;  %v15047_v24 = vld [vmem:[%s19490_s18 + $0x2c0] sm:$0xff]   ;;  %v15048_v35 = vld [vmem:[%s19490_s18 + $0x288] sm:$0xff]  }
 0xb53   : > { %14080 = vmatprep.subr.bf16.mxu0 %v15793_v19  ;;  %14100 = vmatprep.subr.bf16.mxu1 %v15793_v19 }
 0xb56   : > { %14081 = vmatpush3.bf16.msra.mxu0 %v14992_v36  ;;  %14101 = vmatpush3.bf16.msra.mxu1 %v14993_v37  ;;  %v15049_v36 = vld [vmem:[%s19490_s18 + $0x2c8] sm:$0xff]   ;;  %v15050_v37 = vld [vmem:[%s19490_s18 + $0x290] sm:$0xff]  }
 0xb57   : > { %14082 = vmatprep.subr.bf16.mxu0 %v15793_v19  ;;  %14102 = vmatprep.subr.bf16.mxu1 %v15793_v19 }
 0xb5a   : > { %14083 = vmatpush3.bf16.msra.mxu0 %v14994_v33  ;;  %14103 = vmatpush3.bf16.msra.mxu1 %v14995_v38  ;;  %v15051_v33 = vld [vmem:[%s19490_s18 + $0x2d0] sm:$0xff]   ;;  %v15052_v38 = vld [vmem:[%s19490_s18 + $0x298] sm:$0xff]  }
 0xb5b   : > { %14084 = vmatprep.subr.bf16.mxu0 %v15793_v19  ;;  %14104 = vmatprep.subr.bf16.mxu1 %v15793_v19 }
 0xb5e   : > { %14085 = vmatpush3.bf16.msra.mxu0 %v14996_v40  ;;  %14105 = vmatpush3.bf16.msra.mxu1 %v14997_v41  ;;  %v15053_v40 = vld [vmem:[%s19490_s18 + $0x2d8] sm:$0xff]   ;;  %v15054_v41 = vld [vmem:[%s19490_s18 + $0x2a0] sm:$0xff]  }
 0xb5f   : > { %14110 = vmatprep.subr.bf16.mxu0 %v15793_v19  ;;  %14130 = vmatprep.subr.bf16.mxu1 %v15793_v19 }
 0xb61   : > { %14087 = vmatmul.mubr.bf16.vlgmr.msra.gmra.mrb[104].mxu0 %v17301_v26  ;;  %14107 = vmatmul.mubr.bf16.vlgmr.msra.gmra.mrb[104].mxu1 %v17301_v26 }
 0xb62   : > { %14111 = vmatpush3.bf16.msra.mxu0 %v14998_v42  ;;  %14131 = vmatpush3.bf16.msra.mxu1 %v14999_v43  ;;  %v15055_v42 = vld [vmem:[%s19490_s18 + $0x2e0] sm:$0xff]   ;;  %v15056_v43 = vld [vmem:[%s19490_s18 + $0x2a8] sm:$0xff]  }
 0xb63   : > { %14112 = vmatprep.subr.bf16.mxu0 %v15793_v19  ;;  %14132 = vmatprep.subr.bf16.mxu1 %v15793_v19 }
 0xb64   : > { %14126 = vmatprep.mubr.msk.bf16.mxu0 %vm15794_vm7, %v15793_v19  ;;  %14146 = vmatprep.mubr.msk.bf16.mxu1 %vm15794_vm7, %v15793_v19 }
 0xb66   : > { %14113 = vmatpush3.bf16.msra.mxu0 %v15000_v31  ;;  %14133 = vmatpush3.bf16.msra.mxu1 %v15001_v44  ;;  %v15057_v31 = vld [vmem:[%s19490_s18 + $0x2e8] sm:$0xff]   ;;  %v15058_v44 = vld [vmem:[%s19490_s18 + $0x2b0] sm:$0xff]  }
 0xb67   : > { %14114 = vmatprep.subr.bf16.mxu0 %v15793_v19  ;;  %14134 = vmatprep.subr.bf16.mxu1 %v15793_v19 }
 0xb6a   : > { %14115 = vmatpush3.bf16.msra.mxu0 %v15002_v45  ;;  %14135 = vmatpush3.bf16.msra.mxu1 %v15003_v48  ;;  %v15059_v45 = vld [vmem:[%s19490_s18 + $0x2f0] sm:$0xff]   ;;  %v15060_v48 = vld [vmem:[%s19490_s18 + $0x2b8] sm:$0xff]  }
 0xb6b   : > { %14116 = vmatprep.subr.bf16.mxu0 %v15793_v19  ;;  %14136 = vmatprep.subr.bf16.mxu1 %v15793_v19 }
 0xb6e   : > { %14117 = vmatpush3.bf16.msra.mxu0 %v15004_v50  ;;  %14137 = vmatpush3.bf16.msra.mxu1 %v15005_v52  ;;  %v15061_v50 = vld [vmem:[%s19490_s18 + $0x2f8] sm:$0xff]   ;;  %v15062_v52 = vld [vmem:[%s19490_s18 + $0x300] sm:$0xff]  }
 0xb6f   : > { %14118 = vmatprep.subr.bf16.mxu0 %v15793_v19  ;;  %14138 = vmatprep.subr.bf16.mxu1 %v15793_v19 }
 0xb72   : > { %14119 = vmatpush3.bf16.msra.mxu0 %v15006_v58  ;;  %14139 = vmatpush3.bf16.msra.mxu1 %v15007_v53  ;;  %v15063_v58 = vld [vmem:[%s19490_s18 + $0x340] sm:$0xff]   ;;  %v15064_v53 = vld [vmem:[%s19490_s18 + $0x308] sm:$0xff]  }
 0xb73   : > { %14120 = vmatprep.subr.bf16.mxu0 %v15793_v19  ;;  %14140 = vmatprep.subr.bf16.mxu1 %v15793_v19 }
 0xb76   : > { %14121 = vmatpush3.bf16.msra.mxu0 %v15008_v59  ;;  %14141 = vmatpush3.bf16.msra.mxu1 %v15009_v55  ;;  %v15065_v59 = vld [vmem:[%s19490_s18 + $0x348] sm:$0xff]   ;;  %v15066_v55 = vld [vmem:[%s19490_s18 + $0x310] sm:$0xff]  }
 0xb77   : > { %14122 = vmatprep.subr.bf16.mxu0 %v15793_v19  ;;  %14142 = vmatprep.subr.bf16.mxu1 %v15793_v19 }
 0xb7a   : > { %14123 = vmatpush3.bf16.msra.mxu0 %v15010_v34  ;;  %14143 = vmatpush3.bf16.msra.mxu1 %v15011_v39  ;;  %v15067_v34 = vld [vmem:[%s19490_s18 + $0x350] sm:$0xff]   ;;  %v15068_v39 = vld [vmem:[%s19490_s18 + $0x318] sm:$0xff]  }
 0xb7b   : > { %14124 = vmatprep.subr.bf16.mxu0 %v15793_v19  ;;  %14144 = vmatprep.subr.bf16.mxu1 %v15793_v19 }
 0xb7e   : > { %14125 = vmatpush3.bf16.msra.mxu0 %v15012_v51  ;;  %14145 = vmatpush3.bf16.msra.mxu1 %v15013_v28  ;;  %v15069_v51 = vld [vmem:[%s19490_s18 + $0x358] sm:$0xff]   ;;  %v15070_v28 = vld [vmem:[%s19490_s18 + $0x320] sm:$0xff]  }
 0xb7f   : > { %14150 = vmatprep.subr.bf16.mxu0 %v15793_v19  ;;  %14170 = vmatprep.subr.bf16.mxu1 %v15793_v19 }
 0xb81   : > { %14127 = vmatmul.mubr.bf16.vlgmr.msra.gmra.mrb[108].mxu0 %v17301_v26  ;;  %14147 = vmatmul.mubr.bf16.vlgmr.msra.gmra.mrb[108].mxu1 %v17301_v26 }
 0xb82   : > { %14151 = vmatpush3.bf16.msra.mxu0 %v15014_v54  ;;  %14171 = vmatpush3.bf16.msra.mxu1 %v15015_v57  ;;  %v15071_v54 = vld [vmem:[%s19490_s18 + $0x360] sm:$0xff]   ;;  %v15072_v57 = vld [vmem:[%s19490_s18 + $0x328] sm:$0xff]  }
 0xb83   : > { %14152 = vmatprep.subr.bf16.mxu0 %v15793_v19  ;;  %14172 = vmatprep.subr.bf16.mxu1 %v15793_v19 }
 0xb84   : > { %14166 = vmatprep.mubr.msk.bf16.mxu0 %vm15794_vm7, %v15793_v19  ;;  %14186 = vmatprep.mubr.msk.bf16.mxu1 %vm15794_vm7, %v15793_v19 }
 0xb86   : > { %14153 = vmatpush3.bf16.msra.mxu0 %v15016_v60  ;;  %14173 = vmatpush3.bf16.msra.mxu1 %v15017_v61  ;;  %v15073_v60 = vld [vmem:[%s19490_s18 + $0x368] sm:$0xff]   ;;  %v15074_v61 = vld [vmem:[%s19490_s18 + $0x330] sm:$0xff]  }
 0xb87   : > { %14154 = vmatprep.subr.bf16.mxu0 %v15793_v19  ;;  %14174 = vmatprep.subr.bf16.mxu1 %v15793_v19 }
 0xb8a   : > { %14155 = vmatpush3.bf16.msra.mxu0 %v15018_v62  ;;  %14175 = vmatpush3.bf16.msra.mxu1 %v15019_v63  ;;  %v15075_v62 = vld [vmem:[%s19490_s18 + $0x370] sm:$0xff]   ;;  %v15076_v63 = vld [vmem:[%s19490_s18 + $0x338] sm:$0xff]  }
 0xb8b   : > { %14156 = vmatprep.subr.bf16.mxu0 %v15793_v19  ;;  %14176 = vmatprep.subr.bf16.mxu1 %v15793_v19 }
 0xb8e   : > { %14157 = vmatpush3.bf16.msra.mxu0 %v15020_v0  ;;  %14177 = vmatpush3.bf16.msra.mxu1 %v15021_v1  ;;  %v15077_v0 = vld [vmem:[%s19490_s18 + $0x378] sm:$0xff]   ;;  %v15078_v1 = vld [vmem:[%s19490_s18 + $0x380] sm:$0xff]  }
 0xb8f   : > { %14158 = vmatprep.subr.bf16.mxu0 %v15793_v19  ;;  %14178 = vmatprep.subr.bf16.mxu1 %v15793_v19 }
 0xb92   : > { %14159 = vmatpush3.bf16.msra.mxu0 %v15022_v2  ;;  %14179 = vmatpush3.bf16.msra.mxu1 %v15023_v20  ;;  %v15079_v2 = vld [vmem:[%s19490_s18 + $0x3c0] sm:$0xff]   ;;  %v15080_v20 = vld [vmem:[%s19490_s18 + $0x388] sm:$0xff]  }
 0xb93   : > { %14160 = vmatprep.subr.bf16.mxu0 %v15793_v19  ;;  %14180 = vmatprep.subr.bf16.mxu1 %v15793_v19 }
 0xb96   : > { %14161 = vmatpush3.bf16.msra.mxu0 %v15024_v3  ;;  %14181 = vmatpush3.bf16.msra.mxu1 %v15025_v21  ;;  %v15081_v3 = vld [vmem:[%s19490_s18 + $0x3c8] sm:$0xff]   ;;  %v15082_v21 = vld [vmem:[%s19490_s18 + $0x390] sm:$0xff]  }
 0xb97   : > { %14162 = vmatprep.subr.bf16.mxu0 %v15793_v19  ;;  %14182 = vmatprep.subr.bf16.mxu1 %v15793_v19 }
 0xb9a   : > { %14163 = vmatpush3.bf16.msra.mxu0 %v15026_v4  ;;  %14183 = vmatpush3.bf16.msra.mxu1 %v15027_v5  ;;  %v15083_v4 = vld [vmem:[%s19490_s18 + $0x3d0] sm:$0xff]   ;;  %v15084_v5 = vld [vmem:[%s19490_s18 + $0x398] sm:$0xff]  }
 0xb9b   : > { %14164 = vmatprep.subr.bf16.mxu0 %v15793_v19  ;;  %14184 = vmatprep.subr.bf16.mxu1 %v15793_v19 }
 0xb9e   : > { %14165 = vmatpush3.bf16.msra.mxu0 %v15028_v6  ;;  %14185 = vmatpush3.bf16.msra.mxu1 %v15029_v7  ;;  %v15085_v6 = vld [vmem:[%s19490_s18 + $0x3d8] sm:$0xff]   ;;  %v15086_v7 = vld [vmem:[%s19490_s18 + $0x3a0] sm:$0xff]  }
 0xb9f   : > { %14190 = vmatprep.subr.bf16.mxu0 %v15793_v19  ;;  %14210 = vmatprep.subr.bf16.mxu1 %v15793_v19 }
 0xba1   : > { %14167 = vmatmul.mubr.bf16.vlgmr.msra.gmra.mrb[112].mxu0 %v17301_v26  ;;  %14187 = vmatmul.mubr.bf16.vlgmr.msra.gmra.mrb[112].mxu1 %v17301_v26 }
 0xba2   : > { %14191 = vmatpush3.bf16.msra.mxu0 %v15030_v8  ;;  %14211 = vmatpush3.bf16.msra.mxu1 %v15031_v9  ;;  %v15087_v8 = vld [vmem:[%s19490_s18 + $0x3e0] sm:$0xff]   ;;  %v15088_v9 = vld [vmem:[%s19490_s18 + $0x3a8] sm:$0xff]  }
 0xba3   : > { %14192 = vmatprep.subr.bf16.mxu0 %v15793_v19  ;;  %14212 = vmatprep.subr.bf16.mxu1 %v15793_v19 }
 0xba4   : > { %14206 = vmatprep.mubr.msk.bf16.mxu0 %vm15794_vm7, %v15793_v19  ;;  %14226 = vmatprep.mubr.msk.bf16.mxu1 %vm15794_vm7, %v15793_v19 }
 0xba6   : > { %14193 = vmatpush3.bf16.msra.mxu0 %v15032_v12  ;;  %14213 = vmatpush3.bf16.msra.mxu1 %v15033_v14  ;;  %v15089_v12 = vld [vmem:[%s19490_s18 + $0x3e8] sm:$0xff]  }
 0xba7   : > { %14194 = vmatprep.subr.bf16.mxu0 %v15793_v19  ;;  %14214 = vmatprep.subr.bf16.mxu1 %v15793_v19 }
 0xbaa   : > { %14195 = vmatpush3.bf16.msra.mxu0 %v15034_v46  ;;  %14215 = vmatpush3.bf16.msra.mxu1 %v15035_v15 }
 0xbab   : > { %14196 = vmatprep.subr.bf16.mxu0 %v15793_v19  ;;  %14216 = vmatprep.subr.bf16.mxu1 %v15793_v19 }
 0xbae   : > { %14197 = vmatpush3.bf16.msra.mxu0 %v15036_v47  ;;  %14217 = vmatpush3.bf16.msra.mxu1 %v15037_v17 }
 0xbaf   : > { %14198 = vmatprep.subr.bf16.mxu0 %v15793_v19  ;;  %14218 = vmatprep.subr.bf16.mxu1 %v15793_v19 }
 0xbb2   : > { %14199 = vmatpush3.bf16.msra.mxu0 %v15038_v18  ;;  %14219 = vmatpush3.bf16.msra.mxu1 %v15039_v22  ;;  %v15090_v22 = vld [vmem:[%s19490_s18 + $0x3b0] sm:$0xff]  }
 0xbb3   : > { %14200 = vmatprep.subr.bf16.mxu0 %v15793_v19  ;;  %14220 = vmatprep.subr.bf16.mxu1 %v15793_v19 }
 0xbb6   : > { %14201 = vmatpush3.bf16.msra.mxu0 %v15040_v25  ;;  %14221 = vmatpush3.bf16.msra.mxu1 %v15041_v27  ;;  %v15091_v25 = vld [vmem:[%s19490_s18 + $0x3f0] sm:$0xff]  }
 0xbb7   : > { %14202 = vmatprep.subr.bf16.mxu0 %v15793_v19  ;;  %14222 = vmatprep.subr.bf16.mxu1 %v15793_v19 }
 0xbba   : > { %14203 = vmatpush3.bf16.msra.mxu0 %v15042_v49  ;;  %14223 = vmatpush3.bf16.msra.mxu1 %v15043_v29  ;;  %v15092_v29 = vld [vmem:[%s19490_s18 + $0x3b8] sm:$0xff]  }
 0xbbb   : > { %14204 = vmatprep.subr.bf16.mxu0 %v15793_v19  ;;  %14224 = vmatprep.subr.bf16.mxu1 %v15793_v19 }
 0xbbe   : > { %14205 = vmatpush3.bf16.msra.mxu0 %v15044_v32  ;;  %14225 = vmatpush3.bf16.msra.mxu1 %v15045_v16  ;;  %v15093_v32 = vld [vmem:[%s19490_s18 + $0x3f8] sm:$0xff]   ;;  %v15094_v16 = vld [vmem:[%s19418_s8 + $0x200] sm:$0xff]  }
 0xbbf   : > { %14230 = vmatprep.subr.bf16.mxu0 %v15793_v19  ;;  %14250 = vmatprep.subr.bf16.mxu1 %v15793_v19 }
 0xbc1   : > { %14207 = vmatmul.mubr.bf16.vlgmr.msra.gmra.mrb[116].mxu0 %v17301_v26  ;;  %14227 = vmatmul.mubr.bf16.vlgmr.msra.gmra.mrb[116].mxu1 %v17301_v26 }
 0xbc2   : > { %14231 = vmatpush3.bf16.msra.mxu0 %v15046_v23  ;;  %14251 = vmatpush3.bf16.msra.mxu1 %v15047_v24  ;;  %v15095_v23 = vld [vmem:[%s19418_s8 + $0x240] sm:$0xff]   ;;  %v15096_v24 = vld [vmem:[%s19418_s8 + $0x208] sm:$0xff]  }
 0xbc3   : > { %14232 = vmatprep.subr.bf16.mxu0 %v15793_v19  ;;  %14252 = vmatprep.subr.bf16.mxu1 %v15793_v19 }
 0xbc4   : > { %14246 = vmatprep.mubr.msk.bf16.mxu0 %vm15794_vm7, %v15793_v19  ;;  %14266 = vmatprep.mubr.msk.bf16.mxu1 %vm15794_vm7, %v15793_v19 }
 0xbc6   : > { %14233 = vmatpush3.bf16.msra.mxu0 %v15048_v35  ;;  %14253 = vmatpush3.bf16.msra.mxu1 %v15049_v36  ;;  %v15097_v35 = vld [vmem:[%s19418_s8 + $0x248] sm:$0xff]   ;;  %v15098_v36 = vld [vmem:[%s19418_s8 + $0x210] sm:$0xff]  }
 0xbc7   : > { %14234 = vmatprep.subr.bf16.mxu0 %v15793_v19  ;;  %14254 = vmatprep.subr.bf16.mxu1 %v15793_v19 }
 0xbca   : > { %14235 = vmatpush3.bf16.msra.mxu0 %v15050_v37  ;;  %14255 = vmatpush3.bf16.msra.mxu1 %v15051_v33  ;;  %v15099_v37 = vld [vmem:[%s19418_s8 + $0x250] sm:$0xff]   ;;  %v15100_v33 = vld [vmem:[%s19418_s8 + $0x218] sm:$0xff]  }
 0xbcb   : > { %14236 = vmatprep.subr.bf16.mxu0 %v15793_v19  ;;  %14256 = vmatprep.subr.bf16.mxu1 %v15793_v19 }
 0xbce   : > { %14237 = vmatpush3.bf16.msra.mxu0 %v15052_v38  ;;  %14257 = vmatpush3.bf16.msra.mxu1 %v15053_v40  ;;  %v15101_v38 = vld [vmem:[%s19418_s8 + $0x258] sm:$0xff]   ;;  %v15102_v40 = vld [vmem:[%s19418_s8 + $0x220] sm:$0xff]  }
 0xbcf   : > { %14238 = vmatprep.subr.bf16.mxu0 %v15793_v19  ;;  %14258 = vmatprep.subr.bf16.mxu1 %v15793_v19 }
 0xbd2   : > { %14239 = vmatpush3.bf16.msra.mxu0 %v15054_v41  ;;  %14259 = vmatpush3.bf16.msra.mxu1 %v15055_v42  ;;  %v15103_v41 = vld [vmem:[%s19418_s8 + $0x260] sm:$0xff]   ;;  %v15104_v42 = vld [vmem:[%s19418_s8 + $0x228] sm:$0xff]  }
 0xbd3   : > { %14240 = vmatprep.subr.bf16.mxu0 %v15793_v19  ;;  %14260 = vmatprep.subr.bf16.mxu1 %v15793_v19 }
 0xbd6   : > { %14241 = vmatpush3.bf16.msra.mxu0 %v15056_v43  ;;  %14261 = vmatpush3.bf16.msra.mxu1 %v15057_v31  ;;  %v15105_v43 = vld [vmem:[%s19418_s8 + $0x268] sm:$0xff]  }
 0xbd7   : > { %14242 = vmatprep.subr.bf16.mxu0 %v15793_v19  ;;  %14262 = vmatprep.subr.bf16.mxu1 %v15793_v19 }
 0xbda   : > { %14243 = vmatpush3.bf16.msra.mxu0 %v15058_v44  ;;  %14263 = vmatpush3.bf16.msra.mxu1 %v15059_v45 }
 0xbdb   : > { %14244 = vmatprep.subr.bf16.mxu0 %v15793_v19  ;;  %14264 = vmatprep.subr.bf16.mxu1 %v15793_v19 }
 0xbde   : > { %14245 = vmatpush3.bf16.msra.mxu0 %v15060_v48  ;;  %14265 = vmatpush3.bf16.msra.mxu1 %v15061_v50 }
 0xbdf   : > { %14270 = vmatprep.subr.bf16.mxu0 %v15793_v19  ;;  %14290 = vmatprep.subr.bf16.mxu1 %v15793_v19 }
 0xbe1   : > { %14247 = vmatmul.mubr.bf16.vlgmr.msra.gmra.mrb[120].mxu0 %v17301_v26  ;;  %14267 = vmatmul.mubr.bf16.vlgmr.msra.gmra.mrb[120].mxu1 %v17301_v26 }
 0xbe2   : > { %14271 = vmatpush3.bf16.msra.mxu0 %v15062_v52  ;;  %14291 = vmatpush3.bf16.msra.mxu1 %v15063_v58  ;;  %v15106_v58 = vld [vmem:[%s19418_s8 + $0x230] sm:$0xff]  }
 0xbe3   : > { %14272 = vmatprep.subr.bf16.mxu0 %v15793_v19  ;;  %14292 = vmatprep.subr.bf16.mxu1 %v15793_v19 }
 0xbe4   : > { %14286 = vmatprep.mubr.msk.bf16.mxu0 %vm15794_vm7, %v15793_v19  ;;  %14306 = vmatprep.mubr.msk.bf16.mxu1 %vm15794_vm7, %v15793_v19 }
 0xbe6   : > { %14273 = vmatpush3.bf16.msra.mxu0 %v15064_v53  ;;  %14293 = vmatpush3.bf16.msra.mxu1 %v15065_v59  ;;  %v15107_v53 = vld [vmem:[%s19418_s8 + $0x270] sm:$0xff]  }
 0xbe7   : > { %14274 = vmatprep.subr.bf16.mxu0 %v15793_v19  ;;  %14294 = vmatprep.subr.bf16.mxu1 %v15793_v19 }
 0xbea   : > { %14275 = vmatpush3.bf16.msra.mxu0 %v15066_v55  ;;  %14295 = vmatpush3.bf16.msra.mxu1 %v15067_v34  ;;  %v15108_v34 = vld [vmem:[%s19418_s8 + $0x238] sm:$0xff]  }
 0xbeb   : > { %14276 = vmatprep.subr.bf16.mxu0 %v15793_v19  ;;  %14296 = vmatprep.subr.bf16.mxu1 %v15793_v19 }
 0xbee   : > { %14277 = vmatpush3.bf16.msra.mxu0 %v15068_v39  ;;  %14297 = vmatpush3.bf16.msra.mxu1 %v15069_v51  ;;  %v15109_v39 = vld [vmem:[%s19418_s8 + $0x278] sm:$0xff]   ;;  %v15110_v51 = vld [vmem:[%s19418_s8 + $0x280] sm:$0xff]  }
 0xbef   : > { %14278 = vmatprep.subr.bf16.mxu0 %v15793_v19  ;;  %14298 = vmatprep.subr.bf16.mxu1 %v15793_v19 }
 0xbf2   : > { %14279 = vmatpush3.bf16.msra.mxu0 %v15070_v28  ;;  %14299 = vmatpush3.bf16.msra.mxu1 %v15071_v54  ;;  %v15111_v28 = vld [vmem:[%s19418_s8 + $0x2c0] sm:$0xff]   ;;  %v15112_v54 = vld [vmem:[%s19418_s8 + $0x288] sm:$0xff]  }
 0xbf3   : > { %14280 = vmatprep.subr.bf16.mxu0 %v15793_v19  ;;  %14300 = vmatprep.subr.bf16.mxu1 %v15793_v19 }
 0xbf6   : > { %14281 = vmatpush3.bf16.msra.mxu0 %v15072_v57  ;;  %14301 = vmatpush3.bf16.msra.mxu1 %v15073_v60  ;;  %v15113_v57 = vld [vmem:[%s19418_s8 + $0x2c8] sm:$0xff]   ;;  %v15114_v60 = vld [vmem:[%s19418_s8 + $0x290] sm:$0xff]  }
 0xbf7   : > { %14282 = vmatprep.subr.bf16.mxu0 %v15793_v19  ;;  %14302 = vmatprep.subr.bf16.mxu1 %v15793_v19 }
 0xbfa   : > { %14283 = vmatpush3.bf16.msra.mxu0 %v15074_v61  ;;  %14303 = vmatpush3.bf16.msra.mxu1 %v15075_v62  ;;  %v15115_v61 = vld [vmem:[%s19418_s8 + $0x2d0] sm:$0xff]   ;;  %v15116_v62 = vld [vmem:[%s19418_s8 + $0x298] sm:$0xff]  }
 0xbfb   : > { %14284 = vmatprep.subr.bf16.mxu0 %v15793_v19  ;;  %14304 = vmatprep.subr.bf16.mxu1 %v15793_v19 }
 0xbfe   : > { %14285 = vmatpush3.bf16.msra.mxu0 %v15076_v63  ;;  %14305 = vmatpush3.bf16.msra.mxu1 %v15077_v0  ;;  %v15117_v63 = vld [vmem:[%s19418_s8 + $0x2d8] sm:$0xff]   ;;  %v15118_v0 = vld [vmem:[%s19418_s8 + $0x2a0] sm:$0xff]  }
 0xbff   : > { %14310 = vmatprep.subr.bf16.mxu0 %v15793_v19  ;;  %14330 = vmatprep.subr.bf16.mxu1 %v15793_v19 }
 0xc01   : > { %14287 = vmatmul.mubr.bf16.vlgmr.msra.gmra.mrb[124].mxu0 %v17301_v26  ;;  %14307 = vmatmul.mubr.bf16.vlgmr.msra.gmra.mrb[124].mxu1 %v17301_v26 }
 0xc02   : > { %14311 = vmatpush3.bf16.msra.mxu0 %v15078_v1  ;;  %14331 = vmatpush3.bf16.msra.mxu1 %v15079_v2  ;;  %v15119_v1 = vld [vmem:[%s19418_s8 + $0x2e0] sm:$0xff]   ;;  %v15120_v2 = vld [vmem:[%s19418_s8 + $0x2a8] sm:$0xff]  }
 0xc03   : > { %14312 = vmatprep.subr.bf16.mxu0 %v15793_v19  ;;  %14332 = vmatprep.subr.bf16.mxu1 %v15793_v19 }
 0xc04   : > { %14326 = vmatprep.mubr.msk.bf16.mxu0 %vm15794_vm7, %v15793_v19  ;;  %14346 = vmatprep.mubr.msk.bf16.mxu1 %vm15794_vm7, %v15793_v19 }
 0xc06   : > { %14313 = vmatpush3.bf16.msra.mxu0 %v15080_v20  ;;  %14333 = vmatpush3.bf16.msra.mxu1 %v15081_v3  ;;  %v15121_v20 = vld [vmem:[%s19418_s8 + $0x2e8] sm:$0xff]  }
 0xc07   : > { %14314 = vmatprep.subr.bf16.mxu0 %v15793_v19  ;;  %14334 = vmatprep.subr.bf16.mxu1 %v15793_v19 }
 0xc0a   : > { %14315 = vmatpush3.bf16.msra.mxu0 %v15082_v21  ;;  %14335 = vmatpush3.bf16.msra.mxu1 %v15083_v4 }
 0xc0b   : > { %14316 = vmatprep.subr.bf16.mxu0 %v15793_v19  ;;  %14336 = vmatprep.subr.bf16.mxu1 %v15793_v19 }
 0xc0e   : > { %14317 = vmatpush3.bf16.msra.mxu0 %v15084_v5  ;;  %14337 = vmatpush3.bf16.msra.mxu1 %v15085_v6 }
 0xc0f   : > { %14318 = vmatprep.subr.bf16.mxu0 %v15793_v19  ;;  %14338 = vmatprep.subr.bf16.mxu1 %v15793_v19 }
 0xc12   : > { %14319 = vmatpush3.bf16.msra.mxu0 %v15086_v7  ;;  %14339 = vmatpush3.bf16.msra.mxu1 %v15087_v8  ;;  %v15122_v8 = vld [vmem:[%s19418_s8 + $0x2b0] sm:$0xff]  }
 0xc13   : > { %14320 = vmatprep.subr.bf16.mxu0 %v15793_v19  ;;  %14340 = vmatprep.subr.bf16.mxu1 %v15793_v19 }
 0xc14   : > { %v17769_v14 = vpop.f32.mrb[100].mxu0  ;;  %v17771_v46 = vpop.f32.mrb[100].mxu1 }
 0xc15   : > { %v14048_v15 = vpop.f32.mrb[101].mxu0  ;;  %v14068_v47 = vpop.f32.mrb[101].mxu1 }
 0xc16   : > { %14321 = vmatpush3.bf16.msra.mxu0 %v15088_v9  ;;  %14341 = vmatpush3.bf16.msra.mxu1 %v15089_v12  ;;  %v5216_v17 = vpop.f32.mrb[102].mxu0  ;;  %v5304_v18 = vpop.f32.mrb[102].mxu1  ;;  %v15123_v9 = vld [vmem:[%s19418_s8 + $0x2f0] sm:$0xff]   ;;  %v15124_v47 = vld [vmem:[%s19418_s8 + $0x2b8] sm:$0xff]  }
 0xc17   : > { %v14049_v27 = vpop.f32.mrb[103].mxu0  ;;  %v14069_v49 = vpop.f32.mrb[103].mxu1  ;;  %14322 = vmatprep.subr.bf16.mxu0 %v15793_v19  ;;  %14342 = vmatprep.subr.bf16.mxu1 %v15793_v19  ;;  %v15125_v17 = vld [vmem:[%s19418_s8 + $0x2f8] sm:$0xff]   ;;  %v15126_v18 = vld [vmem:[%s19418_s8 + $0x300] sm:$0xff]  }
 0xc18   : > { %v15129_v27 = vld [vmem:[%s19418_s8 + $0x348] sm:$0xff]   ;;  %v15130_v49 = vld [vmem:[%s19418_s8 + $0x310] sm:$0xff]  }
 0xc1a   : > { %14323 = vmatpush3.bf16.msra.mxu0 %v15090_v22  ;;  %14343 = vmatpush3.bf16.msra.mxu1 %v15091_v25  ;;  %v15127_v22 = vld [vmem:[%s19418_s8 + $0x340] sm:$0xff]   ;;  %v15128_v25 = vld [vmem:[%s19418_s8 + $0x308] sm:$0xff]  }
 0xc1b   : > { %14324 = vmatprep.subr.bf16.mxu0 %v15793_v19  ;;  %14344 = vmatprep.subr.bf16.mxu1 %v15793_v19 }
 0xc1e   : > { %14325 = vmatpush3.bf16.msra.mxu0 %v15092_v29  ;;  %14345 = vmatpush3.bf16.msra.mxu1 %v15093_v32  ;;  %v15131_v29 = vld [vmem:[%s19418_s8 + $0x350] sm:$0xff]   ;;  %v15132_v32 = vld [vmem:[%s19418_s8 + $0x318] sm:$0xff]  }
 0xc1f   : > { %14350 = vmatprep.subr.bf16.mxu0 %v15793_v19  ;;  %14370 = vmatprep.subr.bf16.mxu1 %v15793_v19 }
 0xc21   : > { %14327 = vmatmul.mubr.bf16.vlgmr.msra.gmra.mrb[128].mxu0 %v17301_v26  ;;  %14347 = vmatmul.mubr.bf16.vlgmr.msra.gmra.mrb[128].mxu1 %v17301_v26 }
 0xc22   : > { %14351 = vmatpush3.bf16.msra.mxu0 %v15094_v16  ;;  %14371 = vmatpush3.bf16.msra.mxu1 %v15095_v23  ;;  %v15133_v16 = vld [vmem:[%s19418_s8 + $0x358] sm:$0xff]   ;;  %v15134_v23 = vld [vmem:[%s19418_s8 + $0x320] sm:$0xff]  }
 0xc23   : > { %14352 = vmatprep.subr.bf16.mxu0 %v15793_v19  ;;  %14372 = vmatprep.subr.bf16.mxu1 %v15793_v19 }
 0xc24   : > { %14366 = vmatprep.mubr.msk.bf16.mxu0 %vm15794_vm7, %v15793_v19  ;;  %14386 = vmatprep.mubr.msk.bf16.mxu1 %vm15794_vm7, %v15793_v19 }
 0xc26   : > { %14353 = vmatpush3.bf16.msra.mxu0 %v15096_v24  ;;  %14373 = vmatpush3.bf16.msra.mxu1 %v15097_v35  ;;  %v15135_v24 = vld [vmem:[%s19418_s8 + $0x360] sm:$0xff]   ;;  %v15136_v35 = vld [vmem:[%s19418_s8 + $0x328] sm:$0xff]  }
 0xc27   : > { %14354 = vmatprep.subr.bf16.mxu0 %v15793_v19  ;;  %14374 = vmatprep.subr.bf16.mxu1 %v15793_v19 }
 0xc2a   : > { %14355 = vmatpush3.bf16.msra.mxu0 %v15098_v36  ;;  %14375 = vmatpush3.bf16.msra.mxu1 %v15099_v37  ;;  %v15137_v36 = vld [vmem:[%s19418_s8 + $0x368] sm:$0xff]  }
 0xc2b   : > { %14356 = vmatprep.subr.bf16.mxu0 %v15793_v19  ;;  %14376 = vmatprep.subr.bf16.mxu1 %v15793_v19 }
 0xc2e   : > { %14357 = vmatpush3.bf16.msra.mxu0 %v15100_v33  ;;  %14377 = vmatpush3.bf16.msra.mxu1 %v15101_v38 }
 0xc2f   : > { %14358 = vmatprep.subr.bf16.mxu0 %v15793_v19  ;;  %14378 = vmatprep.subr.bf16.mxu1 %v15793_v19 }
 0xc32   : > { %14359 = vmatpush3.bf16.msra.mxu0 %v15102_v40  ;;  %14379 = vmatpush3.bf16.msra.mxu1 %v15103_v41 }
 0xc33   : > { %14360 = vmatprep.subr.bf16.mxu0 %v15793_v19  ;;  %14380 = vmatprep.subr.bf16.mxu1 %v15793_v19 }
 0xc34   : > { %v17843_v31 = vpop.f32.mrb[104].mxu0  ;;  %v17845_v44 = vpop.f32.mrb[104].mxu1 }
 0xc35   : > { %v14088_v45 = vpop.f32.mrb[105].mxu0  ;;  %v14108_v48 = vpop.f32.mrb[105].mxu1 }
 0xc36   : > { %v5392_v50 = vpop.f32.mrb[106].mxu0  ;;  %v5480_v52 = vpop.f32.mrb[106].mxu1  ;;  %14361 = vmatpush3.bf16.msra.mxu0 %v15104_v42  ;;  %14381 = vmatpush3.bf16.msra.mxu1 %v15105_v43  ;;  %v15138_v43 = vld [vmem:[%s19418_s8 + $0x330] sm:$0xff]  }
 0xc37   : > { %v14089_v59 = vpop.f32.mrb[107].mxu0  ;;  %v14109_v55 = vpop.f32.mrb[107].mxu1  ;;  %14362 = vmatprep.subr.bf16.mxu0 %v15793_v19  ;;  %14382 = vmatprep.subr.bf16.mxu1 %v15793_v19  ;;  %v15139_v45 = vld [vmem:[%s19418_s8 + $0x370] sm:$0xff]   ;;  %v15140_v52 = vld [vmem:[%s19418_s8 + $0x338] sm:$0xff]  }
 0xc38   : > { %v15143_v59 = vld [vmem:[%s19418_s8 + $0x3c0] sm:$0xff]   ;;  %v15144_v55 = vld [vmem:[%s19418_s8 + $0x388] sm:$0xff]  }
 0xc3a   : > { %14363 = vmatpush3.bf16.msra.mxu0 %v15106_v58  ;;  %14383 = vmatpush3.bf16.msra.mxu1 %v15107_v53  ;;  %v15141_v58 = vld [vmem:[%s19418_s8 + $0x378] sm:$0xff]   ;;  %v15142_v53 = vld [vmem:[%s19418_s8 + $0x380] sm:$0xff]  }
 0xc3b   : > { %14364 = vmatprep.subr.bf16.mxu0 %v15793_v19  ;;  %14384 = vmatprep.subr.bf16.mxu1 %v15793_v19 }
 0xc3e   : > { %14365 = vmatpush3.bf16.msra.mxu0 %v15108_v34  ;;  %14385 = vmatpush3.bf16.msra.mxu1 %v15109_v39  ;;  %v15145_v34 = vld [vmem:[%s19418_s8 + $0x3c8] sm:$0xff]   ;;  %v15146_v39 = vld [vmem:[%s19418_s8 + $0x390] sm:$0xff]  }
 0xc3f   : > { %14390 = vmatprep.subr.bf16.mxu0 %v15793_v19  ;;  %14410 = vmatprep.subr.bf16.mxu1 %v15793_v19 }
 0xc41   : > { %14367 = vmatmul.mubr.bf16.vlgmr.msra.gmra.mrb[132].mxu0 %v17301_v26  ;;  %14387 = vmatmul.mubr.bf16.vlgmr.msra.gmra.mrb[132].mxu1 %v17301_v26 }
 0xc42   : > { %14391 = vmatpush3.bf16.msra.mxu0 %v15110_v51  ;;  %14411 = vmatpush3.bf16.msra.mxu1 %v15111_v28  ;;  %v15147_v51 = vld [vmem:[%s19418_s8 + $0x3d0] sm:$0xff]   ;;  %v15148_v28 = vld [vmem:[%s19418_s8 + $0x398] sm:$0xff]  }
 0xc43   : > { %14392 = vmatprep.subr.bf16.mxu0 %v15793_v19  ;;  %14412 = vmatprep.subr.bf16.mxu1 %v15793_v19 }
 0xc44   : > { %14406 = vmatprep.mubr.msk.bf16.mxu0 %vm15794_vm7, %v15793_v19  ;;  %14426 = vmatprep.mubr.msk.bf16.mxu1 %vm15794_vm7, %v15793_v19 }
 0xc46   : > { %14393 = vmatpush3.bf16.msra.mxu0 %v15112_v54  ;;  %14413 = vmatpush3.bf16.msra.mxu1 %v15113_v57  ;;  %v15149_v54 = vld [vmem:[%s19418_s8 + $0x3d8] sm:$0xff]   ;;  %v15150_v57 = vld [vmem:[%s19418_s8 + $0x3a0] sm:$0xff]  }
 0xc47   : > { %14394 = vmatprep.subr.bf16.mxu0 %v15793_v19  ;;  %14414 = vmatprep.subr.bf16.mxu1 %v15793_v19 }
 0xc4a   : > { %14395 = vmatpush3.bf16.msra.mxu0 %v15114_v60  ;;  %14415 = vmatpush3.bf16.msra.mxu1 %v15115_v61  ;;  %v15151_v60 = vld [vmem:[%s19418_s8 + $0x3e0] sm:$0xff]   ;;  %v15152_v61 = vld [vmem:[%s19418_s8 + $0x3a8] sm:$0xff]  }
 0xc4b   : > { %14396 = vmatprep.subr.bf16.mxu0 %v15793_v19  ;;  %14416 = vmatprep.subr.bf16.mxu1 %v15793_v19 }
 0xc4e   : > { %14397 = vmatpush3.bf16.msra.mxu0 %v15116_v62  ;;  %14417 = vmatpush3.bf16.msra.mxu1 %v15117_v63  ;;  %v15153_v62 = vld [vmem:[%s19418_s8 + $0x3e8] sm:$0xff]  }
 0xc4f   : > { %14398 = vmatprep.subr.bf16.mxu0 %v15793_v19  ;;  %14418 = vmatprep.subr.bf16.mxu1 %v15793_v19 }
 0xc52   : > { %14399 = vmatpush3.bf16.msra.mxu0 %v15118_v0  ;;  %14419 = vmatpush3.bf16.msra.mxu1 %v15119_v1 }
 0xc53   : > { %14400 = vmatprep.subr.bf16.mxu0 %v15793_v19  ;;  %14420 = vmatprep.subr.bf16.mxu1 %v15793_v19 }
 0xc54   : > { %v17917_v3 = vpop.f32.mrb[108].mxu0  ;;  %v17919_v21 = vpop.f32.mrb[108].mxu1 }
 0xc55   : > { %v14128_v4 = vpop.f32.mrb[109].mxu0  ;;  %v14148_v5 = vpop.f32.mrb[109].mxu1 }
 0xc56   : > { %v5568_v6 = vpop.f32.mrb[110].mxu0  ;;  %v5656_v7 = vpop.f32.mrb[110].mxu1  ;;  %14401 = vmatpush3.bf16.msra.mxu0 %v15120_v2  ;;  %14421 = vmatpush3.bf16.msra.mxu1 %v15121_v20  ;;  %v15154_v5 = vld [vmem:[%s19418_s8 + $0x3b0] sm:$0xff]  }
 0xc57   : > { %v14129_v12 = vpop.f32.mrb[111].mxu0  ;;  %v14149_v15 = vpop.f32.mrb[111].mxu1  ;;  %14402 = vmatprep.subr.bf16.mxu0 %v15793_v19  ;;  %14422 = vmatprep.subr.bf16.mxu1 %v15793_v19  ;;  %v15155_v6 = vld [vmem:[%s19418_s8 + $0x3f0] sm:$0xff]  }
 0xc58   : > { %v15157_v12 = vld [vmem:[%s19418_s8 + $0x3f8] sm:$0xff]  }
 0xc5a   : > { %14403 = vmatpush3.bf16.msra.mxu0 %v15122_v8  ;;  %14423 = vmatpush3.bf16.msra.mxu1 %v15123_v9  ;;  %v15156_v9 = vld [vmem:[%s19418_s8 + $0x3b8] sm:$0xff]  }
 0xc5b   : > { %14404 = vmatprep.subr.bf16.mxu0 %v15793_v19  ;;  %14424 = vmatprep.subr.bf16.mxu1 %v15793_v19 }
 0xc5e   : > { %14405 = vmatpush3.bf16.msra.mxu0 %v15124_v47  ;;  %14425 = vmatpush3.bf16.msra.mxu1 %v15125_v17 }
 0xc5f   : > { %14430 = vmatprep.subr.bf16.mxu0 %v15793_v19  ;;  %14450 = vmatprep.subr.bf16.mxu1 %v15793_v19 }
 0xc61   : > { %14407 = vmatmul.mubr.bf16.vlgmr.msra.gmra.mrb[136].mxu0 %v17301_v26  ;;  %14427 = vmatmul.mubr.bf16.vlgmr.msra.gmra.mrb[136].mxu1 %v17301_v26 }
 0xc62   : > { %14431 = vmatpush3.bf16.msra.mxu0 %v15126_v18  ;;  %14451 = vmatpush3.bf16.msra.mxu1 %v15127_v22  ;;  %v7502_v22 = vpack.c.bf16 %v17771_v46, %v17771_v46 }
 0xc63   : > { %14432 = vmatprep.subr.bf16.mxu0 %v15793_v19  ;;  %14452 = vmatprep.subr.bf16.mxu1 %v15793_v19 }
 0xc64   : > { %14446 = vmatprep.mubr.msk.bf16.mxu0 %vm15794_vm7, %v15793_v19  ;;  %14466 = vmatprep.mubr.msk.bf16.mxu1 %vm15794_vm7, %v15793_v19 }
 0xc66   : > { %14433 = vmatpush3.bf16.msra.mxu0 %v15128_v25  ;;  %14453 = vmatpush3.bf16.msra.mxu1 %v15129_v27 }
 0xc67   : > { %14434 = vmatprep.subr.bf16.mxu0 %v15793_v19  ;;  %14454 = vmatprep.subr.bf16.mxu1 %v15793_v19 }
 0xc6a   : > { %14435 = vmatpush3.bf16.msra.mxu0 %v15130_v49  ;;  %14455 = vmatpush3.bf16.msra.mxu1 %v15131_v29 }
 0xc6b   : > { %14436 = vmatprep.subr.bf16.mxu0 %v15793_v19  ;;  %14456 = vmatprep.subr.bf16.mxu1 %v15793_v19 }
 0xc6e   : > { %14437 = vmatpush3.bf16.msra.mxu0 %v15132_v32  ;;  %14457 = vmatpush3.bf16.msra.mxu1 %v15133_v16 }
 0xc6f   : > { %14438 = vmatprep.subr.bf16.mxu0 %v15793_v19  ;;  %14458 = vmatprep.subr.bf16.mxu1 %v15793_v19 }
 0xc72   : > { %14439 = vmatpush3.bf16.msra.mxu0 %v15134_v23  ;;  %14459 = vmatpush3.bf16.msra.mxu1 %v15135_v24 }
 0xc73   : > { %14440 = vmatprep.subr.bf16.mxu0 %v15793_v19  ;;  %14460 = vmatprep.subr.bf16.mxu1 %v15793_v19 }
 0xc74   : > { %v17991_v37 = vpop.f32.mrb[112].mxu0  ;;  %v17993_v33 = vpop.f32.mrb[112].mxu1 }
 0xc75   : > { %v14168_v38 = vpop.f32.mrb[113].mxu0  ;;  %v14188_v40 = vpop.f32.mrb[113].mxu1 }
 0xc76   : > { %v5744_v41 = vpop.f32.mrb[114].mxu0  ;;  %v5832_v42 = vpop.f32.mrb[114].mxu1  ;;  %14441 = vmatpush3.bf16.msra.mxu0 %v15136_v35  ;;  %14461 = vmatpush3.bf16.msra.mxu1 %v15137_v36  ;;  %v7503_v38 = vpack.c.bf16 %v17843_v31, %v17843_v31  ;;  %v7504_v40 = vpack.c.bf16 %v17845_v44, %v17845_v44 }
 0xc77   : > { %v14169_v48 = vpop.f32.mrb[115].mxu0  ;;  %v14189_v50 = vpop.f32.mrb[115].mxu1  ;;  %14442 = vmatprep.subr.bf16.mxu0 %v15793_v19  ;;  %14462 = vmatprep.subr.bf16.mxu1 %v15793_v19 }
 0xc7a   : > { %14443 = vmatpush3.bf16.msra.mxu0 %v15138_v43  ;;  %14463 = vmatpush3.bf16.msra.mxu1 %v15139_v45 }
 0xc7b   : > { %14444 = vmatprep.subr.bf16.mxu0 %v15793_v19  ;;  %14464 = vmatprep.subr.bf16.mxu1 %v15793_v19 }
 0xc7e   : > { %14445 = vmatpush3.bf16.msra.mxu0 %v15140_v52  ;;  %14465 = vmatpush3.bf16.msra.mxu1 %v15141_v58 }
 0xc7f   : > { %14470 = vmatprep.subr.bf16.mxu0 %v15793_v19  ;;  %14490 = vmatprep.subr.bf16.mxu1 %v15793_v19 }
 0xc81   : > { %14447 = vmatmul.mubr.bf16.vlgmr.msra.gmra.mrb[140].mxu0 %v17301_v26  ;;  %14467 = vmatmul.mubr.bf16.vlgmr.msra.gmra.mrb[140].mxu1 %v17301_v26 }
 0xc82   : > { %14471 = vmatpush3.bf16.msra.mxu0 %v15142_v53  ;;  %14491 = vmatpush3.bf16.msra.mxu1 %v15143_v59 }
 0xc83   : > { %14472 = vmatprep.subr.bf16.mxu0 %v15793_v19  ;;  %14492 = vmatprep.subr.bf16.mxu1 %v15793_v19 }
 0xc84   : > { %14486 = vmatprep.mubr.msk.bf16.mxu0 %vm15794_vm7, %v15793_v19  ;;  %14506 = vmatprep.mubr.msk.bf16.mxu1 %vm15794_vm7, %v15793_v19 }
 0xc86   : > { %14473 = vmatpush3.bf16.msra.mxu0 %v15144_v55  ;;  %14493 = vmatpush3.bf16.msra.mxu1 %v15145_v34  ;;  %v7505_v55 = vpack.c.bf16 %v17917_v3, %v17917_v3  ;;  %v7506_v34 = vpack.c.bf16 %v17919_v21, %v17919_v21 }
 0xc87   : > { %14474 = vmatprep.subr.bf16.mxu0 %v15793_v19  ;;  %14494 = vmatprep.subr.bf16.mxu1 %v15793_v19 }
 0xc8a   : > { %14475 = vmatpush3.bf16.msra.mxu0 %v15146_v39  ;;  %14495 = vmatpush3.bf16.msra.mxu1 %v15147_v51 }
 0xc8b   : > { %14476 = vmatprep.subr.bf16.mxu0 %v15793_v19  ;;  %14496 = vmatprep.subr.bf16.mxu1 %v15793_v19 }
 0xc8e   : > { %14477 = vmatpush3.bf16.msra.mxu0 %v15148_v28  ;;  %14497 = vmatpush3.bf16.msra.mxu1 %v15149_v54 }
 0xc8f   : > { %14478 = vmatprep.subr.bf16.mxu0 %v15793_v19  ;;  %14498 = vmatprep.subr.bf16.mxu1 %v15793_v19 }
 0xc92   : > { %14479 = vmatpush3.bf16.msra.mxu0 %v15150_v57  ;;  %14499 = vmatpush3.bf16.msra.mxu1 %v15151_v60 }
 0xc93   : > { %14480 = vmatprep.subr.bf16.mxu0 %v15793_v19  ;;  %14500 = vmatprep.subr.bf16.mxu1 %v15793_v19 }
 0xc94   : > { %v6046_v63 = vpop.f32.mrb[116].mxu0  ;;  %v6134_v0 = vpop.f32.mrb[116].mxu1 }
 0xc95   : > { %v14208_v1 = vpop.f32.mrb[117].mxu0  ;;  %v14228_v2 = vpop.f32.mrb[117].mxu1  ;;  %v7509_v15 = vpack.c.bf16 %v6046_v63, %v6046_v63  ;;  %v7510_v47 = vpack.c.bf16 %v6134_v0, %v6134_v0 }
 0xc96   : > { %v6049_v20 = vpop.f32.mrb[118].mxu0  ;;  %v6137_v4 = vpop.f32.mrb[118].mxu1  ;;  %14481 = vmatpush3.bf16.msra.mxu0 %v15152_v61  ;;  %14501 = vmatpush3.bf16.msra.mxu1 %v15153_v62  ;;  %v7507_v1 = vpack.c.bf16 %v17991_v37, %v17991_v37  ;;  %v7508_v2 = vpack.c.bf16 %v17993_v33, %v17993_v33 }
 0xc97   : > { %v14209_v7 = vpop.f32.mrb[119].mxu0  ;;  %v14229_v8 = vpop.f32.mrb[119].mxu1  ;;  %14482 = vmatprep.subr.bf16.mxu0 %v15793_v19  ;;  %14502 = vmatprep.subr.bf16.mxu1 %v15793_v19  ;;  %v7521_v17 = vsel %vm3317_vm8, %v7509_v15, 0  ;;  %v7567_v18 = vsel %vm3317_vm8, %v7510_v47, 0 }
 0xc9a   : > { %14483 = vmatpush3.bf16.msra.mxu0 %v15154_v5  ;;  %14503 = vmatpush3.bf16.msra.mxu1 %v15155_v6 }
 0xc9b   : > { %14484 = vmatprep.subr.bf16.mxu0 %v15793_v19  ;;  %14504 = vmatprep.subr.bf16.mxu1 %v15793_v19 }
 0xc9e   : > { %14485 = vmatpush3.bf16.msra.mxu0 %v15156_v9  ;;  %14505 = vmatpush3.bf16.msra.mxu1 %v15157_v12 }
 0xc9f   : > { %14510 = vmatprep.subr.bf16.mxu0 %v15793_v19  ;;  %14516 = vmatprep.subr.bf16.mxu1 %v15793_v19 }
 0xca1   : > { %14487 = vmatmul.mubr.bf16.vlgmr.msra.gmra.mrb[144].mxu0 %v17301_v26  ;;  %14507 = vmatmul.mubr.bf16.vlgmr.msra.gmra.mrb[144].mxu1 %v17301_v26  ;;  %v7501_v26 = vpack.c.bf16 %v17769_v14, %v17769_v14 }
 0xca2   : > { %14512 = vmatprep.mubr.msk.bf16.mxu0 %vm15794_vm7, %v15793_v19  ;;  %14518 = vmatprep.mubr.msk.bf16.mxu1 %vm15794_vm7, %v15793_v19 }
 0xca7   : > { %14511 = vmatpush3.bf16.xpose.msra.mxu0 %v7521_v17  ;;  %14517 = vmatpush3.bf16.xpose.msra.mxu1 %v7567_v18 }
 0xca8   : > { %14522 = vmatprep.subr.bf16.mxu0 %v15793_v19  ;;  %14528 = vmatprep.subr.bf16.mxu1 %v15793_v19 }
 0xcae   : > { %14513 = vmatmul.mubr.msk.bf16.vlgmr.msra.gmra.mrb[148].mxu0 %vm3317_vm8, %v7501_v26  ;;  %14519 = vmatmul.mubr.msk.bf16.vlgmr.msra.gmra.mrb[148].mxu1 %vm3317_vm8, %v7502_v22 }
 0xcaf   : > { %14524 = vmatprep.mubr.msk.bf16.mxu0 %vm15794_vm7, %v15793_v19  ;;  %14530 = vmatprep.mubr.msk.bf16.mxu1 %vm15794_vm7, %v15793_v19 }
 0xcb4   : > { %v6222_v25 = vpop.f32.mrb[120].mxu0  ;;  %v6310_v27 = vpop.f32.mrb[120].mxu1 }
 0xcb5   : > { %v7511_v49 = vpack.c.bf16 %v6222_v25, %v6222_v25  ;;  %v7512_v29 = vpack.c.bf16 %v6310_v27, %v6310_v27  ;;  %v14248_v32 = vpop.f32.mrb[121].mxu0  ;;  %v14268_v16 = vpop.f32.mrb[121].mxu1 }
 0xcb6   : > { %v6225_v14 = vpop.f32.mrb[122].mxu0  ;;  %v6313_v23 = vpop.f32.mrb[122].mxu1 }
 0xcb7   : > { %v7613_v46 = vsel %vm3317_vm8, %v7511_v49, 0  ;;  %v7659_v24 = vsel %vm3317_vm8, %v7512_v29, 0  ;;  %v14249_v35 = vpop.f32.mrb[123].mxu0  ;;  %v14269_v36 = vpop.f32.mrb[123].mxu1 }
 0xcb8   : > { %14523 = vmatpush3.bf16.xpose.msra.mxu0 %v7613_v46  ;;  %14529 = vmatpush3.bf16.xpose.msra.mxu1 %v7659_v24 }
 0xcb9   : > { %14534 = vmatprep.subr.bf16.mxu0 %v15793_v19  ;;  %14540 = vmatprep.subr.bf16.mxu1 %v15793_v19 }
 0xcbf   : > { %14525 = vmatmul.mubr.msk.bf16.vlgmr.msra.gmra.mrb[152].mxu0 %vm3317_vm8, %v7503_v38  ;;  %14531 = vmatmul.mubr.msk.bf16.vlgmr.msra.gmra.mrb[152].mxu1 %vm3317_vm8, %v7504_v40 }
 0xcc0   : > { %14536 = vmatprep.mubr.msk.bf16.mxu0 %vm15794_vm7, %v15793_v19  ;;  %14542 = vmatprep.mubr.msk.bf16.mxu1 %vm15794_vm7, %v15793_v19 }
 0xcd4   : > { %v6398_v41 = vpop.f32.mrb[124].mxu0  ;;  %v6486_v42 = vpop.f32.mrb[124].mxu1 }
 0xcd5   : > { %v7513_v43 = vpack.c.bf16 %v6398_v41, %v6398_v41  ;;  %v7514_v45 = vpack.c.bf16 %v6486_v42, %v6486_v42  ;;  %v14288_v48 = vpop.f32.mrb[125].mxu0  ;;  %v14308_v50 = vpop.f32.mrb[125].mxu1 }
 0xcd6   : > { %v6401_v31 = vpop.f32.mrb[126].mxu0  ;;  %v6489_v52 = vpop.f32.mrb[126].mxu1 }
 0xcd7   : > { %v7705_v44 = vsel %vm3317_vm8, %v7513_v43, 0  ;;  %v7751_v58 = vsel %vm3317_vm8, %v7514_v45, 0  ;;  %v14289_v53 = vpop.f32.mrb[127].mxu0  ;;  %v14309_v59 = vpop.f32.mrb[127].mxu1 }
 0xcd8   : > { %14535 = vmatpush3.bf16.xpose.msra.mxu0 %v7705_v44  ;;  %14541 = vmatpush3.bf16.xpose.msra.mxu1 %v7751_v58 }
 0xcd9   : > { %14546 = vmatprep.subr.bf16.mxu0 %v15793_v19  ;;  %14552 = vmatprep.subr.bf16.mxu1 %v15793_v19 }
 0xcdf   : > { %14537 = vmatmul.mubr.msk.bf16.vlgmr.msra.gmra.mrb[156].mxu0 %vm3317_vm8, %v7505_v55  ;;  %14543 = vmatmul.mubr.msk.bf16.vlgmr.msra.gmra.mrb[156].mxu1 %vm3317_vm8, %v7506_v34 }
 0xce0   : > { %14548 = vmatprep.mubr.msk.bf16.mxu0 %vm15794_vm7, %v15793_v19  ;;  %14554 = vmatprep.mubr.msk.bf16.mxu1 %vm15794_vm7, %v15793_v19 }
 0xcf4   : > { %v6574_v39 = vpop.f32.mrb[128].mxu0  ;;  %v6662_v51 = vpop.f32.mrb[128].mxu1 }
 0xcf5   : > { %v7515_v28 = vpack.c.bf16 %v6574_v39, %v6574_v39  ;;  %v7516_v54 = vpack.c.bf16 %v6662_v51, %v6662_v51  ;;  %v14328_v57 = vpop.f32.mrb[129].mxu0  ;;  %v14348_v60 = vpop.f32.mrb[129].mxu1 }
 0xcf6   : > { %v6577_v3 = vpop.f32.mrb[130].mxu0  ;;  %v6665_v61 = vpop.f32.mrb[130].mxu1 }
 0xcf7   : > { %v7797_v21 = vsel %vm3317_vm8, %v7515_v28, 0  ;;  %v7843_v62 = vsel %vm3317_vm8, %v7516_v54, 0  ;;  %v14329_v63 = vpop.f32.mrb[131].mxu0  ;;  %v14349_v0 = vpop.f32.mrb[131].mxu1 }
 0xcf8   : > { %14547 = vmatpush3.bf16.xpose.msra.mxu0 %v7797_v21  ;;  %14553 = vmatpush3.bf16.xpose.msra.mxu1 %v7843_v62 }
 0xcf9   : > { %14558 = vmatprep.subr.bf16.mxu0 %v15793_v19  ;;  %14564 = vmatprep.subr.bf16.mxu1 %v15793_v19 }
 0xcff   : > { %14549 = vmatmul.mubr.msk.bf16.vlgmr.msra.gmra.mrb[160].mxu0 %vm3317_vm8, %v7507_v1  ;;  %14555 = vmatmul.mubr.msk.bf16.vlgmr.msra.gmra.mrb[160].mxu1 %vm3317_vm8, %v7508_v2 }
 0xd00   : > { %14560 = vmatprep.mubr.msk.bf16.mxu0 %vm15794_vm7, %v15793_v19  ;;  %14566 = vmatprep.mubr.msk.bf16.mxu1 %vm15794_vm7, %v15793_v19 }
 0xd14   : > { %v6879_v20 = vpop.f32.mrb[132].mxu0  ;;  %v6967_v4 = vpop.f32.mrb[132].mxu1 }
 0xd15   : > { %v7989_v5 = vpack.c.bf16 %v6879_v20, %v6879_v20  ;;  %v7990_v6 = vpack.c.bf16 %v6967_v4, %v6967_v4  ;;  %v14368_v7 = vpop.f32.mrb[133].mxu0  ;;  %v14388_v8 = vpop.f32.mrb[133].mxu1 }
 0xd16   : > { %v6882_v37 = vpop.f32.mrb[134].mxu0  ;;  %v6970_v9 = vpop.f32.mrb[134].mxu1 }
 0xd17   : > { %v8001_v33 = vsel %vm766_vm3, %v7989_v5, 0  ;;  %v8047_v12 = vsel %vm766_vm3, %v7990_v6, 0  ;;  %v14369_v15 = vpop.f32.mrb[135].mxu0  ;;  %v14389_v47 = vpop.f32.mrb[135].mxu1 }
 0xd18   : > { %14559 = vmatpush3.bf16.msra.mxu0 %v8001_v33  ;;  %14565 = vmatpush3.bf16.msra.mxu1 %v8047_v12 }
 0xd19   : > { %14570 = vmatprep.subr.bf16.mxu0 %v15793_v19  ;;  %14576 = vmatprep.subr.bf16.mxu1 %v15793_v19 }
 0xd34   : > { %v18149_v17 = vpop.f32.mrb[136].mxu0  ;;  %v18151_v18 = vpop.f32.mrb[136].mxu1 }
 0xd35   : > { %v14408_v26 = vpop.f32.mrb[137].mxu0  ;;  %v14428_v22 = vpop.f32.mrb[137].mxu1 }
 0xd36   : > { %v7058_v25 = vpop.f32.mrb[138].mxu0  ;;  %v7146_v27 = vpop.f32.mrb[138].mxu1 }
 0xd37   : > { %v14409_v49 = vpop.f32.mrb[139].mxu0  ;;  %v14429_v29 = vpop.f32.mrb[139].mxu1 }
 0xd54   : > { %v18153_v32 = vpop.f32.mrb[140].mxu0  ;;  %v18155_v16 = vpop.f32.mrb[140].mxu1 }
 0xd55   : > { %v14448_v14 = vpop.f32.mrb[141].mxu0  ;;  %v14468_v23 = vpop.f32.mrb[141].mxu1 }
 0xd56   : > { %v7234_v46 = vpop.f32.mrb[142].mxu0  ;;  %v7322_v24 = vpop.f32.mrb[142].mxu1 }
 0xd57   : > { %v14449_v35 = vpop.f32.mrb[143].mxu0  ;;  %v14469_v36 = vpop.f32.mrb[143].mxu1 }
 0xd74   : > { %v18157_v38 = vpop.f32.mrb[144].mxu0  ;;  %v18159_v40 = vpop.f32.mrb[144].mxu1 }
 0xd75   : > { %v14488_v41 = vpop.f32.mrb[145].mxu0  ;;  %v14508_v42 = vpop.f32.mrb[145].mxu1 }
 0xd76   : > { %v7410_v43 = vpop.f32.mrb[146].mxu0  ;;  %v7498_v45 = vpop.f32.mrb[146].mxu1 }
 0xd77   : > { %v14489_v48 = vpop.f32.mrb[147].mxu0  ;;  %v14509_v50 = vpop.f32.mrb[147].mxu1 }
 0xd81   : > { %v7557_v31 = vpop.f32.mrb[148].mxu0  ;;  %v7603_v52 = vpop.f32.mrb[148].mxu1 }
 0xd82   : > { %v7885_v44 = vmul.f32 0.25, %v7557_v31  ;;  %v7886_v58 = vmul.f32 0.25, %v7603_v52  ;;  %v14514_v53 = vpop.f32.mrb[149].mxu0  ;;  %v14520_v59 = vpop.f32.mrb[149].mxu1 }
 0xd83   : > { %v7560_v55 = vpop.f32.mrb[150].mxu0  ;;  %v7606_v34 = vpop.f32.mrb[150].mxu1 }
 0xd84   : > { %v14515_v39 = vpop.f32.mrb[151].mxu0  ;;  %v14521_v51 = vpop.f32.mrb[151].mxu1  ;;  %v7896_v28 = vsel %vm3694_vm9, %v7886_v58, -inf  ;;  %v7893_v54 = vsel %vm3694_vm9, %v7885_v44, -inf }
 0xd85   : > { %7897 = vmax.xlane.f32.xlu1 %v7896_v28  ;;  %7894 = vmax.xlane.f32.xlu0 %v7893_v54 }
 0xd92   : > { %v7649_v57 = vpop.f32.mrb[152].mxu0  ;;  %v7695_v60 = vpop.f32.mrb[152].mxu1 }
 0xd93   : > { %v7887_v3 = vmul.f32 0.25, %v7649_v57  ;;  %v7888_v61 = vmul.f32 0.25, %v7695_v60  ;;  %v14526_v21 = vpop.f32.mrb[153].mxu0  ;;  %v14532_v62 = vpop.f32.mrb[153].mxu1 }
 0xd94   : > { %v7652_v63 = vpop.f32.mrb[154].mxu0  ;;  %v7698_v0 = vpop.f32.mrb[154].mxu1 }
 0xd95   : > { %v14527_v1 = vpop.f32.mrb[155].mxu0  ;;  %v14533_v2 = vpop.f32.mrb[155].mxu1  ;;  %v7902_v20 = vsel %vm3694_vm9, %v7888_v61, -inf  ;;  %v7899_v4 = vsel %vm3694_vm9, %v7887_v3, -inf }
 0xd96   : > { %7903 = vmax.xlane.f32.xlu1 %v7902_v20  ;;  %7900 = vmax.xlane.f32.xlu0 %v7899_v4 }
 0xdb2   : > { %v7741_v5 = vpop.f32.mrb[156].mxu0  ;;  %v7787_v6 = vpop.f32.mrb[156].mxu1 }
 0xdb3   : > { %v7889_v7 = vmul.f32 0.25, %v7741_v5  ;;  %v7890_v8 = vmul.f32 0.25, %v7787_v6  ;;  %v14538_v37 = vpop.f32.mrb[157].mxu0  ;;  %v14544_v9 = vpop.f32.mrb[157].mxu1 }
 0xdb4   : > { %v7744_v33 = vpop.f32.mrb[158].mxu0  ;;  %v7790_v12 = vpop.f32.mrb[158].mxu1 }
 0xdb5   : > { %v14539_v15 = vpop.f32.mrb[159].mxu0  ;;  %v14545_v47 = vpop.f32.mrb[159].mxu1  ;;  %v7908_v26 = vsel %vm3694_vm9, %v7890_v8, -inf  ;;  %v7905_v22 = vsel %vm3694_vm9, %v7889_v7, -inf }
 0xdb6   : > { %7909 = vmax.xlane.f32.xlu1 %v7908_v26  ;;  %7906 = vmax.xlane.f32.xlu0 %v7905_v22 }
 0xdd2   : > { %v7833_v25 = vpop.f32.mrb[160].mxu0  ;;  %v7879_v27 = vpop.f32.mrb[160].mxu1 }
 0xdd3   : > { %v7891_v49 = vmul.f32 0.25, %v7833_v25  ;;  %v7892_v29 = vmul.f32 0.25, %v7879_v27  ;;  %v14550_v14 = vpop.f32.mrb[161].mxu0  ;;  %v14556_v23 = vpop.f32.mrb[161].mxu1 }
 0xdd4   : > { %v7836_v46 = vpop.f32.mrb[162].mxu0  ;;  %v7882_v24 = vpop.f32.mrb[162].mxu1  ;;  %v7992_v14 = vpack.c.bf16 %v18151_v18, %v18151_v18 }
 0xdd5   : > { %v14551_v35 = vpop.f32.mrb[163].mxu0  ;;  %v14557_v36 = vpop.f32.mrb[163].mxu1  ;;  %v7914_v41 = vsel %vm3694_vm9, %v7892_v29, -inf  ;;  %v7911_v42 = vsel %vm3694_vm9, %v7891_v49, -inf  ;;  %v7991_v46 = vpack.c.bf16 %v18149_v17, %v18149_v17 }
 0xdd6   : > { %7915 = vmax.xlane.f32.xlu1 %v7914_v41  ;;  %7912 = vmax.xlane.f32.xlu0 %v7911_v42  ;;  %v8139_v41 = vsel %vm766_vm3, %v7992_v14, 0 }
 0xdd7   : > { %v8093_v42 = vsel %vm766_vm3, %v7991_v46, 0 }
 0xe12   : > { %v7898_v43 = vpop.xlane.xlu1 %7897  ;;  %v7895_v45 = vpop.xlane.xlu0 %7894 }
 0xe13   : > { %v7918_v48 = vsub.f32 %v7886_v58, %v7898_v43  ;;  %v7917_v50 = vsub.f32 %v7885_v44, %v7895_v45 }
 0xe15   : > { %v7927_v31 = vmul.f32 1.442695, %v7918_v48  ;;  %v7925_v52 = vmul.f32 1.442695, %v7917_v50  ;;  %v7994_v48 = vpack.c.bf16 %v18155_v16, %v18155_v16 }
 0xe17   : > { %15672 = vpow2.f32 %v7927_v31  ;;  %v7993_v31 = vpack.c.bf16 %v18153_v32, %v18153_v32 }
 0xe18   : > { %15674 = vpow2.f32 %v7925_v52 }
 0xe21   : > { %v15673_v53 = vpop.eup %15672 }
 0xe22   : > { %v15675_v59 = vpop.eup %15674  ;;  %v7944_v55 = vsel %vm3694_vm9, %v15673_v53, 0.0 }
 0xe23   : > { %v7904_v34 = vpop.xlane.xlu1 %7903  ;;  %7945 = vadd.xlane.f32.xlu1 %v7944_v55  ;;  %v7901_v39 = vpop.xlane.xlu0 %7900  ;;  %v7941_v51 = vsel %vm3694_vm9, %v15675_v59, 0.0  ;;  %v8231_v55 = vsel %vm766_vm3, %v7994_v48, 0 }
 0xe24   : > { %v7920_v28 = vsub.f32 %v7888_v61, %v7904_v34  ;;  %v7919_v54 = vsub.f32 %v7887_v3, %v7901_v39  ;;  %7942 = vadd.xlane.f32.xlu0 %v7941_v51  ;;  %v8185_v34 = vsel %vm766_vm3, %v7993_v31, 0 }
 0xe26   : > { %v7931_v57 = vmul.f32 1.442695, %v7920_v28  ;;  %v7929_v60 = vmul.f32 1.442695, %v7919_v54  ;;  %v7996_v28 = vpack.c.bf16 %v18159_v40, %v18159_v40 }
 0xe28   : > { %15676 = vpow2.f32 %v7931_v57  ;;  %v7995_v57 = vpack.c.bf16 %v18157_v38, %v18157_v38 }
 0xe29   : > { %15678 = vpow2.f32 %v7929_v60 }
 0xe32   : > { %v18171_v44 = vpop.eup %15676 }
 0xe33   : > { %v18173_v58 = vpop.eup %15678  ;;  %v7950_v21 = vsel %vm3694_vm9, %v18171_v44, 0.0 }
 0xe34   : > { %7951 = vadd.xlane.f32.xlu1 %v7950_v21  ;;  %v7947_v62 = vsel %vm3694_vm9, %v18173_v58, 0.0  ;;  %v8323_v21 = vsel %vm766_vm3, %v7996_v28, 0 }
 0xe35   : > { %7948 = vadd.xlane.f32.xlu0 %v7947_v62  ;;  %v8277_v62 = vsel %vm766_vm3, %v7995_v57, 0 }
 0xe43   : > { %v7910_v63 = vpop.xlane.xlu1 %7909  ;;  %v7907_v61 = vpop.xlane.xlu0 %7906 }
 0xe44   : > { %v7922_v3 = vsub.f32 %v7890_v8, %v7910_v63  ;;  %v7921_v0 = vsub.f32 %v7889_v7, %v7907_v61 }
 0xe46   : > { %v7935_v1 = vmul.f32 1.442695, %v7922_v3  ;;  %v7933_v2 = vmul.f32 1.442695, %v7921_v0 }
 0xe48   : > { %15680 = vpow2.f32 %v7935_v1 }
 0xe49   : > { %15682 = vpow2.f32 %v7933_v2 }
 0xe52   : > { %v18179_v20 = vpop.eup %15680 }
 0xe53   : > { %v18181_v4 = vpop.eup %15682  ;;  %v7956_v5 = vsel %vm3694_vm9, %v18179_v20, 0.0 }
 0xe54   : > { %7957 = vadd.xlane.f32.xlu1 %v7956_v5  ;;  %v7953_v6 = vsel %vm3694_vm9, %v18181_v4, 0.0 }
 0xe55   : > { %7954 = vadd.xlane.f32.xlu0 %v7953_v6  ;;  %v15161_v6 = vld [vmem:[%s19419_s9 + $0x58] sm:$0xff]  }
 0xe63   : > { %v7916_v37 = vpop.xlane.xlu1 %7915  ;;  %v7913_v9 = vpop.xlane.xlu0 %7912 }
 0xe64   : > { %v7924_v8 = vsub.f32 %v7892_v29, %v7916_v37  ;;  %v7923_v7 = vsub.f32 %v7891_v49, %v7913_v9 }
 0xe66   : > { %v7939_v33 = vmul.f32 1.442695, %v7924_v8  ;;  %v7937_v12 = vmul.f32 1.442695, %v7923_v7  ;;  %v15160_v7 = vld [vmem:[%s19419_s9 + $0x50] sm:$0xff]  }
 0xe68   : > { %15684 = vpow2.f32 %v7939_v33 }
 0xe69   : > { %15686 = vpow2.f32 %v7937_v12 }
 0xe72   : > { %v18187_v15 = vpop.eup %15684 }
 0xe73   : > { %v18189_v47 = vpop.eup %15686  ;;  %v7962_v26 = vsel %vm3694_vm9, %v18187_v15, 0.0 }
 0xe74   : > { %7963 = vadd.xlane.f32.xlu1 %v7962_v26  ;;  %v7959_v22 = vsel %vm3694_vm9, %v18189_v47, 0.0 }
 0xe75   : > { %7960 = vadd.xlane.f32.xlu0 %v7959_v22 }
 0xeb0   : > { %v7946_v25 = vpop.xlane.xlu1 %7945 }
 0xeb1   : > { %15688 = vrcp.f32 %v7946_v25  ;;  %v7943_v27 = vpop.xlane.xlu0 %7942 }
 0xeb2   : > { %15690 = vrcp.f32 %v7943_v27  ;;  %v15163_v27 = vld [vmem:[%s19419_s9 + $0x68] sm:$0xff]  }
 0xebb   : > { %v15689_v49 = vpop.eup %15688 }
 0xebc   : > { %v15691_v29 = vpop.eup %15690  ;;  %v7974_v23 = vmul.f32 %v15689_v49, %v15673_v53 }
 0xebd   : > { %v7973_v24 = vmul.f32 %v15691_v29, %v15675_v59 }
 0xebe   : > { %v7982_v35 = vpack.c.bf16 %v7974_v23, %v7974_v23  ;;  %v15162_v23 = vld [vmem:[%s19419_s9 + $0x60] sm:$0xff]  }
 0xebf   : > { %v7981_v36 = vpack.c.bf16 %v7973_v24, %v7973_v24 }
 0xec0   : > { %14567 = vmatmul.mubr.msk.bf16.vlgmr.msra.gmra.mrb[164].mxu1 %vm3694_vm9, %v7982_v35 }
 0xec1   : > { %14561 = vmatmul.mubr.msk.bf16.vlgmr.msra.gmra.mrb[164].mxu0 %vm3694_vm9, %v7981_v36  ;;  %14577 = vmatpush3.bf16.msra.mxu1 %v8139_v41  ;;  %v7952_v43 = vpop.xlane.xlu1 %7951 }
 0xec2   : > { %14571 = vmatpush3.bf16.msra.mxu0 %v8093_v42  ;;  %15692 = vrcp.f32 %v7952_v43  ;;  %v7949_v18 = vpop.xlane.xlu0 %7948  ;;  %14572 = vmatprep.mubr.msk.bf16.mxu0 %vm15794_vm7, %v15793_v19 }
 0xec3   : > { %15694 = vrcp.f32 %v7949_v18  ;;  %14578 = vmatprep.mubr.msk.bf16.mxu1 %vm15794_vm7, %v15793_v19  ;;  %14582 = vmatprep.subr.bf16.mxu0 %v15793_v19  ;;  %v15165_v18 = vld [vmem:[%s19419_s9 + $0x78] sm:$0xff]  }
 0xec4   : > { %14588 = vmatprep.subr.bf16.mxu1 %v15793_v19 }
 0xecc   : > { %v15693_v17 = vpop.eup %15692 }
 0xecd   : > { %v15695_v45 = vpop.eup %15694  ;;  %v7976_v50 = vmul.f32 %v15693_v17, %v18171_v44 }
 0xece   : > { %v7975_v52 = vmul.f32 %v15695_v45, %v18173_v58 }
 0xecf   : > { %v7984_v53 = vpack.c.bf16 %v7976_v50, %v7976_v50  ;;  %v15164_v50 = vld [vmem:[%s19419_s9 + $0x70] sm:$0xff]  }
 0xed0   : > { %v7983_v59 = vpack.c.bf16 %v7975_v52, %v7975_v52 }
 0xed1   : > { %14579 = vmatmul.mubr.msk.bf16.vlgmr.msra.gmra.mrb[168].mxu1 %vm3694_vm9, %v7984_v53 }
 0xed2   : > { %14573 = vmatmul.mubr.msk.bf16.vlgmr.msra.gmra.mrb[168].mxu0 %vm3694_vm9, %v7983_v59  ;;  %14589 = vmatpush3.bf16.msra.mxu1 %v8231_v55 }
 0xed3   : > { %14583 = vmatpush3.bf16.msra.mxu0 %v8185_v34  ;;  %14584 = vmatprep.mubr.msk.bf16.mxu0 %vm15794_vm7, %v15793_v19 }
 0xed4   : > { %14590 = vmatprep.mubr.msk.bf16.mxu1 %vm15794_vm7, %v15793_v19  ;;  %14594 = vmatprep.subr.bf16.mxu0 %v15793_v19 }
 0xed5   : > { %14600 = vmatprep.subr.bf16.mxu1 %v15793_v19 }
 0xee1   : > { %v7958_v32 = vpop.xlane.xlu1 %7957 }
 0xee2   : > { %15696 = vrcp.f32 %v7958_v32  ;;  %v7955_v16 = vpop.xlane.xlu0 %7954 }
 0xee3   : > { %15698 = vrcp.f32 %v7955_v16 }
 0xeec   : > { %v15697_v39 = vpop.eup %15696 }
 0xeed   : > { %v15699_v51 = vpop.eup %15698  ;;  %v7978_v54 = vmul.f32 %v15697_v39, %v18179_v20  ;;  %v15158_v20 = vld [vmem:[%s19419_s9 + $0x40] sm:$0xff]  }
 0xeee   : > { %v7977_v60 = vmul.f32 %v15699_v51, %v18181_v4  ;;  %v15159_v4 = vld [vmem:[%s19419_s9 + $0x48] sm:$0xff]  }
 0xeef   : > { %v7986_v44 = vpack.c.bf16 %v7978_v54, %v7978_v54 }
 0xef0   : > { %v7985_v58 = vpack.c.bf16 %v7977_v60, %v7977_v60 }
 0xef1   : > { %14591 = vmatmul.mubr.msk.bf16.vlgmr.msra.gmra.mrb[172].mxu1 %vm3694_vm9, %v7986_v44 }
 0xef2   : > { %14585 = vmatmul.mubr.msk.bf16.vlgmr.msra.gmra.mrb[172].mxu0 %vm3694_vm9, %v7985_v58  ;;  %14601 = vmatpush3.bf16.msra.mxu1 %v8323_v21 }
 0xef3   : > { %14595 = vmatpush3.bf16.msra.mxu0 %v8277_v62  ;;  %14596 = vmatprep.mubr.msk.bf16.mxu0 %vm15794_vm7, %v15793_v19 }
 0xef4   : > { %14602 = vmatprep.mubr.msk.bf16.mxu1 %vm15794_vm7, %v15793_v19  ;;  %14606 = vmatprep.subr.bf16.mxu0 %v15793_v19 }
 0xef5   : > { %14612 = vmatprep.subr.bf16.mxu1 %v15793_v19 }
 0xf01   : > { %v7964_v38 = vpop.xlane.xlu1 %7963 }
 0xf02   : > { %15700 = vrcp.f32 %v7964_v38  ;;  %v7961_v40 = vpop.xlane.xlu0 %7960 }
 0xf03   : > { %15702 = vrcp.f32 %v7961_v40 }
 0xf0c   : > { %v15701_v63 = vpop.eup %15700 }
 0xf0d   : > { %v15703_v61 = vpop.eup %15702  ;;  %v7980_v3 = vmul.f32 %v15701_v63, %v18187_v15 }
 0xf0e   : > { %v7979_v0 = vmul.f32 %v15703_v61, %v18189_v47 }
 0xf0f   : > { %v7988_v1 = vpack.c.bf16 %v7980_v3, %v7980_v3 }
 0xf10   : > { %v7987_v2 = vpack.c.bf16 %v7979_v0, %v7979_v0 }
 0xf11   : > { %14603 = vmatmul.mubr.msk.bf16.vlgmr.msra.gmra.mrb[176].mxu1 %vm3694_vm9, %v7988_v1 }
 0xf12   : > { %14597 = vmatmul.mubr.msk.bf16.vlgmr.msra.gmra.mrb[176].mxu0 %vm3694_vm9, %v7987_v2  ;;  %14614 = vmatprep.mubr.msk.bf16.mxu1 %vm15794_vm7, %v15793_v19 }
 0xf13   : > { %14608 = vmatprep.mubr.msk.bf16.mxu0 %vm15794_vm7, %v15793_v19  ;;  %14607 = vmatpush3.bf16.msra.mxu0 %v15158_v20 }
 0xf14   : > { %14613 = vmatpush3.bf16.msra.mxu1 %v15159_v4  ;;  %14618 = vmatprep.subr.bf16.mxu0 %v15793_v19 }
 0xf15   : > { %14624 = vmatprep.subr.bf16.mxu1 %v15793_v19 }
 0xf93   : > { %v8083_v5 = vpop.f32.mrb[164].mxu1 }
 0xf94   : > { %v8037_v37 = vpop.f32.mrb[164].mxu0  ;;  %v8366_v9 = vpack.c.bf16 %v8083_v5, %v8083_v5  ;;  %v14568_v8 = vpop.f32.mrb[165].mxu1 }
 0xf95   : > { %v8365_v33 = vpack.c.bf16 %v8037_v37, %v8037_v37  ;;  %v14562_v12 = vpop.f32.mrb[165].mxu0  ;;  %v8086_v15 = vpop.f32.mrb[166].mxu1 }
 0xf96   : > { %v8040_v47 = vpop.f32.mrb[166].mxu0  ;;  %v14569_v26 = vpop.f32.mrb[167].mxu1  ;;  %14615 = vmatmul.mubr.msk.bf16.vlgmr.msra.gmra.mrb[180].mxu1 %vm3317_vm8, %v8366_v9 }
 0xf97   : > { %v14563_v22 = vpop.f32.mrb[167].mxu0  ;;  %14609 = vmatmul.mubr.msk.bf16.vlgmr.msra.gmra.mrb[180].mxu0 %vm3317_vm8, %v8365_v33  ;;  %14625 = vmatpush3.bf16.msra.mxu1 %v15161_v6 }
 0xf98   : > { %14619 = vmatpush3.bf16.msra.mxu0 %v15160_v7  ;;  %14620 = vmatprep.mubr.msk.bf16.mxu0 %vm15794_vm7, %v15793_v19 }
 0xf99   : > { %14626 = vmatprep.mubr.msk.bf16.mxu1 %vm15794_vm7, %v15793_v19  ;;  %14630 = vmatprep.subr.bf16.mxu0 %v15793_v19 }
 0xf9a   : > { %14636 = vmatprep.subr.bf16.mxu1 %v15793_v19 }
 0xfa4   : > { %v8175_v25 = vpop.f32.mrb[168].mxu1 }
 0xfa5   : > { %v8129_v49 = vpop.f32.mrb[168].mxu0  ;;  %v8368_v29 = vpack.c.bf16 %v8175_v25, %v8175_v25  ;;  %v14580_v14 = vpop.f32.mrb[169].mxu1 }
 0xfa6   : > { %v8367_v46 = vpack.c.bf16 %v8129_v49, %v8129_v49  ;;  %v14574_v24 = vpop.f32.mrb[169].mxu0  ;;  %v8178_v35 = vpop.f32.mrb[170].mxu1 }
 0xfa7   : > { %v8132_v36 = vpop.f32.mrb[170].mxu0  ;;  %v14581_v41 = vpop.f32.mrb[171].mxu1  ;;  %14627 = vmatmul.mubr.msk.bf16.vlgmr.msra.gmra.mrb[184].mxu1 %vm3317_vm8, %v8368_v29 }
 0xfa8   : > { %v14575_v42 = vpop.f32.mrb[171].mxu0  ;;  %14621 = vmatmul.mubr.msk.bf16.vlgmr.msra.gmra.mrb[184].mxu0 %vm3317_vm8, %v8367_v46  ;;  %14637 = vmatpush3.bf16.msra.mxu1 %v15163_v27 }
 0xfa9   : > { %14631 = vmatpush3.bf16.msra.mxu0 %v15162_v23  ;;  %14632 = vmatprep.mubr.msk.bf16.mxu0 %vm15794_vm7, %v15793_v19 }
 0xfaa   : > { %14638 = vmatprep.mubr.msk.bf16.mxu1 %vm15794_vm7, %v15793_v19  ;;  %14642 = vmatprep.subr.bf16.mxu0 %v15793_v19 }
 0xfab   : > { %14648 = vmatprep.subr.bf16.mxu1 %v15793_v19 }
 0xfc4   : > { %v8267_v43 = vpop.f32.mrb[172].mxu1 }
 0xfc5   : > { %v8221_v17 = vpop.f32.mrb[172].mxu0  ;;  %v8370_v45 = vpack.c.bf16 %v8267_v43, %v8267_v43  ;;  %v14592_v48 = vpop.f32.mrb[173].mxu1 }
 0xfc6   : > { %v8369_v31 = vpack.c.bf16 %v8221_v17, %v8221_v17  ;;  %v14586_v52 = vpop.f32.mrb[173].mxu0  ;;  %v8270_v53 = vpop.f32.mrb[174].mxu1  ;;  %v12433_v17 = vld [vmem:[%s19420_s10 + $0x1] ss:$0 sm:$0xff] }
 0xfc7   : > { %v8224_v59 = vpop.f32.mrb[174].mxu0  ;;  %v14593_v55 = vpop.f32.mrb[175].mxu1  ;;  %14639 = vmatmul.mubr.msk.bf16.vlgmr.msra.gmra.mrb[188].mxu1 %vm3317_vm8, %v8370_v45  ;;  %v15171_v52 = vld [vmem:[%s19423_s13 + $0x94] ss:$8 sps:$4 sm:$0xff]   ;;  %v15174_v53 = vld [vmem:[%s19423_s13 + $0xa4] ss:$8 sps:$4 sm:$0xff]  }
 0xfc8   : > { %v14587_v34 = vpop.f32.mrb[175].mxu0  ;;  %14633 = vmatmul.mubr.msk.bf16.vlgmr.msra.gmra.mrb[188].mxu0 %vm3317_vm8, %v8369_v31  ;;  %14649 = vmatpush3.bf16.msra.mxu1 %v15165_v18  ;;  %v15168_v31 = vld [vmem:[%s19423_s13 + $0x84] ss:$8 sps:$4 sm:$0xff]   ;;  %v15172_v59 = vld [vmem:[%s19423_s13 + $0xa0] ss:$8 sps:$4 sm:$0xff]  }
 0xfc9   : > { %14643 = vmatpush3.bf16.msra.mxu0 %v15164_v50  ;;  %14644 = vmatprep.mubr.msk.bf16.mxu0 %vm15794_vm7, %v15793_v19  ;;  %v15166_v50 = vld [vmem:[%s19423_s13 + $0x80] ss:$8 sps:$4 sm:$0xff]  }
 0xfca   : > { %14650 = vmatprep.mubr.msk.bf16.mxu1 %vm15794_vm7, %v15793_v19  ;;  %8939 = vmatprep.subr.bf16.mxu0 %v15168_v31  ;;  %v15231_v31 = vld [vmem:[%s19493_s14 + $0x360] ss:$16 sps:$4 sm:$0xff]  }
 0xfe4   : > { %v8359_v32 = vpop.f32.mrb[176].mxu1 }
 0xfe5   : > { %v8313_v16 = vpop.f32.mrb[176].mxu0  ;;  %v8372_v39 = vpack.c.bf16 %v8359_v32, %v8359_v32  ;;  %v14604_v51 = vpop.f32.mrb[177].mxu1 }
 0xfe6   : > { %v8371_v28 = vpack.c.bf16 %v8313_v16, %v8313_v16  ;;  %v14598_v54 = vpop.f32.mrb[177].mxu0  ;;  %v8362_v57 = vpop.f32.mrb[178].mxu1  ;;  %v15175_v51 = vld [vmem:[%s19423_s13 + $0xb0] ss:$8 sps:$4 sm:$0xff]  }
 0xfe7   : > { %v8316_v60 = vpop.f32.mrb[178].mxu0  ;;  %v14605_v44 = vpop.f32.mrb[179].mxu1  ;;  %14651 = vmatmul.mubr.msk.bf16.vlgmr.msra.gmra.mrb[192].mxu1 %vm3317_vm8, %v8372_v39  ;;  %v15177_v39 = vld [vmem:[%s19423_s13 + $0xb4] ss:$8 sps:$4 sm:$0xff]   ;;  %v15178_v54 = vld [vmem:[%s19423_s13 + $0xc0] ss:$8 sps:$4 sm:$0xff]  }
 0xfe8   : > { %v14599_v58 = vpop.f32.mrb[179].mxu0  ;;  %14645 = vmatmul.mubr.msk.bf16.vlgmr.msra.gmra.mrb[192].mxu0 %vm3317_vm8, %v8371_v28  ;;  %v15180_v28 = vld [vmem:[%s19423_s13 + $0xc4] ss:$8 sps:$4 sm:$0xff]   ;;  %v15183_v57 = vld [vmem:[%s19423_s13 + $0xd4] ss:$8 sps:$4 sm:$0xff]  }
 0xfe9   : > { %8971 = vmatprep.mubr.bf16.mxu0 %v15795_v30  ;;  %8940 = vmatpush1.bf16.msra.mxu0 %v15166_v50  ;;  %v15181_v60 = vld [vmem:[%s19423_s13 + $0xd0] ss:$8 sps:$4 sm:$0xff]   ;;  %v15186_v44 = vld [vmem:[%s19423_s13 + $0xe4] ss:$8 sps:$4 sm:$0xff]   ;;  %v15184_v58 = vld [vmem:[%s19423_s13 + $0xe0] ss:$8 sps:$4 sm:$0xff]  }
 0xfea   : > { %8941 = vmatprep.subr.bf16.mxu0 %v15171_v52  ;;  %v15230_v50 = vld [vmem:[%s19425_s15 + $0x98] sm:$0xff]   ;;  %v15233_v52 = vld [vmem:[%s19493_s14 + $0x364] ss:$16 sps:$4 sm:$0xff]  }
0x1069   : > { %v8482_v21 = vpop.f32.mrb[180].mxu1 }
0x106a   : > { %v8433_v62 = vpop.f32.mrb[180].mxu0  ;;  %v14616_v38 = vpop.f32.mrb[181].mxu1 }
0x106b   : > { %v8782_v19 = vadd.f32 %v8482_v21, %v8433_v62  ;;  %v14610_v40 = vpop.f32.mrb[181].mxu0  ;;  %v8485_v63 = vpop.f32.mrb[182].mxu1  ;;  %v15189_v21 = vld [vmem:[%s19423_s13 + $0xf4] ss:$8 sps:$4 sm:$0xff]   ;;  %v15187_v62 = vld [vmem:[%s19423_s13 + $0xf0] ss:$8 sps:$4 sm:$0xff]  }
0x106c   : > { %v8436_v61 = vpop.f32.mrb[182].mxu0  ;;  %v14617_v3 = vpop.f32.mrb[183].mxu1  ;;  %v15192_v38 = vld [vmem:[%s19493_s14 + $0x204] ss:$16 sps:$4 sm:$0xff]  }
0x106d   : > { %v14611_v0 = vpop.f32.mrb[183].mxu0  ;;  %v12436_v3 = vld [vmem:[%s19421_s11 + $0x1] ss:$0 sm:$0xff] }
0x107a   : > { %v8580_v1 = vpop.f32.mrb[184].mxu1 }
0x107b   : > { %v8531_v2 = vpop.f32.mrb[184].mxu0  ;;  %v14628_v20 = vpop.f32.mrb[185].mxu1 }
0x107c   : > { %v8783_v4 = vadd.f32 %v8782_v19, %v8531_v2  ;;  %v14622_v5 = vpop.f32.mrb[185].mxu0  ;;  %v8583_v6 = vpop.f32.mrb[186].mxu1 }
0x107d   : > { %v8534_v37 = vpop.f32.mrb[186].mxu0  ;;  %v14629_v9 = vpop.f32.mrb[187].mxu1  ;;  %v15195_v6 = vld [vmem:[%s19493_s14 + $0x224] ss:$16 sps:$4 sm:$0xff]  }
0x107e   : > { %v8784_v8 = vadd.f32 %v8783_v4, %v8580_v1  ;;  %v14623_v7 = vpop.f32.mrb[187].mxu0  ;;  %v12437_v1 = vld [vmem:[%s19422_s12 + $0x1] ss:$0 sm:$0xff]  ;;  %v15198_v9 = vld [vmem:[%s19493_s14 + $0x244] ss:$16 sps:$4 sm:$0xff]  }
0x107f   : > { %v15190_v4 = vld [vmem:[%s19493_s14 + $0x200] ss:$16 sps:$4 sm:$0xff]   ;;  %v15201_v7 = vld [vmem:[%s19493_s14 + $0x264] ss:$16 sps:$4 sm:$0xff]  }
0x1080   : > { %v15193_v37 = vld [vmem:[%s19493_s14 + $0x220] ss:$16 sps:$4 sm:$0xff]  }
0x109a   : > { %v8678_v33 = vpop.f32.mrb[188].mxu1 }
0x109b   : > { %v8629_v12 = vpop.f32.mrb[188].mxu0  ;;  %v14640_v15 = vpop.f32.mrb[189].mxu1 }
0x109c   : > { %v8785_v47 = vadd.f32 %v8784_v8, %v8629_v12  ;;  %v14634_v26 = vpop.f32.mrb[189].mxu0  ;;  %v8681_v22 = vpop.f32.mrb[190].mxu1  ;;  %v15196_v8 = vld [vmem:[%s19493_s14 + $0x240] ss:$16 sps:$4 sm:$0xff]   ;;  %v15204_v12 = vld [vmem:[%s19493_s14 + $0x284] ss:$16 sps:$4 sm:$0xff]  }
0x109d   : > { %v8632_v25 = vpop.f32.mrb[190].mxu0  ;;  %v14641_v27 = vpop.f32.mrb[191].mxu1  ;;  %v15202_v15 = vld [vmem:[%s19493_s14 + $0x280] ss:$16 sps:$4 sm:$0xff]   ;;  %v15210_v22 = vld [vmem:[%s19493_s14 + $0x2c4] ss:$16 sps:$4 sm:$0xff]  }
0x109e   : > { %v8786_v49 = vadd.f32 %v8785_v47, %v8678_v33  ;;  %v14635_v29 = vpop.f32.mrb[191].mxu0  ;;  %v15199_v33 = vld [vmem:[%s19493_s14 + $0x260] ss:$16 sps:$4 sm:$0xff]   ;;  %v15207_v47 = vld [vmem:[%s19493_s14 + $0x2a4] ss:$16 sps:$4 sm:$0xff]  }
0x109f   : > { %v15205_v26 = vld [vmem:[%s19493_s14 + $0x2a0] ss:$16 sps:$4 sm:$0xff]   ;;  %v15213_v27 = vld [vmem:[%s19493_s14 + $0x2e4] ss:$16 sps:$4 sm:$0xff]  }
0x10a0   : > { %v15208_v25 = vld [vmem:[%s19493_s14 + $0x2c0] ss:$16 sps:$4 sm:$0xff]  }
0x10a1   : > { %v15214_v29 = vld [vmem:[%s19425_s15 + $0xc0] sm:$0xff]  }
0x10a2   : > { %13362 = vmatprep.subr.bf16.mxu1 %v15214_v29  ;;  %v15311_v29 = vld [vmem:[%s19493_s14 + $0x520] ss:$16 sps:$4 sm:$0xff]  }
0x10ba   : > { %v8776_v14 = vpop.f32.mrb[192].mxu1 }
0x10bb   : > { %v8727_v23 = vpop.f32.mrb[192].mxu0  ;;  %v14652_v46 = vpop.f32.mrb[193].mxu1 }
0x10bc   : > { %v8787_v24 = vadd.f32 %v8786_v49, %v8727_v23  ;;  %v14646_v35 = vpop.f32.mrb[193].mxu0  ;;  %v8779_v36 = vpop.f32.mrb[194].mxu1  ;;  %v15211_v49 = vld [vmem:[%s19493_s14 + $0x2e0] ss:$16 sps:$4 sm:$0xff]   ;;  %v15218_v23 = vld [vmem:[%s19493_s14 + $0x304] ss:$16 sps:$4 sm:$0xff]  }
0x10bd   : > { %v8730_v41 = vpop.f32.mrb[194].mxu0  ;;  %v14653_v42 = vpop.f32.mrb[195].mxu1  ;;  %v15216_v46 = vld [vmem:[%s19493_s14 + $0x300] ss:$16 sps:$4 sm:$0xff]   ;;  %v15220_v35 = vld [vmem:[%s19425_s15 + $0x88] sm:$0xff]  }
0x10be   : > { %v8788_v43 = vadd.f32 %v8787_v24, %v8776_v14  ;;  %v14647_v18 = vpop.f32.mrb[195].mxu0  ;;  %v15215_v14 = vld [vmem:[%s19425_s15 + $0x80] sm:$0xff]   ;;  %v15219_v24 = vld [vmem:[%s19425_s15 + $0xc8] sm:$0xff]   ;;  %v15224_v42 = vld [vmem:[%s19425_s15 + $0xd0] sm:$0xff]  }
0x10bf   : > { %13363 = vmatpush3.bf16.msra.mxu1 %v15215_v14  ;;  %v15223_v36 = vld [vmem:[%s19493_s14 + $0x324] ss:$16 sps:$4 sm:$0xff]   ;;  %v15221_v41 = vld [vmem:[%s19493_s14 + $0x320] ss:$16 sps:$4 sm:$0xff]  }
0x10c0   : > { %v8789_v45 = vadd.f32 %v8788_v43, %v17221_v56  ;;  %v15169_v56 = vld [vmem:[%s19423_s13 + $0x90] ss:$8 sps:$4 sm:$0xff]   ;;  %13364 = vmatprep.subr.bf16.mxu1 %v15219_v24  ;;  %v15228_v18 = vld [vmem:[%s19493_s14 + $0x344] ss:$16 sps:$4 sm:$0xff]  }
0x10c1   : > { %8942 = vmatpush1.bf16.msra.mxu0 %v15169_v56  ;;  %v15225_v43 = vld [vmem:[%s19425_s15 + $0x90] sm:$0xff]   ;;  %v15234_v56 = vld [vmem:[%s19425_s15 + $0xe0] sm:$0xff]  }
0x10c2   : > { %v18304_v48 = vadd.f32 %v12433_v17, %v8789_v45  ;;  %8943 = vmatprep.subr.bf16.mxu0 %v15174_v53  ;;  %v15226_v17 = vld [vmem:[%s19493_s14 + $0x340] ss:$16 sps:$4 sm:$0xff]   ;;  %v15229_v45 = vld [vmem:[%s19425_s15 + $0xd8] sm:$0xff]   ;;  %v15319_v14 = vld [vmem:[%s19493_s14 + $0x544] ss:$16 sps:$4 sm:$0xff]  }
0x10c3   : > { %13365 = vmatpush3.bf16.msra.mxu1 %v15220_v35  ;;  %v15235_v53 = vld [vmem:[%s19425_s15 + $0xa0] sm:$0xff]  }
0x10c4   : > { %8803 = vadd.xlane.f32.xlu0 %v18304_v48  ;;  %13366 = vmatprep.subr.bf16.mxu1 %v15224_v42  ;;  %v15323_v24 = vld [vmem:[%s19493_s14 + $0x560] ss:$16 sps:$4 sm:$0xff]   ;;  %v15331_v35 = vld [vmem:[%s19493_s14 + $0x584] ss:$16 sps:$4 sm:$0xff]  }
0x10c5   : > { %8944 = vmatpush1.bf16.msra.mxu0 %v15172_v59  ;;  %v15238_v59 = vld [vmem:[%s19493_s14 + $0x384] ss:$16 sps:$4 sm:$0xff]   ;;  %v15335_v42 = vld [vmem:[%s19493_s14 + $0x5a0] ss:$16 sps:$4 sm:$0xff]  }
0x10c6   : > { %8945 = vmatprep.subr.bf16.mxu0 %v15177_v39  ;;  %v15244_v39 = vld [vmem:[%s19425_s15 + $0xf0] sm:$0xff]  }
0x10c7   : > { %13367 = vmatpush3.bf16.msra.mxu1 %v15225_v43  ;;  %v15343_v43 = vld [vmem:[%s19493_s14 + $0x5c4] ss:$16 sps:$4 sm:$0xff]  }
0x10c8   : > { %13368 = vmatprep.subr.bf16.mxu1 %v15229_v45  ;;  %v15349_v45 = vld [vmem:[%s19493_s14 + $0x5e4] ss:$16 sps:$4 sm:$0xff]  }
0x10c9   : > { %8946 = vmatpush1.bf16.msra.mxu0 %v15175_v51  ;;  %v15241_v51 = vld [vmem:[%s19493_s14 + $0x3a0] ss:$16 sps:$4 sm:$0xff]  }
0x10ca   : > { %8947 = vmatprep.subr.bf16.mxu0 %v15180_v28  ;;  %v15248_v28 = vld [vmem:[%s19493_s14 + $0x3c4] ss:$16 sps:$4 sm:$0xff]  }
0x10cb   : > { %13369 = vmatpush3.bf16.msra.mxu1 %v15230_v50  ;;  %v9206_v50 = vsub.s32 4, %v17202_v10 }
0x10cc   : > { %13370 = vmatprep.subr.bf16.mxu1 %v15234_v56 }
0x10cd   : > { %8948 = vmatpush1.bf16.msra.mxu0 %v15178_v54  ;;  %v15245_v54 = vld [vmem:[%s19425_s15 + $0xb0] sm:$0xff]  }
0x10ce   : > { %8949 = vmatprep.subr.bf16.mxu0 %v15183_v57  ;;  %v15249_v57 = vld [vmem:[%s19425_s15 + $0xf8] sm:$0xff]  }
0x10cf   : > { %13371 = vmatpush3.bf16.msra.mxu1 %v15235_v53 }
0x10d1   : > { %8950 = vmatpush1.bf16.msra.mxu0 %v15181_v60  ;;  %v15246_v60 = vld [vmem:[%s19493_s14 + $0x3c0] ss:$16 sps:$4 sm:$0xff]  }
0x10d2   : > { %8951 = vmatprep.subr.bf16.mxu0 %v15186_v44  ;;  %v15253_v44 = vld [vmem:[%s19493_s14 + $0x3e4] ss:$16 sps:$4 sm:$0xff]  }
0x10d5   : > { %8952 = vmatpush1.bf16.msra.mxu0 %v15184_v58  ;;  %v15250_v58 = vld [vmem:[%s19425_s15 + $0xb8] sm:$0xff]  }
0x10d6   : > { %8953 = vmatprep.subr.bf16.mxu0 %v15189_v21  ;;  %v15251_v21 = vld [vmem:[%s19493_s14 + $0x3e0] ss:$16 sps:$4 sm:$0xff]  }
0x10d9   : > { %8954 = vmatpush1.bf16.msra.mxu0 %v15187_v62  ;;  %v9202_v62 = vsub.s32 3, %v17202_v10 }
0x10da   : > { %10439 = vmatprep.subr.bf16.mxu0 %v15192_v38  ;;  %v18512_v38 = vld [vmem:[%s684_s2] sm:$0x3f]  ;;  %s15726_s2 = scalar_lea.vmem %s19370_s5, 16 }
0x10db   : > { %v9207_v56 = vrot.slane %v18512_v38, %v9206_v50  ;;  %v15310_v50 = vld [vmem:[%s19493_s14 + $0x124] ss:$16 sps:$4 sm:$0xff]   ;;  %p15727_p2 = scmp.ne.s32.totalorder %s19370_s5, %s15726_s2 }
0x10dd   : > { %p15728_p3 = pnand %p15727_p2, %p15958_p10 }
0x10df   : > { %p15729_p4 = pneg %p15728_p3 }
0x1151   : > { %v8804_v55 = vpop.xlane.xlu0 %8803 }
0x1152   : > { %v8805_v34 = vmul.f32 0.0078125, %v8804_v55  ;;  %v15239_v55 = vld [vmem:[%s19425_s15 + $0xe8] sm:$0xff]  }
0x1153   : > { %13372 = vmatprep.subr.bf16.mxu1 %v15239_v55  ;;  %v12454_v55 = vld [vmem:[%s19491_s16 + $0x2] sm:$0x3] }
0x1154   : > { %v8806_v32 = vsub.f32 %v18304_v48, %v8805_v34  ;;  %v15236_v34 = vld [vmem:[%s19493_s14 + $0x380] ss:$16 sps:$4 sm:$0xff]  }
0x1156   : > { %v8807_v16 = vmul.f32 %v8806_v32, %v8806_v32 }
0x1158   : > { %8808 = vadd.xlane.f32.xlu1 %v8807_v16  ;;  %v15240_v16 = vld [vmem:[%s19425_s15 + $0xa8] sm:$0xff]  }
0x1159   : > { %13373 = vmatpush3.bf16.msra.mxu1 %v15240_v16 }
0x115a   : > { %13374 = vmatprep.subr.bf16.mxu1 %v15244_v39 }
0x115d   : > { %13375 = vmatpush3.bf16.msra.mxu1 %v15245_v54 }
0x115e   : > { %13376 = vmatprep.subr.bf16.mxu1 %v15249_v57 }
0x1161   : > { %13377 = vmatpush3.bf16.msra.mxu1 %v15250_v58 }
0x11e5   : > { %v8809_v19 = vpop.xlane.xlu1 %8808 }
0x11e6   : > { %v8810_v40 = vmul.f32 0.0078125, %v8809_v19  ;;  %v9198_v19 = vsub.s32 2, %v17202_v10 }
0x11e8   : > { %v8811_v63 = vadd.f32 1e-05, %v8810_v40  ;;  %v15256_v40 = vld [vmem:[%s19493_s14 + $0x4] ss:$16 sps:$4 sm:$0xff]  }
0x11e9   : > { %10398 = vmatprep.subr.bf16.mxu1 %v15256_v40 }
0x11ea   : > { %15704 = vrsqrt.f32 %v8811_v63  ;;  %v9203_v63 = vrot.slane %v18512_v38, %v9202_v62 }
0x11f4   : > { %v15705_v61 = vpop.eup %15704 }
0x11f5   : > { %v8813_v0 = vmul.f32 %v15705_v61, %v8806_v32  ;;  %v15243_v32 = vld [vmem:[%s19493_s14 + $0x3a4] ss:$16 sps:$4 sm:$0xff]   ;;  %v9199_v61 = vrot.slane %v18512_v38, %v9198_v19 }
0x11f7   : > { %v8820_v2 = vmul.f32 %v12436_v3, %v8813_v0  ;;  %v18524_v3 = vpack.c.bf16 %v9203_v63, %v9203_v63  ;;  %v15259_v0 = vld [vmem:[%s19493_s14 + $0x404] ss:$16 sps:$4 sm:$0xff]  }
0x11f9   : > { %v8827_v20 = vadd.f32 %v12437_v1, %v8820_v2  ;;  %v15257_v1 = vld [vmem:[%s19493_s14 + $0x400] ss:$16 sps:$4 sm:$0xff]   ;;  %v18532_v2 = vpack.c.bf16 %v9199_v61, %v9199_v61 }
0x11fb   : > { %v8828_v5 = vpack.c.bf16 %v8827_v20, %v8827_v20  ;;  %v15265_v20 = vld [vmem:[%s19493_s14 + $0x424] ss:$16 sps:$4 sm:$0xff]  }
0x11fd   : > { %8972 = vmatmul.mubr.bf16.vlgmr.msra.gmra.mrb[196].mxu0 %v8828_v5  ;;  %v15271_v5 = vld [vmem:[%s19493_s14 + $0x444] ss:$16 sps:$4 sm:$0xff]  }
0x11fe   : > { %10440 = vmatpush1.bf16.msra.mxu0 %v15190_v4  ;;  %10471 = vmatprep.mubr.bf16.mxu0 %v18524_v3  ;;  %v15263_v4 = vld [vmem:[%s19493_s14 + $0x420] ss:$16 sps:$4 sm:$0xff]  }
0x11ff   : > { %10441 = vmatprep.subr.bf16.mxu0 %v15195_v6  ;;  %v15269_v6 = vld [vmem:[%s19493_s14 + $0x440] ss:$16 sps:$4 sm:$0xff]  }
0x1202   : > { %10442 = vmatpush1.bf16.msra.mxu0 %v15193_v37  ;;  %v15277_v37 = vld [vmem:[%s19493_s14 + $0x464] ss:$16 sps:$4 sm:$0xff]  }
0x1203   : > { %10443 = vmatprep.subr.bf16.mxu0 %v15198_v9  ;;  %v15275_v9 = vld [vmem:[%s19493_s14 + $0x460] ss:$16 sps:$4 sm:$0xff]  }
0x1206   : > { %10444 = vmatpush1.bf16.msra.mxu0 %v15196_v8  ;;  %v15283_v8 = vld [vmem:[%s19493_s14 + $0x484] ss:$16 sps:$4 sm:$0xff]  }
0x1207   : > { %10445 = vmatprep.subr.bf16.mxu0 %v15201_v7  ;;  %v15281_v7 = vld [vmem:[%s19493_s14 + $0x480] ss:$16 sps:$4 sm:$0xff]  }
0x120a   : > { %10446 = vmatpush1.bf16.msra.mxu0 %v15199_v33  ;;  %v15289_v33 = vld [vmem:[%s19493_s14 + $0x4a4] ss:$16 sps:$4 sm:$0xff]  }
0x120b   : > { %10447 = vmatprep.subr.bf16.mxu0 %v15204_v12  ;;  %v15287_v12 = vld [vmem:[%s19493_s14 + $0x4a0] ss:$16 sps:$4 sm:$0xff]  }
0x120e   : > { %10448 = vmatpush1.bf16.msra.mxu0 %v15202_v15  ;;  %v15295_v15 = vld [vmem:[%s19493_s14 + $0x4c4] ss:$16 sps:$4 sm:$0xff]  }
0x120f   : > { %10449 = vmatprep.subr.bf16.mxu0 %v15207_v47  ;;  %v15293_v47 = vld [vmem:[%s19493_s14 + $0x4c0] ss:$16 sps:$4 sm:$0xff]  }
0x1212   : > { %10450 = vmatpush1.bf16.msra.mxu0 %v15205_v26  ;;  %v15301_v26 = vld [vmem:[%s19493_s14 + $0x4e4] ss:$16 sps:$4 sm:$0xff]  }
0x1213   : > { %10451 = vmatprep.subr.bf16.mxu0 %v15210_v22  ;;  %v15299_v22 = vld [vmem:[%s19493_s14 + $0x4e0] ss:$16 sps:$4 sm:$0xff]  }
0x1216   : > { %10452 = vmatpush1.bf16.msra.mxu0 %v15208_v25  ;;  %v15307_v25 = vld [vmem:[%s19493_s14 + $0x504] ss:$16 sps:$4 sm:$0xff]  }
0x1217   : > { %10453 = vmatprep.subr.bf16.mxu0 %v15213_v27  ;;  %v15305_v27 = vld [vmem:[%s19493_s14 + $0x500] ss:$16 sps:$4 sm:$0xff]  }
0x121a   : > { %10454 = vmatpush1.bf16.msra.mxu0 %v15211_v49  ;;  %v15313_v49 = vld [vmem:[%s19493_s14 + $0x524] ss:$16 sps:$4 sm:$0xff]  }
0x121b   : > { %10455 = vmatprep.subr.bf16.mxu0 %v15218_v23  ;;  %v15317_v23 = vld [vmem:[%s19493_s14 + $0x540] ss:$16 sps:$4 sm:$0xff]  }
0x121e   : > { %10456 = vmatpush1.bf16.msra.mxu0 %v15216_v46  ;;  %v15325_v46 = vld [vmem:[%s19493_s14 + $0x564] ss:$16 sps:$4 sm:$0xff]  }
0x121f   : > { %10457 = vmatprep.subr.bf16.mxu0 %v15223_v36  ;;  %v15329_v36 = vld [vmem:[%s19493_s14 + $0x580] ss:$16 sps:$4 sm:$0xff]  }
0x1222   : > { %10458 = vmatpush1.bf16.msra.mxu0 %v15221_v41  ;;  %v15337_v41 = vld [vmem:[%s19493_s14 + $0x5a4] ss:$16 sps:$4 sm:$0xff]  }
0x1223   : > { %10459 = vmatprep.subr.bf16.mxu0 %v15228_v18  ;;  %v15341_v18 = vld [vmem:[%s19493_s14 + $0x5c0] ss:$16 sps:$4 sm:$0xff]  }
0x1226   : > { %10460 = vmatpush1.bf16.msra.mxu0 %v15226_v17  ;;  %v9210_v17 = vsub.s32 5, %v17202_v10  ;;  %v15595_v10 = vld [vmem:[%s19496_s23 + $0x214] ss:$8 sps:$4 sm:$0xff]  }
0x1227   : > { %10461 = vmatprep.subr.bf16.mxu0 %v15233_v52 }
0x1228   : > { %v9211_v52 = vrot.slane %v18512_v38, %v9210_v17  ;;  %v15304_v17 = vld [vmem:[%s19493_s14 + $0x104] ss:$16 sps:$4 sm:$0xff]  }
0x122a   : > { %10462 = vmatpush1.bf16.msra.mxu0 %v15231_v31  ;;  %v15347_v31 = vld [vmem:[%s19493_s14 + $0x5e0] ss:$16 sps:$4 sm:$0xff]   ;;  %v18630_v53 = vpack.c.bf16 %v9211_v52, %v9211_v52  ;;  %v15316_v52 = vld [vmem:[%s19493_s14 + $0x144] ss:$16 sps:$4 sm:$0xff]  }
0x122b   : > { %10463 = vmatprep.subr.bf16.mxu0 %v15238_v59  ;;  %v18632_v59 = vpack.c.bf16 %v9207_v56, %v9207_v56  ;;  %v15314_v56 = vld [vmem:[%s19493_s14 + $0x140] ss:$16 sps:$4 sm:$0xff]  }
0x122e   : > { %10464 = vmatpush1.bf16.msra.mxu0 %v15236_v34  ;;  %v8852_v34 = vrot.slane %v12454_v55, %v17205_v11 }
0x122f   : > { %10465 = vmatprep.subr.bf16.mxu0 %v15243_v32  ;;  %v8856_v32 = vrot.slane %v12454_v55, %v17211_v13  ;;  %v15322_v55 = vld [vmem:[%s19493_s14 + $0x164] ss:$16 sps:$4 sm:$0xff]  }
0x1232   : > { %10466 = vmatpush1.bf16.msra.mxu0 %v15241_v51 }
0x1233   : > { %10467 = vmatprep.subr.bf16.mxu0 %v15248_v28 }
0x1236   : > { %10468 = vmatpush1.bf16.msra.mxu0 %v15246_v60 }
0x1237   : > { %10469 = vmatprep.subr.bf16.mxu0 %v15253_v44 }
0x123a   : > { %10470 = vmatpush1.bf16.msra.mxu0 %v15251_v21 }
0x123b   : > { %10480 = vmatprep.subr.bf16.mxu0 %v15259_v0 }
0x123d   : > { %10472 = vmatmul.mubr.bf16.vlgmr.msra.gmra.mrb[200].mxu0 %v18532_v2 }
0x123e   : > { %10481 = vmatpush1.bf16.msra.mxu0 %v15257_v1  ;;  %10512 = vmatprep.mubr.bf16.mxu0 %v18630_v53 }
0x123f   : > { %10482 = vmatprep.subr.bf16.mxu0 %v15265_v20 }
0x1242   : > { %10483 = vmatpush1.bf16.msra.mxu0 %v15263_v4 }
0x1243   : > { %10484 = vmatprep.subr.bf16.mxu0 %v15271_v5 }
0x1246   : > { %10485 = vmatpush1.bf16.msra.mxu0 %v15269_v6 }
0x1247   : > { %10486 = vmatprep.subr.bf16.mxu0 %v15277_v37 }
0x124a   : > { %10487 = vmatpush1.bf16.msra.mxu0 %v15275_v9 }
0x124b   : > { %10488 = vmatprep.subr.bf16.mxu0 %v15283_v8 }
0x124e   : > { %10489 = vmatpush1.bf16.msra.mxu0 %v15281_v7  ;;  %v9195_v7 = vrot.slane %v18512_v38, %v17211_v13 }
0x124f   : > { %10490 = vmatprep.subr.bf16.mxu0 %v15289_v33 }
0x1252   : > { %10491 = vmatpush1.bf16.msra.mxu0 %v15287_v12 }
0x1253   : > { %10492 = vmatprep.subr.bf16.mxu0 %v15295_v15 }
0x1256   : > { %10493 = vmatpush1.bf16.msra.mxu0 %v15293_v47  ;;  %v15254_v47 = vld [vmem:[%s19493_s14] ss:$16 sps:$4 sm:$0xff]  }
0x1257   : > { %10494 = vmatprep.subr.bf16.mxu0 %v15301_v26  ;;  %v18646_v26 = vpack.c.bf16 %v9195_v7, %v9195_v7  ;;  %v15373_v7 = vld [vmem:[%s19493_s14 + $0xec] ss:$16 sps:$4 sm:$0xff]  }
0x125a   : > { %10495 = vmatpush1.bf16.msra.mxu0 %v15299_v22 }
0x125b   : > { %10496 = vmatprep.subr.bf16.mxu0 %v15307_v25  ;;  %v15262_v25 = vld [vmem:[%s19493_s14 + $0x24] ss:$16 sps:$4 sm:$0xff]  }
0x125e   : > { %10497 = vmatpush1.bf16.msra.mxu0 %v15305_v27  ;;  %v15260_v27 = vld [vmem:[%s19493_s14 + $0x20] ss:$16 sps:$4 sm:$0xff]  }
0x125f   : > { %10498 = vmatprep.subr.bf16.mxu0 %v15313_v49  ;;  %v15268_v49 = vld [vmem:[%s19493_s14 + $0x44] ss:$16 sps:$4 sm:$0xff]  }
0x1262   : > { %10499 = vmatpush1.bf16.msra.mxu0 %v15311_v29  ;;  %v15266_v29 = vld [vmem:[%s19493_s14 + $0x40] ss:$16 sps:$4 sm:$0xff]  }
0x1263   : > { %10500 = vmatprep.subr.bf16.mxu0 %v15319_v14  ;;  %v15274_v14 = vld [vmem:[%s19493_s14 + $0x64] ss:$16 sps:$4 sm:$0xff]  }
0x1266   : > { %10501 = vmatpush1.bf16.msra.mxu0 %v15317_v23  ;;  %v15272_v23 = vld [vmem:[%s19493_s14 + $0x60] ss:$16 sps:$4 sm:$0xff]  }
0x1267   : > { %10502 = vmatprep.subr.bf16.mxu0 %v15325_v46  ;;  %v15280_v46 = vld [vmem:[%s19493_s14 + $0x84] ss:$16 sps:$4 sm:$0xff]  }
0x126a   : > { %10503 = vmatpush1.bf16.msra.mxu0 %v15323_v24  ;;  %v15278_v24 = vld [vmem:[%s19493_s14 + $0x80] ss:$16 sps:$4 sm:$0xff]  }
0x126b   : > { %10504 = vmatprep.subr.bf16.mxu0 %v15331_v35  ;;  %v15286_v35 = vld [vmem:[%s19493_s14 + $0xa4] ss:$16 sps:$4 sm:$0xff]  }
0x126e   : > { %10505 = vmatpush1.bf16.msra.mxu0 %v15329_v36  ;;  %v15284_v36 = vld [vmem:[%s19493_s14 + $0xa0] ss:$16 sps:$4 sm:$0xff]  }
0x126f   : > { %10506 = vmatprep.subr.bf16.mxu0 %v15337_v41  ;;  %v15292_v41 = vld [vmem:[%s19493_s14 + $0xc4] ss:$16 sps:$4 sm:$0xff]  }
0x1272   : > { %10507 = vmatpush1.bf16.msra.mxu0 %v15335_v42  ;;  %v15290_v42 = vld [vmem:[%s19493_s14 + $0xc0] ss:$16 sps:$4 sm:$0xff]  }
0x1273   : > { %10508 = vmatprep.subr.bf16.mxu0 %v15343_v43  ;;  %v15298_v43 = vld [vmem:[%s19493_s14 + $0xe4] ss:$16 sps:$4 sm:$0xff]  }
0x1276   : > { %10509 = vmatpush1.bf16.msra.mxu0 %v15341_v18  ;;  %v15296_v18 = vld [vmem:[%s19493_s14 + $0xe0] ss:$16 sps:$4 sm:$0xff]  }
0x1277   : > { %10510 = vmatprep.subr.bf16.mxu0 %v15349_v45  ;;  %v15302_v45 = vld [vmem:[%s19493_s14 + $0x100] ss:$16 sps:$4 sm:$0xff]  }
0x127a   : > { %10511 = vmatpush1.bf16.msra.mxu0 %v15347_v31  ;;  %v15308_v31 = vld [vmem:[%s19493_s14 + $0x120] ss:$16 sps:$4 sm:$0xff]  }
0x127d   : > { %10513 = vmatmul.mubr.bf16.vlgmr.msra.gmra.mrb[200].mxu0 %v18632_v59 }
0x12d0   : > { %v8973_v16 = vpop.f32.mrb[196].mxu0 }
0x12d1   : > { %v8974_v39 = vadd.f32 %v8973_v16, %v8852_v34  ;;  %v8975_v51 = vpop.f32.mrb[197].mxu0  ;;  %v15320_v34 = vld [vmem:[%s19493_s14 + $0x160] ss:$16 sps:$4 sm:$0xff]  }
0x12d2   : > { %v8976_v28 = vadd.f32 %v8975_v51, %v8856_v32  ;;  %v8977_v54 = vpop.f32.mrb[198].mxu0  ;;  %v15328_v32 = vld [vmem:[%s19493_s14 + $0x184] ss:$16 sps:$4 sm:$0xff]   ;;  %v15326_v16 = vld [vmem:[%s19493_s14 + $0x180] ss:$16 sps:$4 sm:$0xff]  }
0x12d3   : > { %v8980_v57 = vmul.f32 %v8974_v39, %v8974_v39  ;;  %v8978_v60 = vpop.f32.mrb[199].mxu0  ;;  %v15332_v51 = vld [vmem:[%s19493_s14 + $0x1a0] ss:$16 sps:$4 sm:$0xff]  }
0x12d4   : > { %v8981_v44 = vmul.f32 %v8976_v28, %v8976_v28  ;;  %v15338_v54 = vld [vmem:[%s19493_s14 + $0x1c0] ss:$16 sps:$4 sm:$0xff]   ;;  %v9191_v60 = vrot.slane %v18512_v38, %v17205_v11  ;;  %v15355_v38 = vld [vmem:[%s19493_s14 + $0x2c] ss:$16 sps:$4 sm:$0xff]  }
0x12d5   : > { %v8982_v58 = vmul.f32 %v8980_v57, %v8974_v39  ;;  %v15346_v57 = vld [vmem:[%s19493_s14 + $0x1e4] ss:$16 sps:$4 sm:$0xff]  }
0x12d6   : > { %v8983_v21 = vmul.f32 %v8981_v44, %v8976_v28  ;;  %v15344_v44 = vld [vmem:[%s19493_s14 + $0x1e0] ss:$16 sps:$4 sm:$0xff]  }
0x12d7   : > { %v8984_v40 = vmul.f32 0.044715, %v8982_v58  ;;  %v15352_v58 = vld [vmem:[%s19493_s14 + $0xc] ss:$16 sps:$4 sm:$0xff]  }
0x12d8   : > { %v8985_v63 = vmul.f32 0.044715, %v8983_v21  ;;  %v18744_v21 = vpack.c.bf16 %v9191_v60, %v9191_v60  ;;  %v15520_v60 = vld [vmem:[%s19496_s23 + $0x84] ss:$8 sps:$4 sm:$0xff]  }
0x12d9   : > { %v8986_v61 = vadd.f32 %v8984_v40, %v8974_v39  ;;  %v15350_v40 = vld [vmem:[%s19493_s14 + $0x8] ss:$16 sps:$4 sm:$0xff]  }
0x12da   : > { %v8987_v0 = vadd.f32 %v8985_v63, %v8976_v28  ;;  %v15353_v63 = vld [vmem:[%s19493_s14 + $0x28] ss:$16 sps:$4 sm:$0xff]  }
0x12db   : > { %v8988_v1 = vmul.f32 0.7978846, %v8986_v61  ;;  %v15358_v61 = vld [vmem:[%s19493_s14 + $0x4c] ss:$16 sps:$4 sm:$0xff]  }
0x12dc   : > { %v8989_v20 = vmul.f32 0.7978846, %v8987_v0  ;;  %v15356_v0 = vld [vmem:[%s19493_s14 + $0x48] ss:$16 sps:$4 sm:$0xff]  }
0x12dd   : > { %15706 = vtanh.f32 %v8988_v1  ;;  %v15361_v1 = vld [vmem:[%s19493_s14 + $0x6c] ss:$16 sps:$4 sm:$0xff]  }
0x12de   : > { %15708 = vtanh.f32 %v8989_v20  ;;  %v15359_v20 = vld [vmem:[%s19493_s14 + $0x68] ss:$16 sps:$4 sm:$0xff]  }
0x12e7   : > { %v15707_v4 = vpop.eup %15706 }
0x12e8   : > { %v15709_v5 = vpop.eup %15708  ;;  %v8992_v6 = vadd.f32 1.0, %v15707_v4  ;;  %v15364_v4 = vld [vmem:[%s19493_s14 + $0x8c] ss:$16 sps:$4 sm:$0xff]  }
0x12e9   : > { %v8993_v37 = vadd.f32 1.0, %v15709_v5  ;;  %v15362_v5 = vld [vmem:[%s19493_s14 + $0x88] ss:$16 sps:$4 sm:$0xff]  }
0x12ea   : > { %v8994_v9 = vmul.f32 0.5, %v8992_v6  ;;  %v15367_v6 = vld [vmem:[%s19493_s14 + $0xac] ss:$16 sps:$4 sm:$0xff]  }
0x12eb   : > { %v8995_v8 = vmul.f32 0.5, %v8993_v37  ;;  %v15365_v37 = vld [vmem:[%s19493_s14 + $0xa8] ss:$16 sps:$4 sm:$0xff]  }
0x12ec   : > { %v8996_v33 = vmul.f32 %v8994_v9, %v8974_v39  ;;  %v15334_v39 = vld [vmem:[%s19493_s14 + $0x1a4] ss:$16 sps:$4 sm:$0xff]   ;;  %v15370_v9 = vld [vmem:[%s19493_s14 + $0xcc] ss:$16 sps:$4 sm:$0xff]  }
0x12ed   : > { %v8997_v12 = vmul.f32 %v8995_v8, %v8976_v28  ;;  %v15340_v28 = vld [vmem:[%s19493_s14 + $0x1c4] ss:$16 sps:$4 sm:$0xff]   ;;  %v15368_v8 = vld [vmem:[%s19493_s14 + $0xc8] ss:$16 sps:$4 sm:$0xff]  }
0x12ee   : > { %v8998_v22 = vpack.c.bf16 %v8996_v33, %v8996_v33  ;;  %v15371_v33 = vld [vmem:[%s19493_s14 + $0xe8] ss:$16 sps:$4 sm:$0xff]  }
0x12ef   : > { %v8999_v15 = vpack.c.bf16 %v8997_v12, %v8997_v12  ;;  %v15376_v12 = vld [vmem:[%s19493_s14 + $0x10c] ss:$16 sps:$4 sm:$0xff]  }
0x12f1   : > { %9169 = vmatprep.mubr.bf16.mxu1 %v8999_v15  ;;  %v15472_v15 = vld [vmem:[%s19496_s23 + $0x4] ss:$8 sps:$4 sm:$0xff]  }
0x12f2   : > { %9170 = vmatmul.mubr.bf16.vlgmr.msra.gmra.mrb[196].mxu1 %v8998_v22  ;;  %11141 = vmatprep.subr.bf16.mxu0 %v15472_v15  ;;  %v15379_v22 = vld [vmem:[%s19493_s14 + $0x12c] ss:$16 sps:$4 sm:$0xff]   ;;  %v15413_v15 = vld [vmem:[%s19493_s14 + $0x2a8] ss:$16 sps:$4 sm:$0xff]  }
0x12f3   : > { %10399 = vmatpush1.bf16.msra.mxu1 %v15254_v47  ;;  %10430 = vmatprep.mubr.bf16.mxu1 %v18646_v26  ;;  %v15470_v47 = vld [vmem:[%s19496_s23] ss:$8 sps:$4 sm:$0xff]  }
0x12f4   : > { %10400 = vmatprep.subr.bf16.mxu1 %v15262_v25  ;;  %11142 = vmatpush1.bf16.msra.mxu0 %v15470_v47  ;;  %v15478_v25 = vld [vmem:[%s19496_s23 + $0x14] ss:$8 sps:$4 sm:$0xff]  }
0x12f5   : > { %11143 = vmatprep.subr.bf16.mxu0 %v15478_v25  ;;  %v15418_v47 = vld [vmem:[%s19493_s14 + $0x2cc] ss:$16 sps:$4 sm:$0xff]   ;;  %v15416_v25 = vld [vmem:[%s19493_s14 + $0x2c8] ss:$16 sps:$4 sm:$0xff]  }
0x12f7   : > { %10401 = vmatpush1.bf16.msra.mxu1 %v15260_v27  ;;  %v15476_v27 = vld [vmem:[%s19496_s23 + $0x10] ss:$8 sps:$4 sm:$0xff]  }
0x12f8   : > { %10402 = vmatprep.subr.bf16.mxu1 %v15268_v49  ;;  %v15377_v49 = vld [vmem:[%s19493_s14 + $0x128] ss:$16 sps:$4 sm:$0xff]   ;;  %11144 = vmatpush1.bf16.msra.mxu0 %v15476_v27  ;;  %v15421_v27 = vld [vmem:[%s19493_s14 + $0x2ec] ss:$16 sps:$4 sm:$0xff]  }
0x12fb   : > { %10403 = vmatpush1.bf16.msra.mxu1 %v15266_v29  ;;  %v15382_v29 = vld [vmem:[%s19493_s14 + $0x14c] ss:$16 sps:$4 sm:$0xff]  }
0x12fc   : > { %10404 = vmatprep.subr.bf16.mxu1 %v15274_v14  ;;  %v15482_v14 = vld [vmem:[%s19496_s23 + $0x20] ss:$8 sps:$4 sm:$0xff]  }
0x12ff   : > { %10405 = vmatpush1.bf16.msra.mxu1 %v15272_v23  ;;  %v15484_v23 = vld [vmem:[%s19496_s23 + $0x24] ss:$8 sps:$4 sm:$0xff]  }
0x1300   : > { %10406 = vmatprep.subr.bf16.mxu1 %v15280_v46  ;;  %11145 = vmatprep.subr.bf16.mxu0 %v15484_v23  ;;  %v15380_v46 = vld [vmem:[%s19493_s14 + $0x148] ss:$16 sps:$4 sm:$0xff]  }
0x1301   : > { %11146 = vmatpush1.bf16.msra.mxu0 %v15482_v14  ;;  %v15539_v23 = vld [vmem:[%s19496_s23 + $0xf0] ss:$8 sps:$4 sm:$0xff]  }
0x1303   : > { %10407 = vmatpush1.bf16.msra.mxu1 %v15278_v24  ;;  %v15385_v24 = vld [vmem:[%s19493_s14 + $0x16c] ss:$16 sps:$4 sm:$0xff]  }
0x1304   : > { %10408 = vmatprep.subr.bf16.mxu1 %v15286_v35  ;;  %v15488_v35 = vld [vmem:[%s19496_s23 + $0x30] ss:$8 sps:$4 sm:$0xff]  }
0x1307   : > { %10409 = vmatpush1.bf16.msra.mxu1 %v15284_v36  ;;  %v15490_v36 = vld [vmem:[%s19496_s23 + $0x34] ss:$8 sps:$4 sm:$0xff]  }
0x1308   : > { %10410 = vmatprep.subr.bf16.mxu1 %v15292_v41  ;;  %11147 = vmatprep.subr.bf16.mxu0 %v15490_v36  ;;  %v15383_v41 = vld [vmem:[%s19493_s14 + $0x168] ss:$16 sps:$4 sm:$0xff]   ;;  %v15424_v36 = vld [vmem:[%s19493_s14 + $0x30c] ss:$16 sps:$4 sm:$0xff]  }
0x1309   : > { %11148 = vmatpush1.bf16.msra.mxu0 %v15488_v35 }
0x130b   : > { %10411 = vmatpush1.bf16.msra.mxu1 %v15290_v42  ;;  %v15388_v42 = vld [vmem:[%s19493_s14 + $0x18c] ss:$16 sps:$4 sm:$0xff]  }
0x130c   : > { %10412 = vmatprep.subr.bf16.mxu1 %v15298_v43  ;;  %v15494_v43 = vld [vmem:[%s19496_s23 + $0x40] ss:$8 sps:$4 sm:$0xff]  }
0x130f   : > { %10413 = vmatpush1.bf16.msra.mxu1 %v15296_v18  ;;  %v15496_v18 = vld [vmem:[%s19496_s23 + $0x44] ss:$8 sps:$4 sm:$0xff]  }
0x1310   : > { %10414 = vmatprep.subr.bf16.mxu1 %v15304_v17  ;;  %11149 = vmatprep.subr.bf16.mxu0 %v15496_v18  ;;  %v15386_v17 = vld [vmem:[%s19493_s14 + $0x188] ss:$16 sps:$4 sm:$0xff]  }
0x1311   : > { %11150 = vmatpush1.bf16.msra.mxu0 %v15494_v43  ;;  %v15427_v43 = vld [vmem:[%s19493_s14 + $0x32c] ss:$16 sps:$4 sm:$0xff]   ;;  %v15425_v18 = vld [vmem:[%s19493_s14 + $0x328] ss:$16 sps:$4 sm:$0xff]  }
0x1313   : > { %10415 = vmatpush1.bf16.msra.mxu1 %v15302_v45  ;;  %v15391_v45 = vld [vmem:[%s19493_s14 + $0x1ac] ss:$16 sps:$4 sm:$0xff]  }
0x1314   : > { %10416 = vmatprep.subr.bf16.mxu1 %v15310_v50  ;;  %v15500_v50 = vld [vmem:[%s19496_s23 + $0x50] ss:$8 sps:$4 sm:$0xff]  }
0x1317   : > { %10417 = vmatpush1.bf16.msra.mxu1 %v15308_v31  ;;  %v15502_v31 = vld [vmem:[%s19496_s23 + $0x54] ss:$8 sps:$4 sm:$0xff]  }
0x1318   : > { %10418 = vmatprep.subr.bf16.mxu1 %v15316_v52  ;;  %11151 = vmatprep.subr.bf16.mxu0 %v15502_v31  ;;  %v15389_v52 = vld [vmem:[%s19493_s14 + $0x1a8] ss:$16 sps:$4 sm:$0xff]  }
0x1319   : > { %11152 = vmatpush1.bf16.msra.mxu0 %v15500_v50  ;;  %v15433_v50 = vld [vmem:[%s19493_s14 + $0x36c] ss:$16 sps:$4 sm:$0xff]   ;;  %v15431_v31 = vld [vmem:[%s19493_s14 + $0x368] ss:$16 sps:$4 sm:$0xff]  }
0x131b   : > { %10419 = vmatpush1.bf16.msra.mxu1 %v15314_v56  ;;  %v15394_v56 = vld [vmem:[%s19493_s14 + $0x1cc] ss:$16 sps:$4 sm:$0xff]  }
0x131c   : > { %10420 = vmatprep.subr.bf16.mxu1 %v15322_v55  ;;  %v15506_v55 = vld [vmem:[%s19496_s23 + $0x60] ss:$8 sps:$4 sm:$0xff]  }
0x131f   : > { %10421 = vmatpush1.bf16.msra.mxu1 %v15320_v34  ;;  %v15508_v34 = vld [vmem:[%s19496_s23 + $0x64] ss:$8 sps:$4 sm:$0xff]  }
0x1320   : > { %10422 = vmatprep.subr.bf16.mxu1 %v15328_v32  ;;  %11153 = vmatprep.subr.bf16.mxu0 %v15508_v34  ;;  %v15392_v32 = vld [vmem:[%s19493_s14 + $0x1c8] ss:$16 sps:$4 sm:$0xff]  }
0x1321   : > { %11154 = vmatpush1.bf16.msra.mxu0 %v15506_v55  ;;  %v15439_v55 = vld [vmem:[%s19493_s14 + $0x3ac] ss:$16 sps:$4 sm:$0xff]   ;;  %v15437_v34 = vld [vmem:[%s19493_s14 + $0x3a8] ss:$16 sps:$4 sm:$0xff]  }
0x1323   : > { %10423 = vmatpush1.bf16.msra.mxu1 %v15326_v16  ;;  %v15397_v16 = vld [vmem:[%s19493_s14 + $0x1ec] ss:$16 sps:$4 sm:$0xff]  }
0x1324   : > { %10424 = vmatprep.subr.bf16.mxu1 %v15334_v39  ;;  %v15512_v39 = vld [vmem:[%s19496_s23 + $0x70] ss:$8 sps:$4 sm:$0xff]  }
0x1327   : > { %10425 = vmatpush1.bf16.msra.mxu1 %v15332_v51  ;;  %v15514_v51 = vld [vmem:[%s19496_s23 + $0x74] ss:$8 sps:$4 sm:$0xff]  }
0x1328   : > { %10426 = vmatprep.subr.bf16.mxu1 %v15340_v28  ;;  %11155 = vmatprep.subr.bf16.mxu0 %v15514_v51  ;;  %v15395_v28 = vld [vmem:[%s19493_s14 + $0x1e8] ss:$16 sps:$4 sm:$0xff]  }
0x1329   : > { %11156 = vmatpush1.bf16.msra.mxu0 %v15512_v39  ;;  %v15445_v39 = vld [vmem:[%s19493_s14 + $0x3ec] ss:$16 sps:$4 sm:$0xff]   ;;  %v15443_v51 = vld [vmem:[%s19493_s14 + $0x3e8] ss:$16 sps:$4 sm:$0xff]  }
0x132a   : > { %11157 = vmatprep.subr.bf16.mxu0 %v15520_v60  ;;  %v15449_v60 = vld [vmem:[%s19493_s14 + $0x428] ss:$16 sps:$4 sm:$0xff]  }
0x132b   : > { %10427 = vmatpush1.bf16.msra.mxu1 %v15338_v54  ;;  %v15400_v54 = vld [vmem:[%s19493_s14 + $0x20c] ss:$16 sps:$4 sm:$0xff]  }
0x132c   : > { %10428 = vmatprep.subr.bf16.mxu1 %v15346_v57  ;;  %v15518_v57 = vld [vmem:[%s19496_s23 + $0x80] ss:$8 sps:$4 sm:$0xff]  }
0x132d   : > { %11158 = vmatpush1.bf16.msra.mxu0 %v15518_v57  ;;  %v15451_v57 = vld [vmem:[%s19493_s14 + $0x42c] ss:$16 sps:$4 sm:$0xff]  }
0x132f   : > { %10429 = vmatpush1.bf16.msra.mxu1 %v15344_v44  ;;  %v15398_v44 = vld [vmem:[%s19493_s14 + $0x208] ss:$16 sps:$4 sm:$0xff]  }
0x1330   : > { %10521 = vmatprep.subr.bf16.mxu1 %v15352_v58  ;;  %v15403_v58 = vld [vmem:[%s19493_s14 + $0x22c] ss:$16 sps:$4 sm:$0xff]  }
0x1332   : > { %10431 = vmatmul.mubr.bf16.vlgmr.msra.gmra.mrb[200].mxu1 %v18744_v21 }
0x1333   : > { %10522 = vmatpush1.bf16.msra.mxu1 %v15350_v40  ;;  %10553 = vmatprep.mubr.bf16.mxu1 %v18646_v26  ;;  %v15374_v26 = vld [vmem:[%s19493_s14 + $0x108] ss:$16 sps:$4 sm:$0xff]   ;;  %v15523_v40 = vld [vmem:[%s19496_s23 + $0x94] ss:$8 sps:$4 sm:$0xff]  }
0x1334   : > { %10523 = vmatprep.subr.bf16.mxu1 %v15355_v38  ;;  %v15521_v38 = vld [vmem:[%s19496_s23 + $0x90] ss:$8 sps:$4 sm:$0xff]   ;;  %11159 = vmatprep.subr.bf16.mxu0 %v15523_v40  ;;  %v15460_v40 = vld [vmem:[%s19493_s14 + $0x48c] ss:$16 sps:$4 sm:$0xff]  }
0x1335   : > { %11160 = vmatpush1.bf16.msra.mxu0 %v15521_v38  ;;  %v15458_v38 = vld [vmem:[%s19493_s14 + $0x488] ss:$16 sps:$4 sm:$0xff]  }
0x1337   : > { %10524 = vmatpush1.bf16.msra.mxu1 %v15353_v63  ;;  %v15526_v63 = vld [vmem:[%s19496_s23 + $0xa4] ss:$8 sps:$4 sm:$0xff]  }
0x1338   : > { %10525 = vmatprep.subr.bf16.mxu1 %v15358_v61  ;;  %v15401_v61 = vld [vmem:[%s19493_s14 + $0x228] ss:$16 sps:$4 sm:$0xff]   ;;  %11161 = vmatprep.subr.bf16.mxu0 %v15526_v63  ;;  %v15463_v63 = vld [vmem:[%s19493_s14 + $0x4ac] ss:$16 sps:$4 sm:$0xff]  }
0x133b   : > { %10526 = vmatpush1.bf16.msra.mxu1 %v15356_v0  ;;  %v15406_v0 = vld [vmem:[%s19493_s14 + $0x24c] ss:$16 sps:$4 sm:$0xff]  }
0x133c   : > { %10527 = vmatprep.subr.bf16.mxu1 %v15361_v1  ;;  %v15529_v1 = vld [vmem:[%s19496_s23 + $0xb4] ss:$8 sps:$4 sm:$0xff]  }
0x133f   : > { %10528 = vmatpush1.bf16.msra.mxu1 %v15359_v20  ;;  %v15409_v20 = vld [vmem:[%s19493_s14 + $0x26c] ss:$16 sps:$4 sm:$0xff]  }
0x1340   : > { %10529 = vmatprep.subr.bf16.mxu1 %v15364_v4  ;;  %v15527_v4 = vld [vmem:[%s19496_s23 + $0xb0] ss:$8 sps:$4 sm:$0xff]  }
0x1343   : > { %10530 = vmatpush1.bf16.msra.mxu1 %v15362_v5  ;;  %v15532_v5 = vld [vmem:[%s19496_s23 + $0xc4] ss:$8 sps:$4 sm:$0xff]  }
0x1344   : > { %10531 = vmatprep.subr.bf16.mxu1 %v15367_v6  ;;  %v15407_v6 = vld [vmem:[%s19493_s14 + $0x268] ss:$16 sps:$4 sm:$0xff]  }
0x1347   : > { %10532 = vmatpush1.bf16.msra.mxu1 %v15365_v37  ;;  %v15412_v37 = vld [vmem:[%s19493_s14 + $0x28c] ss:$16 sps:$4 sm:$0xff]  }
0x1348   : > { %10533 = vmatprep.subr.bf16.mxu1 %v15370_v9  ;;  %v15530_v9 = vld [vmem:[%s19496_s23 + $0xc0] ss:$8 sps:$4 sm:$0xff]  }
0x134b   : > { %10534 = vmatpush1.bf16.msra.mxu1 %v15368_v8  ;;  %v15535_v8 = vld [vmem:[%s19496_s23 + $0xd4] ss:$8 sps:$4 sm:$0xff]  }
0x134c   : > { %10535 = vmatprep.subr.bf16.mxu1 %v15373_v7  ;;  %v15410_v7 = vld [vmem:[%s19493_s14 + $0x288] ss:$16 sps:$4 sm:$0xff]  }
0x134f   : > { %10536 = vmatpush1.bf16.msra.mxu1 %v15371_v33  ;;  %v15415_v33 = vld [vmem:[%s19493_s14 + $0x2ac] ss:$16 sps:$4 sm:$0xff]  }
0x1350   : > { %10537 = vmatprep.subr.bf16.mxu1 %v15376_v12  ;;  %v15533_v12 = vld [vmem:[%s19496_s23 + $0xd0] ss:$8 sps:$4 sm:$0xff]  }
0x1353   : > { %10538 = vmatpush1.bf16.msra.mxu1 %v15374_v26  ;;  %v15538_v26 = vld [vmem:[%s19496_s23 + $0xe4] ss:$8 sps:$4 sm:$0xff]  }
0x1354   : > { %10539 = vmatprep.subr.bf16.mxu1 %v15379_v22  ;;  %v15536_v22 = vld [vmem:[%s19496_s23 + $0xe0] ss:$8 sps:$4 sm:$0xff]  }
0x1357   : > { %10540 = vmatpush1.bf16.msra.mxu1 %v15377_v49  ;;  %v18978_v49 = vpop.f32.mrb[200].mxu0 }
0x1358   : > { %10541 = vmatprep.subr.bf16.mxu1 %v15382_v29  ;;  %v15541_v29 = vld [vmem:[%s19496_s23 + $0xf4] ss:$8 sps:$4 sm:$0xff]   ;;  %v18983_v14 = vpop.f32.mrb[201].mxu0 }
0x135b   : > { %10542 = vmatpush1.bf16.msra.mxu1 %v15380_v46  ;;  %v10518_v46 = vpop.f32.mrb[202].mxu0 }
0x135c   : > { %10543 = vmatprep.subr.bf16.mxu1 %v15385_v24  ;;  %v15419_v24 = vld [vmem:[%s19493_s14 + $0x2e8] ss:$16 sps:$4 sm:$0xff]   ;;  %v10519_v35 = vpop.f32.mrb[203].mxu0 }
0x135d   : > { %v15509_v46 = vld [vmem:[%s19493_s14 + $0x5c8] ss:$16 sps:$4 sm:$0xff]  }
0x135e   : > { %v15515_v35 = vld [vmem:[%s19493_s14 + $0x5e8] ss:$16 sps:$4 sm:$0xff]  }
0x135f   : > { %10544 = vmatpush1.bf16.msra.mxu1 %v15383_v41  ;;  %v15544_v41 = vld [vmem:[%s19496_s23 + $0x104] ss:$8 sps:$4 sm:$0xff]  }
0x1360   : > { %10545 = vmatprep.subr.bf16.mxu1 %v15388_v42  ;;  %v15422_v42 = vld [vmem:[%s19493_s14 + $0x308] ss:$16 sps:$4 sm:$0xff]  }
0x1363   : > { %10546 = vmatpush1.bf16.msra.mxu1 %v15386_v17  ;;  %v15430_v17 = vld [vmem:[%s19493_s14 + $0x34c] ss:$16 sps:$4 sm:$0xff]  }
0x1364   : > { %10547 = vmatprep.subr.bf16.mxu1 %v15391_v45  ;;  %v15428_v45 = vld [vmem:[%s19493_s14 + $0x348] ss:$16 sps:$4 sm:$0xff]  }
0x1367   : > { %10548 = vmatpush1.bf16.msra.mxu1 %v15389_v52  ;;  %v15436_v52 = vld [vmem:[%s19493_s14 + $0x38c] ss:$16 sps:$4 sm:$0xff]  }
0x1368   : > { %10549 = vmatprep.subr.bf16.mxu1 %v15394_v56  ;;  %v15434_v56 = vld [vmem:[%s19493_s14 + $0x388] ss:$16 sps:$4 sm:$0xff]  }
0x136b   : > { %10550 = vmatpush1.bf16.msra.mxu1 %v15392_v32  ;;  %v15442_v32 = vld [vmem:[%s19493_s14 + $0x3cc] ss:$16 sps:$4 sm:$0xff]  }
0x136c   : > { %10551 = vmatprep.subr.bf16.mxu1 %v15397_v16  ;;  %v15440_v16 = vld [vmem:[%s19493_s14 + $0x3c8] ss:$16 sps:$4 sm:$0xff]  }
0x136f   : > { %10552 = vmatpush1.bf16.msra.mxu1 %v15395_v28  ;;  %v15448_v28 = vld [vmem:[%s19493_s14 + $0x40c] ss:$16 sps:$4 sm:$0xff]  }
0x1370   : > { %10562 = vmatprep.subr.bf16.mxu1 %v15400_v54  ;;  %v15446_v54 = vld [vmem:[%s19493_s14 + $0x408] ss:$16 sps:$4 sm:$0xff]  }
0x1372   : > { %10554 = vmatmul.mubr.bf16.vlgmr.msra.gmra.mrb[204].mxu1 %v18744_v21  ;;  %v15524_v21 = vld [vmem:[%s19496_s23 + $0xa0] ss:$8 sps:$4 sm:$0xff]  }
0x1373   : > { %10563 = vmatpush1.bf16.msra.mxu1 %v15398_v44  ;;  %10594 = vmatprep.mubr.bf16.mxu1 %v18524_v3  ;;  %v15404_v3 = vld [vmem:[%s19493_s14 + $0x248] ss:$16 sps:$4 sm:$0xff]   ;;  %v15454_v44 = vld [vmem:[%s19493_s14 + $0x44c] ss:$16 sps:$4 sm:$0xff]  }
0x1374   : > { %10564 = vmatprep.subr.bf16.mxu1 %v15403_v58  ;;  %11162 = vmatpush1.bf16.msra.mxu0 %v15524_v21  ;;  %v15452_v58 = vld [vmem:[%s19493_s14 + $0x448] ss:$16 sps:$4 sm:$0xff]  }
0x1375   : > { %11163 = vmatprep.subr.bf16.mxu0 %v15529_v1 }
0x1377   : > { %10565 = vmatpush1.bf16.msra.mxu1 %v15401_v61  ;;  %v15461_v61 = vld [vmem:[%s19493_s14 + $0x4a8] ss:$16 sps:$4 sm:$0xff]  }
0x1378   : > { %10566 = vmatprep.subr.bf16.mxu1 %v15406_v0  ;;  %11164 = vmatpush1.bf16.msra.mxu0 %v15527_v4  ;;  %v15466_v0 = vld [vmem:[%s19493_s14 + $0x4cc] ss:$16 sps:$4 sm:$0xff]   ;;  %v15464_v4 = vld [vmem:[%s19493_s14 + $0x4c8] ss:$16 sps:$4 sm:$0xff]  }
0x1379   : > { %11165 = vmatprep.subr.bf16.mxu0 %v15532_v5 }
0x137b   : > { %10567 = vmatpush1.bf16.msra.mxu1 %v15404_v3 }
0x137c   : > { %10568 = vmatprep.subr.bf16.mxu1 %v15409_v20  ;;  %11166 = vmatpush1.bf16.msra.mxu0 %v15530_v9  ;;  %v15475_v9 = vld [vmem:[%s19493_s14 + $0x50c] ss:$16 sps:$4 sm:$0xff]  }
0x137d   : > { %11167 = vmatprep.subr.bf16.mxu0 %v15535_v8  ;;  %v15473_v8 = vld [vmem:[%s19493_s14 + $0x508] ss:$16 sps:$4 sm:$0xff]  }
0x137f   : > { %10569 = vmatpush1.bf16.msra.mxu1 %v15407_v6  ;;  %v15469_v6 = vld [vmem:[%s19493_s14 + $0x4ec] ss:$16 sps:$4 sm:$0xff]  }
0x1380   : > { %10570 = vmatprep.subr.bf16.mxu1 %v15412_v37  ;;  %11168 = vmatpush1.bf16.msra.mxu0 %v15533_v12  ;;  %v15467_v37 = vld [vmem:[%s19493_s14 + $0x4e8] ss:$16 sps:$4 sm:$0xff]   ;;  %v15487_v12 = vld [vmem:[%s19493_s14 + $0x54c] ss:$16 sps:$4 sm:$0xff]  }
0x1381   : > { %11169 = vmatprep.subr.bf16.mxu0 %v15538_v26  ;;  %v15491_v26 = vld [vmem:[%s19493_s14 + $0x568] ss:$16 sps:$4 sm:$0xff]  }
0x1383   : > { %10571 = vmatpush1.bf16.msra.mxu1 %v15410_v7  ;;  %v15481_v7 = vld [vmem:[%s19493_s14 + $0x52c] ss:$16 sps:$4 sm:$0xff]  }
0x1384   : > { %10572 = vmatprep.subr.bf16.mxu1 %v15415_v33  ;;  %11170 = vmatpush1.bf16.msra.mxu0 %v15536_v22  ;;  %v15479_v33 = vld [vmem:[%s19493_s14 + $0x528] ss:$16 sps:$4 sm:$0xff]   ;;  %v15499_v22 = vld [vmem:[%s19493_s14 + $0x58c] ss:$16 sps:$4 sm:$0xff]  }
0x1385   : > { %11171 = vmatprep.subr.bf16.mxu0 %v15541_v29  ;;  %v15503_v29 = vld [vmem:[%s19493_s14 + $0x5a8] ss:$16 sps:$4 sm:$0xff]  }
0x1387   : > { %10573 = vmatpush1.bf16.msra.mxu1 %v15413_v15  ;;  %v15485_v15 = vld [vmem:[%s19493_s14 + $0x548] ss:$16 sps:$4 sm:$0xff]  }
0x1388   : > { %10574 = vmatprep.subr.bf16.mxu1 %v15418_v47  ;;  %11172 = vmatpush1.bf16.msra.mxu0 %v15539_v23  ;;  %v15493_v47 = vld [vmem:[%s19493_s14 + $0x56c] ss:$16 sps:$4 sm:$0xff]  }
0x1389   : > { %11182 = vmatprep.subr.bf16.mxu0 %v15544_v41  ;;  %v15511_v23 = vld [vmem:[%s19493_s14 + $0x5cc] ss:$16 sps:$4 sm:$0xff]  }
0x138b   : > { %10575 = vmatpush1.bf16.msra.mxu1 %v15416_v25  ;;  %v15497_v25 = vld [vmem:[%s19493_s14 + $0x588] ss:$16 sps:$4 sm:$0xff]  }
0x138c   : > { %10576 = vmatprep.subr.bf16.mxu1 %v15421_v27  ;;  %v15505_v27 = vld [vmem:[%s19493_s14 + $0x5ac] ss:$16 sps:$4 sm:$0xff]  }
0x138f   : > { %10577 = vmatpush1.bf16.msra.mxu1 %v15419_v24  ;;  %v15517_v24 = vld [vmem:[%s19493_s14 + $0x5ec] ss:$16 sps:$4 sm:$0xff]  }
0x1390   : > { %10578 = vmatprep.subr.bf16.mxu1 %v15424_v36  ;;  %v19146_v36 = vld [vmem:[%s19497_s21] sm:$0xf]  ;;  %s19502_s21 = sld [smem:[#allocation32_spill]] }
0x1391   : > { %v10381_v41 = vrot.slane %v19146_v36, %v17205_v11 }
0x1393   : > { %10579 = vmatpush1.bf16.msra.mxu1 %v15422_v42  ;;  %v10385_v42 = vrot.slane %v19146_v36, %v17211_v13 }
0x1394   : > { %10580 = vmatprep.subr.bf16.mxu1 %v15427_v43 }
0x1397   : > { %10581 = vmatpush1.bf16.msra.mxu1 %v15425_v18 }
0x1398   : > { %10582 = vmatprep.subr.bf16.mxu1 %v15430_v17 }
0x139b   : > { %10583 = vmatpush1.bf16.msra.mxu1 %v15428_v45 }
0x139c   : > { %10584 = vmatprep.subr.bf16.mxu1 %v15433_v50 }
0x139f   : > { %10585 = vmatpush1.bf16.msra.mxu1 %v15431_v31 }
0x13a0   : > { %10586 = vmatprep.subr.bf16.mxu1 %v15436_v52 }
0x13a3   : > { %10587 = vmatpush1.bf16.msra.mxu1 %v15434_v56 }
0x13a4   : > { %10588 = vmatprep.subr.bf16.mxu1 %v15439_v55 }
0x13a7   : > { %10589 = vmatpush1.bf16.msra.mxu1 %v15437_v34  ;;  %v15542_v34 = vld [vmem:[%s19496_s23 + $0x100] ss:$8 sps:$4 sm:$0xff]  }
0x13a8   : > { %10590 = vmatprep.subr.bf16.mxu1 %v15442_v32  ;;  %v15547_v32 = vld [vmem:[%s19496_s23 + $0x114] ss:$8 sps:$4 sm:$0xff]  }
0x13ab   : > { %10591 = vmatpush1.bf16.msra.mxu1 %v15440_v16  ;;  %v15548_v16 = vld [vmem:[%s19496_s23 + $0x120] ss:$8 sps:$4 sm:$0xff]  }
0x13ac   : > { %10592 = vmatprep.subr.bf16.mxu1 %v15445_v39  ;;  %v15553_v39 = vld [vmem:[%s19496_s23 + $0x134] ss:$8 sps:$4 sm:$0xff]  }
0x13af   : > { %10593 = vmatpush1.bf16.msra.mxu1 %v15443_v51  ;;  %v15551_v51 = vld [vmem:[%s19496_s23 + $0x130] ss:$8 sps:$4 sm:$0xff]  }
0x13b0   : > { %10603 = vmatprep.subr.bf16.mxu1 %v15448_v28  ;;  %v15556_v28 = vld [vmem:[%s19496_s23 + $0x144] ss:$8 sps:$4 sm:$0xff]  }
0x13b2   : > { %10595 = vmatmul.mubr.bf16.vlgmr.msra.gmra.mrb[204].mxu1 %v18532_v2  ;;  %v15457_v2 = vld [vmem:[%s19493_s14 + $0x46c] ss:$16 sps:$4 sm:$0xff]  }
0x13b3   : > { %10604 = vmatpush1.bf16.msra.mxu1 %v15446_v54  ;;  %10635 = vmatprep.mubr.bf16.mxu1 %v18630_v53  ;;  %v15455_v53 = vld [vmem:[%s19493_s14 + $0x468] ss:$16 sps:$4 sm:$0xff]  }
0x13b4   : > { %10605 = vmatprep.subr.bf16.mxu1 %v15451_v57  ;;  %v15554_v54 = vld [vmem:[%s19496_s23 + $0x140] ss:$8 sps:$4 sm:$0xff]   ;;  %v15559_v57 = vld [vmem:[%s19496_s23 + $0x154] ss:$8 sps:$4 sm:$0xff]  }
0x13b7   : > { %10606 = vmatpush1.bf16.msra.mxu1 %v15449_v60  ;;  %v15557_v60 = vld [vmem:[%s19496_s23 + $0x150] ss:$8 sps:$4 sm:$0xff]  }
0x13b8   : > { %10607 = vmatprep.subr.bf16.mxu1 %v15454_v44  ;;  %v15562_v44 = vld [vmem:[%s19496_s23 + $0x164] ss:$8 sps:$4 sm:$0xff]  }
0x13bb   : > { %10608 = vmatpush1.bf16.msra.mxu1 %v15452_v58  ;;  %v15560_v58 = vld [vmem:[%s19496_s23 + $0x160] ss:$8 sps:$4 sm:$0xff]  }
0x13bc   : > { %10609 = vmatprep.subr.bf16.mxu1 %v15457_v2  ;;  %v15565_v2 = vld [vmem:[%s19496_s23 + $0x174] ss:$8 sps:$4 sm:$0xff]  }
0x13bf   : > { %10610 = vmatpush1.bf16.msra.mxu1 %v15455_v53  ;;  %v15563_v53 = vld [vmem:[%s19496_s23 + $0x170] ss:$8 sps:$4 sm:$0xff]  }
0x13c0   : > { %10611 = vmatprep.subr.bf16.mxu1 %v15460_v40  ;;  %v15568_v40 = vld [vmem:[%s19496_s23 + $0x184] ss:$8 sps:$4 sm:$0xff]  }
0x13c3   : > { %10612 = vmatpush1.bf16.msra.mxu1 %v15458_v38  ;;  %v15566_v38 = vld [vmem:[%s19496_s23 + $0x180] ss:$8 sps:$4 sm:$0xff]  }
0x13c4   : > { %10613 = vmatprep.subr.bf16.mxu1 %v15463_v63  ;;  %v15571_v63 = vld [vmem:[%s19496_s23 + $0x194] ss:$8 sps:$4 sm:$0xff]  }
0x13c5   : > { %v13378_v21 = vpop.f32.mrb[196].mxu1 }
0x13c6   : > { %v13379_v1 = vpop.f32.mrb[197].mxu1 }
0x13c7   : > { %v19083_v3 = vadd.f32 %v13379_v1, %v13378_v21  ;;  %10614 = vmatpush1.bf16.msra.mxu1 %v15461_v61  ;;  %v13381_v20 = vpop.f32.mrb[198].mxu1  ;;  %v15569_v61 = vld [vmem:[%s19496_s23 + $0x190] ss:$8 sps:$4 sm:$0xff]   ;;  %v15572_v21 = vld [vmem:[%s19496_s23 + $0x1a0] ss:$8 sps:$4 sm:$0xff]  }
0x13c8   : > { %v13382_v5 = vpop.f32.mrb[199].mxu1  ;;  %10615 = vmatprep.subr.bf16.mxu1 %v15466_v0  ;;  %v15574_v0 = vld [vmem:[%s19496_s23 + $0x1a4] ss:$8 sps:$4 sm:$0xff]   ;;  %v15577_v1 = vld [vmem:[%s19496_s23 + $0x1b4] ss:$8 sps:$4 sm:$0xff]  }
0x13c9   : > { %v15575_v20 = vld [vmem:[%s19496_s23 + $0x1b0] ss:$8 sps:$4 sm:$0xff]   ;;  %v15578_v5 = vld [vmem:[%s19496_s23 + $0x1c0] ss:$8 sps:$4 sm:$0xff]  }
0x13cb   : > { %10616 = vmatpush1.bf16.msra.mxu1 %v15464_v4  ;;  %v15580_v4 = vld [vmem:[%s19496_s23 + $0x1c4] ss:$8 sps:$4 sm:$0xff]  }
0x13cc   : > { %10617 = vmatprep.subr.bf16.mxu1 %v15469_v6  ;;  %v15583_v6 = vld [vmem:[%s19496_s23 + $0x1d4] ss:$8 sps:$4 sm:$0xff]  }
0x13cf   : > { %10618 = vmatpush1.bf16.msra.mxu1 %v15467_v37  ;;  %v15581_v37 = vld [vmem:[%s19496_s23 + $0x1d0] ss:$8 sps:$4 sm:$0xff]  }
0x13d0   : > { %10619 = vmatprep.subr.bf16.mxu1 %v15475_v9  ;;  %v15586_v9 = vld [vmem:[%s19496_s23 + $0x1e4] ss:$8 sps:$4 sm:$0xff]  }
0x13d3   : > { %10620 = vmatpush1.bf16.msra.mxu1 %v15473_v8  ;;  %v15584_v8 = vld [vmem:[%s19496_s23 + $0x1e0] ss:$8 sps:$4 sm:$0xff]  }
0x13d4   : > { %10621 = vmatprep.subr.bf16.mxu1 %v15481_v7  ;;  %v15589_v7 = vld [vmem:[%s19496_s23 + $0x1f4] ss:$8 sps:$4 sm:$0xff]  }
0x13d7   : > { %10622 = vmatpush1.bf16.msra.mxu1 %v15479_v33  ;;  %v15587_v33 = vld [vmem:[%s19496_s23 + $0x1f0] ss:$8 sps:$4 sm:$0xff]  }
0x13d8   : > { %10623 = vmatprep.subr.bf16.mxu1 %v15487_v12  ;;  %v15592_v12 = vld [vmem:[%s19496_s23 + $0x204] ss:$8 sps:$4 sm:$0xff]  }
0x13db   : > { %10624 = vmatpush1.bf16.msra.mxu1 %v15485_v15  ;;  %v10389_v15 = vrot.slane %v19146_v36, %v9198_v19  ;;  %v15590_v19 = vld [vmem:[%s19496_s23 + $0x200] ss:$8 sps:$4 sm:$0xff]  }
0x13dc   : > { %10625 = vmatprep.subr.bf16.mxu1 %v15493_v47  ;;  %v12504_v47 = vld [vmem:[%s19492_s24 + $0x1] ss:$0 sm:$0xff] }
0x13df   : > { %10626 = vmatpush1.bf16.msra.mxu1 %v15491_v26  ;;  %v10393_v26 = vrot.slane %v19146_v36, %v9202_v62  ;;  %v15593_v62 = vld [vmem:[%s19496_s23 + $0x210] ss:$8 sps:$4 sm:$0xff]   ;;  %v15596_v36 = vld [vmem:[%s19496_s23 + $0x220] ss:$8 sps:$4 sm:$0xff]  }
0x13e0   : > { %10627 = vmatprep.subr.bf16.mxu1 %v15499_v22 }
0x13e3   : > { %10628 = vmatpush1.bf16.msra.mxu1 %v15497_v25  ;;  %v9172_v25 = vadd.f32 %v19083_v3, %v12504_v47 }
0x13e4   : > { %10629 = vmatprep.subr.bf16.mxu1 %v15505_v27 }
0x13e7   : > { %10630 = vmatpush1.bf16.msra.mxu1 %v15503_v29 }
0x13e8   : > { %10631 = vmatprep.subr.bf16.mxu1 %v15511_v23 }
0x13eb   : > { %10632 = vmatpush1.bf16.msra.mxu1 %v15509_v46 }
0x13ec   : > { %10633 = vmatprep.subr.bf16.mxu1 %v15517_v24 }
0x13ef   : > { %10634 = vmatpush1.bf16.msra.mxu1 %v15515_v35 }
0x13f2   : > { %10636 = vmatmul.mubr.bf16.vlgmr.msra.gmra.mrb[204].mxu1 %v18632_v59 }
0x1405   : > { %v10432_v43 = vpop.f32.mrb[200].mxu1 }
0x1406   : > { %v10433_v18 = vadd.f32 %v10432_v43, %v10381_v41  ;;  %v10434_v17 = vpop.f32.mrb[201].mxu1  ;;  %v9177_v41 = vadd.f32 %v9172_v25, %v18304_v48  ;;  %v15598_v48 = vld [vmem:[%s19496_s23 + $0x224] ss:$8 sps:$4 sm:$0xff]  }
0x1407   : > { %v10435_v45 = vadd.f32 %v10434_v17, %v10385_v42  ;;  %v10436_v50 = vpop.f32.mrb[202].mxu1 }
0x1408   : > { %v14655_v31 = vadd.f32 %v18978_v49, %v10433_v18  ;;  %v10437_v52 = vpop.f32.mrb[203].mxu1  ;;  %v15545_v49 = vld [vmem:[%s19496_s23 + $0x110] ss:$8 sps:$4 sm:$0xff]   ;;  %v9178_v3 = vrot.slane %v9177_v41, 4  ;;  %v15601_v18 = vld [vmem:[%s19496_s23 + $0x234] ss:$8 sps:$4 sm:$0xff]  }
0x1409   : > { %v14657_v59 = vadd.f32 %v18983_v14, %v10435_v45  ;;  %v15550_v14 = vld [vmem:[%s19496_s23 + $0x124] ss:$8 sps:$4 sm:$0xff]   ;;  %v15602_v50 = vld [vmem:[%s19496_s23 + $0x240] ss:$8 sps:$4 sm:$0xff]   ;;  %v15607_v52 = vld [vmem:[%s19496_s23 + $0x254] ss:$8 sps:$4 sm:$0xff]  }
0x140a   : > { %v10644_v56 = vpack.c.bf16 %v14655_v31, %v14655_v31  ;;  %v9179_v43 = vadd.f32 %v9178_v3, %v9177_v41  ;;  %v15604_v45 = vld [vmem:[%s19496_s23 + $0x244] ss:$8 sps:$4 sm:$0xff]  }
0x140b   : > { %v10645_v55 = vpack.c.bf16 %v14657_v59, %v14657_v59  ;;  %v15605_v59 = vld [vmem:[%s19496_s23 + $0x250] ss:$8 sps:$4 sm:$0xff]  }
0x140c   : > { %v9180_v17 = vrot.slane %v9179_v43, 2 }
0x140d   : > { %11173 = vmatprep.mubr.bf16.mxu0 %v10645_v55 }
0x140e   : > { %11174 = vmatmul.mubr.bf16.vlgmr.msra.gmra.mrb[204].mxu0 %v10644_v56  ;;  %v9181_v31 = vadd.f32 %v9180_v17, %v9179_v43  ;;  %v15610_v56 = vld [vmem:[%s19496_s23 + $0x264] ss:$8 sps:$4 sm:$0xff]  }
0x140f   : > { %11183 = vmatpush1.bf16.msra.mxu0 %v15542_v34  ;;  %v15608_v34 = vld [vmem:[%s19496_s23 + $0x260] ss:$8 sps:$4 sm:$0xff]  }
0x1410   : > { %11184 = vmatprep.subr.bf16.mxu0 %v15547_v32  ;;  %v9182_v55 = vrot.slane %v9181_v31, 1  ;;  %v15613_v32 = vld [vmem:[%s19496_s23 + $0x274] ss:$8 sps:$4 sm:$0xff]  }
0x1413   : > { %11185 = vmatpush1.bf16.msra.mxu0 %v15545_v49  ;;  %v9183_v49 = vadd.f32 %v9182_v55, %v9181_v31 }
0x1414   : > { %11186 = vmatprep.subr.bf16.mxu0 %v15550_v14  ;;  %v15611_v14 = vld [vmem:[%s19496_s23 + $0x270] ss:$8 sps:$4 sm:$0xff]  }
0x1417   : > { %11187 = vmatpush1.bf16.msra.mxu0 %v15548_v16  ;;  %v9185_v16 = vmul.f32 0.125, %v9183_v49 }
0x1418   : > { %11188 = vmatprep.subr.bf16.mxu0 %v15553_v39 }
0x1419   : > { %v10648_v39 = vpack.c.bf16 %v9185_v16, %v9185_v16 }
0x141b   : > { %11189 = vmatpush1.bf16.msra.mxu0 %v15551_v51  ;;  %v15614_v51 = vld [vmem:[%s19498_s6 + $0x40] sm:$0xff]  }
0x141c   : > { %11190 = vmatprep.subr.bf16.mxu0 %v15556_v28  ;;  %v15615_v28 = vld [vmem:[%s19499_s0] sm:$0xff]   ;;  %13384 = vmatprep.subr.bf16.mxu1 %v15614_v51 }
0x141d   : > { %13385 = vmatpush3.bf16.msra.mxu1 %v15615_v28 }
0x141f   : > { %11191 = vmatpush1.bf16.msra.mxu0 %v15554_v54  ;;  %v15616_v54 = vld [vmem:[%s19499_s0 + $0x48] sm:$0xff]  }
0x1420   : > { %11192 = vmatprep.subr.bf16.mxu0 %v15559_v57  ;;  %v15617_v57 = vld [vmem:[%s19499_s0 + $0x8] sm:$0xff]   ;;  %13386 = vmatprep.subr.bf16.mxu1 %v15616_v54 }
0x1421   : > { %13387 = vmatpush3.bf16.msra.mxu1 %v15617_v57 }
0x1423   : > { %11193 = vmatpush1.bf16.msra.mxu0 %v15557_v60  ;;  %v15618_v60 = vld [vmem:[%s19499_s0 + $0x50] sm:$0xff]  }
0x1424   : > { %11194 = vmatprep.subr.bf16.mxu0 %v15562_v44  ;;  %v15619_v44 = vld [vmem:[%s19499_s0 + $0x10] sm:$0xff]   ;;  %13388 = vmatprep.subr.bf16.mxu1 %v15618_v60 }
0x1425   : > { %13389 = vmatpush3.bf16.msra.mxu1 %v15619_v44 }
0x1427   : > { %11195 = vmatpush1.bf16.msra.mxu0 %v15560_v58  ;;  %v15620_v58 = vld [vmem:[%s19499_s0 + $0x58] sm:$0xff]  }
0x1428   : > { %11196 = vmatprep.subr.bf16.mxu0 %v15565_v2  ;;  %v15621_v2 = vld [vmem:[%s19499_s0 + $0x18] sm:$0xff]   ;;  %13390 = vmatprep.subr.bf16.mxu1 %v15620_v58 }
0x1429   : > { %13391 = vmatpush3.bf16.msra.mxu1 %v15621_v2 }
0x142b   : > { %11197 = vmatpush1.bf16.msra.mxu0 %v15563_v53  ;;  %v15622_v53 = vld [vmem:[%s19499_s0 + $0x60] sm:$0xff]  }
0x142c   : > { %11198 = vmatprep.subr.bf16.mxu0 %v15568_v40  ;;  %v15623_v40 = vld [vmem:[%s19499_s0 + $0x20] sm:$0xff]   ;;  %13392 = vmatprep.subr.bf16.mxu1 %v15622_v53 }
0x142d   : > { %13393 = vmatpush3.bf16.msra.mxu1 %v15623_v40 }
0x142f   : > { %11199 = vmatpush1.bf16.msra.mxu0 %v15566_v38  ;;  %v15624_v38 = vld [vmem:[%s19499_s0 + $0x68] sm:$0xff]  }
0x1430   : > { %11200 = vmatprep.subr.bf16.mxu0 %v15571_v63  ;;  %v15625_v63 = vld [vmem:[%s19499_s0 + $0x28] sm:$0xff]   ;;  %13394 = vmatprep.subr.bf16.mxu1 %v15624_v38 }
0x1431   : > { %13395 = vmatpush3.bf16.msra.mxu1 %v15625_v63 }
0x1433   : > { %11201 = vmatpush1.bf16.msra.mxu0 %v15569_v61  ;;  %v15626_v61 = vld [vmem:[%s19499_s0 + $0x70] sm:$0xff]  }
0x1434   : > { %11202 = vmatprep.subr.bf16.mxu0 %v15574_v0  ;;  %v15627_v0 = vld [vmem:[%s19499_s0 + $0x30] sm:$0xff]   ;;  %13396 = vmatprep.subr.bf16.mxu1 %v15626_v61 }
0x1435   : > { %13397 = vmatpush3.bf16.msra.mxu1 %v15627_v0 }
0x1437   : > { %11203 = vmatpush1.bf16.msra.mxu0 %v15572_v21  ;;  %v15628_v21 = vld [vmem:[%s19499_s0 + $0x78] sm:$0xff]  }
0x1438   : > { %11204 = vmatprep.subr.bf16.mxu0 %v15577_v1  ;;  %v15629_v1 = vld [vmem:[%s19499_s0 + $0x38] sm:$0xff]   ;;  %13398 = vmatprep.subr.bf16.mxu1 %v15628_v21 }
0x1439   : > { %13399 = vmatpush3.bf16.msra.mxu1 %v15629_v1 }
0x143b   : > { %11205 = vmatpush1.bf16.msra.mxu0 %v15575_v20  ;;  %v10729_v20 = vld [vmem:[%s19500_s27] sm:$0x3]  ;;  %s19368_s27 = scalar_lea.hbm %s19504_s28, %s12809_s30 }
0x143c   : > { %11206 = vmatprep.subr.bf16.mxu0 %v15580_v4  ;;  %v11134_v4 = vrot.slane %v10729_v20, %v17205_v11 }
0x143f   : > { %11207 = vmatpush1.bf16.msra.mxu0 %v15578_v5  ;;  %v11138_v5 = vrot.slane %v10729_v20, %v17211_v13 }
0x1440   : > { %11208 = vmatprep.subr.bf16.mxu0 %v15583_v6 }
0x1443   : > { %11209 = vmatpush1.bf16.msra.mxu0 %v15581_v37 }
0x1444   : > { %11210 = vmatprep.subr.bf16.mxu0 %v15586_v9 }
0x1447   : > { %11211 = vmatpush1.bf16.msra.mxu0 %v15584_v8 }
0x1448   : > { %11212 = vmatprep.subr.bf16.mxu0 %v15589_v7 }
0x144b   : > { %11213 = vmatpush1.bf16.msra.mxu0 %v15587_v33 }
0x144c   : > { %11223 = vmatprep.subr.bf16.mxu0 %v15592_v12 }
0x14c5   : > { %v10637_v22 = vpop.f32.mrb[204].mxu1 }
0x14c6   : > { %v14658_v27 = vadd.f32 %v10637_v22, %v10389_v15  ;;  %v10639_v29 = vpop.f32.mrb[205].mxu1 }
0x14c7   : > { %v14659_v23 = vadd.f32 %v10639_v29, %v10393_v26  ;;  %v10641_v46 = vpop.f32.mrb[206].mxu1 }
0x14c8   : > { %v10642_v24 = vpop.f32.mrb[207].mxu1  ;;  %v10646_v42 = vpack.c.bf16 %v14658_v27, %v14658_v27 }
0x14c9   : > { %v10647_v35 = vpack.c.bf16 %v14659_v23, %v14659_v23 }
0x14cb   : > { %11214 = vmatprep.mubr.bf16.mxu0 %v10647_v35 }
0x14cc   : > { %11215 = vmatmul.mubr.bf16.vlgmr.msra.gmra.mrb[204].mxu0 %v10646_v42 }
0x14cd   : > { %11224 = vmatpush1.bf16.msra.mxu0 %v15590_v19  ;;  %11255 = vmatprep.mubr.bf16.mxu0 %v15795_v30  ;;  %v15599_v30 = vld [vmem:[%s19496_s23 + $0x230] ss:$8 sps:$4 sm:$0xff]  }
0x14ce   : > { %11225 = vmatprep.subr.bf16.mxu0 %v15595_v10 }
0x14d1   : > { %11226 = vmatpush1.bf16.msra.mxu0 %v15593_v62 }
0x14d2   : > { %11227 = vmatprep.subr.bf16.mxu0 %v15598_v48 }
0x14d5   : > { %11228 = vmatpush1.bf16.msra.mxu0 %v15596_v36  ;;  %v11316_v36 = vld [vmem:[%s19502_s21] sm:$0x1]  ;;  %s15732_s21 = scalar_lea.vmem %s15731_s4, 32 }
0x14d6   : > { %11229 = vmatprep.subr.bf16.mxu0 %v15601_v18  ;;  %p15734_p6 = scmp.lt.s32.totalorder %s15732_s21, %s15726_s2 }
0x14d8   : > { %p15735_p7 = por %p15734_p6, %p15733_p5 }
0x14d9   : > { %11230 = vmatpush1.bf16.msra.mxu0 %v15599_v30 }
0x14da   : > { %11231 = vmatprep.subr.bf16.mxu0 %v15604_v45  ;;  %p15736_p8 = pnand %p15735_p7, %p15729_p4 }
0x14dd   : > { %11232 = vmatpush1.bf16.msra.mxu0 %v15602_v50 }
0x14de   : > { %11233 = vmatprep.subr.bf16.mxu0 %v15607_v52 }
0x14e1   : > { %11234 = vmatpush1.bf16.msra.mxu0 %v15605_v59 }
0x14e2   : > { %11235 = vmatprep.subr.bf16.mxu0 %v15610_v56 }
0x14e5   : > { %11236 = vmatpush1.bf16.msra.mxu0 %v15608_v34 }
0x14e6   : > { %11237 = vmatprep.subr.bf16.mxu0 %v15613_v32 }
0x14e9   : > { %11238 = vmatpush1.bf16.msra.mxu0 %v15611_v14 }
0x14ec   : > { %11256 = vmatmul.mubr.bf16.vlgmr.msra.gmra.mrb[204].mxu0 %v10648_v39 }
0x15bf   : > { %v11257_v6 = vpop.f32.mrb[204].mxu0 }
0x15c0   : > { %v14660_v37 = vadd.f32 %v11257_v6, %v11134_v4  ;;  %v11259_v9 = vpop.f32.mrb[205].mxu0 }
0x15c1   : > { %v14661_v8 = vadd.f32 %v11259_v9, %v11138_v5  ;;  %v11261_v7 = vpop.f32.mrb[206].mxu0 }
0x15c2   : > { %v11264_v33 = vmul.f32 %v14660_v37, %v14660_v37  ;;  %v11262_v12 = vpop.f32.mrb[207].mxu0 }
0x15c3   : > { %v11265_v15 = vmul.f32 %v14661_v8, %v14661_v8 }
0x15c4   : > { %v11266_v47 = vmul.f32 %v14660_v37, %v11264_v33 }
0x15c5   : > { %v11267_v26 = vmul.f32 %v14661_v8, %v11265_v15 }
0x15c6   : > { %v11268_v22 = vmul.f32 0.044715, %v11266_v47 }
0x15c7   : > { %v11269_v25 = vmul.f32 0.044715, %v11267_v26 }
0x15c8   : > { %v11270_v27 = vadd.f32 %v14660_v37, %v11268_v22 }
0x15c9   : > { %v11271_v29 = vadd.f32 %v14661_v8, %v11269_v25 }
0x15ca   : > { %v11272_v23 = vmul.f32 0.7978846, %v11270_v27 }
0x15cb   : > { %v11273_v46 = vmul.f32 0.7978846, %v11271_v29 }
0x15cc   : > { %15710 = vtanh.f32 %v11272_v23 }
0x15cd   : > { %15712 = vtanh.f32 %v11273_v46 }
0x15d6   : > { %v15711_v11 = vpop.eup %15710 }
0x15d7   : > { %v15713_v13 = vpop.eup %15712  ;;  %v11276_v24 = vadd.f32 1.0, %v15711_v11 }
0x15d8   : > { %v11277_v35 = vadd.f32 1.0, %v15713_v13 }
0x15d9   : > { %v11278_v19 = vmul.f32 0.5, %v11276_v24 }
0x15da   : > { %v11279_v41 = vmul.f32 0.5, %v11277_v35 }
0x15db   : > { %v11280_v42 = vmul.f32 %v14660_v37, %v11278_v19 }
0x15dc   : > { %v11281_v10 = vmul.f32 %v14661_v8, %v11279_v41 }
0x15dd   : > { %v11282_v3 = vpack.c.bf16 %v11280_v42, %v11280_v42 }
0x15de   : > { %v11283_v62 = vpack.c.bf16 %v11281_v10, %v11281_v10 }
0x15e0   : > { %11445 = vmatprep.mubr.bf16.mxu1 %v11283_v62 }
0x15e1   : > { %11446 = vmatmul.mubr.bf16.vlgmr.msra.gmra.mrb[208].mxu1 %v11282_v3 }
0x16b4   : > { %v13400_v48 = vpop.f32.mrb[208].mxu1 }
0x16b5   : > { %v13401_v43 = vpop.f32.mrb[209].mxu1 }
0x16b6   : > { %v13402_v18 = vadd.f32 %v13401_v43, %v13400_v48  ;;  %v13403_v30 = vpop.f32.mrb[210].mxu1 }
0x16b7   : > { %v13404_v17 = vpop.f32.mrb[211].mxu1 }
0x16b8   : > { %v11448_v45 = vadd.f32 %v13402_v18, %v11316_v36 }
0x16ba   : > { %11453 = vst [vmem:[%s680_s7] sm:$0x1] %v11448_v45 }
0x16bb   : > { %15739 = shalt.err (!%p15736_p8)
}
0x16bc   : > { %s15740_s17 = scalar_lea.hbm %s19368_s27, 16  ;;  %s15744_s1 = scalar_lea.hbm %s19504_s28, 32 }
0x16bd   : > { %p15741_p9 = scmp.ne.s32.totalorder %s19368_s27, %s15740_s17  ;;  %p15745_p0 = scmp.lt.u32.totalorder %s19368_s27, %s19504_s28 }
0x16be   : > { %p15746_p1 = scmp.lt.u32.totalorder %s15744_s1, %s15740_s17  ;;  %p15748_p3 = scmp.lt.u32.totalorder %s15740_s17, %s19368_s27 }
0x16bf   : > { %p15742_p12 = pnand %p15741_p9, %p15958_p10 }
0x16c0   : > { %p15747_p2 = por %p15746_p1, %p15745_p0 }
0x16c1   : > { %p15743_p13 = pneg %p15742_p12 }
0x16c2   : > { %p15749_p4 = por %p15748_p3, %p15747_p2 }
0x16c4   : > { %p15750_p5 = pnand %p15749_p4, %p15743_p13 }
0x16c6   : > { %15753 = shalt.err (!%p15750_p5)
}
0x16c7   : > { %14683 = dma.vmem_to_hbm [thread:$0]  (%p15958_p10), %s19370_s5, 16, %s19368_s27, %s11455_s29  }
0x16c8 PF: > { %s19505_s2 = sld [smem:[#allocation11_spill]]  ;;  %s19506_s4 = sld [smem:[#allocation8_spill]] }
0x16ce   : > { %p14689_p6 = scmp.ge.s32.totalorder %s19505_s2, 2  ;;  %s11479_s30 = sand.u32 1, %s19506_s4  }
0x16cf   : > { %s11480_s7 = scalar_lea.sflag [#allocation5], %s11479_s30 }
0x16d0   : > { %p14686_p7 = pnand %p14689_p6, %p15962_p11 }
0x16d2   : > { %15773 = dma.done.wait (!%p14686_p7), %s11480_s7, 16  }
0x16d3   : > { %15775 = vsyncadd (!%p14686_p7), %s11480_s7, 4294967280  ;;  %s19508_s6 = sld [smem:[#allocation13_spill]]  ;;  %s19509_s1 = sld [smem:[#allocation9_spill]] }
0x16d4   : > { %s19510_s26 = sld [smem:[#allocation10_spill]]  ;;  %s19511_s2 = sld [smem:[#allocation14_spill]] }
0x16d9   : > { %p39_p8 = scmp.ge.s32.totalorder %s19508_s6, 4  }
0x16db   :  { %41 = sbr.rel (!%p39_p8) target bundleno = 30 (0x1e), region = 164 }
0x16e2   :  { %11484 = vsyncpa [#allocation5], 1 }
0x16e3   :  { %11486 = vsyncpa [#allocation5 + $0x1], 1 }

</bundles_post_ra>
